<compile_context>
chip_gen: v5e
topology: v5e:2x2
jax: 0.10.0
libtpu: 0.0.40
codegen_flags: <defaults>
</compile_context>

<pallas_src>
import functools

import jax
import jax.numpy as jnp
from jax.experimental import pallas as pl
from jax.experimental.pallas import tpu as pltpu


# ----------------------------------------------------------------------------
# Fused kernel
# ----------------------------------------------------------------------------
def bottleneck_kernel(x_ref, w1_ref, b1_ref,
                      w2_ref, b2_ref,
                      w3_ref, b3_ref,
                      o_ref,
                      t1p_ref):
    # x_ref : (B, H, W, Cin) f32   input block (also the residual identity)
    # w1_ref: (Cin, Cm)   bf16 (BN1 scale folded in)   b1_ref: (1, Cm)   f32
    # w2_ref: (9, Cm, Cm) bf16 (BN2 scale folded in)   b2_ref: (1, Cm)   f32
    # w3_ref: (Cm, Cout)  bf16 (BN3 scale folded in)   b3_ref: (1, Cout) f32
    # t1p_ref: (B, H+2, W+2, Cm) bf16 VMEM scratch (zero-halo conv2 input)
    B, H, W, Cin = x_ref.shape
    Cm = w1_ref.shape[1]
    Cout = w3_ref.shape[1]
    M = B * H * W

    # Zero only the 1-pixel halo border every step (interior is fully
    # overwritten below; per-step zeroing keeps it safe under megacore
    # sharding since scratch is per-core).
    zrow = jnp.zeros((B, 1, W + 2, Cm), jnp.bfloat16)
    t1p_ref[:, 0:1, :, :] = zrow
    t1p_ref[:, H + 1:H + 2, :, :] = zrow
    zcol = jnp.zeros((B, H + 2, 1, Cm), jnp.bfloat16)
    t1p_ref[:, :, 0:1, :] = zcol
    t1p_ref[:, :, W + 1:W + 2, :] = zcol

    # ---- conv1 (1x1): bf16 MXU matmul, f32 accumulate, bias + ReLU ---------
    x_bf16 = x_ref[...].reshape(M, Cin).astype(jnp.bfloat16)
    t1 = jnp.dot(x_bf16, w1_ref[...], preferred_element_type=jnp.float32)
    t1 = jnp.maximum(t1 + b1_ref[...], 0.0)
    # Write conv1 output (bf16) into the interior of the zero-halo scratch.
    t1p_ref[:, 1:H + 1, 1:W + 1, :] = t1.reshape(B, H, W, Cm).astype(jnp.bfloat16)

    # ---- conv2 (3x3, pad=1): 9 accumulating dots over shifted tap windows --
    acc = None
    for ky in range(3):                      # statically unrolled 9 taps
        for kx in range(3):
            j = ky * 3 + kx
            tap = t1p_ref[:, ky:ky + H, kx:kx + W, :].reshape(M, Cm)
            d = jnp.dot(tap, w2_ref[j], preferred_element_type=jnp.float32)
            acc = d if acc is None else acc + d
    t2 = jnp.maximum(acc + b2_ref[...], 0.0)

    # ---- conv3 (1x1): bias, residual add, ReLU ------------------------------
    t3 = jnp.dot(t2.astype(jnp.bfloat16), w3_ref[...],
                 preferred_element_type=jnp.float32)
    t3 = t3 + b3_ref[...]

    # Re-read the resident input block for the identity (short live range;
    # avoids keeping an f32 copy alive across all three matmuls).
    ident = x_ref[...].reshape(M, Cout)
    y = jnp.maximum(t3 + ident, 0.0)
    o_ref[...] = y.reshape(B, H, W, Cout).astype(o_ref.dtype)


# ----------------------------------------------------------------------------
# Host wrapper
# ----------------------------------------------------------------------------
def fold_bn(gamma, beta, mean, var, eps=1e-5):
    scale = gamma / jnp.sqrt(var + eps)
    bias = beta - mean * scale
    return scale[None, :], bias[None, :]              # (1, C) for broadcasting


def _pick_batch_block(N, H, W, Cin, Cm, Cout, vmem_budget):
    """Smallest divisor of N reaching M = B*H*W >= 512 that fits the budget."""
    def footprint(b):
        return (2 * b * H * W * Cin * 4                 # x block, double-buffered
                + 2 * b * H * W * Cout * 4              # out block, double-buffered
                + b * (H + 2) * (W + 2) * Cm * 2        # padded bf16 scratch
                + 4 * b * H * W * max(Cm, Cout) * 4)    # f32 temporaries headroom
    target = max(1, -(-512 // (H * W)))                 # ceil(512 / (H*W))
    divisors = [d for d in range(1, N + 1) if N % d == 0]
    for d in divisors:
        if d >= target and footprint(d) <= vmem_budget:
            return d
    fitting = [d for d in divisors if footprint(d) <= vmem_budget]
    return fitting[-1] if fitting else 1


def bottleneck_forward_nhwc(x_nhwc, params):
    """x_nhwc: (N, H, W, Cin) float32. Returns (N, H, W, Cout) float32."""
    x = x_nhwc.astype(jnp.float32)
    N, H, W, Cin = x.shape

    w1, (s1, b1) = params["w1"], params["bn1"]
    w2, (s2, b2) = params["w2"], params["bn2"]
    w3, (s3, b3) = params["w3"], params["bn3"]
    Cm = w1.shape[1]
    Cout = w3.shape[1]
    assert Cin == Cout, "downsample=None requires inplanes == planes*expansion"

    # Fold BN scale into the bf16 matmul weights (output-channel axis); only
    # the bias add + ReLU remain as VPU work inside the kernel.
    w1b = (w1 * s1).astype(jnp.bfloat16)                       # (Cin, Cm)
    w2b = (w2 * s2[0]).reshape(9, Cm, Cm).astype(jnp.bfloat16)  # HWIO -> (9,Cm,Cm)
    w3b = (w3 * s3).astype(jnp.bfloat16)                       # (Cm, Cout)

    # Headroom-aware VMEM limit: ~75% of the chip's physical VMEM.
    vmem_cap = 128 * 1024 * 1024
    try:
        vmem_cap = int(getattr(pltpu.get_tpu_info(),
                               "vmem_capacity_bytes", vmem_cap))
    except Exception:
        pass
    vmem_limit = int(vmem_cap * 0.75)

    b_blk = _pick_batch_block(N, H, W, Cin, Cm, Cout,
                              vmem_budget=int(vmem_limit * 0.6))

    out = pl.pallas_call(
        bottleneck_kernel,
        out_shape=jax.ShapeDtypeStruct((N, H, W, Cout), jnp.float32),
        grid=(N // b_blk,),
        in_specs=[
            pl.BlockSpec((b_blk, H, W, Cin), lambda n: (n, 0, 0, 0)),
            pl.BlockSpec((Cin, Cm), lambda n: (0, 0)),
            pl.BlockSpec((1, Cm), lambda n: (0, 0)),
            pl.BlockSpec((9, Cm, Cm), lambda n: (0, 0, 0)),
            pl.BlockSpec((1, Cm), lambda n: (0, 0)),
            pl.BlockSpec((Cm, Cout), lambda n: (0, 0)),
            pl.BlockSpec((1, Cout), lambda n: (0, 0)),
        ],
        out_specs=pl.BlockSpec((b_blk, H, W, Cout), lambda n: (n, 0, 0, 0)),
        scratch_shapes=[
            pltpu.VMEM((b_blk, H + 2, W + 2, Cm), jnp.bfloat16),  # padded conv2 in
        ],
        compiler_params=pltpu.CompilerParams(
            dimension_semantics=("parallel",),
            vmem_limit_bytes=vmem_limit),
    )(x, w1b, b1, w2b, b2, w3b, b3)
    return out


def bottleneck_forward(x_nchw, params):
    """NCHW compatibility wrapper (matches the PyTorch module contract).

    Note: the two transposes each rewrite the full activation tensor in HBM;
    prefer bottleneck_forward_nhwc when the caller can keep NHWC activations.
    """
    x = jnp.transpose(x_nchw, (0, 2, 3, 1))
    y = bottleneck_forward_nhwc(x, params)
    return jnp.transpose(y, (0, 3, 1, 2))


# ----------------------------------------------------------------------------
# Pure-JAX reference (correctness sanity checks)
# ----------------------------------------------------------------------------
def bottleneck_reference(x_nchw, params, matmul_dtype=jnp.float32):
    x = jnp.transpose(x_nchw, (0, 2, 3, 1)).astype(jnp.float32)
    dn = ("NHWC", "HWIO", "NHWC")
    conv = functools.partial(jax.lax.conv_general_dilated,
                             dimension_numbers=dn,
                             preferred_element_type=jnp.float32)
    w1, (s1, b1) = params["w1"], params["bn1"]
    w2, (s2, b2) = params["w2"], params["bn2"]
    w3, (s3, b3) = params["w3"], params["bn3"]
    # BN scale folded into the weights (exact in f32; matches the kernel's
    # precision path when matmul_dtype=bfloat16).
    w1f = (w1 * s1).astype(matmul_dtype)
    w2f = (w2 * s2[0]).astype(matmul_dtype)
    w3f = (w3 * s3).astype(matmul_dtype)

    t = conv(x.astype(matmul_dtype), w1f[None, None], (1, 1), "VALID") + b1
    t = jnp.maximum(t, 0.0)
    t = conv(t.astype(matmul_dtype), w2f, (1, 1), ((1, 1), (1, 1))) + b2
    t = jnp.maximum(t, 0.0)
    t = conv(t.astype(matmul_dtype), w3f[None, None], (1, 1), "VALID") + b3
    t = jnp.maximum(t + x, 0.0)
    return jnp.transpose(t, (0, 3, 1, 2))


# ----------------------------------------------------------------------------
if __name__ == "__main__":
    # Shapes consistent with the module: inplanes = planes * expansion so the
    # identity shortcut is valid with downsample=None, stride=1.
    N, inplanes, planes, H, W = 2, 16, 4, 16, 16
    width = planes            # base_width=64, groups=1 -> width = planes
    cout = planes * 4         # expansion = 4  (== inplanes)

    key = jax.random.PRNGKey(0)
    ks = jax.random.split(key, 16)

    def bn_params(kg, kb, km, kv, c):
        gamma = 0.5 + jax.random.uniform(kg, (c,), jnp.float32)
        beta = 0.1 * jax.random.normal(kb, (c,), jnp.float32)
        mean = 0.1 * jax.random.normal(km, (c,), jnp.float32)
        var = 0.5 + jax.random.uniform(kv, (c,), jnp.float32)
        return fold_bn(gamma, beta, mean, var)

    params = {
        # conv1: PyTorch (width, inplanes, 1, 1) -> stored (inplanes, width)
        "w1": 0.1 * jax.random.normal(ks[0], (inplanes, width), jnp.float32),
        "bn1": bn_params(ks[1], ks[2], ks[3], ks[4], width),
        # conv2: PyTorch (width, width, 3, 3) -> stored HWIO (3, 3, width, width)
        "w2": 0.1 * jax.random.normal(ks[5], (3, 3, width, width), jnp.float32),
        "bn2": bn_params(ks[6], ks[7], ks[8], ks[9], width),
        # conv3: PyTorch (cout, width, 1, 1) -> stored (width, cout)
        "w3": 0.1 * jax.random.normal(ks[10], (width, cout), jnp.float32),
        "bn3": bn_params(ks[11], ks[12], ks[13], ks[14], cout),
    }

    x = jax.random.normal(ks[15], (N, inplanes, H, W), jnp.float32)

    out = jax.block_until_ready(bottleneck_forward(x, params))
    ref_bf16 = jax.block_until_ready(
        bottleneck_reference(x, params, matmul_dtype=jnp.bfloat16))
    ref_f32 = jax.block_until_ready(
        bottleneck_reference(x, params, matmul_dtype=jnp.float32))

    assert out.shape == (N, cout, H, W), out.shape
    # Tight check against a bf16-matmul, scale-folded reference (same
    # precision path as the kernel).
    assert jnp.allclose(out, ref_bf16, atol=2e-3, rtol=2e-3), \
        "mismatch vs bf16 reference"
    # Loose check against the full-f32 module semantics (bf16 matmuls are an
    # intentional precision reduction vs. the f32 PyTorch module).
    assert jnp.allclose(out, ref_f32, atol=5e-2, rtol=5e-2), \
        "mismatch vs f32 reference"

    print("KERNEL_OK")
</pallas_src>

<mosaic_0001>
module attributes {stable_mosaic.version = 11 : i64} {
  func.func @bottleneck_kernel(%arg0: i32, %arg1: memref<2x16x16x16xf32, #tpu.memory_space<vmem>>, %arg2: memref<16x4xbf16, #tpu.memory_space<vmem>>, %arg3: memref<1x4xf32, #tpu.memory_space<vmem>>, %arg4: memref<9x4x4xbf16, #tpu.memory_space<vmem>>, %arg5: memref<1x4xf32, #tpu.memory_space<vmem>>, %arg6: memref<4x16xbf16, #tpu.memory_space<vmem>>, %arg7: memref<1x16xf32, #tpu.memory_space<vmem>>, %arg8: memref<2x16x16x16xf32, #tpu.memory_space<vmem>>, %arg9: memref<2x18x18x4xbf16, #tpu.memory_space<vmem>>) attributes {dimension_semantics = [#tpu.dimension_semantics<parallel>], iteration_bounds = array<i64: 1>, scalar_prefetch = 0 : i64, scratch_operands = 1 : i64, tpu.core_type = #tpu.core_type<tc>, window_params = [{transform_indices = @transform_0, window_bounds = array<i64: 2, 16, 16, 16>}, {pipeline_mode = #tpu.pipeline_mode<synchronous>, transform_indices = @transform_1, window_bounds = array<i64: 16, 4>}, {pipeline_mode = #tpu.pipeline_mode<synchronous>, transform_indices = @transform_2, window_bounds = array<i64: 1, 4>}, {pipeline_mode = #tpu.pipeline_mode<synchronous>, transform_indices = @transform_3, window_bounds = array<i64: 9, 4, 4>}, {pipeline_mode = #tpu.pipeline_mode<synchronous>, transform_indices = @transform_4, window_bounds = array<i64: 1, 4>}, {pipeline_mode = #tpu.pipeline_mode<synchronous>, transform_indices = @transform_5, window_bounds = array<i64: 4, 16>}, {pipeline_mode = #tpu.pipeline_mode<synchronous>, transform_indices = @transform_6, window_bounds = array<i64: 1, 16>}, {transform_indices = @transform_7, window_bounds = array<i64: 2, 16, 16, 16>}]} {
    %cst = arith.constant 0.000000e+00 : bf16
    %0 = vector.broadcast %cst : bf16 to vector<2x1x18x4xbf16>
    %c0 = arith.constant 0 : index
    %c0_0 = arith.constant 0 : index
    %c0_1 = arith.constant 0 : index
    %c0_2 = arith.constant 0 : index
    %1 = vector.load %arg9[%c0, %c0_0, %c0_1, %c0_2] : memref<2x18x18x4xbf16, #tpu.memory_space<vmem>>, vector<2x1x18x4xbf16>
    tpu.vector_store %arg9[%c0, %c0_0, %c0_1, %c0_2], %0 {strides = array<i32>} : memref<2x18x18x4xbf16, #tpu.memory_space<vmem>>, vector<2x1x18x4xbf16>,
    %c0_3 = arith.constant 0 : index
    %c17 = arith.constant 17 : index
    %c0_4 = arith.constant 0 : index
    %c0_5 = arith.constant 0 : index
    %2 = vector.load %arg9[%c0_3, %c17, %c0_4, %c0_5] : memref<2x18x18x4xbf16, #tpu.memory_space<vmem>>, vector<2x1x18x4xbf16>
    tpu.vector_store %arg9[%c0_3, %c17, %c0_4, %c0_5], %0 {strides = array<i32>} : memref<2x18x18x4xbf16, #tpu.memory_space<vmem>>, vector<2x1x18x4xbf16>,
    %cst_6 = arith.constant 0.000000e+00 : bf16
    %3 = vector.broadcast %cst_6 : bf16 to vector<2x18x1x4xbf16>
    %c0_7 = arith.constant 0 : index
    %c0_8 = arith.constant 0 : index
    %c0_9 = arith.constant 0 : index
    %c0_10 = arith.constant 0 : index
    %4 = vector.load %arg9[%c0_7, %c0_8, %c0_9, %c0_10] : memref<2x18x18x4xbf16, #tpu.memory_space<vmem>>, vector<2x18x1x4xbf16>
    tpu.vector_store %arg9[%c0_7, %c0_8, %c0_9, %c0_10], %3 {strides = array<i32>} : memref<2x18x18x4xbf16, #tpu.memory_space<vmem>>, vector<2x18x1x4xbf16>,
    %c0_11 = arith.constant 0 : index
    %c0_12 = arith.constant 0 : index
    %c17_13 = arith.constant 17 : index
    %c0_14 = arith.constant 0 : index
    %5 = vector.load %arg9[%c0_11, %c0_12, %c17_13, %c0_14] : memref<2x18x18x4xbf16, #tpu.memory_space<vmem>>, vector<2x18x1x4xbf16>
    tpu.vector_store %arg9[%c0_11, %c0_12, %c17_13, %c0_14], %3 {strides = array<i32>} : memref<2x18x18x4xbf16, #tpu.memory_space<vmem>>, vector<2x18x1x4xbf16>,
    %c0_15 = arith.constant 0 : index
    %c0_16 = arith.constant 0 : index
    %c0_17 = arith.constant 0 : index
    %c0_18 = arith.constant 0 : index
    %6 = vector.load %arg1[%c0_15, %c0_16, %c0_17, %c0_18] : memref<2x16x16x16xf32, #tpu.memory_space<vmem>>, vector<2x16x16x16xf32>
    %7 = vector.shape_cast %6 : vector<2x16x16x16xf32> to vector<512x16xf32>
    %8 = arith.truncf %7 : vector<512x16xf32> to vector<512x16xbf16>
    %c0_19 = arith.constant 0 : index
    %c0_20 = arith.constant 0 : index
    %9 = vector.load %arg2[%c0_19, %c0_20] : memref<16x4xbf16, #tpu.memory_space<vmem>>, vector<16x4xbf16>
    %cst_21 = arith.constant dense<0.000000e+00> : vector<512x4xf32>
    %10 = tpu.matmul %8, %9, %cst_21 {dimension_numbers = #tpu.dot_dimension_numbers<[1], [0], [0], [1], [0, 0, 1, 1], [], []>} : vector<512x16xbf16>, vector<16x4xbf16>, vector<512x4xf32> -> vector<512x4xf32>
    %c0_22 = arith.constant 0 : index
    %c0_23 = arith.constant 0 : index
    %11 = vector.load %arg3[%c0_22, %c0_23] : memref<1x4xf32, #tpu.memory_space<vmem>>, vector<1x4xf32>
    %12 = vector.broadcast %11 : vector<1x4xf32> to vector<512x4xf32>
    %13 = arith.addf %10, %12 : vector<512x4xf32>
    %cst_24 = arith.constant 0.000000e+00 : f32
    %14 = vector.broadcast %cst_24 : f32 to vector<512x4xf32>
    %15 = arith.maximumf %13, %14 : vector<512x4xf32>
    %16 = vector.shape_cast %15 : vector<512x4xf32> to vector<2x16x16x4xf32>
    %17 = arith.truncf %16 : vector<2x16x16x4xf32> to vector<2x16x16x4xbf16>
    %c0_25 = arith.constant 0 : index
    %c1 = arith.constant 1 : index
    %c1_26 = arith.constant 1 : index
    %c0_27 = arith.constant 0 : index
    %18 = vector.load %arg9[%c0_25, %c1, %c1_26, %c0_27] : memref<2x18x18x4xbf16, #tpu.memory_space<vmem>>, vector<2x16x16x4xbf16>
    tpu.vector_store %arg9[%c0_25, %c1, %c1_26, %c0_27], %17 {strides = array<i32>} : memref<2x18x18x4xbf16, #tpu.memory_space<vmem>>, vector<2x16x16x4xbf16>,
    %c0_28 = arith.constant 0 : index
    %c0_29 = arith.constant 0 : index
    %c0_30 = arith.constant 0 : index
    %c0_31 = arith.constant 0 : index
    %19 = vector.load %arg9[%c0_28, %c0_29, %c0_30, %c0_31] : memref<2x18x18x4xbf16, #tpu.memory_space<vmem>>, vector<2x16x16x4xbf16>
    %20 = vector.shape_cast %19 : vector<2x16x16x4xbf16> to vector<512x4xbf16>
    %c0_32 = arith.constant 0 : index
    %c0_33 = arith.constant 0 : index
    %c0_34 = arith.constant 0 : index
    %21 = vector.load %arg4[%c0_32, %c0_33, %c0_34] : memref<9x4x4xbf16, #tpu.memory_space<vmem>>, vector<1x4x4xbf16>
    %22 = vector.shape_cast %21 : vector<1x4x4xbf16> to vector<4x4xbf16>
    %cst_35 = arith.constant dense<0.000000e+00> : vector<512x4xf32>
    %23 = tpu.matmul %20, %22, %cst_35 {dimension_numbers = #tpu.dot_dimension_numbers<[1], [0], [0], [1], [0, 0, 1, 1], [], []>} : vector<512x4xbf16>, vector<4x4xbf16>, vector<512x4xf32> -> vector<512x4xf32>
    %c0_36 = arith.constant 0 : index
    %c0_37 = arith.constant 0 : index
    %c1_38 = arith.constant 1 : index
    %c0_39 = arith.constant 0 : index
    %24 = vector.load %arg9[%c0_36, %c0_37, %c1_38, %c0_39] : memref<2x18x18x4xbf16, #tpu.memory_space<vmem>>, vector<2x16x16x4xbf16>
    %25 = vector.shape_cast %24 : vector<2x16x16x4xbf16> to vector<512x4xbf16>
    %c1_40 = arith.constant 1 : index
    %c0_41 = arith.constant 0 : index
    %c0_42 = arith.constant 0 : index
    %26 = vector.load %arg4[%c1_40, %c0_41, %c0_42] : memref<9x4x4xbf16, #tpu.memory_space<vmem>>, vector<1x4x4xbf16>
    %27 = vector.shape_cast %26 : vector<1x4x4xbf16> to vector<4x4xbf16>
    %cst_43 = arith.constant dense<0.000000e+00> : vector<512x4xf32>
    %28 = tpu.matmul %25, %27, %cst_43 {dimension_numbers = #tpu.dot_dimension_numbers<[1], [0], [0], [1], [0, 0, 1, 1], [], []>} : vector<512x4xbf16>, vector<4x4xbf16>, vector<512x4xf32> -> vector<512x4xf32>
    %29 = arith.addf %23, %28 : vector<512x4xf32>
    %c0_44 = arith.constant 0 : index
    %c0_45 = arith.constant 0 : index
    %c2 = arith.constant 2 : index
    %c0_46 = arith.constant 0 : index
    %30 = vector.load %arg9[%c0_44, %c0_45, %c2, %c0_46] : memref<2x18x18x4xbf16, #tpu.memory_space<vmem>>, vector<2x16x16x4xbf16>
    %31 = vector.shape_cast %30 : vector<2x16x16x4xbf16> to vector<512x4xbf16>
    %c2_47 = arith.constant 2 : index
    %c0_48 = arith.constant 0 : index
    %c0_49 = arith.constant 0 : index
    %32 = vector.load %arg4[%c2_47, %c0_48, %c0_49] : memref<9x4x4xbf16, #tpu.memory_space<vmem>>, vector<1x4x4xbf16>
    %33 = vector.shape_cast %32 : vector<1x4x4xbf16> to vector<4x4xbf16>
    %cst_50 = arith.constant dense<0.000000e+00> : vector<512x4xf32>
    %34 = tpu.matmul %31, %33, %cst_50 {dimension_numbers = #tpu.dot_dimension_numbers<[1], [0], [0], [1], [0, 0, 1, 1], [], []>} : vector<512x4xbf16>, vector<4x4xbf16>, vector<512x4xf32> -> vector<512x4xf32>
    %35 = arith.addf %29, %34 : vector<512x4xf32>
    %c0_51 = arith.constant 0 : index
    %c1_52 = arith.constant 1 : index
    %c0_53 = arith.constant 0 : index
    %c0_54 = arith.constant 0 : index
    %36 = vector.load %arg9[%c0_51, %c1_52, %c0_53, %c0_54] : memref<2x18x18x4xbf16, #tpu.memory_space<vmem>>, vector<2x16x16x4xbf16>
    %37 = vector.shape_cast %36 : vector<2x16x16x4xbf16> to vector<512x4xbf16>
    %c3 = arith.constant 3 : index
    %c0_55 = arith.constant 0 : index
    %c0_56 = arith.constant 0 : index
    %38 = vector.load %arg4[%c3, %c0_55, %c0_56] : memref<9x4x4xbf16, #tpu.memory_space<vmem>>, vector<1x4x4xbf16>
    %39 = vector.shape_cast %38 : vector<1x4x4xbf16> to vector<4x4xbf16>
    %cst_57 = arith.constant dense<0.000000e+00> : vector<512x4xf32>
    %40 = tpu.matmul %37, %39, %cst_57 {dimension_numbers = #tpu.dot_dimension_numbers<[1], [0], [0], [1], [0, 0, 1, 1], [], []>} : vector<512x4xbf16>, vector<4x4xbf16>, vector<512x4xf32> -> vector<512x4xf32>
    %41 = arith.addf %35, %40 : vector<512x4xf32>
    %c0_58 = arith.constant 0 : index
    %c1_59 = arith.constant 1 : index
    %c1_60 = arith.constant 1 : index
    %c0_61 = arith.constant 0 : index
    %42 = vector.load %arg9[%c0_58, %c1_59, %c1_60, %c0_61] : memref<2x18x18x4xbf16, #tpu.memory_space<vmem>>, vector<2x16x16x4xbf16>
    %43 = vector.shape_cast %42 : vector<2x16x16x4xbf16> to vector<512x4xbf16>
    %c4 = arith.constant 4 : index
    %c0_62 = arith.constant 0 : index
    %c0_63 = arith.constant 0 : index
    %44 = vector.load %arg4[%c4, %c0_62, %c0_63] : memref<9x4x4xbf16, #tpu.memory_space<vmem>>, vector<1x4x4xbf16>
    %45 = vector.shape_cast %44 : vector<1x4x4xbf16> to vector<4x4xbf16>
    %cst_64 = arith.constant dense<0.000000e+00> : vector<512x4xf32>
    %46 = tpu.matmul %43, %45, %cst_64 {dimension_numbers = #tpu.dot_dimension_numbers<[1], [0], [0], [1], [0, 0, 1, 1], [], []>} : vector<512x4xbf16>, vector<4x4xbf16>, vector<512x4xf32> -> vector<512x4xf32>
    %47 = arith.addf %41, %46 : vector<512x4xf32>
    %c0_65 = arith.constant 0 : index
    %c1_66 = arith.constant 1 : index
    %c2_67 = arith.constant 2 : index
    %c0_68 = arith.constant 0 : index
    %48 = vector.load %arg9[%c0_65, %c1_66, %c2_67, %c0_68] : memref<2x18x18x4xbf16, #tpu.memory_space<vmem>>, vector<2x16x16x4xbf16>
    %49 = vector.shape_cast %48 : vector<2x16x16x4xbf16> to vector<512x4xbf16>
    %c5 = arith.constant 5 : index
    %c0_69 = arith.constant 0 : index
    %c0_70 = arith.constant 0 : index
    %50 = vector.load %arg4[%c5, %c0_69, %c0_70] : memref<9x4x4xbf16, #tpu.memory_space<vmem>>, vector<1x4x4xbf16>
    %51 = vector.shape_cast %50 : vector<1x4x4xbf16> to vector<4x4xbf16>
    %cst_71 = arith.constant dense<0.000000e+00> : vector<512x4xf32>
    %52 = tpu.matmul %49, %51, %cst_71 {dimension_numbers = #tpu.dot_dimension_numbers<[1], [0], [0], [1], [0, 0, 1, 1], [], []>} : vector<512x4xbf16>, vector<4x4xbf16>, vector<512x4xf32> -> vector<512x4xf32>
    %53 = arith.addf %47, %52 : vector<512x4xf32>
    %c0_72 = arith.constant 0 : index
    %c2_73 = arith.constant 2 : index
    %c0_74 = arith.constant 0 : index
    %c0_75 = arith.constant 0 : index
    %54 = vector.load %arg9[%c0_72, %c2_73, %c0_74, %c0_75] : memref<2x18x18x4xbf16, #tpu.memory_space<vmem>>, vector<2x16x16x4xbf16>
    %55 = vector.shape_cast %54 : vector<2x16x16x4xbf16> to vector<512x4xbf16>
    %c6 = arith.constant 6 : index
    %c0_76 = arith.constant 0 : index
    %c0_77 = arith.constant 0 : index
    %56 = vector.load %arg4[%c6, %c0_76, %c0_77] : memref<9x4x4xbf16, #tpu.memory_space<vmem>>, vector<1x4x4xbf16>
    %57 = vector.shape_cast %56 : vector<1x4x4xbf16> to vector<4x4xbf16>
    %cst_78 = arith.constant dense<0.000000e+00> : vector<512x4xf32>
    %58 = tpu.matmul %55, %57, %cst_78 {dimension_numbers = #tpu.dot_dimension_numbers<[1], [0], [0], [1], [0, 0, 1, 1], [], []>} : vector<512x4xbf16>, vector<4x4xbf16>, vector<512x4xf32> -> vector<512x4xf32>
    %59 = arith.addf %53, %58 : vector<512x4xf32>
    %c0_79 = arith.constant 0 : index
    %c2_80 = arith.constant 2 : index
    %c1_81 = arith.constant 1 : index
    %c0_82 = arith.constant 0 : index
    %60 = vector.load %arg9[%c0_79, %c2_80, %c1_81, %c0_82] : memref<2x18x18x4xbf16, #tpu.memory_space<vmem>>, vector<2x16x16x4xbf16>
    %61 = vector.shape_cast %60 : vector<2x16x16x4xbf16> to vector<512x4xbf16>
    %c7 = arith.constant 7 : index
    %c0_83 = arith.constant 0 : index
    %c0_84 = arith.constant 0 : index
    %62 = vector.load %arg4[%c7, %c0_83, %c0_84] : memref<9x4x4xbf16, #tpu.memory_space<vmem>>, vector<1x4x4xbf16>
    %63 = vector.shape_cast %62 : vector<1x4x4xbf16> to vector<4x4xbf16>
    %cst_85 = arith.constant dense<0.000000e+00> : vector<512x4xf32>
    %64 = tpu.matmul %61, %63, %cst_85 {dimension_numbers = #tpu.dot_dimension_numbers<[1], [0], [0], [1], [0, 0, 1, 1], [], []>} : vector<512x4xbf16>, vector<4x4xbf16>, vector<512x4xf32> -> vector<512x4xf32>
    %65 = arith.addf %59, %64 : vector<512x4xf32>
    %c0_86 = arith.constant 0 : index
    %c2_87 = arith.constant 2 : index
    %c2_88 = arith.constant 2 : index
    %c0_89 = arith.constant 0 : index
    %66 = vector.load %arg9[%c0_86, %c2_87, %c2_88, %c0_89] : memref<2x18x18x4xbf16, #tpu.memory_space<vmem>>, vector<2x16x16x4xbf16>
    %67 = vector.shape_cast %66 : vector<2x16x16x4xbf16> to vector<512x4xbf16>
    %c8 = arith.constant 8 : index
    %c0_90 = arith.constant 0 : index
    %c0_91 = arith.constant 0 : index
    %68 = vector.load %arg4[%c8, %c0_90, %c0_91] : memref<9x4x4xbf16, #tpu.memory_space<vmem>>, vector<1x4x4xbf16>
    %69 = vector.shape_cast %68 : vector<1x4x4xbf16> to vector<4x4xbf16>
    %cst_92 = arith.constant dense<0.000000e+00> : vector<512x4xf32>
    %70 = tpu.matmul %67, %69, %cst_92 {dimension_numbers = #tpu.dot_dimension_numbers<[1], [0], [0], [1], [0, 0, 1, 1], [], []>} : vector<512x4xbf16>, vector<4x4xbf16>, vector<512x4xf32> -> vector<512x4xf32>
    %71 = arith.addf %65, %70 : vector<512x4xf32>
    %c0_93 = arith.constant 0 : index
    %c0_94 = arith.constant 0 : index
    %72 = vector.load %arg5[%c0_93, %c0_94] : memref<1x4xf32, #tpu.memory_space<vmem>>, vector<1x4xf32>
    %73 = vector.broadcast %72 : vector<1x4xf32> to vector<512x4xf32>
    %74 = arith.addf %71, %73 : vector<512x4xf32>
    %cst_95 = arith.constant 0.000000e+00 : f32
    %75 = vector.broadcast %cst_95 : f32 to vector<512x4xf32>
    %76 = arith.maximumf %74, %75 : vector<512x4xf32>
    %77 = arith.truncf %76 : vector<512x4xf32> to vector<512x4xbf16>
    %c0_96 = arith.constant 0 : index
    %c0_97 = arith.constant 0 : index
    %78 = vector.load %arg6[%c0_96, %c0_97] : memref<4x16xbf16, #tpu.memory_space<vmem>>, vector<4x16xbf16>
    %cst_98 = arith.constant dense<0.000000e+00> : vector<512x16xf32>
    %79 = tpu.matmul %77, %78, %cst_98 {dimension_numbers = #tpu.dot_dimension_numbers<[1], [0], [0], [1], [0, 0, 1, 1], [], []>} : vector<512x4xbf16>, vector<4x16xbf16>, vector<512x16xf32> -> vector<512x16xf32>
    %c0_99 = arith.constant 0 : index
    %c0_100 = arith.constant 0 : index
    %80 = vector.load %arg7[%c0_99, %c0_100] : memref<1x16xf32, #tpu.memory_space<vmem>>, vector<1x16xf32>
    %81 = vector.broadcast %80 : vector<1x16xf32> to vector<512x16xf32>
    %82 = arith.addf %79, %81 : vector<512x16xf32>
    %c0_101 = arith.constant 0 : index
    %c0_102 = arith.constant 0 : index
    %c0_103 = arith.constant 0 : index
    %c0_104 = arith.constant 0 : index
    %83 = vector.load %arg1[%c0_101, %c0_102, %c0_103, %c0_104] : memref<2x16x16x16xf32, #tpu.memory_space<vmem>>, vector<2x16x16x16xf32>
    %84 = vector.shape_cast %83 : vector<2x16x16x16xf32> to vector<512x16xf32>
    %85 = arith.addf %82, %84 : vector<512x16xf32>
    %cst_105 = arith.constant 0.000000e+00 : f32
    %86 = vector.broadcast %cst_105 : f32 to vector<512x16xf32>
    %87 = arith.maximumf %85, %86 : vector<512x16xf32>
    %88 = vector.shape_cast %87 : vector<512x16xf32> to vector<2x16x16x16xf32>
    %c0_106 = arith.constant 0 : index
    %c0_107 = arith.constant 0 : index
    %c0_108 = arith.constant 0 : index
    %c0_109 = arith.constant 0 : index
    %89 = vector.load %arg8[%c0_106, %c0_107, %c0_108, %c0_109] : memref<2x16x16x16xf32, #tpu.memory_space<vmem>>, vector<2x16x16x16xf32>
    tpu.vector_store %arg8[%c0_106, %c0_107, %c0_108, %c0_109], %88 {strides = array<i32>} : memref<2x16x16x16xf32, #tpu.memory_space<vmem>>, vector<2x16x16x16xf32>,
    return
  }
  func.func @transform_0(%arg0: i32) -> (i32, i32, i32, i32) {
    %c0_i32 = arith.constant 0 : i32
    %c0_i32_0 = arith.constant 0 : i32
    %c0_i32_1 = arith.constant 0 : i32
    %c0_i32_2 = arith.constant 0 : i32
    return %arg0, %c0_i32, %c0_i32_0, %c0_i32_1 : i32, i32, i32, i32
  }
  func.func @transform_1(%arg0: i32) -> (i32, i32) {
    %c0_i32 = arith.constant 0 : i32
    %c0_i32_0 = arith.constant 0 : i32
    %c0_i32_1 = arith.constant 0 : i32
    return %c0_i32, %c0_i32_0 : i32, i32
  }
  func.func @transform_2(%arg0: i32) -> (i32, i32) {
    %c0_i32 = arith.constant 0 : i32
    %c0_i32_0 = arith.constant 0 : i32
    %c0_i32_1 = arith.constant 0 : i32
    return %c0_i32, %c0_i32_0 : i32, i32
  }
  func.func @transform_3(%arg0: i32) -> (i32, i32, i32) {
    %c0_i32 = arith.constant 0 : i32
    %c0_i32_0 = arith.constant 0 : i32
    %c0_i32_1 = arith.constant 0 : i32
    %c0_i32_2 = arith.constant 0 : i32
    return %c0_i32, %c0_i32_0, %c0_i32_1 : i32, i32, i32
  }
  func.func @transform_4(%arg0: i32) -> (i32, i32) {
    %c0_i32 = arith.constant 0 : i32
    %c0_i32_0 = arith.constant 0 : i32
    %c0_i32_1 = arith.constant 0 : i32
    return %c0_i32, %c0_i32_0 : i32, i32
  }
  func.func @transform_5(%arg0: i32) -> (i32, i32) {
    %c0_i32 = arith.constant 0 : i32
    %c0_i32_0 = arith.constant 0 : i32
    %c0_i32_1 = arith.constant 0 : i32
    return %c0_i32, %c0_i32_0 : i32, i32
  }
  func.func @transform_6(%arg0: i32) -> (i32, i32) {
    %c0_i32 = arith.constant 0 : i32
    %c0_i32_0 = arith.constant 0 : i32
    %c0_i32_1 = arith.constant 0 : i32
    return %c0_i32, %c0_i32_0 : i32, i32
  }
  func.func @transform_7(%arg0: i32) -> (i32, i32, i32, i32) {
    %c0_i32 = arith.constant 0 : i32
    %c0_i32_0 = arith.constant 0 : i32
    %c0_i32_1 = arith.constant 0 : i32
    %c0_i32_2 = arith.constant 0 : i32
    return %arg0, %c0_i32, %c0_i32_0, %c0_i32_1 : i32, i32, i32, i32
  }
}

</mosaic_0001>

<bundles_post_ra>
// kernel: tpu_custom_call.1
= control target key start
LH: loop header
LB: loop body
LE: loop exit
PB: predicated region body
PF: predicated region fallthrough
CT: control target
= control target key end

     0   :  { %12 = vsyncpa [#allocation4], 0  ;;  %s15107_s0 = inlined_call_operand.hbm [shape: f32[2,16,16,16], index: 0, kind: input, shape index: {}]   ;;  %s15108_s1 = inlined_call_operand.vmem [shape: bf16[16,4], index: 1, kind: input, shape index: {}]   ;;  %s15109_s2 = inlined_call_operand.vmem [shape: f32[1,4], index: 2, kind: input, shape index: {}]   ;;  %s15110_s3 = inlined_call_operand.vmem [shape: bf16[9,4,4], index: 3, kind: input, shape index: {}]   ;;  %s15111_s4 = inlined_call_operand.vmem [shape: f32[1,4], index: 4, kind: input, shape index: {}]   ;;  %s15112_s5 = inlined_call_operand.vmem [shape: bf16[4,16], index: 5, kind: input, shape index: {}]   ;;  %s15113_s6 = inlined_call_operand.vmem [shape: f32[1,16], index: 6, kind: input, shape index: {}]   ;;  %s15114_s7 = inlined_call_operand.hbm [shape: f32[2,16,16,16], index: 7, kind: output, shape index: {}]  }
   0x1   :  { %13 = vsyncpa [#allocation5], 0  ;;  %s18_s26 = sshll.u32 %s15107_s0, 4  ;;  %s11174_s27 = smov [#allocation3]   ;;  %s19_s26 = int_to_ptr.hbm [resolvable:$true] %s18_s26 }
   0x2   :  { %s20_s28 = sshll.u32 %s11174_s27, 4  ;;  %s11175_s29 = smov 128   ;;  %s21_s28 = int_to_ptr.vmem [resolvable:$true] %s20_s28 }
   0x3   :  { %s11176_s30 = smov 8  }
   0x4   :  { %26 = dma.hbm_to_vmem [thread:$0]  %s19_s26, 8192, %s21_s28, [#allocation4], %s11175_s29, %s11175_s29, %s11176_s30  }
   0x5   :  { %11170 = dma.done.wait [#allocation4], 8192  }
   0x6   :  { %11171 = vsyncadd [#allocation4], 4294959104  ;;  %v10893_v0 = vld [vmem:[%s15108_s1] sm:$0xff]  ;;  %v280_v1 = vld [vmem:[#allocation3] sm:$0xff]  ;;  %vm388_vm0 = vcmask 130048   ;;  %vm47_vm1 = vcmask 24576  }
   0x7   :  { %v281_v2 = vld [vmem:[#allocation3 + $0x8] sm:$0xff]  ;;  %492 = vmatpush.bf16.msra.mxu0 %v10893_v0  ;;  %10990 = vmatpush.bf16.msra.mxu3 %v10893_v0  ;;  %v282_v4 = vld [vmem:[#allocation3 + $0x10] sm:$0xff]  ;;  %v283_v5 = vld [vmem:[#allocation3 + $0x18] sm:$0xff]  ;;  %vm60_vm2 = vsmask.f32 256  ;;  %v15124_v20 = vmov 0 }
   0x8   :  { %v344_v3 = vpack.c.bf16 %v281_v2, %v280_v1  ;;  %v345_v6 = vpack.c.bf16 %v283_v5, %v282_v4  ;;  %v284_v7 = vld [vmem:[#allocation3 + $0x20] sm:$0xff]  ;;  %v285_v8 = vld [vmem:[#allocation3 + $0x28] sm:$0xff]  ;;  %v286_v10 = vld [vmem:[#allocation3 + $0x30] sm:$0xff]  ;;  %vm44_vm4 = vcmask 27648   ;;  %v11177_v24 = vmov 0   ;;  %s10036_s24 = sshll.u32 %s15114_s7, 4  ;;  %s10037_s24 = int_to_ptr.hbm [resolvable:$true] %s10036_s24 }
   0x9   :  { %v346_v9 = vpack.c.bf16 %v285_v8, %v284_v7  ;;  %v287_v11 = vld [vmem:[#allocation3 + $0x38] sm:$0xff]  ;;  %v288_v13 = vld [vmem:[#allocation3 + $0x40] sm:$0xff]  ;;  %v289_v14 = vld [vmem:[#allocation3 + $0x48] sm:$0xff]  ;;  %45 = vst.msk [vmem:[#allocation2] sm:$0xf] %vm44_vm4, %v11177_v24  ;;  %v15127_v28 = vmov 0 }
   0xa   :  { %10053 = vmatmul.msk.bf16.vlgmr.msra.gmra.mxu0 %vm388_vm0, %v344_v3  ;;  %v347_v12 = vpack.c.bf16 %v287_v11, %v286_v10  ;;  %v348_v15 = vpack.c.bf16 %v289_v14, %v288_v13  ;;  %v290_v16 = vld [vmem:[#allocation3 + $0x50] sm:$0xff]  ;;  %v291_v17 = vld [vmem:[#allocation3 + $0x58] sm:$0xff]  ;;  %vm11236_vm3 = vmand %vm47_vm1, %vm60_vm2  ;;  %46 = vst.msk [vmem:[#allocation2 + $0x4] sm:$0xf] %vm44_vm4, %v11177_v24  ;;  %vm170_vm5 = vsmask.f32 7938 }
   0xb   :  { %v349_v18 = vpack.c.bf16 %v291_v17, %v290_v16  ;;  %v65_v19 = vld [vmem:[#allocation2 + $0xc] sm:$0x1]  ;;  %v15125_v20 = vsel %vm11236_vm3, 4294967295, %v15124_v20  ;;  %v292_v22 = vld [vmem:[#allocation3 + $0x60] sm:$0xff]  ;;  %v293_v23 = vld [vmem:[#allocation3 + $0x68] sm:$0xff]  ;;  %vm2714_vm7 = vcmask 1041408  }
   0xc   :  { %15126 = vst [vmem:[#allocation9_spill] sm:$0xff] %v15125_v20  ;;  %v66_v21 = vsel %vm11236_vm3, 0, %v65_v19  ;;  %v350_v25 = vpack.c.bf16 %v293_v23, %v292_v22  ;;  %vm11256_vm6 = vmand %vm47_vm1, %vm170_vm5  ;;  %v294_v31 = vld [vmem:[#allocation3 + $0x70] sm:$0xff]  ;;  %v175_v32 = vld [vmem:[#allocation2 + $0x14] sm:$0x1]  ;;  %vm2617_vm8 = vcmask 31744  }
   0xd   :  { %67 = vst [vmem:[#allocation2 + $0xc] sm:$0x1] %v66_v21  ;;  %v15128_v28 = vsel %vm11256_vm6, 4294967295, %v15127_v28  ;;  %v295_v33 = vld [vmem:[#allocation3 + $0x78] sm:$0xff]  ;;  %v176_v34 = vsel %vm11256_vm6, 0, %v175_v32  ;;  %v15130_v56 = vmov 0  ;;  %vm11309_vm14 = vmand %vm44_vm4, %vm170_vm5 }
   0xe   :  { %48 = vst.msk [vmem:[#allocation2 + $0x8] sm:$0x1] %vm47_vm1, %v11177_v24  ;;  %v1715_v35 = vld [vmem:[%s15110_s3] sm:$0x3]  ;;  %v351_v39 = vpack.c.bf16 %v295_v33, %v294_v31  ;;  %v68_v51 = vld [vmem:[#allocation2 + $0x18] sm:$0x1] }
   0xf   :  { %49 = vst.msk [vmem:[#allocation2 + $0xd8] sm:$0xf] %vm44_vm4, %v11177_v24  ;;  %v11271_v36 = vsel %vm2714_vm7, %v1715_v35, 0  ;;  %v69_v54 = vsel %vm11236_vm3, 0, %v68_v51  ;;  %vm1748_vm9 = vsmask.f32 3328 }
  0x10   :  { %50 = vst.msk [vmem:[#allocation2 + $0xdc] sm:$0xf] %vm44_vm4, %v11177_v24  ;;  %v62_v26 = vld [vmem:[#allocation2] sm:$0x1]  ;;  %3153 = vmatpush.bf16.msra.mxu2 %v11271_v36  ;;  %vm1749_vm10 = vsmask.f32 7440 }
  0x11   :  { %51 = vst.msk [vmem:[#allocation2 + $0xe0] sm:$0x1] %vm47_vm1, %v11177_v24  ;;  %v63_v27 = vsel %vm11236_vm3, 0, %v62_v26  ;;  %v11274_v40 = vld [vmem:[#allocation2 + $0x4] sm:$0xf]  ;;  %vm11282_vm11 = vmor %vm1748_vm9, %vm1749_vm10  ;;  %v296_v2 = vld [vmem:[#allocation3 + $0x80] sm:$0xff] }
  0x12   :  { %53 = vst.msk [vmem:[#allocation2 + $0xcc] sm:$0xf] %vm44_vm4, %v11177_v24  ;;  %v1761_v43 = vshll.u32 %v11274_v40, 16  ;;  %v1765_v44 = vshrl.u32 %v11274_v40, 16  ;;  %v15131_v56 = vsel %vm11282_vm11, 4294967295, %v15130_v56  ;;  %v297_v3 = vld [vmem:[#allocation3 + $0x88] sm:$0xff] }
  0x13   :  { %54 = vst.msk [vmem:[#allocation2 + $0xd0] sm:$0xf] %vm44_vm4, %v11177_v24  ;;  %v10085_v59 = vld [vmem:[%s15110_s3 + $0x2] sm:$0x3]  ;;  %v178_v4 = vld [vmem:[#allocation2 + $0x20] sm:$0x1]  ;;  %v352_v7 = vpack.c.bf16 %v297_v3, %v296_v2 }
  0x14   :  { %55 = vst.msk [vmem:[#allocation2 + $0xd4] sm:$0x1] %vm47_vm1, %v11177_v24  ;;  %v1763_v47 = vrot.slane %v1761_v43, 5  ;;  %v1767_v48 = vrot.slane %v1765_v44, 4  ;;  %v2716_v61 = vsel %vm2714_vm7, %v10085_v59, 0  ;;  %vm3411_vm12 = vcmask 1042432  }
  0x15   :  { %64 = vst [vmem:[#allocation2] sm:$0x1] %v63_v27  ;;  %v172_v29 = vld [vmem:[#allocation2 + $0x8] sm:$0x1]  ;;  %2725 = vmatpush.bf16.msra.mxu1 %v2716_v61  ;;  %10991 = vmatpush.bf16.msrb.mxu3 %v2716_v61  ;;  %v11297_v5 = vld [vmem:[%s15109_s2] ss:$0 sm:$0xff] }
  0x16   :  { %15129 = vst [vmem:[#allocation10_spill] sm:$0xff] %v15128_v28  ;;  %v173_v30 = vsel %vm11256_vm6, 0, %v172_v29  ;;  %v1768_v52 = vor.u32 %v1767_v48, %v1763_v47  ;;  %v71_v11 = vld [vmem:[#allocation2 + $0x24] sm:$0x1]  ;;  %vm3412_vm13 = vcmask 1046532   ;;  %v299_v31 = vld [vmem:[#allocation3 + $0x98] sm:$0xff] }
  0x17   :  { %56 = vst.msk [vmem:[#allocation2 + $0x1a4] sm:$0xf] %vm44_vm4, %v11177_v24  ;;  %v72_v13 = vsel %vm11236_vm3, 0, %v71_v11  ;;  %vm11316_vm15 = vmor %vm3411_vm12, %vm3412_vm13  ;;  %v181_v32 = vld [vmem:[#allocation2 + $0x2c] sm:$0x1] }
  0x18   :  { %57 = vst.msk [vmem:[#allocation2 + $0x1a8] sm:$0xf] %vm44_vm4, %v11177_v24  ;;  %v1769_v57 = vrot.slane %v1768_v52, 4  ;;  %v182_v35 = vsel %vm11256_vm6, 0, %v181_v32 }
  0x19   :  { %58 = vst.msk [vmem:[#allocation2 + $0x1ac] sm:$0x1] %vm47_vm1, %v11177_v24  ;;  %v1427_v24 = vld [vmem:[#allocation2 + $0xc] sm:$0xf]  ;;  %vm782_vm1 = vsmask.f32 4368 }
  0x1a   :  { %10054 = vmatmul.msk.bf16.gmra.mxu0 %vm388_vm0, %v345_v6  ;;  %174 = vst [vmem:[#allocation2 + $0x8] sm:$0x1] %v173_v30  ;;  %v179_v6 = vsel %vm11256_vm6, 0, %v178_v4  ;;  %v298_v30 = vld [vmem:[#allocation3 + $0x90] sm:$0xff]  ;;  %vm11330_vm5 = vmor %vm60_vm2, %vm782_vm1 }
  0x1b   :  { %177 = vst [vmem:[#allocation2 + $0x14] sm:$0x1] %v176_v34 }
  0x1c   :  { %v10894_v37 = vld [vmem:[#allocation2] sm:$0xff]  ;;  %70 = vst [vmem:[#allocation2 + $0x18] sm:$0x1] %v69_v54 }
  0x1d   :  { %v1651_v38 = vld [vmem:[#allocation2] sm:$0xf]  ;;  %10246 = vmatmul.msk.bf16.vlgmr.msra.gmra.mxu2 %vm2617_vm8, %v10894_v37  ;;  %15132 = vst [vmem:[#allocation11_spill] sm:$0xff] %v15131_v56 }
  0x1e   :  { %v1752_v41 = vshrl.u32 %v1651_v38, 16  ;;  %v1755_v42 = vshll.u32 %v1651_v38, 16  ;;  %180 = vst [vmem:[#allocation2 + $0x20] sm:$0x1] %v179_v6  ;;  %v353_v38 = vpack.c.bf16 %v299_v31, %v298_v30  ;;  %v300_v6 = vld [vmem:[#allocation3 + $0xa0] sm:$0xff] }
  0x1f   :  { %73 = vst [vmem:[#allocation2 + $0x24] sm:$0x1] %v72_v13 }
  0x20   :  { %v1754_v45 = vrot.slane %v1752_v41, 4  ;;  %v1757_v46 = vrot.slane %v1755_v42, 5  ;;  %183 = vst [vmem:[#allocation2 + $0x2c] sm:$0x1] %v182_v35 }
  0x21   :  { %v1716_v49 = vld [vmem:[#allocation2 + $0x8] sm:$0x1] }
  0x22   :  { %v1758_v50 = vor.u32 %v1757_v46, %v1754_v45  ;;  %v1771_v53 = vshll.u32 %v1716_v49, 16  ;;  %v3419_v16 = vrot.slane %v1716_v49, 5  ;;  %v1431_v45 = vld [vmem:[#allocation2 + $0x14] sm:$0x1] }
  0x24   :  { %v1759_v55 = vrot.slane %v1758_v50, 4  ;;  %v1773_v58 = vrot.slane %v1771_v53, 5  ;;  %v74_v50 = vld [vmem:[#allocation2 + $0x30] sm:$0x1] }
  0x26   :  { %v1764_v60 = vsel %vm11282_vm11, %v1759_v55, %v1763_v47  ;;  %v1774_v62 = vsel %vm11282_vm11, %v1769_v57, %v1773_v58  ;;  %v75_v55 = vsel %vm11236_vm3, 0, %v74_v50 }
  0x27   :  { %v2521_v63 = vunpack.c.l.b16 %v1764_v60  ;;  %v2522_v0 = vunpack.c.l.b16 %v1774_v62  ;;  %76 = vst [vmem:[#allocation2 + $0x30] sm:$0x1] %v75_v55 }
  0x29   :  { %v2585_v1 = vpack.c.b16 %v2522_v0, %v2521_v63  ;;  %v1434_v0 = vld [vmem:[#allocation2 + $0x18] sm:$0xf] }
  0x2a   :  { %10055 = vmatmul.msk.bf16.gmra.mxu0 %vm388_vm0, %v346_v9 }
  0x2b   :  { %10086 = vmatmul.msk.bf16.vlgmr.msra.gmra.mxu1 %vm2617_vm8, %v2585_v1 }
  0x3a   :  { %10056 = vmatmul.msk.bf16.gmra.mxu0 %vm388_vm0, %v347_v12 }
  0x4a   :  { %10057 = vmatmul.msk.bf16.gmra.mxu0 %vm388_vm0, %v348_v15  ;;  %v15115_v15 = vrot.slane %v11274_v40, 5 }
  0x4c   :  { %v3418_v23 = vrot.slane %v15115_v15, 4 }
  0x4e   :  { %v11322_v29 = vsel %vm11316_vm15, %v3418_v23, %v3419_v16 }
  0x5a   :  { %10058 = vmatmul.msk.bf16.gmra.mxu0 %vm388_vm0, %v349_v18 }
  0x6a   :  { %10059 = vmatmul.msk.bf16.gmra.mxu0 %vm388_vm0, %v350_v25 }
  0x7a   :  { %10060 = vmatmul.msk.bf16.gmra.mxu0 %vm388_vm0, %v351_v39 }
  0x87   :  { %v494_v8 = vpop.f32.mrf.mxu0 }
  0x88   :  { %v495_v9 = vadd.f32 %v11297_v5, %v494_v8  ;;  %v184_v8 = vld [vmem:[#allocation2 + $0x38] sm:$0x1] }
  0x89   :  { %v185_v13 = vsel %vm11256_vm6, 0, %v184_v8  ;;  %v187_v8 = vld [vmem:[#allocation2 + $0x44] sm:$0x1] }
  0x8a   :  { %v654_v10 = vmax.f32 %v495_v9, 0.0  ;;  %10061 = vmatmul.msk.bf16.gmra.mxu0 %vm388_vm0, %v352_v7  ;;  %v301_v7 = vld [vmem:[#allocation3 + $0xa8] sm:$0xff]  ;;  %186 = vst [vmem:[#allocation2 + $0x38] sm:$0x1] %v185_v13  ;;  %v188_v13 = vsel %vm11256_vm6, 0, %v187_v8 }
  0x8b   :  { %189 = vst [vmem:[#allocation2 + $0x44] sm:$0x1] %v188_v13  ;;  %v190_v8 = vld [vmem:[#allocation2 + $0x50] sm:$0x1] }
  0x8c   :  { %v718_v12 = vpack.c.bf16 %v654_v10, %v654_v10  ;;  %v191_v13 = vsel %vm11256_vm6, 0, %v190_v8  ;;  %v193_v8 = vld [vmem:[#allocation2 + $0x5c] sm:$0x1] }
  0x8d   :  { %192 = vst [vmem:[#allocation2 + $0x50] sm:$0x1] %v191_v13  ;;  %v194_v13 = vsel %vm11256_vm6, 0, %v193_v8  ;;  %v196_v8 = vld [vmem:[#allocation2 + $0x68] sm:$0x1] }
  0x8e   :  { %v785_v14 = vshrl.u32 %v718_v12, 16  ;;  %v788_v19 = vshll.u32 %v718_v12, 16  ;;  %195 = vst [vmem:[#allocation2 + $0x5c] sm:$0x1] %v194_v13  ;;  %v197_v13 = vsel %vm11256_vm6, 0, %v196_v8 }
  0x8f   :  { %v496_v17 = vpop.f32.mrf.mxu0  ;;  %198 = vst [vmem:[#allocation2 + $0x68] sm:$0x1] %v197_v13  ;;  %v199_v8 = vld [vmem:[#allocation2 + $0x74] sm:$0x1] }
  0x90   :  { %v787_v18 = vrot.slane %v785_v14, 7  ;;  %v497_v22 = vadd.f32 %v11297_v5, %v496_v17  ;;  %v200_v13 = vsel %vm11256_vm6, 0, %v199_v8  ;;  %v202_v8 = vld [vmem:[#allocation2 + $0x80] sm:$0x1] }
  0x91   :  { %201 = vst [vmem:[#allocation2 + $0x74] sm:$0x1] %v200_v13  ;;  %v203_v13 = vsel %vm11256_vm6, 0, %v202_v8 }
  0x92   :  { %v790_v26 = vor.u32 %v788_v19, %v787_v18  ;;  %v655_v27 = vmax.f32 %v497_v22, 0.0  ;;  %v791_v46 = vrot.slane %v787_v18, 4  ;;  %v354_v22 = vpack.c.bf16 %v301_v7, %v300_v6  ;;  %v302_v6 = vld [vmem:[#allocation3 + $0xb0] sm:$0xff]  ;;  %v303_v7 = vld [vmem:[#allocation3 + $0xb8] sm:$0xff]  ;;  %204 = vst [vmem:[#allocation2 + $0x80] sm:$0x1] %v203_v13 }
  0x94   :  { %v1428_v33 = vsel %vm11309_vm14, %v790_v26, %v1427_v24  ;;  %v719_v34 = vpack.c.bf16 %v655_v27, %v655_v27 }
  0x95   :  { %1429 = vst [vmem:[#allocation2 + $0xc] sm:$0xf] %v1428_v33  ;;  %v1438_v33 = vld [vmem:[#allocation2 + $0x20] sm:$0x1] }
  0x96   :  { %v793_v37 = vshrl.u32 %v719_v34, 16  ;;  %v796_v42 = vshll.u32 %v719_v34, 16 }
  0x97   :  { %v499_v39 = vpop.f32.mrf.mxu0 }
  0x98   :  { %v795_v41 = vrot.slane %v793_v37, 7  ;;  %v500_v43 = vadd.f32 %v11297_v5, %v499_v39 }
  0x9a   :  { %v798_v47 = vor.u32 %v796_v42, %v795_v41  ;;  %v800_v48 = vrot.slane %v795_v41, 4  ;;  %v656_v49 = vmax.f32 %v500_v43, 0.0  ;;  %10062 = vmatmul.msk.bf16.gmra.mxu0 %vm388_vm0, %v353_v38 }
  0x9c   :  { %v799_v51 = vsel %vm11330_vm5, %v791_v46, %v798_v47  ;;  %v1432_v52 = vsel %vm11236_vm3, %v800_v48, %v1431_v45  ;;  %v720_v53 = vpack.c.bf16 %v656_v49, %v656_v49  ;;  %v1653_v54 = vld [vmem:[#allocation2 + $0xc] sm:$0xf]  ;;  %v77_v46 = vld [vmem:[#allocation2 + $0x3c] sm:$0x1] }
  0x9d   :  { %1430 = vst.msk [vmem:[#allocation2 + $0x10] sm:$0xf] %vm44_vm4, %v799_v51  ;;  %v1776_v57 = vshrl.u32 %v1653_v54, 16  ;;  %v1779_v58 = vshll.u32 %v1653_v54, 16  ;;  %v78_v51 = vsel %vm11236_vm3, 0, %v77_v46 }
  0x9e   :  { %1433 = vst [vmem:[#allocation2 + $0x14] sm:$0x1] %v1432_v52  ;;  %v802_v59 = vshrl.u32 %v720_v53, 16  ;;  %v805_v62 = vshll.u32 %v720_v53, 16  ;;  %v80_v46 = vld [vmem:[#allocation2 + $0x48] sm:$0x1] }
  0x9f   :  { %v501_v60 = vpop.f32.mrf.mxu0  ;;  %v1778_v1 = vrot.slane %v1776_v57, 4  ;;  %v1781_v2 = vrot.slane %v1779_v58, 5  ;;  %79 = vst [vmem:[#allocation2 + $0x3c] sm:$0x1] %v78_v51  ;;  %v81_v51 = vsel %vm11236_vm3, 0, %v80_v46 }
  0xa0   :  { %v804_v61 = vrot.slane %v802_v59, 7  ;;  %v502_v63 = vadd.f32 %v11297_v5, %v501_v60  ;;  %82 = vst [vmem:[#allocation2 + $0x48] sm:$0x1] %v81_v51  ;;  %v83_v46 = vld [vmem:[#allocation2 + $0x54] sm:$0x1] }
  0xa1   :  { %v1782_v16 = vor.u32 %v1781_v2, %v1778_v1  ;;  %v84_v51 = vsel %vm11236_vm3, 0, %v83_v46  ;;  %v86_v46 = vld [vmem:[#allocation2 + $0x60] sm:$0x1] }
  0xa2   :  { %v807_v3 = vor.u32 %v805_v62, %v804_v61  ;;  %v657_v4 = vmax.f32 %v502_v63, 0.0  ;;  %v808_v37 = vrot.slane %v804_v61, 4  ;;  %85 = vst [vmem:[#allocation2 + $0x54] sm:$0x1] %v84_v51  ;;  %v87_v51 = vsel %vm11236_vm3, 0, %v86_v46 }
  0xa3   :  { %v1783_v34 = vrot.slane %v1782_v16, 4  ;;  %88 = vst [vmem:[#allocation2 + $0x60] sm:$0x1] %v87_v51  ;;  %v89_v46 = vld [vmem:[#allocation2 + $0x6c] sm:$0x1] }
  0xa4   :  { %v1435_v9 = vsel %vm11309_vm14, %v807_v3, %v1434_v0  ;;  %v721_v10 = vpack.c.bf16 %v657_v4, %v657_v4  ;;  %v10895_v11 = vld [vmem:[#allocation2 + $0xc] sm:$0xff]  ;;  %v1441_v0 = vld [vmem:[#allocation2 + $0x24] sm:$0xf]  ;;  %v90_v51 = vsel %vm11236_vm3, 0, %v89_v46  ;;  %v92_v46 = vld [vmem:[#allocation2 + $0x78] sm:$0x1] }
  0xa5   :  { %v1654_v12 = vld [vmem:[#allocation2 + $0x10] sm:$0xf]  ;;  %1436 = vst [vmem:[#allocation2 + $0x18] sm:$0xf] %v1435_v9  ;;  %v1717_v14 = vld [vmem:[#allocation2 + $0x14] sm:$0x1]  ;;  %10247 = vmatmul.msk.bf16.gmra.mxu2 %vm2617_vm8, %v10895_v11 }
  0xa6   :  { %v1785_v17 = vshll.u32 %v1654_v12, 16  ;;  %v1789_v18 = vshrl.u32 %v1654_v12, 16  ;;  %v810_v19 = vshrl.u32 %v721_v10, 16  ;;  %v1795_v27 = vshll.u32 %v1717_v14, 16  ;;  %91 = vst [vmem:[#allocation2 + $0x6c] sm:$0x1] %v90_v51 }
  0xa7   :  { %v504_v23 = vpop.f32.mrf.mxu0  ;;  %v813_v31 = vshll.u32 %v721_v10, 16  ;;  %v93_v51 = vsel %vm11236_vm3, 0, %v92_v46  ;;  %v95_v46 = vld [vmem:[#allocation2 + $0x84] sm:$0x1] }
  0xa8   :  { %v1787_v24 = vrot.slane %v1785_v17, 5  ;;  %v1791_v26 = vrot.slane %v1789_v18, 4  ;;  %v812_v30 = vrot.slane %v810_v19, 7  ;;  %v505_v32 = vadd.f32 %v11297_v5, %v504_v23  ;;  %94 = vst [vmem:[#allocation2 + $0x78] sm:$0x1] %v93_v51 }
  0xa9   :  { %v1797_v45 = vrot.slane %v1795_v27, 5  ;;  %v96_v51 = vsel %vm11236_vm3, 0, %v95_v46 }
  0xaa   :  { %v1792_v35 = vor.u32 %v1791_v26, %v1787_v24  ;;  %v815_v38 = vor.u32 %v813_v31, %v812_v30  ;;  %v817_v39 = vrot.slane %v812_v30, 4  ;;  %v658_v41 = vmax.f32 %v505_v32, 0.0  ;;  %10063 = vmatmul.msk.bf16.gmra.mxu0 %vm388_vm0, %v354_v22  ;;  %97 = vst [vmem:[#allocation2 + $0x84] sm:$0x1] %v96_v51 }
  0xab   :  { %v1788_v42 = vsel %vm11282_vm11, %v1783_v34, %v1787_v24  ;;  %v355_v22 = vpack.c.bf16 %v303_v7, %v302_v6  ;;  %v304_v6 = vld [vmem:[#allocation3 + $0xc0] sm:$0xff]  ;;  %v305_v7 = vld [vmem:[#allocation3 + $0xc8] sm:$0xff] }
  0xac   :  { %v1793_v43 = vrot.slane %v1792_v35, 4  ;;  %v816_v47 = vsel %vm11330_vm5, %v808_v37, %v815_v38  ;;  %v1439_v48 = vsel %vm11236_vm3, %v817_v39, %v1438_v33  ;;  %v722_v49 = vpack.c.bf16 %v658_v41, %v658_v41  ;;  %v1655_v50 = vld [vmem:[#allocation2 + $0x18] sm:$0xf]  ;;  %v1445_v33 = vld [vmem:[#allocation2 + $0x2c] sm:$0x1] }
  0xad   :  { %1437 = vst.msk [vmem:[#allocation2 + $0x1c] sm:$0xf] %vm44_vm4, %v816_v47  ;;  %v1800_v53 = vshrl.u32 %v1655_v50, 16  ;;  %v1803_v54 = vshll.u32 %v1655_v50, 16  ;;  %v2523_v57 = vunpack.c.l.b16 %v1788_v42 }
  0xae   :  { %v1798_v52 = vsel %vm11282_vm11, %v1793_v43, %v1797_v45  ;;  %1440 = vst [vmem:[#allocation2 + $0x20] sm:$0x1] %v1439_v48  ;;  %v819_v55 = vshrl.u32 %v722_v49, 16  ;;  %v822_v61 = vshll.u32 %v722_v49, 16 }
  0xaf   :  { %v2524_v58 = vunpack.c.l.b16 %v1798_v52  ;;  %v506_v59 = vpop.f32.mrf.mxu0  ;;  %v1802_v1 = vrot.slane %v1800_v53, 4  ;;  %v1805_v2 = vrot.slane %v1803_v54, 5 }
  0xb0   :  { %v821_v60 = vrot.slane %v819_v55, 7  ;;  %v507_v62 = vadd.f32 %v11297_v5, %v506_v59 }
  0xb1   :  { %v2586_v63 = vpack.c.b16 %v2524_v58, %v2523_v57  ;;  %v1806_v16 = vor.u32 %v1805_v2, %v1802_v1 }
  0xb2   :  { %v824_v3 = vor.u32 %v822_v61, %v821_v60  ;;  %v659_v4 = vmax.f32 %v507_v62, 0.0  ;;  %v825_v37 = vrot.slane %v821_v60, 4 }
  0xb3   :  { %10087 = vmatmul.msk.bf16.gmra.mxu1 %vm2617_vm8, %v2586_v63  ;;  %v1807_v34 = vrot.slane %v1806_v16, 4 }
  0xb4   :  { %v1442_v9 = vsel %vm11309_vm14, %v824_v3, %v1441_v0  ;;  %v723_v10 = vpack.c.bf16 %v659_v4, %v659_v4  ;;  %v10896_v11 = vld [vmem:[#allocation2 + $0x18] sm:$0xff]  ;;  %v1448_v0 = vld [vmem:[#allocation2 + $0x30] sm:$0xf] }
  0xb5   :  { %v1656_v12 = vld [vmem:[#allocation2 + $0x1c] sm:$0xf]  ;;  %1443 = vst [vmem:[#allocation2 + $0x24] sm:$0xf] %v1442_v9  ;;  %v1718_v14 = vld [vmem:[#allocation2 + $0x20] sm:$0x1]  ;;  %10248 = vmatmul.msk.bf16.gmra.mxu2 %vm2617_vm8, %v10896_v11 }
  0xb6   :  { %v1809_v17 = vshll.u32 %v1656_v12, 16  ;;  %v1813_v18 = vshrl.u32 %v1656_v12, 16  ;;  %v827_v19 = vshrl.u32 %v723_v10, 16  ;;  %v1819_v27 = vshll.u32 %v1718_v14, 16 }
  0xb7   :  { %v509_v23 = vpop.f32.mrf.mxu0  ;;  %v830_v31 = vshll.u32 %v723_v10, 16 }
  0xb8   :  { %v1811_v24 = vrot.slane %v1809_v17, 5  ;;  %v1815_v26 = vrot.slane %v1813_v18, 4  ;;  %v829_v30 = vrot.slane %v827_v19, 7  ;;  %v510_v32 = vadd.f32 %v11297_v5, %v509_v23 }
  0xb9   :  { %v1821_v45 = vrot.slane %v1819_v27, 5 }
  0xba   :  { %v1816_v35 = vor.u32 %v1815_v26, %v1811_v24  ;;  %v832_v38 = vor.u32 %v830_v31, %v829_v30  ;;  %v834_v39 = vrot.slane %v829_v30, 4  ;;  %v660_v41 = vmax.f32 %v510_v32, 0.0  ;;  %10064 = vmatmul.msk.bf16.gmra.mxu0 %vm388_vm0, %v355_v22 }
  0xbb   :  { %v1812_v42 = vsel %vm11282_vm11, %v1807_v34, %v1811_v24  ;;  %v356_v22 = vpack.c.bf16 %v305_v7, %v304_v6  ;;  %v306_v6 = vld [vmem:[#allocation3 + $0xd0] sm:$0xff]  ;;  %v307_v7 = vld [vmem:[#allocation3 + $0xd8] sm:$0xff] }
  0xbc   :  { %v1817_v43 = vrot.slane %v1816_v35, 4  ;;  %v833_v47 = vsel %vm11330_vm5, %v825_v37, %v832_v38  ;;  %v1446_v48 = vsel %vm11236_vm3, %v834_v39, %v1445_v33  ;;  %v724_v49 = vpack.c.bf16 %v660_v41, %v660_v41  ;;  %v1657_v50 = vld [vmem:[#allocation2 + $0x24] sm:$0xf]  ;;  %v1452_v33 = vld [vmem:[#allocation2 + $0x38] sm:$0x1] }
  0xbd   :  { %1444 = vst.msk [vmem:[#allocation2 + $0x28] sm:$0xf] %vm44_vm4, %v833_v47  ;;  %v1824_v53 = vshrl.u32 %v1657_v50, 16  ;;  %v1827_v54 = vshll.u32 %v1657_v50, 16  ;;  %v2525_v57 = vunpack.c.l.b16 %v1812_v42 }
  0xbe   :  { %v1822_v52 = vsel %vm11282_vm11, %v1817_v43, %v1821_v45  ;;  %1447 = vst [vmem:[#allocation2 + $0x2c] sm:$0x1] %v1446_v48  ;;  %v836_v55 = vshrl.u32 %v724_v49, 16  ;;  %v839_v61 = vshll.u32 %v724_v49, 16 }
  0xbf   :  { %v2526_v58 = vunpack.c.l.b16 %v1822_v52  ;;  %v511_v59 = vpop.f32.mrf.mxu0  ;;  %v1826_v1 = vrot.slane %v1824_v53, 4  ;;  %v1829_v2 = vrot.slane %v1827_v54, 5 }
  0xc0   :  { %v838_v60 = vrot.slane %v836_v55, 7  ;;  %v512_v62 = vadd.f32 %v11297_v5, %v511_v59 }
  0xc1   :  { %v2587_v63 = vpack.c.b16 %v2526_v58, %v2525_v57  ;;  %v1830_v16 = vor.u32 %v1829_v2, %v1826_v1 }
  0xc2   :  { %v841_v3 = vor.u32 %v839_v61, %v838_v60  ;;  %v661_v4 = vmax.f32 %v512_v62, 0.0  ;;  %v842_v37 = vrot.slane %v838_v60, 4 }
  0xc3   :  { %10088 = vmatmul.msk.bf16.gmra.mxu1 %vm2617_vm8, %v2587_v63  ;;  %v1831_v34 = vrot.slane %v1830_v16, 4 }
  0xc4   :  { %v1449_v9 = vsel %vm11309_vm14, %v841_v3, %v1448_v0  ;;  %v725_v10 = vpack.c.bf16 %v661_v4, %v661_v4  ;;  %v10897_v11 = vld [vmem:[#allocation2 + $0x24] sm:$0xff]  ;;  %v1455_v0 = vld [vmem:[#allocation2 + $0x3c] sm:$0xf] }
  0xc5   :  { %v1658_v12 = vld [vmem:[#allocation2 + $0x28] sm:$0xf]  ;;  %1450 = vst [vmem:[#allocation2 + $0x30] sm:$0xf] %v1449_v9  ;;  %v1719_v14 = vld [vmem:[#allocation2 + $0x2c] sm:$0x1]  ;;  %10249 = vmatmul.msk.bf16.gmra.mxu2 %vm2617_vm8, %v10897_v11 }
  0xc6   :  { %v1833_v17 = vshll.u32 %v1658_v12, 16  ;;  %v1837_v18 = vshrl.u32 %v1658_v12, 16  ;;  %v844_v19 = vshrl.u32 %v725_v10, 16  ;;  %v1843_v27 = vshll.u32 %v1719_v14, 16 }
  0xc7   :  { %v514_v23 = vpop.f32.mrf.mxu0  ;;  %v847_v31 = vshll.u32 %v725_v10, 16 }
  0xc8   :  { %v1835_v24 = vrot.slane %v1833_v17, 5  ;;  %v1839_v26 = vrot.slane %v1837_v18, 4  ;;  %v846_v30 = vrot.slane %v844_v19, 7  ;;  %v515_v32 = vadd.f32 %v11297_v5, %v514_v23 }
  0xc9   :  { %v1845_v45 = vrot.slane %v1843_v27, 5 }
  0xca   :  { %v1840_v35 = vor.u32 %v1839_v26, %v1835_v24  ;;  %v849_v38 = vor.u32 %v847_v31, %v846_v30  ;;  %v851_v39 = vrot.slane %v846_v30, 4  ;;  %v662_v41 = vmax.f32 %v515_v32, 0.0  ;;  %10065 = vmatmul.msk.bf16.gmra.mxu0 %vm388_vm0, %v356_v22 }
  0xcb   :  { %v1836_v42 = vsel %vm11282_vm11, %v1831_v34, %v1835_v24  ;;  %v357_v22 = vpack.c.bf16 %v307_v7, %v306_v6  ;;  %v308_v6 = vld [vmem:[#allocation3 + $0xe0] sm:$0xff]  ;;  %v309_v7 = vld [vmem:[#allocation3 + $0xe8] sm:$0xff] }
  0xcc   :  { %v1841_v43 = vrot.slane %v1840_v35, 4  ;;  %v850_v47 = vsel %vm11330_vm5, %v842_v37, %v849_v38  ;;  %v1453_v48 = vsel %vm11236_vm3, %v851_v39, %v1452_v33  ;;  %v726_v49 = vpack.c.bf16 %v662_v41, %v662_v41  ;;  %v1659_v50 = vld [vmem:[#allocation2 + $0x30] sm:$0xf]  ;;  %v1459_v33 = vld [vmem:[#allocation2 + $0x44] sm:$0x1] }
  0xcd   :  { %1451 = vst.msk [vmem:[#allocation2 + $0x34] sm:$0xf] %vm44_vm4, %v850_v47  ;;  %v1848_v53 = vshrl.u32 %v1659_v50, 16  ;;  %v1851_v54 = vshll.u32 %v1659_v50, 16  ;;  %v2527_v57 = vunpack.c.l.b16 %v1836_v42 }
  0xce   :  { %v1846_v52 = vsel %vm11282_vm11, %v1841_v43, %v1845_v45  ;;  %1454 = vst [vmem:[#allocation2 + $0x38] sm:$0x1] %v1453_v48  ;;  %v853_v55 = vshrl.u32 %v726_v49, 16  ;;  %v856_v61 = vshll.u32 %v726_v49, 16 }
  0xcf   :  { %v2528_v58 = vunpack.c.l.b16 %v1846_v52  ;;  %v516_v59 = vpop.f32.mrf.mxu0  ;;  %v1850_v1 = vrot.slane %v1848_v53, 4  ;;  %v1853_v2 = vrot.slane %v1851_v54, 5 }
  0xd0   :  { %v855_v60 = vrot.slane %v853_v55, 7  ;;  %v517_v62 = vadd.f32 %v11297_v5, %v516_v59 }
  0xd1   :  { %v2588_v63 = vpack.c.b16 %v2528_v58, %v2527_v57  ;;  %v1854_v16 = vor.u32 %v1853_v2, %v1850_v1 }
  0xd2   :  { %v858_v3 = vor.u32 %v856_v61, %v855_v60  ;;  %v663_v4 = vmax.f32 %v517_v62, 0.0  ;;  %v859_v37 = vrot.slane %v855_v60, 4 }
  0xd3   :  { %10089 = vmatmul.msk.bf16.gmra.mxu1 %vm2617_vm8, %v2588_v63  ;;  %v1855_v34 = vrot.slane %v1854_v16, 4 }
  0xd4   :  { %v1456_v9 = vsel %vm11309_vm14, %v858_v3, %v1455_v0  ;;  %v727_v10 = vpack.c.bf16 %v663_v4, %v663_v4  ;;  %v10898_v11 = vld [vmem:[#allocation2 + $0x30] sm:$0xff]  ;;  %v1462_v0 = vld [vmem:[#allocation2 + $0x48] sm:$0xf] }
  0xd5   :  { %v1660_v12 = vld [vmem:[#allocation2 + $0x34] sm:$0xf]  ;;  %1457 = vst [vmem:[#allocation2 + $0x3c] sm:$0xf] %v1456_v9  ;;  %v1720_v14 = vld [vmem:[#allocation2 + $0x38] sm:$0x1]  ;;  %10250 = vmatmul.msk.bf16.gmra.mxu2 %vm2617_vm8, %v10898_v11 }
  0xd6   :  { %v1857_v17 = vshll.u32 %v1660_v12, 16  ;;  %v1861_v18 = vshrl.u32 %v1660_v12, 16  ;;  %v861_v19 = vshrl.u32 %v727_v10, 16  ;;  %v1867_v27 = vshll.u32 %v1720_v14, 16 }
  0xd7   :  { %v519_v23 = vpop.f32.mrf.mxu0  ;;  %v864_v31 = vshll.u32 %v727_v10, 16 }
  0xd8   :  { %v1859_v24 = vrot.slane %v1857_v17, 5  ;;  %v1863_v26 = vrot.slane %v1861_v18, 4  ;;  %v863_v30 = vrot.slane %v861_v19, 7  ;;  %v520_v32 = vadd.f32 %v11297_v5, %v519_v23 }
  0xd9   :  { %v1869_v45 = vrot.slane %v1867_v27, 5 }
  0xda   :  { %v1864_v35 = vor.u32 %v1863_v26, %v1859_v24  ;;  %v866_v38 = vor.u32 %v864_v31, %v863_v30  ;;  %v868_v39 = vrot.slane %v863_v30, 4  ;;  %v664_v41 = vmax.f32 %v520_v32, 0.0  ;;  %10066 = vmatmul.msk.bf16.gmra.mxu0 %vm388_vm0, %v357_v22 }
  0xdb   :  { %v1860_v42 = vsel %vm11282_vm11, %v1855_v34, %v1859_v24  ;;  %v358_v22 = vpack.c.bf16 %v309_v7, %v308_v6  ;;  %v310_v6 = vld [vmem:[#allocation3 + $0xf0] sm:$0xff]  ;;  %v311_v7 = vld [vmem:[#allocation3 + $0xf8] sm:$0xff] }
  0xdc   :  { %v1865_v43 = vrot.slane %v1864_v35, 4  ;;  %v867_v47 = vsel %vm11330_vm5, %v859_v37, %v866_v38  ;;  %v1460_v48 = vsel %vm11236_vm3, %v868_v39, %v1459_v33  ;;  %v728_v49 = vpack.c.bf16 %v664_v41, %v664_v41  ;;  %v1661_v50 = vld [vmem:[#allocation2 + $0x3c] sm:$0xf]  ;;  %v1466_v33 = vld [vmem:[#allocation2 + $0x50] sm:$0x1] }
  0xdd   :  { %1458 = vst.msk [vmem:[#allocation2 + $0x40] sm:$0xf] %vm44_vm4, %v867_v47  ;;  %v1872_v53 = vshrl.u32 %v1661_v50, 16  ;;  %v1875_v54 = vshll.u32 %v1661_v50, 16  ;;  %v2529_v57 = vunpack.c.l.b16 %v1860_v42 }
  0xde   :  { %v1870_v52 = vsel %vm11282_vm11, %v1865_v43, %v1869_v45  ;;  %1461 = vst [vmem:[#allocation2 + $0x44] sm:$0x1] %v1460_v48  ;;  %v870_v55 = vshrl.u32 %v728_v49, 16  ;;  %v873_v61 = vshll.u32 %v728_v49, 16 }
  0xdf   :  { %v2530_v58 = vunpack.c.l.b16 %v1870_v52  ;;  %v521_v59 = vpop.f32.mrf.mxu0  ;;  %v1874_v1 = vrot.slane %v1872_v53, 4  ;;  %v1877_v2 = vrot.slane %v1875_v54, 5 }
  0xe0   :  { %v872_v60 = vrot.slane %v870_v55, 7  ;;  %v522_v62 = vadd.f32 %v11297_v5, %v521_v59 }
  0xe1   :  { %v2589_v63 = vpack.c.b16 %v2530_v58, %v2529_v57  ;;  %v1878_v16 = vor.u32 %v1877_v2, %v1874_v1 }
  0xe2   :  { %v875_v3 = vor.u32 %v873_v61, %v872_v60  ;;  %v665_v4 = vmax.f32 %v522_v62, 0.0  ;;  %v876_v37 = vrot.slane %v872_v60, 4 }
  0xe3   :  { %10090 = vmatmul.msk.bf16.gmra.mxu1 %vm2617_vm8, %v2589_v63  ;;  %v1879_v34 = vrot.slane %v1878_v16, 4 }
  0xe4   :  { %v1463_v9 = vsel %vm11309_vm14, %v875_v3, %v1462_v0  ;;  %v729_v10 = vpack.c.bf16 %v665_v4, %v665_v4  ;;  %v10899_v11 = vld [vmem:[#allocation2 + $0x3c] sm:$0xff]  ;;  %v1469_v0 = vld [vmem:[#allocation2 + $0x54] sm:$0xf] }
  0xe5   :  { %v1662_v12 = vld [vmem:[#allocation2 + $0x40] sm:$0xf]  ;;  %1464 = vst [vmem:[#allocation2 + $0x48] sm:$0xf] %v1463_v9  ;;  %v1721_v14 = vld [vmem:[#allocation2 + $0x44] sm:$0x1]  ;;  %10251 = vmatmul.msk.bf16.gmra.mxu2 %vm2617_vm8, %v10899_v11 }
  0xe6   :  { %v1881_v17 = vshll.u32 %v1662_v12, 16  ;;  %v1885_v18 = vshrl.u32 %v1662_v12, 16  ;;  %v878_v19 = vshrl.u32 %v729_v10, 16  ;;  %v1891_v27 = vshll.u32 %v1721_v14, 16 }
  0xe7   :  { %v524_v23 = vpop.f32.mrf.mxu0  ;;  %v881_v31 = vshll.u32 %v729_v10, 16 }
  0xe8   :  { %v1883_v24 = vrot.slane %v1881_v17, 5  ;;  %v1887_v26 = vrot.slane %v1885_v18, 4  ;;  %v880_v30 = vrot.slane %v878_v19, 7  ;;  %v525_v32 = vadd.f32 %v11297_v5, %v524_v23 }
  0xe9   :  { %v1893_v45 = vrot.slane %v1891_v27, 5 }
  0xea   :  { %v1888_v35 = vor.u32 %v1887_v26, %v1883_v24  ;;  %v883_v38 = vor.u32 %v881_v31, %v880_v30  ;;  %v885_v39 = vrot.slane %v880_v30, 4  ;;  %v666_v41 = vmax.f32 %v525_v32, 0.0  ;;  %10067 = vmatmul.msk.bf16.gmra.mxu0 %vm388_vm0, %v358_v22 }
  0xeb   :  { %v1884_v42 = vsel %vm11282_vm11, %v1879_v34, %v1883_v24  ;;  %v359_v22 = vpack.c.bf16 %v311_v7, %v310_v6  ;;  %v312_v6 = vld [vmem:[#allocation3 + $0x100] sm:$0xff]  ;;  %v313_v7 = vld [vmem:[#allocation3 + $0x108] sm:$0xff] }
  0xec   :  { %v1889_v43 = vrot.slane %v1888_v35, 4  ;;  %v884_v47 = vsel %vm11330_vm5, %v876_v37, %v883_v38  ;;  %v1467_v48 = vsel %vm11236_vm3, %v885_v39, %v1466_v33  ;;  %v730_v49 = vpack.c.bf16 %v666_v41, %v666_v41  ;;  %v1663_v50 = vld [vmem:[#allocation2 + $0x48] sm:$0xf]  ;;  %v1473_v33 = vld [vmem:[#allocation2 + $0x5c] sm:$0x1] }
  0xed   :  { %1465 = vst.msk [vmem:[#allocation2 + $0x4c] sm:$0xf] %vm44_vm4, %v884_v47  ;;  %v1896_v53 = vshrl.u32 %v1663_v50, 16  ;;  %v1899_v54 = vshll.u32 %v1663_v50, 16  ;;  %v2531_v57 = vunpack.c.l.b16 %v1884_v42 }
  0xee   :  { %v1894_v52 = vsel %vm11282_vm11, %v1889_v43, %v1893_v45  ;;  %1468 = vst [vmem:[#allocation2 + $0x50] sm:$0x1] %v1467_v48  ;;  %v887_v55 = vshrl.u32 %v730_v49, 16  ;;  %v890_v61 = vshll.u32 %v730_v49, 16 }
  0xef   :  { %v2532_v58 = vunpack.c.l.b16 %v1894_v52  ;;  %v526_v59 = vpop.f32.mrf.mxu0  ;;  %v1898_v1 = vrot.slane %v1896_v53, 4  ;;  %v1901_v2 = vrot.slane %v1899_v54, 5 }
  0xf0   :  { %v889_v60 = vrot.slane %v887_v55, 7  ;;  %v527_v62 = vadd.f32 %v11297_v5, %v526_v59 }
  0xf1   :  { %v2590_v63 = vpack.c.b16 %v2532_v58, %v2531_v57  ;;  %v1902_v16 = vor.u32 %v1901_v2, %v1898_v1 }
  0xf2   :  { %v892_v3 = vor.u32 %v890_v61, %v889_v60  ;;  %v667_v4 = vmax.f32 %v527_v62, 0.0  ;;  %v893_v37 = vrot.slane %v889_v60, 4 }
  0xf3   :  { %10091 = vmatmul.msk.bf16.gmra.mxu1 %vm2617_vm8, %v2590_v63  ;;  %v1903_v34 = vrot.slane %v1902_v16, 4 }
  0xf4   :  { %v1470_v9 = vsel %vm11309_vm14, %v892_v3, %v1469_v0  ;;  %v731_v10 = vpack.c.bf16 %v667_v4, %v667_v4  ;;  %v10900_v11 = vld [vmem:[#allocation2 + $0x48] sm:$0xff]  ;;  %v1476_v0 = vld [vmem:[#allocation2 + $0x60] sm:$0xf] }
  0xf5   :  { %v1664_v12 = vld [vmem:[#allocation2 + $0x4c] sm:$0xf]  ;;  %1471 = vst [vmem:[#allocation2 + $0x54] sm:$0xf] %v1470_v9  ;;  %v1722_v14 = vld [vmem:[#allocation2 + $0x50] sm:$0x1]  ;;  %10252 = vmatmul.msk.bf16.gmra.mxu2 %vm2617_vm8, %v10900_v11 }
  0xf6   :  { %v1905_v17 = vshll.u32 %v1664_v12, 16  ;;  %v1909_v18 = vshrl.u32 %v1664_v12, 16  ;;  %v895_v19 = vshrl.u32 %v731_v10, 16  ;;  %v1915_v27 = vshll.u32 %v1722_v14, 16 }
  0xf7   :  { %v529_v23 = vpop.f32.mrf.mxu0  ;;  %v898_v31 = vshll.u32 %v731_v10, 16 }
  0xf8   :  { %v1907_v24 = vrot.slane %v1905_v17, 5  ;;  %v1911_v26 = vrot.slane %v1909_v18, 4  ;;  %v897_v30 = vrot.slane %v895_v19, 7  ;;  %v530_v32 = vadd.f32 %v11297_v5, %v529_v23 }
  0xf9   :  { %v1917_v45 = vrot.slane %v1915_v27, 5 }
  0xfa   :  { %v1912_v35 = vor.u32 %v1911_v26, %v1907_v24  ;;  %v900_v38 = vor.u32 %v898_v31, %v897_v30  ;;  %v902_v39 = vrot.slane %v897_v30, 4  ;;  %v668_v41 = vmax.f32 %v530_v32, 0.0  ;;  %10068 = vmatmul.msk.bf16.gmra.mxu0 %vm388_vm0, %v359_v22 }
  0xfb   :  { %v1908_v42 = vsel %vm11282_vm11, %v1903_v34, %v1907_v24  ;;  %v360_v22 = vpack.c.bf16 %v313_v7, %v312_v6 }
  0xfc   :  { %v1913_v43 = vrot.slane %v1912_v35, 4  ;;  %v901_v47 = vsel %vm11330_vm5, %v893_v37, %v900_v38  ;;  %v1474_v48 = vsel %vm11236_vm3, %v902_v39, %v1473_v33  ;;  %v732_v49 = vpack.c.bf16 %v668_v41, %v668_v41  ;;  %v1665_v50 = vld [vmem:[#allocation2 + $0x54] sm:$0xf]  ;;  %v1480_v33 = vld [vmem:[#allocation2 + $0x68] sm:$0x1] }
  0xfd   :  { %1472 = vst.msk [vmem:[#allocation2 + $0x58] sm:$0xf] %vm44_vm4, %v901_v47  ;;  %v1920_v53 = vshrl.u32 %v1665_v50, 16  ;;  %v1923_v54 = vshll.u32 %v1665_v50, 16  ;;  %v2533_v57 = vunpack.c.l.b16 %v1908_v42 }
  0xfe   :  { %v1918_v52 = vsel %vm11282_vm11, %v1913_v43, %v1917_v45  ;;  %1475 = vst [vmem:[#allocation2 + $0x5c] sm:$0x1] %v1474_v48  ;;  %v904_v55 = vshrl.u32 %v732_v49, 16  ;;  %v907_v61 = vshll.u32 %v732_v49, 16 }
  0xff   :  { %v2534_v58 = vunpack.c.l.b16 %v1918_v52  ;;  %v531_v59 = vpop.f32.mrf.mxu0  ;;  %v1922_v1 = vrot.slane %v1920_v53, 4  ;;  %v1925_v2 = vrot.slane %v1923_v54, 5  ;;  %v3155_v53 = vpop.f32.mrf.mxu2 }
 0x100   :  { %v906_v60 = vrot.slane %v904_v55, 7  ;;  %v532_v62 = vadd.f32 %v11297_v5, %v531_v59  ;;  %v2727_v54 = vpop.f32.mrf.mxu1 }
 0x101   :  { %v2591_v63 = vpack.c.b16 %v2534_v58, %v2533_v57  ;;  %v1926_v16 = vor.u32 %v1925_v2, %v1922_v1 }
 0x102   :  { %v909_v3 = vor.u32 %v907_v61, %v906_v60  ;;  %v669_v4 = vmax.f32 %v532_v62, 0.0  ;;  %v910_v37 = vrot.slane %v906_v60, 4  ;;  %v11481_v61 = vadd.f32 %v3155_v53, %v2727_v54 }
 0x103   :  { %10092 = vmatmul.msk.bf16.gmra.mxu1 %vm2617_vm8, %v2591_v63  ;;  %v1927_v34 = vrot.slane %v1926_v16, 4 }
 0x104   :  { %v1477_v9 = vsel %vm11309_vm14, %v909_v3, %v1476_v0  ;;  %v733_v10 = vpack.c.bf16 %v669_v4, %v669_v4  ;;  %v10901_v11 = vld [vmem:[#allocation2 + $0x54] sm:$0xff]  ;;  %v1483_v3 = vld [vmem:[#allocation2 + $0x6c] sm:$0xf] }
 0x105   :  { %v1666_v12 = vld [vmem:[#allocation2 + $0x58] sm:$0xf]  ;;  %1478 = vst [vmem:[#allocation2 + $0x60] sm:$0xf] %v1477_v9  ;;  %v1723_v14 = vld [vmem:[#allocation2 + $0x5c] sm:$0x1]  ;;  %10253 = vmatmul.msk.bf16.gmra.mxu2 %vm2617_vm8, %v10901_v11 }
 0x106   :  { %v1929_v17 = vshll.u32 %v1666_v12, 16  ;;  %v1933_v18 = vshrl.u32 %v1666_v12, 16  ;;  %v912_v19 = vshrl.u32 %v733_v10, 16  ;;  %v1939_v27 = vshll.u32 %v1723_v14, 16  ;;  %v314_v9 = vld [vmem:[#allocation3 + $0x110] sm:$0xff] }
 0x107   :  { %v534_v23 = vpop.f32.mrf.mxu0  ;;  %v915_v31 = vshll.u32 %v733_v10, 16  ;;  %v315_v10 = vld [vmem:[#allocation3 + $0x118] sm:$0xff] }
 0x108   :  { %v1931_v24 = vrot.slane %v1929_v17, 5  ;;  %v1935_v26 = vrot.slane %v1933_v18, 4  ;;  %v914_v30 = vrot.slane %v912_v19, 7  ;;  %v535_v32 = vadd.f32 %v11297_v5, %v534_v23  ;;  %v205_v11 = vld [vmem:[#allocation2 + $0x8c] sm:$0x1] }
 0x109   :  { %v1941_v45 = vrot.slane %v1939_v27, 5 }
 0x10a   :  { %v1936_v35 = vor.u32 %v1935_v26, %v1931_v24  ;;  %v917_v38 = vor.u32 %v915_v31, %v914_v30  ;;  %v919_v39 = vrot.slane %v914_v30, 4  ;;  %v670_v41 = vmax.f32 %v535_v32, 0.0  ;;  %10069 = vmatmul.msk.bf16.gmra.mxu0 %vm388_vm0, %v360_v22 }
 0x10b   :  { %v1932_v42 = vsel %vm11282_vm11, %v1927_v34, %v1931_v24  ;;  %v361_v24 = vpack.c.bf16 %v315_v10, %v314_v9  ;;  %v11493_v34 = vld [vmem:[%s15109_s2] ss:$0 sm:$0xff] }
 0x10c   :  { %v1937_v43 = vrot.slane %v1936_v35, 4  ;;  %v918_v47 = vsel %vm11330_vm5, %v910_v37, %v917_v38  ;;  %v1481_v48 = vsel %vm11236_vm3, %v919_v39, %v1480_v33  ;;  %v734_v49 = vpack.c.bf16 %v670_v41, %v670_v41  ;;  %v1667_v50 = vld [vmem:[#allocation2 + $0x60] sm:$0xf]  ;;  %v1487_v37 = vld [vmem:[#allocation2 + $0x74] sm:$0x1] }
 0x10d   :  { %1479 = vst.msk [vmem:[#allocation2 + $0x64] sm:$0xf] %vm44_vm4, %v918_v47  ;;  %v1944_v55 = vshrl.u32 %v1667_v50, 16  ;;  %v1947_v57 = vshll.u32 %v1667_v50, 16  ;;  %v2535_v59 = vunpack.c.l.b16 %v1932_v42 }
 0x10e   :  { %v1942_v52 = vsel %vm11282_vm11, %v1937_v43, %v1941_v45  ;;  %1482 = vst [vmem:[#allocation2 + $0x68] sm:$0x1] %v1481_v48  ;;  %v921_v58 = vshrl.u32 %v734_v49, 16  ;;  %v924_v0 = vshll.u32 %v734_v49, 16  ;;  %v98_v49 = vld [vmem:[#allocation2 + $0x90] sm:$0x1] }
 0x10f   :  { %v2536_v60 = vunpack.c.l.b16 %v1942_v52  ;;  %v536_v62 = vpop.f32.mrf.mxu0  ;;  %v1946_v4 = vrot.slane %v1944_v55, 4  ;;  %v1949_v6 = vrot.slane %v1947_v57, 5  ;;  %v99_v54 = vsel %vm11236_vm3, 0, %v98_v49 }
 0x110   :  { %v923_v63 = vrot.slane %v921_v58, 7  ;;  %v537_v1 = vadd.f32 %v11297_v5, %v536_v62  ;;  %v206_v5 = vsel %vm11256_vm6, 0, %v205_v11  ;;  %100 = vst [vmem:[#allocation2 + $0x90] sm:$0x1] %v99_v54  ;;  %v316_v11 = vld [vmem:[#allocation3 + $0x120] sm:$0xff] }
 0x111   :  { %v2592_v2 = vpack.c.b16 %v2536_v60, %v2535_v59  ;;  %v1950_v18 = vor.u32 %v1949_v6, %v1946_v4  ;;  %207 = vst [vmem:[#allocation2 + $0x8c] sm:$0x1] %v206_v5  ;;  %v1490_v6 = vld [vmem:[#allocation2 + $0x78] sm:$0xf] }
 0x112   :  { %v926_v7 = vor.u32 %v924_v0, %v923_v63  ;;  %v671_v8 = vmax.f32 %v537_v1, 0.0  ;;  %v927_v41 = vrot.slane %v923_v63, 4  ;;  %v11508_v0 = vpop.f32.mrf.mxu2 }
 0x113   :  { %10093 = vmatmul.msk.bf16.gmra.mxu1 %vm2617_vm8, %v2592_v2  ;;  %v1951_v38 = vrot.slane %v1950_v18, 4  ;;  %15139 = vst [vmem:[#allocation12_spill] sm:$0xff] %v11508_v0 }
 0x114   :  { %v1484_v12 = vsel %vm11309_vm14, %v926_v7, %v1483_v3  ;;  %v735_v13 = vpack.c.bf16 %v671_v8, %v671_v8  ;;  %v10902_v14 = vld [vmem:[#allocation2 + $0x60] sm:$0xff] }
 0x115   :  { %v1668_v16 = vld [vmem:[#allocation2 + $0x64] sm:$0xf]  ;;  %1485 = vst [vmem:[#allocation2 + $0x6c] sm:$0xf] %v1484_v12  ;;  %v1724_v17 = vld [vmem:[#allocation2 + $0x68] sm:$0x1]  ;;  %10254 = vmatmul.msk.bf16.gmra.mxu2 %vm2617_vm8, %v10902_v14 }
 0x116   :  { %v1953_v19 = vshll.u32 %v1668_v16, 16  ;;  %v1957_v22 = vshrl.u32 %v1668_v16, 16  ;;  %v929_v23 = vshrl.u32 %v735_v13, 16  ;;  %v1963_v31 = vshll.u32 %v1724_v17, 16  ;;  %v317_v12 = vld [vmem:[#allocation3 + $0x128] sm:$0xff] }
 0x117   :  { %v539_v26 = vpop.f32.mrf.mxu0  ;;  %v932_v33 = vshll.u32 %v735_v13, 16  ;;  %v208_v13 = vld [vmem:[#allocation2 + $0x98] sm:$0x1] }
 0x118   :  { %v1955_v27 = vrot.slane %v1953_v19, 5  ;;  %v1959_v30 = vrot.slane %v1957_v22, 4  ;;  %v931_v32 = vrot.slane %v929_v23, 7  ;;  %v540_v35 = vadd.f32 %v11493_v34, %v539_v26  ;;  %v11516_v19 = vpop.f32.mrf.mxu1 }
 0x119   :  { %v1965_v48 = vrot.slane %v1963_v31, 5  ;;  %v209_v18 = vsel %vm11256_vm6, 0, %v208_v13  ;;  %15140 = vst [vmem:[#allocation13_spill] sm:$0xff] %v11516_v19 }
 0x11a   :  { %v1960_v39 = vor.u32 %v1959_v30, %v1955_v27  ;;  %v934_v42 = vor.u32 %v932_v33, %v931_v32  ;;  %v936_v43 = vrot.slane %v931_v32, 4  ;;  %v672_v45 = vmax.f32 %v540_v35, 0.0  ;;  %10070 = vmatmul.msk.bf16.gmra.mxu0 %vm388_vm0, %v361_v24  ;;  %210 = vst [vmem:[#allocation2 + $0x98] sm:$0x1] %v209_v18  ;;  %v318_v18 = vld [vmem:[#allocation3 + $0x130] sm:$0xff] }
 0x11b   :  { %v1956_v46 = vsel %vm11282_vm11, %v1951_v38, %v1955_v27  ;;  %v362_v30 = vpack.c.bf16 %v317_v12, %v316_v11  ;;  %v1497_v12 = vld [vmem:[#allocation2 + $0x84] sm:$0xf] }
 0x11c   :  { %v1961_v47 = vrot.slane %v1960_v39, 4  ;;  %v935_v50 = vsel %vm11330_vm5, %v927_v41, %v934_v42  ;;  %v1488_v51 = vsel %vm11236_vm3, %v936_v43, %v1487_v37  ;;  %v736_v52 = vpack.c.bf16 %v672_v45, %v672_v45  ;;  %v1669_v53 = vld [vmem:[#allocation2 + $0x6c] sm:$0xf]  ;;  %v1494_v41 = vld [vmem:[#allocation2 + $0x80] sm:$0x1] }
 0x11d   :  { %1486 = vst.msk [vmem:[#allocation2 + $0x70] sm:$0xf] %vm44_vm4, %v935_v50  ;;  %v1968_v57 = vshrl.u32 %v1669_v53, 16  ;;  %v1971_v58 = vshll.u32 %v1669_v53, 16  ;;  %v2537_v60 = vunpack.c.l.b16 %v1956_v46  ;;  %v101_v53 = vld [vmem:[#allocation2 + $0x9c] sm:$0x1] }
 0x11e   :  { %v1966_v55 = vsel %vm11282_vm11, %v1961_v47, %v1965_v48  ;;  %1489 = vst [vmem:[#allocation2 + $0x74] sm:$0x1] %v1488_v51  ;;  %v938_v59 = vshrl.u32 %v736_v52, 16  ;;  %v941_v2 = vshll.u32 %v736_v52, 16 }
 0x11f   :  { %v2538_v62 = vunpack.c.l.b16 %v1966_v55  ;;  %v541_v63 = vpop.f32.mrf.mxu0  ;;  %v1970_v7 = vrot.slane %v1968_v57, 4  ;;  %v1973_v8 = vrot.slane %v1971_v58, 5 }
 0x120   :  { %v940_v1 = vrot.slane %v938_v59, 7  ;;  %v542_v3 = vadd.f32 %v11493_v34, %v541_v63  ;;  %v102_v59 = vsel %vm11236_vm3, 0, %v101_v53 }
 0x121   :  { %v2593_v4 = vpack.c.b16 %v2538_v62, %v2537_v60  ;;  %v1974_v23 = vor.u32 %v1973_v8, %v1970_v7  ;;  %103 = vst [vmem:[#allocation2 + $0x9c] sm:$0x1] %v102_v59 }
 0x122   :  { %v943_v9 = vor.u32 %v941_v2, %v940_v1  ;;  %v673_v10 = vmax.f32 %v542_v3, 0.0  ;;  %v944_v46 = vrot.slane %v940_v1, 4 }
 0x123   :  { %10094 = vmatmul.msk.bf16.gmra.mxu1 %vm2617_vm8, %v2593_v4  ;;  %v1975_v43 = vrot.slane %v1974_v23, 4  ;;  %v211_v23 = vld [vmem:[#allocation2 + $0xa4] sm:$0x1] }
 0x124   :  { %v1491_v14 = vsel %vm11309_vm14, %v943_v9, %v1490_v6  ;;  %v737_v16 = vpack.c.bf16 %v673_v10, %v673_v10  ;;  %v10903_v5 = vld [vmem:[#allocation2 + $0x6c] sm:$0xff] }
 0x125   :  { %v1670_v17 = vld [vmem:[#allocation2 + $0x70] sm:$0xf]  ;;  %1492 = vst [vmem:[#allocation2 + $0x78] sm:$0xf] %v1491_v14  ;;  %v1725_v22 = vld [vmem:[#allocation2 + $0x74] sm:$0x1]  ;;  %10255 = vmatmul.msk.bf16.gmra.mxu2 %vm2617_vm8, %v10903_v5 }
 0x126   :  { %v1977_v24 = vshll.u32 %v1670_v17, 16  ;;  %v1981_v26 = vshrl.u32 %v1670_v17, 16  ;;  %v946_v27 = vshrl.u32 %v737_v16, 16  ;;  %v1987_v35 = vshll.u32 %v1725_v22, 16  ;;  %v319_v22 = vld [vmem:[#allocation3 + $0x138] sm:$0xff] }
 0x127   :  { %v544_v31 = vpop.f32.mrf.mxu0  ;;  %v949_v38 = vshll.u32 %v737_v16, 16 }
 0x128   :  { %v1979_v32 = vrot.slane %v1977_v24, 5  ;;  %v1983_v33 = vrot.slane %v1981_v26, 4  ;;  %v948_v37 = vrot.slane %v946_v27, 7  ;;  %v545_v39 = vadd.f32 %v11493_v34, %v544_v31  ;;  %v3160_v42 = vpop.f32.mrf.mxu2 }
 0x129   :  { %v1989_v52 = vrot.slane %v1987_v35, 5  ;;  %v212_v31 = vsel %vm11256_vm6, 0, %v211_v23 }
 0x12a   :  { %v1984_v45 = vor.u32 %v1983_v33, %v1979_v32  ;;  %v951_v47 = vor.u32 %v949_v38, %v948_v37  ;;  %v953_v48 = vrot.slane %v948_v37, 4  ;;  %v674_v49 = vmax.f32 %v545_v39, 0.0  ;;  %10071 = vmatmul.msk.bf16.gmra.mxu0 %vm388_vm0, %v362_v30  ;;  %213 = vst [vmem:[#allocation2 + $0xa4] sm:$0x1] %v212_v31 }
 0x12b   :  { %v1980_v50 = vsel %vm11282_vm11, %v1975_v43, %v1979_v32  ;;  %v363_v39 = vpack.c.bf16 %v319_v22, %v318_v18 }
 0x12c   :  { %v1985_v51 = vrot.slane %v1984_v45, 4  ;;  %v952_v54 = vsel %vm11330_vm5, %v944_v46, %v951_v47  ;;  %v1495_v55 = vsel %vm11236_vm3, %v953_v48, %v1494_v41  ;;  %v738_v57 = vpack.c.bf16 %v674_v49, %v674_v49  ;;  %v1671_v58 = vld [vmem:[#allocation2 + $0x78] sm:$0xf] }
 0x12d   :  { %1493 = vst.msk [vmem:[#allocation2 + $0x7c] sm:$0xf] %vm44_vm4, %v952_v54  ;;  %v1992_v62 = vshrl.u32 %v1671_v58, 16  ;;  %v1995_v63 = vshll.u32 %v1671_v58, 16  ;;  %v2539_v2 = vunpack.c.l.b16 %v1980_v50 }
 0x12e   :  { %v1990_v60 = vsel %vm11282_vm11, %v1985_v51, %v1989_v52  ;;  %1496 = vst [vmem:[#allocation2 + $0x80] sm:$0x1] %v1495_v55  ;;  %v955_v1 = vshrl.u32 %v738_v57, 16  ;;  %v958_v4 = vshll.u32 %v738_v57, 16  ;;  %v1501_v51 = vld [vmem:[#allocation2 + $0x8c] sm:$0x1] }
 0x12f   :  { %v2540_v3 = vunpack.c.l.b16 %v1990_v60  ;;  %v546_v6 = vpop.f32.mrf.mxu0  ;;  %v1994_v14 = vrot.slane %v1992_v62, 4  ;;  %v1997_v16 = vrot.slane %v1995_v63, 5 }
 0x130   :  { %v2732_v7 = vpop.f32.mrf.mxu1  ;;  %v957_v8 = vrot.slane %v955_v1, 7  ;;  %v547_v9 = vadd.f32 %v11493_v34, %v546_v6  ;;  %v3162_v13 = vpop.f32.mrf.mxu2  ;;  %v104_v1 = vld [vmem:[#allocation2 + $0xa8] sm:$0x1] }
 0x131   :  { %v11533_v10 = vadd.f32 %v3160_v42, %v2732_v7  ;;  %v2594_v11 = vpack.c.b16 %v2540_v3, %v2539_v2  ;;  %v1998_v33 = vor.u32 %v1997_v16, %v1994_v14  ;;  %v105_v7 = vsel %vm11236_vm3, 0, %v104_v1  ;;  %v1508_v1 = vld [vmem:[#allocation2 + $0x98] sm:$0x1] }
 0x132   :  { %v960_v5 = vor.u32 %v958_v4, %v957_v8  ;;  %v675_v17 = vmax.f32 %v547_v9, 0.0  ;;  %v961_v55 = vrot.slane %v957_v8, 4  ;;  %106 = vst [vmem:[#allocation2 + $0xa8] sm:$0x1] %v105_v7 }
 0x133   :  { %10095 = vmatmul.msk.bf16.gmra.mxu1 %vm2617_vm8, %v2594_v11  ;;  %v1999_v53 = vrot.slane %v1998_v33, 4 }
 0x134   :  { %v1498_v24 = vsel %vm11309_vm14, %v960_v5, %v1497_v12  ;;  %v739_v26 = vpack.c.bf16 %v675_v17, %v675_v17  ;;  %v10904_v27 = vld [vmem:[#allocation2 + $0x78] sm:$0xff] }
 0x135   :  { %v1672_v30 = vld [vmem:[#allocation2 + $0x7c] sm:$0xf]  ;;  %1499 = vst [vmem:[#allocation2 + $0x84] sm:$0xf] %v1498_v24  ;;  %v1726_v32 = vld [vmem:[#allocation2 + $0x80] sm:$0x1]  ;;  %10256 = vmatmul.msk.bf16.gmra.mxu2 %vm2617_vm8, %v10904_v27 }
 0x136   :  { %v2001_v35 = vshll.u32 %v1672_v30, 16  ;;  %v2005_v37 = vshrl.u32 %v1672_v30, 16  ;;  %v963_v38 = vshrl.u32 %v739_v26, 16  ;;  %v2011_v46 = vshll.u32 %v1726_v32, 16 }
 0x137   :  { %v549_v41 = vpop.f32.mrf.mxu0  ;;  %v966_v48 = vshll.u32 %v739_v26, 16  ;;  %v1504_v26 = vld [vmem:[#allocation2 + $0x90] sm:$0xf] }
 0x138   :  { %v2734_v42 = vpop.f32.mrf.mxu1  ;;  %v2003_v43 = vrot.slane %v2001_v35, 5  ;;  %v2007_v45 = vrot.slane %v2005_v37, 4  ;;  %v965_v47 = vrot.slane %v963_v38, 7  ;;  %v550_v49 = vadd.f32 %v11493_v34, %v549_v41  ;;  %v3165_v52 = vpop.f32.mrf.mxu2  ;;  %v320_v35 = vld [vmem:[#allocation3 + $0x140] sm:$0xff]  ;;  %v321_v37 = vld [vmem:[#allocation3 + $0x148] sm:$0xff] }
 0x139   :  { %v11542_v50 = vadd.f32 %v3162_v13, %v2734_v42  ;;  %v2013_v63 = vrot.slane %v2011_v46, 5  ;;  %v214_v38 = vld [vmem:[#allocation2 + $0xb0] sm:$0x1] }
 0x13a   :  { %v2008_v54 = vor.u32 %v2007_v45, %v2003_v43  ;;  %v968_v57 = vor.u32 %v966_v48, %v965_v47  ;;  %v970_v58 = vrot.slane %v965_v47, 4  ;;  %v676_v59 = vmax.f32 %v550_v49, 0.0  ;;  %10072 = vmatmul.msk.bf16.gmra.mxu0 %vm388_vm0, %v363_v39 }
 0x13b   :  { %v2004_v60 = vsel %vm11282_vm11, %v1999_v53, %v2003_v43  ;;  %v215_v45 = vsel %vm11256_vm6, 0, %v214_v38 }
 0x13c   :  { %v2009_v62 = vrot.slane %v2008_v54, 4  ;;  %v969_v2 = vsel %vm11330_vm5, %v961_v55, %v968_v57  ;;  %v1502_v3 = vsel %vm11236_vm3, %v970_v58, %v1501_v51  ;;  %v740_v4 = vpack.c.bf16 %v676_v59, %v676_v59  ;;  %v1673_v6 = vld [vmem:[#allocation2 + $0x84] sm:$0xf]  ;;  %216 = vst [vmem:[#allocation2 + $0xb0] sm:$0x1] %v215_v45 }
 0x13d   :  { %1500 = vst.msk [vmem:[#allocation2 + $0x88] sm:$0xf] %vm44_vm4, %v969_v2  ;;  %v2016_v9 = vshrl.u32 %v1673_v6, 16  ;;  %v2019_v11 = vshll.u32 %v1673_v6, 16  ;;  %v2541_v13 = vunpack.c.l.b16 %v2004_v60 }
 0x13e   :  { %v2014_v8 = vsel %vm11282_vm11, %v2009_v62, %v2013_v63  ;;  %1503 = vst [vmem:[#allocation2 + $0x8c] sm:$0x1] %v1502_v3  ;;  %v972_v12 = vshrl.u32 %v740_v4, 16  ;;  %v975_v16 = vshll.u32 %v740_v4, 16 }
 0x13f   :  { %v2542_v14 = vunpack.c.l.b16 %v2014_v8  ;;  %v551_v5 = vpop.f32.mrf.mxu0  ;;  %v2018_v30 = vrot.slane %v2016_v9, 4  ;;  %v2021_v31 = vrot.slane %v2019_v11, 5 }
 0x140   :  { %v2737_v17 = vpop.f32.mrf.mxu1  ;;  %v974_v18 = vrot.slane %v972_v12, 7  ;;  %v552_v22 = vadd.f32 %v11493_v34, %v551_v5  ;;  %v3167_v27 = vpop.f32.mrf.mxu2 }
 0x141   :  { %v11557_v23 = vadd.f32 %v3165_v52, %v2737_v17  ;;  %v2595_v24 = vpack.c.b16 %v2542_v14, %v2541_v13  ;;  %v2022_v47 = vor.u32 %v2021_v31, %v2018_v30  ;;  %v364_v52 = vpack.c.bf16 %v321_v37, %v320_v35  ;;  %v107_v14 = vld [vmem:[#allocation2 + $0xb4] sm:$0x1] }
 0x142   :  { %v977_v32 = vor.u32 %v975_v16, %v974_v18  ;;  %v677_v33 = vmax.f32 %v552_v22, 0.0  ;;  %v978_v6 = vrot.slane %v974_v18, 4  ;;  %v108_v18 = vsel %vm11236_vm3, 0, %v107_v14 }
 0x143   :  { %10096 = vmatmul.msk.bf16.gmra.mxu1 %vm2617_vm8, %v2595_v24  ;;  %v2023_v3 = vrot.slane %v2022_v47, 4  ;;  %109 = vst [vmem:[#allocation2 + $0xb4] sm:$0x1] %v108_v18  ;;  %v1515_v18 = vld [vmem:[#allocation2 + $0xa4] sm:$0x1] }
 0x144   :  { %v1505_v39 = vsel %vm11309_vm14, %v977_v32, %v1504_v26  ;;  %v741_v41 = vpack.c.bf16 %v677_v33, %v677_v33  ;;  %v10905_v42 = vld [vmem:[#allocation2 + $0x84] sm:$0xff] }
 0x145   :  { %v1674_v43 = vld [vmem:[#allocation2 + $0x88] sm:$0xf]  ;;  %1506 = vst [vmem:[#allocation2 + $0x90] sm:$0xf] %v1505_v39  ;;  %v1727_v46 = vld [vmem:[#allocation2 + $0x8c] sm:$0x1]  ;;  %10257 = vmatmul.msk.bf16.gmra.mxu2 %vm2617_vm8, %v10905_v42 }
 0x146   :  { %v2025_v48 = vshll.u32 %v1674_v43, 16  ;;  %v2029_v49 = vshrl.u32 %v1674_v43, 16  ;;  %v980_v51 = vshrl.u32 %v741_v41, 16  ;;  %v2035_v58 = vshll.u32 %v1727_v46, 16  ;;  %v1511_v43 = vld [vmem:[#allocation2 + $0x9c] sm:$0xf] }
 0x147   :  { %v554_v53 = vpop.f32.mrf.mxu0  ;;  %v983_v60 = vshll.u32 %v741_v41, 16 }
 0x148   :  { %v2739_v54 = vpop.f32.mrf.mxu1  ;;  %v2027_v55 = vrot.slane %v2025_v48, 5  ;;  %v2031_v57 = vrot.slane %v2029_v49, 4  ;;  %v982_v59 = vrot.slane %v980_v51, 7  ;;  %v555_v62 = vadd.f32 %v11493_v34, %v554_v53  ;;  %v3170_v2 = vpop.f32.mrf.mxu2  ;;  %v322_v51 = vld [vmem:[#allocation3 + $0x150] sm:$0xff]  ;;  %v217_v53 = vld [vmem:[#allocation2 + $0xbc] sm:$0x1] }
 0x149   :  { %v11566_v63 = vadd.f32 %v3167_v27, %v2739_v54  ;;  %v2037_v13 = vrot.slane %v2035_v58, 5 }
 0x14a   :  { %v2032_v4 = vor.u32 %v2031_v57, %v2027_v55  ;;  %v985_v7 = vor.u32 %v983_v60, %v982_v59  ;;  %v987_v8 = vrot.slane %v982_v59, 4  ;;  %v678_v9 = vmax.f32 %v555_v62, 0.0  ;;  %10073 = vmatmul.msk.bf16.gmra.mxu0 %vm388_vm0, %v364_v52  ;;  %v323_v52 = vld [vmem:[#allocation3 + $0x158] sm:$0xff]  ;;  %v328_v60 = vld [vmem:[#allocation3 + $0x180] sm:$0xff] }
 0x14b   :  { %v2028_v11 = vsel %vm11282_vm11, %v2023_v3, %v2027_v55  ;;  %v218_v59 = vsel %vm11256_vm6, 0, %v217_v53 }
 0x14c   :  { %v2033_v12 = vrot.slane %v2032_v4, 4  ;;  %v986_v16 = vsel %vm11330_vm5, %v978_v6, %v985_v7  ;;  %v1509_v5 = vsel %vm11236_vm3, %v987_v8, %v1508_v1  ;;  %v742_v17 = vpack.c.bf16 %v678_v9, %v678_v9  ;;  %v1675_v22 = vld [vmem:[#allocation2 + $0x90] sm:$0xf]  ;;  %v329_v7 = vld [vmem:[#allocation3 + $0x188] sm:$0xff]  ;;  %219 = vst [vmem:[#allocation2 + $0xbc] sm:$0x1] %v218_v59 }
 0x14d   :  { %1507 = vst.msk [vmem:[#allocation2 + $0x94] sm:$0xf] %vm44_vm4, %v986_v16  ;;  %v2040_v26 = vshrl.u32 %v1675_v22, 16  ;;  %v2043_v27 = vshll.u32 %v1675_v22, 16  ;;  %v2543_v31 = vunpack.c.l.b16 %v2028_v11  ;;  %v365_v6 = vpack.c.bf16 %v323_v52, %v322_v51 }
 0x14e   :  { %v2038_v24 = vsel %vm11282_vm11, %v2033_v12, %v2037_v13  ;;  %1510 = vst [vmem:[#allocation2 + $0x98] sm:$0x1] %v1509_v5  ;;  %v989_v30 = vshrl.u32 %v742_v17, 16  ;;  %v992_v33 = vshll.u32 %v742_v17, 16  ;;  %v368_v14 = vpack.c.bf16 %v329_v7, %v328_v60 }
 0x14f   :  { %v2544_v32 = vunpack.c.l.b16 %v2038_v24  ;;  %v556_v35 = vpop.f32.mrf.mxu0  ;;  %v2042_v46 = vrot.slane %v2040_v26, 4  ;;  %v2045_v47 = vrot.slane %v2043_v27, 5 }
 0x150   :  { %v2742_v37 = vpop.f32.mrf.mxu1  ;;  %v991_v38 = vrot.slane %v989_v30, 7  ;;  %v557_v39 = vadd.f32 %v11493_v34, %v556_v35  ;;  %v3172_v45 = vpop.f32.mrf.mxu2  ;;  %10077 = vmatmul.msk.bf16.vlgmr.msra.gmra.mxu3 %vm388_vm0, %v368_v14 }
 0x151   :  { %v11581_v41 = vadd.f32 %v3170_v2, %v2742_v37  ;;  %v2596_v42 = vpack.c.b16 %v2544_v32, %v2543_v31  ;;  %v2046_v1 = vor.u32 %v2045_v47, %v2042_v46  ;;  %10992 = vmatpush.bf16.msra.mxu3 %v11271_v36 }
 0x152   :  { %v994_v48 = vor.u32 %v992_v33, %v991_v38  ;;  %v679_v49 = vmax.f32 %v557_v39, 0.0  ;;  %v995_v30 = vrot.slane %v991_v38, 4 }
 0x153   :  { %10097 = vmatmul.msk.bf16.gmra.mxu1 %vm2617_vm8, %v2596_v42  ;;  %v2047_v26 = vrot.slane %v2046_v1, 4  ;;  %v110_v42 = vld [vmem:[#allocation2 + $0xc0] sm:$0x1]  ;;  %v1518_v1 = vld [vmem:[#allocation2 + $0xa8] sm:$0xf] }
 0x154   :  { %v1512_v54 = vsel %vm11309_vm14, %v994_v48, %v1511_v43  ;;  %v743_v55 = vpack.c.bf16 %v679_v49, %v679_v49  ;;  %v10906_v57 = vld [vmem:[#allocation2 + $0x90] sm:$0xff]  ;;  %v111_v47 = vsel %vm11236_vm3, 0, %v110_v42 }
 0x155   :  { %v1676_v58 = vld [vmem:[#allocation2 + $0x94] sm:$0xf]  ;;  %1513 = vst [vmem:[#allocation2 + $0x9c] sm:$0xf] %v1512_v54  ;;  %v1728_v62 = vld [vmem:[#allocation2 + $0x98] sm:$0x1]  ;;  %10258 = vmatmul.msk.bf16.gmra.mxu2 %vm2617_vm8, %v10906_v57 }
 0x156   :  { %v2049_v2 = vshll.u32 %v1676_v58, 16  ;;  %v2053_v3 = vshrl.u32 %v1676_v58, 16  ;;  %v997_v4 = vshrl.u32 %v743_v55, 16  ;;  %v2059_v13 = vshll.u32 %v1728_v62, 16  ;;  %112 = vst [vmem:[#allocation2 + $0xc0] sm:$0x1] %v111_v47 }
 0x157   :  { %v559_v8 = vpop.f32.mrf.mxu0  ;;  %v1000_v5 = vshll.u32 %v743_v55, 16 }
 0x158   :  { %v2744_v9 = vpop.f32.mrf.mxu1  ;;  %v2051_v11 = vrot.slane %v2049_v2, 5  ;;  %v2055_v12 = vrot.slane %v2053_v3, 4  ;;  %v999_v16 = vrot.slane %v997_v4, 7  ;;  %v560_v17 = vadd.f32 %v11493_v34, %v559_v8  ;;  %v3175_v24 = vpop.f32.mrf.mxu2  ;;  %v324_v8 = vld [vmem:[#allocation3 + $0x160] sm:$0xff] }
 0x159   :  { %v11590_v22 = vadd.f32 %v3172_v45, %v2744_v9  ;;  %v2061_v39 = vrot.slane %v2059_v13, 5  ;;  %v325_v9 = vld [vmem:[#allocation3 + $0x168] sm:$0xff] }
 0x15a   :  { %v2056_v27 = vor.u32 %v2055_v12, %v2051_v11  ;;  %v1002_v31 = vor.u32 %v1000_v5, %v999_v16  ;;  %v1004_v32 = vrot.slane %v999_v16, 4  ;;  %v680_v33 = vmax.f32 %v560_v17, 0.0  ;;  %10074 = vmatmul.msk.bf16.gmra.mxu0 %vm388_vm0, %v365_v6  ;;  %v330_v17 = vld [vmem:[#allocation3 + $0x190] sm:$0xff] }
 0x15b   :  { %v2052_v35 = vsel %vm11282_vm11, %v2047_v26, %v2051_v11  ;;  %v220_v11 = vld [vmem:[#allocation2 + $0xc8] sm:$0x1] }
 0x15c   :  { %v2057_v37 = vrot.slane %v2056_v27, 4  ;;  %v1003_v43 = vsel %vm11330_vm5, %v995_v30, %v1002_v31  ;;  %v1516_v45 = vsel %vm11236_vm3, %v1004_v32, %v1515_v18  ;;  %v744_v38 = vpack.c.bf16 %v680_v33, %v680_v33  ;;  %v1677_v46 = vld [vmem:[#allocation2 + $0x9c] sm:$0xf]  ;;  %v331_v33 = vld [vmem:[#allocation3 + $0x198] sm:$0xff] }
 0x15d   :  { %1514 = vst.msk [vmem:[#allocation2 + $0xa0] sm:$0xf] %vm44_vm4, %v1003_v43  ;;  %v2064_v48 = vshrl.u32 %v1677_v46, 16  ;;  %v2067_v49 = vshll.u32 %v1677_v46, 16  ;;  %v2545_v52 = vunpack.c.l.b16 %v2052_v35  ;;  %v221_v5 = vsel %vm11256_vm6, 0, %v220_v11 }
 0x15e   :  { %v2062_v36 = vsel %vm11282_vm11, %v2057_v37, %v2061_v39  ;;  %1517 = vst [vmem:[#allocation2 + $0xa4] sm:$0x1] %v1516_v45  ;;  %v1006_v51 = vshrl.u32 %v744_v38, 16  ;;  %v1009_v54 = vshll.u32 %v744_v38, 16  ;;  %v366_v31 = vpack.c.bf16 %v325_v9, %v324_v8  ;;  %v10343_v45 = vld [vmem:[%s15110_s3 + $0x6] sm:$0x3] }
 0x15f   :  { %v2546_v53 = vunpack.c.l.b16 %v2062_v36  ;;  %v561_v55 = vpop.f32.mrf.mxu0  ;;  %v2066_v3 = vrot.slane %v2064_v48, 4  ;;  %v2069_v4 = vrot.slane %v2067_v49, 5  ;;  %222 = vst [vmem:[#allocation2 + $0xc8] sm:$0x1] %v221_v5  ;;  %v369_v43 = vpack.c.bf16 %v331_v33, %v330_v17  ;;  %v1522_v48 = vld [vmem:[#allocation2 + $0xb0] sm:$0x1] }
 0x160   :  { %v2747_v57 = vpop.f32.mrf.mxu1  ;;  %v1008_v58 = vrot.slane %v1006_v51, 7  ;;  %v562_v59 = vadd.f32 %v11493_v34, %v561_v55  ;;  %v3177_v2 = vpop.f32.mrf.mxu2  ;;  %v116_v9 = vld [vmem:[#allocation2 + $0xd8] sm:$0x1]  ;;  %v226_v33 = vld [vmem:[#allocation2 + $0xe0] sm:$0x1] }
 0x161   :  { %v11607_v60 = vadd.f32 %v3175_v24, %v2747_v57  ;;  %v2597_v62 = vpack.c.b16 %v2546_v53, %v2545_v52  ;;  %v2070_v24 = vor.u32 %v2069_v4, %v2066_v3  ;;  %10078 = vmatmul.msk.bf16.gmra.mxu3 %vm388_vm0, %v369_v43  ;;  %v4391_v53 = vsel %vm2714_vm7, %v10343_v45, 0  ;;  %v119_v3 = vld [vmem:[#allocation2 + $0xe4] sm:$0x1] }
 0x162   :  { %v1011_v6 = vor.u32 %v1009_v54, %v1008_v58  ;;  %v681_v7 = vmax.f32 %v562_v59, 0.0  ;;  %v1012_v54 = vrot.slane %v1008_v58, 4  ;;  %4400 = vmatpush.bf16.msrb.mxu0 %v4391_v53  ;;  %v120_v8 = vsel %vm11236_vm3, 0, %v119_v3 }
 0x163   :  { %10098 = vmatmul.msk.bf16.gmra.mxu1 %vm2617_vm8, %v2597_v62  ;;  %v2071_v51 = vrot.slane %v2070_v24, 4  ;;  %121 = vst [vmem:[#allocation2 + $0xe4] sm:$0x1] %v120_v8  ;;  %v227_v43 = vsel %vm11256_vm6, 0, %v226_v33 }
 0x164   :  { %v1519_v12 = vsel %vm11309_vm14, %v1011_v6, %v1518_v1  ;;  %v745_v13 = vpack.c.bf16 %v681_v7, %v681_v7  ;;  %v10907_v14 = vld [vmem:[#allocation2 + $0x9c] sm:$0xff]  ;;  %228 = vst [vmem:[#allocation2 + $0xe0] sm:$0x1] %v227_v43  ;;  %v122_v43 = vld [vmem:[#allocation2 + $0xf0] sm:$0x1] }
 0x165   :  { %v1678_v16 = vld [vmem:[#allocation2 + $0xa0] sm:$0xf]  ;;  %1520 = vst [vmem:[#allocation2 + $0xa8] sm:$0xf] %v1519_v12  ;;  %v1729_v18 = vld [vmem:[#allocation2 + $0xa4] sm:$0x1]  ;;  %10259 = vmatmul.msk.bf16.gmra.mxu2 %vm2617_vm8, %v10907_v14 }
 0x166   :  { %v2073_v26 = vshll.u32 %v1678_v16, 16  ;;  %v2077_v27 = vshrl.u32 %v1678_v16, 16  ;;  %v1014_v30 = vshrl.u32 %v745_v13, 16  ;;  %v2083_v32 = vshll.u32 %v1729_v18, 16 }
 0x167   :  { %v564_v35 = vpop.f32.mrf.mxu0  ;;  %v1017_v46 = vshll.u32 %v745_v13, 16  ;;  %v117_v14 = vsel %vm11236_vm3, 0, %v116_v9 }
 0x168   :  { %v2749_v37 = vpop.f32.mrf.mxu1  ;;  %v2075_v39 = vrot.slane %v2073_v26, 5  ;;  %v2079_v42 = vrot.slane %v2077_v27, 4  ;;  %v1016_v38 = vrot.slane %v1014_v30, 7  ;;  %v565_v47 = vadd.f32 %v11493_v34, %v564_v35  ;;  %v3180_v49 = vpop.f32.mrf.mxu2  ;;  %118 = vst [vmem:[#allocation2 + $0xd8] sm:$0x1] %v117_v14 }
 0x169   :  { %v11619_v36 = vadd.f32 %v3177_v2, %v2749_v37  ;;  %v2085_v2 = vrot.slane %v2083_v32, 5  ;;  %v1525_v35 = vld [vmem:[#allocation2 + $0xb4] sm:$0xf] }
 0x16a   :  { %v2080_v52 = vor.u32 %v2079_v42, %v2075_v39  ;;  %v1019_v55 = vor.u32 %v1017_v46, %v1016_v38  ;;  %v1021_v57 = vrot.slane %v1016_v38, 4  ;;  %v682_v59 = vmax.f32 %v565_v47, 0.0  ;;  %10075 = vmatmul.msk.bf16.gmra.mxu0 %vm388_vm0, %v366_v31  ;;  %v326_v46 = vld [vmem:[#allocation3 + $0x170] sm:$0xff]  ;;  %v327_v47 = vld [vmem:[#allocation3 + $0x178] sm:$0xff] }
 0x16b   :  { %v2076_v62 = vsel %vm11282_vm11, %v2071_v51, %v2075_v39  ;;  %v367_v3 = vpack.c.bf16 %v327_v47, %v326_v46 }
 0x16c   :  { %v2081_v1 = vrot.slane %v2080_v52, 4  ;;  %v1020_v4 = vsel %vm11330_vm5, %v1012_v54, %v1019_v55  ;;  %v1523_v6 = vsel %vm11236_vm3, %v1021_v57, %v1522_v48  ;;  %v746_v7 = vpack.c.bf16 %v682_v59, %v682_v59  ;;  %v1679_v58 = vld [vmem:[#allocation2 + $0xa8] sm:$0xf]  ;;  %v229_v48 = vld [vmem:[#allocation2 + $0xec] sm:$0x1]  ;;  %v332_v55 = vld [vmem:[#allocation3 + $0x1a0] sm:$0xff] }
 0x16d   :  { %1521 = vst.msk [vmem:[#allocation2 + $0xac] sm:$0xf] %vm44_vm4, %v1020_v4  ;;  %v2088_v12 = vshrl.u32 %v1679_v58, 16  ;;  %v2091_v13 = vshll.u32 %v1679_v58, 16  ;;  %v2547_v5 = vunpack.c.l.b16 %v2076_v62  ;;  %v230_v54 = vsel %vm11256_vm6, 0, %v229_v48  ;;  %v333_v4 = vld [vmem:[#allocation3 + $0x1a8] sm:$0xff] }
 0x16e   :  { %v2086_v11 = vsel %vm11282_vm11, %v2081_v1, %v2085_v2  ;;  %1524 = vst [vmem:[#allocation2 + $0xb0] sm:$0x1] %v1523_v6  ;;  %v1023_v16 = vshrl.u32 %v746_v7, 16  ;;  %v1026_v18 = vshll.u32 %v746_v7, 16 }
 0x16f   :  { %v2548_v17 = vunpack.c.l.b16 %v2086_v11  ;;  %v566_v24 = vpop.f32.mrf.mxu0  ;;  %v2090_v39 = vrot.slane %v2088_v12, 4  ;;  %v2093_v42 = vrot.slane %v2091_v13, 5  ;;  %231 = vst [vmem:[#allocation2 + $0xec] sm:$0x1] %v230_v54  ;;  %v370_v11 = vpack.c.bf16 %v333_v4, %v332_v55  ;;  %v1532_v4 = vld [vmem:[#allocation2 + $0xc0] sm:$0xf] }
 0x170   :  { %v2752_v26 = vpop.f32.mrf.mxu1  ;;  %v1025_v27 = vrot.slane %v1023_v16, 7  ;;  %v567_v30 = vadd.f32 %v11493_v34, %v566_v24  ;;  %v3182_v37 = vpop.f32.mrf.mxu2 }
 0x171   :  { %v11638_v31 = vadd.f32 %v3180_v49, %v2752_v26  ;;  %v2598_v32 = vpack.c.b16 %v2548_v17, %v2547_v5  ;;  %v2094_v59 = vor.u32 %v2093_v42, %v2090_v39  ;;  %v1529_v5 = vld [vmem:[#allocation2 + $0xbc] sm:$0x1]  ;;  %10079 = vmatmul.msk.bf16.gmra.mxu3 %vm388_vm0, %v370_v11 }
 0x172   :  { %v1028_v45 = vor.u32 %v1026_v18, %v1025_v27  ;;  %v683_v38 = vmax.f32 %v567_v30, 0.0  ;;  %v1029_v26 = vrot.slane %v1025_v27, 4  ;;  %v123_v27 = vsel %vm11236_vm3, 0, %v122_v43 }
 0x173   :  { %10099 = vmatmul.msk.bf16.gmra.mxu1 %vm2617_vm8, %v2598_v32  ;;  %v2095_v18 = vrot.slane %v2094_v59, 4  ;;  %124 = vst [vmem:[#allocation2 + $0xf0] sm:$0x1] %v123_v27  ;;  %v1683_v59 = vld [vmem:[#allocation2 + $0xd8] sm:$0xf] }
 0x174   :  { %v1526_v49 = vsel %vm11309_vm14, %v1028_v45, %v1525_v35  ;;  %v747_v51 = vpack.c.bf16 %v683_v38, %v683_v38  ;;  %v10908_v52 = vld [vmem:[#allocation2 + $0xa8] sm:$0xff] }
 0x175   :  { %v1680_v53 = vld [vmem:[#allocation2 + $0xac] sm:$0xf]  ;;  %1527 = vst [vmem:[#allocation2 + $0xb4] sm:$0xf] %v1526_v49  ;;  %v1730_v57 = vld [vmem:[#allocation2 + $0xb0] sm:$0x1]  ;;  %10260 = vmatmul.msk.bf16.gmra.mxu2 %vm2617_vm8, %v10908_v52 }
 0x176   :  { %v2097_v62 = vshll.u32 %v1680_v53, 16  ;;  %v2101_v1 = vshrl.u32 %v1680_v53, 16  ;;  %v1031_v2 = vshrl.u32 %v747_v51, 16  ;;  %v2107_v9 = vshll.u32 %v1730_v57, 16 }
 0x177   :  { %v569_v6 = vpop.f32.mrf.mxu0  ;;  %v1034_v13 = vshll.u32 %v747_v51, 16 }
 0x178   :  { %v2754_v7 = vpop.f32.mrf.mxu1  ;;  %v2099_v58 = vrot.slane %v2097_v62, 5  ;;  %v2103_v8 = vrot.slane %v2101_v1, 4  ;;  %v1033_v12 = vrot.slane %v1031_v2, 7  ;;  %v570_v14 = vadd.f32 %v11493_v34, %v569_v6  ;;  %v3185_v17 = vpop.f32.mrf.mxu2 }
 0x179   :  { %v11649_v16 = vadd.f32 %v3182_v37, %v2754_v7  ;;  %v2109_v42 = vrot.slane %v2107_v9, 5 }
 0x17a   :  { %v2104_v24 = vor.u32 %v2103_v8, %v2099_v58  ;;  %v1036_v30 = vor.u32 %v1034_v13, %v1033_v12  ;;  %v1038_v32 = vrot.slane %v1033_v12, 4  ;;  %v684_v33 = vmax.f32 %v570_v14, 0.0  ;;  %10076 = vmatmul.msk.bf16.gmra.mxu0 %vm388_vm0, %v367_v3  ;;  %v1684_v8 = vld [vmem:[#allocation2 + $0xdc] sm:$0xf]  ;;  %v232_v14 = vld [vmem:[#allocation2 + $0xf8] sm:$0x1] }
 0x17b   :  { %v2100_v35 = vsel %vm11282_vm11, %v2095_v18, %v2099_v58  ;;  %v2136_v12 = vshrl.u32 %v1683_v59, 16  ;;  %v2139_v13 = vshll.u32 %v1683_v59, 16  ;;  %v10926_v59 = vld [vmem:[#allocation2 + $0xc] sm:$0xff] }
 0x17c   :  { %v2105_v39 = vrot.slane %v2104_v24, 4  ;;  %v1037_v37 = vsel %vm11330_vm5, %v1029_v26, %v1036_v30  ;;  %v1530_v45 = vsel %vm11236_vm3, %v1038_v32, %v1529_v5  ;;  %v748_v38 = vpack.c.bf16 %v684_v33, %v684_v33  ;;  %v1681_v46 = vld [vmem:[#allocation2 + $0xb4] sm:$0xf]  ;;  %v334_v32 = vld [vmem:[#allocation3 + $0x1b0] sm:$0xff] }
 0x17d   :  { %1528 = vst.msk [vmem:[#allocation2 + $0xb8] sm:$0xf] %vm44_vm4, %v1037_v37  ;;  %v2112_v48 = vshrl.u32 %v1681_v46, 16  ;;  %v2115_v49 = vshll.u32 %v1681_v46, 16  ;;  %v2549_v52 = vunpack.c.l.b16 %v2100_v35  ;;  %v233_v26 = vsel %vm11256_vm6, 0, %v232_v14  ;;  %v335_v46 = vld [vmem:[#allocation3 + $0x1b8] sm:$0xff] }
 0x17e   :  { %v2110_v47 = vsel %vm11282_vm11, %v2105_v39, %v2109_v42  ;;  %1531 = vst [vmem:[#allocation2 + $0xbc] sm:$0x1] %v1530_v45  ;;  %v1040_v51 = vshrl.u32 %v748_v38, 16  ;;  %v1043_v54 = vshll.u32 %v748_v38, 16  ;;  %v2145_v30 = vshll.u32 %v1684_v8, 16 }
 0x17f   :  { %v2550_v53 = vunpack.c.l.b16 %v2110_v47  ;;  %v571_v55 = vpop.f32.mrf.mxu0  ;;  %v2114_v7 = vrot.slane %v2112_v48, 4  ;;  %v2117_v58 = vrot.slane %v2115_v49, 5  ;;  %v2138_v37 = vrot.slane %v2136_v12, 4  ;;  %234 = vst [vmem:[#allocation2 + $0xf8] sm:$0x1] %v233_v26 }
 0x180   :  { %v2757_v57 = vpop.f32.mrf.mxu1  ;;  %v11664_v62 = vrot.slane %v1040_v51, 7  ;;  %v572_v1 = vadd.f32 %v11493_v34, %v571_v55  ;;  %v3187_v6 = vpop.f32.mrf.mxu2  ;;  %v2141_v45 = vrot.slane %v2139_v13, 5  ;;  %v2149_v38 = vshrl.u32 %v1684_v8, 16  ;;  %v1732_v13 = vld [vmem:[#allocation2 + $0xe0] sm:$0x1] }
 0x181   :  { %v11667_v2 = vadd.f32 %v3185_v17, %v2757_v57  ;;  %v2599_v3 = vpack.c.b16 %v2550_v53, %v2549_v52  ;;  %v2118_v35 = vor.u32 %v2117_v58, %v2114_v7  ;;  %v371_v52 = vpack.c.bf16 %v335_v46, %v334_v32 }
 0x182   :  { %v1045_v9 = vor.u32 %v1043_v54, %v11664_v62  ;;  %v685_v11 = vmax.f32 %v572_v1, 0.0  ;;  %v1046_v1 = vrot.slane %v11664_v62, 4  ;;  %v11680_v8 = vrot.slane %v2145_v30, 5 }
 0x183   :  { %10100 = vmatmul.msk.bf16.gmra.mxu1 %vm2617_vm8, %v2599_v3  ;;  %v1536_v3 = vld [vmem:[#allocation2 + $0xc8] sm:$0x1]  ;;  %v2119_v7 = vrot.slane %v2118_v35, 4  ;;  %10080 = vmatmul.msk.bf16.gmra.mxu3 %vm388_vm0, %v371_v52  ;;  %v2142_v32 = vor.u32 %v2141_v45, %v2138_v37 }
 0x184   :  { %v1533_v5 = vsel %vm11309_vm14, %v1045_v9, %v1532_v4  ;;  %v749_v18 = vpack.c.bf16 %v685_v11, %v685_v11  ;;  %v10909_v17 = vld [vmem:[#allocation2 + $0xb4] sm:$0xff] }
 0x185   :  { %v1682_v24 = vld [vmem:[#allocation2 + $0xb8] sm:$0xf]  ;;  %1534 = vst [vmem:[#allocation2 + $0xc0] sm:$0xf] %v1533_v5  ;;  %v1731_v33 = vld [vmem:[#allocation2 + $0xbc] sm:$0x1]  ;;  %10261 = vmatmul.msk.bf16.gmra.mxu2 %vm2617_vm8, %v10909_v17 }
 0x186   :  { %v2121_v39 = vshll.u32 %v1682_v24, 16  ;;  %v2125_v42 = vshrl.u32 %v1682_v24, 16  ;;  %v1048_v43 = vshrl.u32 %v749_v18, 16  ;;  %v2131_v51 = vshll.u32 %v1731_v33, 16  ;;  %v125_v5 = vld [vmem:[#allocation2 + $0xfc] sm:$0x1] }
 0x187   :  { %v574_v27 = vpop.f32.mrf.mxu0  ;;  %v1051_v54 = vshll.u32 %v749_v18, 16  ;;  %v126_v26 = vsel %vm11236_vm3, 0, %v125_v5  ;;  %v2155_v33 = vshll.u32 %v1732_v13, 16  ;;  %v10504_v13 = vld [vmem:[%s15110_s3 + $0x8] sm:$0x3] }
 0x188   :  { %v2759_v47 = vpop.f32.mrf.mxu1  ;;  %v2123_v48 = vrot.slane %v2121_v39, 5  ;;  %v2127_v49 = vrot.slane %v2125_v42, 4  ;;  %v1050_v53 = vrot.slane %v1048_v43, 7  ;;  %v575_v55 = vadd.f32 %v11493_v34, %v574_v27  ;;  %v3190_v4 = vpop.f32.mrf.mxu2  ;;  %127 = vst [vmem:[#allocation2 + $0xfc] sm:$0x1] %v126_v26 }
 0x189   :  { %v11677_v57 = vadd.f32 %v3187_v6, %v2759_v47  ;;  %v2151_v34 = vrot.slane %v2149_v38, 4  ;;  %v2133_v62 = vrot.slane %v2131_v51, 5  ;;  %v1539_v51 = vld [vmem:[#allocation2 + $0xe4] sm:$0xf]  ;;  %v5685_v5 = vsel %vm2714_vm7, %v10504_v13, 0 }
 0x18a   :  { %v2128_v58 = vor.u32 %v2127_v49, %v2123_v48  ;;  %v1053_v9 = vor.u32 %v1051_v54, %v1050_v53  ;;  %v1055_v11 = vrot.slane %v1050_v53, 4  ;;  %v686_v12 = vmax.f32 %v575_v55, 0.0  ;;  %10472 = vmatmul.msk.bf16.vlgmr.msrb.gmra.mxu0 %vm2617_vm8, %v10926_v59  ;;  %v10910_v59 = vld [vmem:[#allocation2 + $0xd8] sm:$0xff]  ;;  %5694 = vmatpush.bf16.msrb.mxu1 %v5685_v5  ;;  %v238_v5 = vld [vmem:[#allocation2 + $0x110] sm:$0x1] }
 0x18b   :  { %v2124_v6 = vsel %vm11282_vm11, %v2119_v7, %v2123_v48  ;;  %v2152_v43 = vor.u32 %v2151_v34, %v11680_v8  ;;  %v11699_v48 = vld [vmem:[%s15109_s2] ss:$0 sm:$0xff]  ;;  %v2143_v53 = vrot.slane %v2142_v32, 4  ;;  %v235_v7 = vld [vmem:[#allocation2 + $0x104] sm:$0x1] }
 0x18c   :  { %v2129_v14 = vrot.slane %v2128_v58, 4  ;;  %v1054_v18 = vsel %vm11330_vm5, %v1046_v1, %v1053_v9  ;;  %v1537_v17 = vsel %vm11236_vm3, %v1055_v11, %v1536_v3  ;;  %v750_v24 = vpack.c.bf16 %v686_v12, %v686_v12  ;;  %v336_v11 = vld [vmem:[#allocation3 + $0x1c0] sm:$0xff]  ;;  %v337_v12 = vld [vmem:[#allocation3 + $0x1c8] sm:$0xff] }
 0x18d   :  { %1535 = vst.msk [vmem:[#allocation2 + $0xc4] sm:$0xf] %vm44_vm4, %v1054_v18  ;;  %v2551_v39 = vunpack.c.l.b16 %v2124_v6  ;;  %v2153_v1 = vrot.slane %v2152_v43, 4  ;;  %v2157_v3 = vrot.slane %v2155_v33, 5  ;;  %v372_v34 = vpack.c.bf16 %v337_v12, %v336_v11  ;;  %v10927_v33 = vld [vmem:[#allocation2 + $0x18] sm:$0xff] }
 0x18e   :  { %v2134_v30 = vsel %vm11282_vm11, %v2129_v14, %v2133_v62  ;;  %1538 = vst [vmem:[#allocation2 + $0xc8] sm:$0x1] %v1537_v17  ;;  %v1057_v35 = vshrl.u32 %v750_v24, 16  ;;  %v1060_v38 = vshll.u32 %v750_v24, 16  ;;  %v2148_v14 = vsel %vm11282_vm11, %v2143_v53, %v11680_v8  ;;  %v1546_v12 = vld [vmem:[#allocation2 + $0xf0] sm:$0xf] }
 0x18f   :  { %v2552_v42 = vunpack.c.l.b16 %v2134_v30  ;;  %v576_v46 = vpop.f32.mrf.mxu0  ;;  %v2158_v62 = vsel %vm11282_vm11, %v2153_v1, %v2157_v3 }
 0x190   :  { %v2762_v27 = vpop.f32.mrf.mxu1  ;;  %v1059_v47 = vrot.slane %v1057_v35, 7  ;;  %v577_v49 = vadd.f32 %v11699_v48, %v576_v46  ;;  %v3192_v52 = vpop.f32.mrf.mxu2  ;;  %v1543_v35 = vld [vmem:[#allocation2 + $0xec] sm:$0x1]  ;;  %v2554_v8 = vunpack.c.l.b16 %v2158_v62 }
 0x191   :  { %v11702_v37 = vadd.f32 %v3190_v4, %v2762_v27  ;;  %v2600_v45 = vpack.c.b16 %v2552_v42, %v2551_v39  ;;  %v236_v4 = vsel %vm11256_vm6, 0, %v235_v7  ;;  %v2553_v42 = vunpack.c.l.b16 %v2148_v14 }
 0x192   :  { %v1062_v54 = vor.u32 %v1060_v38, %v1059_v47  ;;  %v687_v55 = vmax.f32 %v577_v49, 0.0  ;;  %237 = vst [vmem:[#allocation2 + $0x104] sm:$0x1] %v236_v4  ;;  %v1063_v43 = vrot.slane %v1059_v47, 4  ;;  %v128_v49 = vld [vmem:[#allocation2 + $0x108] sm:$0x1] }
 0x193   :  { %10101 = vmatmul.msk.bf16.gmra.mxu1 %vm2617_vm8, %v2600_v45  ;;  %10081 = vmatmul.msk.bf16.gmra.mxu3 %vm388_vm0, %v372_v34  ;;  %v2601_v1 = vpack.c.b16 %v2554_v8, %v2553_v42 }
 0x194   :  { %v1540_v58 = vsel %vm11309_vm14, %v1062_v54, %v1539_v51  ;;  %v751_v9 = vpack.c.bf16 %v687_v55, %v687_v55  ;;  %v129_v54 = vsel %vm11236_vm3, 0, %v128_v49 }
 0x195   :  { %1541 = vst [vmem:[#allocation2 + $0xe4] sm:$0xf] %v1540_v58  ;;  %10262 = vmatmul.msk.bf16.gmra.mxu2 %vm2617_vm8, %v10910_v59 }
 0x196   :  { %v1065_v6 = vshrl.u32 %v751_v9, 16  ;;  %v1068_v26 = vshll.u32 %v751_v9, 16  ;;  %130 = vst [vmem:[#allocation2 + $0x108] sm:$0x1] %v129_v54 }
 0x197   :  { %v579_v18 = vpop.f32.mrf.mxu0 }
 0x198   :  { %v2764_v17 = vpop.f32.mrf.mxu1  ;;  %v1067_v24 = vrot.slane %v1065_v6, 7  ;;  %v580_v30 = vadd.f32 %v11699_v48, %v579_v18  ;;  %v3195_v39 = vpop.f32.mrf.mxu2 }
 0x199   :  { %v11720_v32 = vadd.f32 %v3192_v52, %v2764_v17 }
 0x19a   :  { %v1070_v38 = vor.u32 %v1068_v26, %v1067_v24  ;;  %v1072_v46 = vrot.slane %v1067_v24, 4  ;;  %v688_v27 = vmax.f32 %v580_v30, 0.0  ;;  %10473 = vmatmul.msk.bf16.gmra.mxu0 %vm2617_vm8, %v10927_v33  ;;  %v239_v30 = vsel %vm11256_vm6, 0, %v238_v5  ;;  %v338_v33 = vld [vmem:[#allocation3 + $0x1d0] sm:$0xff] }
 0x19b   :  { %240 = vst [vmem:[#allocation2 + $0x110] sm:$0x1] %v239_v30 }
 0x19c   :  { %v1071_v45 = vsel %vm11330_vm5, %v1063_v43, %v1070_v38  ;;  %v1544_v51 = vsel %vm11236_vm3, %v1072_v46, %v1543_v35  ;;  %v752_v52 = vpack.c.bf16 %v688_v27, %v688_v27  ;;  %v1685_v53 = vld [vmem:[#allocation2 + $0xe4] sm:$0xf]  ;;  %v339_v38 = vld [vmem:[#allocation3 + $0x1d8] sm:$0xff] }
 0x19d   :  { %1542 = vst.msk [vmem:[#allocation2 + $0xe8] sm:$0xf] %vm44_vm4, %v1071_v45  ;;  %v2160_v47 = vshrl.u32 %v1685_v53, 16  ;;  %v2163_v55 = vshll.u32 %v1685_v53, 16 }
 0x19e   :  { %1545 = vst [vmem:[#allocation2 + $0xec] sm:$0x1] %v1544_v51  ;;  %v1074_v59 = vshrl.u32 %v752_v52, 16  ;;  %v1077_v9 = vshll.u32 %v752_v52, 16  ;;  %v373_v52 = vpack.c.bf16 %v339_v38, %v338_v33 }
 0x19f   :  { %v581_v3 = vpop.f32.mrf.mxu0  ;;  %v2162_v34 = vrot.slane %v2160_v47, 4  ;;  %v2165_v6 = vrot.slane %v2163_v55, 5 }
 0x1a0   :  { %v2767_v7 = vpop.f32.mrf.mxu1  ;;  %v1076_v58 = vrot.slane %v1074_v59, 7  ;;  %v582_v4 = vadd.f32 %v11699_v48, %v581_v3  ;;  %v3197_v13 = vpop.f32.mrf.mxu2  ;;  %v10928_v59 = vld [vmem:[#allocation2 + $0x24] sm:$0xff] }
 0x1a1   :  { %v11732_v11 = vadd.f32 %v3195_v39, %v2767_v7  ;;  %v2166_v39 = vor.u32 %v2165_v6, %v2162_v34 }
 0x1a2   :  { %v1079_v14 = vor.u32 %v1077_v9, %v1076_v58  ;;  %v689_v62 = vmax.f32 %v582_v4, 0.0  ;;  %v1080_v4 = vrot.slane %v1076_v58, 4 }
 0x1a3   :  { %15141 = vst [vmem:[#allocation14_spill] sm:$0xff] %v11732_v11  ;;  %10102 = vmatmul.msk.bf16.gmra.mxu1 %vm2617_vm8, %v2601_v1  ;;  %v1550_v1 = vld [vmem:[#allocation2 + $0xf8] sm:$0x1]  ;;  %v2167_v7 = vrot.slane %v2166_v39, 4  ;;  %10082 = vmatmul.msk.bf16.gmra.mxu3 %vm388_vm0, %v373_v52  ;;  %v1553_v52 = vld [vmem:[#allocation2 + $0xfc] sm:$0xf] }
 0x1a4   :  { %v1547_v18 = vsel %vm11309_vm14, %v1079_v14, %v1546_v12  ;;  %v753_v17 = vpack.c.bf16 %v689_v62, %v689_v62  ;;  %v10911_v24 = vld [vmem:[#allocation2 + $0xe4] sm:$0xff]  ;;  %v12105_v11 = vld [vmem:[#allocation2 + $0x2c] sm:$0x1] }
 0x1a5   :  { %v1686_v26 = vld [vmem:[#allocation2 + $0xe8] sm:$0xf]  ;;  %1548 = vst [vmem:[#allocation2 + $0xf0] sm:$0xf] %v1547_v18  ;;  %v1733_v35 = vld [vmem:[#allocation2 + $0xec] sm:$0x1]  ;;  %10263 = vmatmul.msk.bf16.gmra.mxu2 %vm2617_vm8, %v10911_v24 }
 0x1a6   :  { %v2169_v42 = vshll.u32 %v1686_v26, 16  ;;  %v2173_v8 = vshrl.u32 %v1686_v26, 16  ;;  %v1082_v43 = vshrl.u32 %v753_v17, 16  ;;  %v2179_v51 = vshll.u32 %v1733_v35, 16 }
 0x1a7   :  { %v584_v46 = vpop.f32.mrf.mxu0  ;;  %v1085_v54 = vshll.u32 %v753_v17, 16 }
 0x1a8   :  { %v2769_v27 = vpop.f32.mrf.mxu1  ;;  %v2171_v49 = vrot.slane %v2169_v42, 5  ;;  %v2175_v45 = vrot.slane %v2173_v8, 4  ;;  %v1084_v53 = vrot.slane %v1082_v43, 7  ;;  %v585_v47 = vadd.f32 %v11699_v48, %v584_v46  ;;  %v3200_v3 = vpop.f32.mrf.mxu2 }
 0x1a9   :  { %v11741_v55 = vadd.f32 %v3197_v13, %v2769_v27  ;;  %v2181_v5 = vrot.slane %v2179_v51, 5  ;;  %v131_v13 = vld [vmem:[#allocation2 + $0x114] sm:$0x1] }
 0x1aa   :  { %v2176_v9 = vor.u32 %v2175_v45, %v2171_v49  ;;  %v1087_v12 = vor.u32 %v1085_v54, %v1084_v53  ;;  %v1089_v34 = vrot.slane %v1084_v53, 4  ;;  %v690_v6 = vmax.f32 %v585_v47, 0.0  ;;  %10474 = vmatmul.msk.bf16.gmra.mxu0 %vm2617_vm8, %v10928_v59 }
 0x1ab   :  { %15142 = vst [vmem:[#allocation15_spill] sm:$0xff] %v11741_v55  ;;  %v2172_v14 = vsel %vm11282_vm11, %v2167_v7, %v2171_v49  ;;  %v132_v58 = vsel %vm11236_vm3, 0, %v131_v13  ;;  %v241_v7 = vld [vmem:[#allocation2 + $0x11c] sm:$0x1] }
 0x1ac   :  { %v2177_v62 = vrot.slane %v2176_v9, 4  ;;  %v1088_v18 = vsel %vm11330_vm5, %v1080_v4, %v1087_v12  ;;  %v1551_v17 = vsel %vm11236_vm3, %v1089_v34, %v1550_v1  ;;  %v754_v24 = vpack.c.bf16 %v690_v6, %v690_v6  ;;  %v1687_v26 = vld [vmem:[#allocation2 + $0xf0] sm:$0xf]  ;;  %133 = vst [vmem:[#allocation2 + $0x114] sm:$0x1] %v132_v58 }
 0x1ad   :  { %1549 = vst.msk [vmem:[#allocation2 + $0xf4] sm:$0xf] %vm44_vm4, %v1088_v18  ;;  %v2184_v33 = vshrl.u32 %v1687_v26, 16  ;;  %v2187_v35 = vshll.u32 %v1687_v26, 16  ;;  %v2555_v42 = vunpack.c.l.b16 %v2172_v14  ;;  %v340_v6 = vld [vmem:[#allocation3 + $0x1e0] sm:$0xff] }
 0x1ae   :  { %v2182_v30 = vsel %vm11282_vm11, %v2177_v62, %v2181_v5  ;;  %1552 = vst [vmem:[#allocation2 + $0xf8] sm:$0x1] %v1551_v17  ;;  %v1091_v39 = vshrl.u32 %v754_v24, 16  ;;  %v1094_v43 = vshll.u32 %v754_v24, 16  ;;  %v341_v17 = vld [vmem:[#allocation3 + $0x1e8] sm:$0xff] }
 0x1af   :  { %v2556_v8 = vunpack.c.l.b16 %v2182_v30  ;;  %v586_v38 = vpop.f32.mrf.mxu0  ;;  %v2186_v54 = vrot.slane %v2184_v33, 4  ;;  %v2189_v47 = vrot.slane %v2187_v35, 5  ;;  %v374_v35 = vpack.c.bf16 %v341_v17, %v340_v6 }
 0x1b0   :  { %v2772_v46 = vpop.f32.mrf.mxu1  ;;  %v1093_v27 = vrot.slane %v1091_v39, 7  ;;  %v587_v49 = vadd.f32 %v11699_v48, %v586_v38  ;;  %v3202_v53 = vpop.f32.mrf.mxu2  ;;  %v10929_v38 = vld [vmem:[#allocation2 + $0x30] sm:$0xff] }
 0x1b1   :  { %v11757_v45 = vadd.f32 %v3200_v3, %v2772_v46  ;;  %v2602_v51 = vpack.c.b16 %v2556_v8, %v2555_v42  ;;  %v242_v3 = vsel %vm11256_vm6, 0, %v241_v7  ;;  %v2190_v62 = vor.u32 %v2189_v47, %v2186_v54  ;;  %v1557_v46 = vld [vmem:[#allocation2 + $0x104] sm:$0x1] }
 0x1b2   :  { %v1096_v59 = vor.u32 %v1094_v43, %v1093_v27  ;;  %v691_v1 = vmax.f32 %v587_v49, 0.0  ;;  %243 = vst [vmem:[#allocation2 + $0x11c] sm:$0x1] %v242_v3  ;;  %v1097_v54 = vrot.slane %v1093_v27, 4 }
 0x1b3   :  { %15143 = vst [vmem:[#allocation16_spill] sm:$0xff] %v11757_v45  ;;  %10103 = vmatmul.msk.bf16.gmra.mxu1 %vm2617_vm8, %v2602_v51  ;;  %v2191_v51 = vrot.slane %v2190_v62, 4  ;;  %10083 = vmatmul.msk.bf16.gmra.mxu3 %vm388_vm0, %v374_v35 }
 0x1b4   :  { %v1554_v9 = vsel %vm11309_vm14, %v1096_v59, %v1553_v52  ;;  %v755_v4 = vpack.c.bf16 %v691_v1, %v691_v1  ;;  %v10912_v12 = vld [vmem:[#allocation2 + $0xf0] sm:$0xff] }
 0x1b5   :  { %v1688_v34 = vld [vmem:[#allocation2 + $0xf4] sm:$0xf]  ;;  %1555 = vst [vmem:[#allocation2 + $0xfc] sm:$0xf] %v1554_v9  ;;  %v1734_v14 = vld [vmem:[#allocation2 + $0xf8] sm:$0x1]  ;;  %10264 = vmatmul.msk.bf16.gmra.mxu2 %vm2617_vm8, %v10912_v12 }
 0x1b6   :  { %v2193_v5 = vshll.u32 %v1688_v34, 16  ;;  %v2197_v13 = vshrl.u32 %v1688_v34, 16  ;;  %v1099_v18 = vshrl.u32 %v755_v4, 16  ;;  %v2203_v33 = vshll.u32 %v1734_v14, 16 }
 0x1b7   :  { %v589_v24 = vpop.f32.mrf.mxu0  ;;  %v1102_v42 = vshll.u32 %v755_v4, 16 }
 0x1b8   :  { %v2774_v26 = vpop.f32.mrf.mxu1  ;;  %v2195_v58 = vrot.slane %v2193_v5, 5  ;;  %v2199_v30 = vrot.slane %v2197_v13, 4  ;;  %v1101_v39 = vrot.slane %v1099_v18, 7  ;;  %v590_v8 = vadd.f32 %v11699_v48, %v589_v24  ;;  %v3205_v49 = vpop.f32.mrf.mxu2  ;;  %v4626_v24 = vld [vmem:[#allocation2 + $0xc] sm:$0xf] }
 0x1b9   :  { %v11766_v43 = vadd.f32 %v3202_v53, %v2774_v26  ;;  %v2205_v4 = vrot.slane %v2203_v33, 5  ;;  %v134_v53 = vld [vmem:[#allocation2 + $0x120] sm:$0x1]  ;;  %v11781_v33 = vld [vmem:[#allocation2 + $0x10] sm:$0xf] }
 0x1ba   :  { %v2200_v52 = vor.u32 %v2199_v30, %v2195_v58  ;;  %v1104_v47 = vor.u32 %v1102_v42, %v1101_v39  ;;  %v1106_v59 = vrot.slane %v1101_v39, 4  ;;  %v692_v1 = vmax.f32 %v590_v8, 0.0  ;;  %10475 = vmatmul.msk.bf16.gmra.mxu0 %vm2617_vm8, %v10929_v38  ;;  %v11788_v38 = vld [vmem:[#allocation2 + $0xc] sm:$0xe] }
 0x1bb   :  { %15144 = vst [vmem:[#allocation17_spill] sm:$0xff] %v11766_v43  ;;  %v2196_v7 = vsel %vm11282_vm11, %v2191_v51, %v2195_v58  ;;  %v135_v27 = vsel %vm11236_vm3, 0, %v134_v53  ;;  %v4736_v53 = vshrl.u32 %v11781_v33, 16 }
 0x1bc   :  { %v2201_v9 = vrot.slane %v2200_v52, 4  ;;  %v1105_v12 = vsel %vm11330_vm5, %v1097_v54, %v1104_v47  ;;  %v1558_v34 = vsel %vm11236_vm3, %v1106_v59, %v1557_v46  ;;  %v756_v3 = vpack.c.bf16 %v692_v1, %v692_v1  ;;  %v1689_v6 = vld [vmem:[#allocation2 + $0xfc] sm:$0xf]  ;;  %136 = vst [vmem:[#allocation2 + $0x120] sm:$0x1] %v135_v27 }
 0x1bd   :  { %1556 = vst.msk [vmem:[#allocation2 + $0x100] sm:$0xf] %vm44_vm4, %v1105_v12  ;;  %v2208_v62 = vshrl.u32 %v1689_v6, 16  ;;  %v2211_v5 = vshll.u32 %v1689_v6, 16  ;;  %v2557_v18 = vunpack.c.l.b16 %v2196_v7  ;;  %v1560_v46 = vld [vmem:[#allocation2 + $0x108] sm:$0xf] }
 0x1be   :  { %v2206_v14 = vsel %vm11282_vm11, %v2201_v9, %v2205_v4  ;;  %1559 = vst [vmem:[#allocation2 + $0x104] sm:$0x1] %v1558_v34  ;;  %v1108_v13 = vshrl.u32 %v756_v3, 16  ;;  %v1111_v26 = vshll.u32 %v756_v3, 16  ;;  %v4723_v47 = vshrl.u32 %v4626_v24, 16 }
 0x1bf   :  { %v2558_v17 = vunpack.c.l.b16 %v2206_v14  ;;  %v591_v58 = vpop.f32.mrf.mxu0  ;;  %v2210_v52 = vrot.slane %v2208_v62, 4  ;;  %v2213_v54 = vrot.slane %v2211_v5, 5  ;;  %v4726_v7 = vshll.u32 %v4626_v24, 16  ;;  %v244_v4 = vld [vmem:[#allocation2 + $0x128] sm:$0x1] }
 0x1c0   :  { %v2777_v30 = vpop.f32.mrf.mxu1  ;;  %v11783_v35 = vrot.slane %v1108_v13, 7  ;;  %v592_v39 = vadd.f32 %v11699_v48, %v591_v58  ;;  %v3207_v51 = vpop.f32.mrf.mxu2  ;;  %v4732_v9 = vshll.u32 %v11781_v33, 16  ;;  %v245_v27 = vsel %vm11256_vm6, 0, %v244_v4  ;;  %v11801_v24 = vld [vmem:[#allocation2 + $0x14] sm:$0x1] }
 0x1c1   :  { %v11786_v42 = vadd.f32 %v3205_v49, %v2777_v30  ;;  %v2603_v8 = vpack.c.b16 %v2558_v17, %v2557_v18  ;;  %v6050_v14 = vrot.slane %v11781_v33, 5  ;;  %v2214_v5 = vor.u32 %v2213_v54, %v2210_v52  ;;  %246 = vst [vmem:[#allocation2 + $0x128] sm:$0x1] %v245_v27 }
 0x1c2   :  { %v1113_v59 = vor.u32 %v1111_v26, %v11783_v35  ;;  %v693_v1 = vmax.f32 %v592_v39, 0.0  ;;  %v11803_v26 = vrot.slane %v4723_v47, 4  ;;  %v11805_v58 = vrot.slane %v4726_v7, 5  ;;  %v1564_v47 = vld [vmem:[#allocation2 + $0x110] sm:$0x1] }
 0x1c3   :  { %15145 = vst [vmem:[#allocation18_spill] sm:$0xff] %v11786_v42  ;;  %10104 = vmatmul.msk.bf16.gmra.mxu1 %vm2617_vm8, %v2603_v8  ;;  %v11807_v30 = vrot.slane %v4732_v9, 5  ;;  %v4738_v52 = vrot.slane %v4736_v53, 4  ;;  %v2215_v7 = vrot.slane %v2214_v5, 4  ;;  %v6052_v9 = vrot.slane %v6050_v14, 4 }
 0x1c4   :  { %v1561_v12 = vsel %vm11309_vm14, %v1113_v59, %v1560_v46  ;;  %v757_v34 = vpack.c.bf16 %v693_v1, %v693_v1  ;;  %v10913_v3 = vld [vmem:[#allocation2 + $0xfc] sm:$0xff]  ;;  %v6053_v49 = vrot.slane %v11801_v24, 5 }
 0x1c5   :  { %v1690_v6 = vld [vmem:[#allocation2 + $0x100] sm:$0xf]  ;;  %1562 = vst [vmem:[#allocation2 + $0x108] sm:$0xf] %v1561_v12  ;;  %v1735_v62 = vld [vmem:[#allocation2 + $0x104] sm:$0x1]  ;;  %10265 = vmatmul.msk.bf16.gmra.mxu2 %vm2617_vm8, %v10913_v3 }
 0x1c6   :  { %v2217_v13 = vshll.u32 %v1690_v6, 16  ;;  %v2221_v18 = vshrl.u32 %v1690_v6, 16  ;;  %v1116_v17 = vshrl.u32 %v757_v34, 16  ;;  %v2227_v59 = vshll.u32 %v1735_v62, 16  ;;  %v10930_v3 = vld [vmem:[#allocation2 + $0x3c] sm:$0xff] }
 0x1c7   :  { %v594_v39 = vpop.f32.mrf.mxu0  ;;  %v1119_v1 = vshll.u32 %v757_v34, 16 }
 0x1c8   :  { %v2779_v8 = vpop.f32.mrf.mxu1  ;;  %v2219_v46 = vrot.slane %v2217_v13, 5  ;;  %v2223_v33 = vrot.slane %v2221_v18, 4  ;;  %v1118_v54 = vrot.slane %v1116_v17, 7  ;;  %v595_v4 = vadd.f32 %v11699_v48, %v594_v39  ;;  %v3210_v6 = vpop.f32.mrf.mxu2  ;;  %v137_v17 = vld [vmem:[#allocation2 + $0x12c] sm:$0x1] }
 0x1c9   :  { %v11810_v12 = vadd.f32 %v3207_v51, %v2779_v8  ;;  %v1114_v13 = vrot.slane %v11783_v35, 4  ;;  %v2229_v34 = vrot.slane %v2227_v59, 5  ;;  %v4739_v39 = vor.u32 %v4738_v52, %v11807_v30 }
 0x1ca   :  { %v2224_v15 = vor.u32 %v2223_v33, %v2219_v46  ;;  %v1121_v18 = vor.u32 %v1119_v1, %v1118_v54  ;;  %v1123_v62 = vrot.slane %v1118_v54, 4  ;;  %v694_v27 = vmax.f32 %v595_v4, 0.0  ;;  %10476 = vmatmul.msk.bf16.gmra.mxu0 %vm2617_vm8, %v10930_v3 }
 0x1cb   :  { %15146 = vst [vmem:[#allocation19_spill] sm:$0xff] %v11810_v12  ;;  %v2220_v53 = vsel %vm11282_vm11, %v2215_v7, %v2219_v46  ;;  %v138_v54 = vsel %vm11236_vm3, 0, %v137_v17  ;;  %v4742_v52 = vshll.u32 %v11801_v24, 16  ;;  %v4740_v24 = vrot.slane %v4739_v39, 4 }
 0x1cc   :  { %v2225_v51 = vrot.slane %v2224_v15, 4  ;;  %v1122_v5 = vsel %vm11330_vm5, %v1114_v13, %v1121_v18  ;;  %v1565_v8 = vsel %vm11236_vm3, %v1123_v62, %v1564_v47  ;;  %v758_v35 = vpack.c.bf16 %v694_v27, %v694_v27  ;;  %v1691_v33 = vld [vmem:[#allocation2 + $0x108] sm:$0xf]  ;;  %139 = vst [vmem:[#allocation2 + $0x12c] sm:$0x1] %v138_v54 }
 0x1cd   :  { %1563 = vst.msk [vmem:[#allocation2 + $0x10c] sm:$0xf] %vm44_vm4, %v1122_v5  ;;  %v2232_v46 = vshrl.u32 %v1691_v33, 16  ;;  %v2235_v59 = vshll.u32 %v1691_v33, 16  ;;  %v2559_v4 = vunpack.c.l.b16 %v2220_v53  ;;  %v4729_v47 = vor.u32 %v11805_v58, %v11803_v26  ;;  %v4629_v58 = vld [vmem:[#allocation2 + $0x18] sm:$0xf] }
 0x1ce   :  { %v2230_v15 = vsel %vm11282_vm11, %v2225_v51, %v2229_v34  ;;  %1566 = vst [vmem:[#allocation2 + $0x110] sm:$0x1] %v1565_v8  ;;  %v1125_v1 = vshrl.u32 %v758_v35, 16  ;;  %v1128_v7 = vshll.u32 %v758_v35, 16  ;;  %v15147_v62 = vrot.slane %v11788_v38, 9 }
 0x1cf   :  { %v2560_v3 = vunpack.c.l.b16 %v2230_v15  ;;  %v596_v13 = vpop.f32.mrf.mxu0  ;;  %v6054_v51 = vsel %vm11316_vm15, %v6052_v9, %v6053_v49  ;;  %v1567_v5 = vld [vmem:[#allocation2 + $0x114] sm:$0xf]  ;;  %v2234_v35 = vrot.slane %v2232_v46, 4  ;;  %v2237_v33 = vrot.slane %v2235_v59, 5 }
 0x1d0   :  { %v2782_v18 = vpop.f32.mrf.mxu1  ;;  %v6051_v27 = vsel %vm11316_vm15, %v15147_v62, %v6050_v14  ;;  %v11836_v34 = vrot.slane %v1125_v1, 7  ;;  %v597_v53 = vadd.f32 %v11699_v48, %v596_v13  ;;  %v3212_v8 = vpop.f32.mrf.mxu2  ;;  %v4744_v38 = vrot.slane %v4742_v52, 5  ;;  %v247_v9 = vld [vmem:[#allocation2 + $0x134] sm:$0x1]  ;;  %v11847_v1 = vld [vmem:[#allocation2 + $0x18] sm:$0xe] }
 0x1d1   :  { %v11839_v17 = vadd.f32 %v3210_v6, %v2782_v18  ;;  %v2604_v26 = vpack.c.b16 %v2560_v3, %v2559_v4  ;;  %v6275_v49 = vunpack.c.l.b16 %v6054_v51  ;;  %v6274_v39 = vunpack.c.l.b16 %v6051_v27 }
 0x1d2   :  { %v1130_v54 = vor.u32 %v1128_v7, %v11836_v34  ;;  %v695_v14 = vmax.f32 %v597_v53, 0.0  ;;  %v11843_v15 = vrot.slane %v4729_v47, 4  ;;  %v4745_v6 = vsel %vm11282_vm11, %v4740_v24, %v4744_v38 }
 0x1d3   :  { %15148 = vst [vmem:[#allocation20_spill] sm:$0xff] %v11839_v17  ;;  %10105 = vmatmul.msk.bf16.gmra.mxu1 %vm2617_vm8, %v2604_v26  ;;  %v4747_v4 = vshrl.u32 %v4629_v58, 16  ;;  %v248_v7 = vsel %vm11256_vm6, 0, %v247_v9  ;;  %v4750_v13 = vshll.u32 %v4629_v58, 16  ;;  %v2238_v47 = vor.u32 %v2237_v33, %v2234_v35 }
 0x1d4   :  { %v1568_v46 = vsel %vm11309_vm14, %v1130_v54, %v1567_v5  ;;  %v759_v59 = vpack.c.bf16 %v695_v14, %v695_v14  ;;  %v10914_v52 = vld [vmem:[#allocation2 + $0x108] sm:$0xff]  ;;  %v11854_v24 = vpack.c.b16 %v6275_v49, %v6274_v39  ;;  %v10538_v26 = vrot.slane %v11847_v1, 9  ;;  %249 = vst [vmem:[#allocation2 + $0x134] sm:$0x1] %v248_v7 }
 0x1d5   :  { %v1692_v3 = vld [vmem:[#allocation2 + $0x10c] sm:$0xf]  ;;  %1569 = vst [vmem:[#allocation2 + $0x114] sm:$0xf] %v1568_v46  ;;  %v1736_v18 = vld [vmem:[#allocation2 + $0x110] sm:$0x1]  ;;  %10266 = vmatmul.msk.bf16.gmra.mxu2 %vm2617_vm8, %v10914_v52  ;;  %v11861_v35 = vunpack.c.l.b16 %v4745_v6 }
 0x1d6   :  { %v2241_v62 = vshll.u32 %v1692_v3, 16  ;;  %v2245_v27 = vshrl.u32 %v1692_v3, 16  ;;  %v1133_v51 = vshrl.u32 %v759_v59, 16  ;;  %v2251_v14 = vshll.u32 %v1736_v18, 16  ;;  %v10931_v46 = vld [vmem:[#allocation2 + $0x48] sm:$0xff] }
 0x1d7   :  { %v599_v5 = vpop.f32.mrf.mxu0  ;;  %v1136_v9 = vshll.u32 %v759_v59, 16  ;;  %v4630_v52 = vld [vmem:[#allocation2 + $0x1c] sm:$0xf]  ;;  %v2239_v0 = vrot.slane %v2238_v47, 4  ;;  %v4749_v19 = vrot.slane %v4747_v4, 4  ;;  %v4752_v17 = vrot.slane %v4750_v13, 5 }
 0x1d8   :  { %v2784_v38 = vpop.f32.mrf.mxu1  ;;  %v2243_v58 = vrot.slane %v2241_v62, 5  ;;  %v2247_v54 = vrot.slane %v2245_v27, 4  ;;  %v1135_v33 = vrot.slane %v1133_v51, 7  ;;  %v600_v49 = vadd.f32 %v11699_v48, %v599_v5  ;;  %v1571_v3 = vld [vmem:[#allocation2 + $0x11c] sm:$0x1]  ;;  %v3215_v53 = vpop.f32.mrf.mxu2 }
 0x1d9   :  { %v11864_v39 = vadd.f32 %v3212_v8, %v2784_v38  ;;  %v1131_v62 = vrot.slane %v11836_v34, 4  ;;  %v2253_v27 = vrot.slane %v2251_v14, 5  ;;  %v140_v51 = vld [vmem:[#allocation2 + $0x138] sm:$0x1]  ;;  %v6057_v5 = vrot.slane %v4630_v52, 5 }
 0x1da   :  { %v2248_v1 = vor.u32 %v2247_v54, %v2243_v58  ;;  %v1138_v18 = vor.u32 %v1136_v9, %v1135_v33  ;;  %v1140_v7 = vrot.slane %v1135_v33, 4  ;;  %v696_v6 = vmax.f32 %v600_v49, 0.0  ;;  %10477 = vmatmul.msk.bf16.gmra.mxu0 %vm2617_vm8, %v10931_v46  ;;  %v614_v54 = vpop.f32.mrf.mxu3 }
 0x1db   :  { %15149 = vst [vmem:[#allocation21_spill] sm:$0xff] %v11864_v39  ;;  %v2244_v59 = vsel %vm11282_vm11, %v2239_v0, %v2243_v58  ;;  %v141_v38 = vsel %vm11236_vm3, 0, %v140_v51  ;;  %v4756_v33 = vshll.u32 %v4630_v52, 16 }
 0x1dc   :  { %v2249_v8 = vrot.slane %v2248_v1, 4  ;;  %v1139_v47 = vsel %vm11330_vm5, %v1131_v62, %v1138_v18  ;;  %v1572_v4 = vsel %vm11236_vm3, %v1140_v7, %v1571_v3  ;;  %v760_v13 = vpack.c.bf16 %v696_v6, %v696_v6  ;;  %v1693_v34 = vld [vmem:[#allocation2 + $0x114] sm:$0xf]  ;;  %v11879_v1 = vld [vmem:[#allocation2 + $0x20] sm:$0x1] }
 0x1dd   :  { %1570 = vst.msk [vmem:[#allocation2 + $0x118] sm:$0xf] %vm44_vm4, %v1139_v47  ;;  %v2256_v58 = vshrl.u32 %v1693_v34, 16  ;;  %v2259_v14 = vshll.u32 %v1693_v34, 16  ;;  %v2561_v49 = vunpack.c.l.b16 %v2244_v59  ;;  %v4753_v3 = vor.u32 %v4752_v17, %v4749_v19  ;;  %v1574_v34 = vld [vmem:[#allocation2 + $0x120] sm:$0xf] }
 0x1de   :  { %v2254_v0 = vsel %vm11282_vm11, %v2249_v8, %v2253_v27  ;;  %1573 = vst [vmem:[#allocation2 + $0x11c] sm:$0x1] %v1572_v4  ;;  %v1142_v9 = vshrl.u32 %v760_v13, 16  ;;  %v1145_v62 = vshll.u32 %v760_v13, 16  ;;  %v4760_v47 = vshrl.u32 %v4630_v52, 16 }
 0x1df   :  { %v2562_v46 = vunpack.c.l.b16 %v2254_v0  ;;  %v601_v18 = vpop.f32.mrf.mxu0  ;;  %v2258_v6 = vrot.slane %v2256_v58, 4  ;;  %v2261_v51 = vrot.slane %v2259_v14, 5  ;;  %142 = vst [vmem:[#allocation2 + $0x138] sm:$0x1] %v141_v38  ;;  %v11888_v0 = vsel %vm11316_vm15, %v10538_v26, %v6057_v5  ;;  %v342_v26 = vld [vmem:[#allocation3 + $0x1f0] sm:$0xff] }
 0x1e0   :  { %v2787_v7 = vpop.f32.mrf.mxu1  ;;  %v11881_v39 = vrot.slane %v1142_v9, 7  ;;  %v602_v8 = vadd.f32 %v11699_v48, %v601_v18  ;;  %v3217_v59 = vpop.f32.mrf.mxu2  ;;  %v6059_v19 = vrot.slane %v6057_v5, 4  ;;  %v6060_v17 = vrot.slane %v11879_v1, 5 }
 0x1e1   :  { %v11884_v27 = vadd.f32 %v3215_v53, %v2787_v7  ;;  %v2605_v4 = vpack.c.b16 %v2562_v46, %v2561_v49  ;;  %v11891_v13 = vrot.slane %v4756_v33, 5  ;;  %v2262_v58 = vor.u32 %v2261_v51, %v2258_v6  ;;  %v250_v49 = vld [vmem:[#allocation2 + $0x140] sm:$0x1]  ;;  %v343_v46 = vld [vmem:[#allocation3 + $0x1f8] sm:$0xff] }
 0x1e2   :  { %v1147_v52 = vor.u32 %v1145_v62, %v11881_v39  ;;  %v697_v38 = vmax.f32 %v602_v8, 0.0  ;;  %v11895_v53 = vrot.slane %v4753_v3, 4  ;;  %v1148_v14 = vrot.slane %v11881_v39, 4  ;;  %v616_v6 = vpop.f32.mrf.mxu3 }
 0x1e3   :  { %15150 = vst [vmem:[#allocation22_spill] sm:$0xff] %v11884_v27  ;;  %10106 = vmatmul.msk.bf16.gmra.mxu1 %vm2617_vm8, %v2605_v4  ;;  %v615_v9 = vadd.f32 %v11699_v48, %v614_v54  ;;  %v15151_v5 = vsel %vm11282_vm11, %v11843_v15, %v11807_v30  ;;  %v11906_v62 = vrot.slane %v4760_v47, 4  ;;  %v251_v54 = vsel %vm11256_vm6, 0, %v250_v49 }
 0x1e4   :  { %v11904_v33 = vunpack.c.l.b16 %v15151_v5  ;;  %v1575_v3 = vsel %vm11309_vm14, %v1147_v52, %v1574_v34  ;;  %v761_v18 = vpack.c.bf16 %v697_v38, %v697_v38  ;;  %v10915_v7 = vld [vmem:[#allocation2 + $0x114] sm:$0xff]  ;;  %v375_v51 = vpack.c.bf16 %v343_v46, %v342_v26  ;;  %252 = vst [vmem:[#allocation2 + $0x140] sm:$0x1] %v251_v54 }
 0x1e5   :  { %v1694_v39 = vld [vmem:[#allocation2 + $0x118] sm:$0xf]  ;;  %1576 = vst [vmem:[#allocation2 + $0x120] sm:$0xf] %v1575_v3  ;;  %v1737_v8 = vld [vmem:[#allocation2 + $0x11c] sm:$0x1]  ;;  %10267 = vmatmul.msk.bf16.gmra.mxu2 %vm2617_vm8, %v10915_v7  ;;  %v11920_v30 = vsel %vm11316_vm15, %v6059_v19, %v6060_v17 }
 0x1e6   :  { %v2265_v4 = vshll.u32 %v1694_v39, 16  ;;  %v2269_v27 = vshrl.u32 %v1694_v39, 16  ;;  %v1150_v47 = vshrl.u32 %v761_v18, 16  ;;  %v2263_v34 = vrot.slane %v2262_v58, 4  ;;  %10084 = vmatmul.msk.bf16.gmra.mxu3 %vm388_vm0, %v375_v51  ;;  %v143_v3 = vld [vmem:[#allocation2 + $0x144] sm:$0x1] }
 0x1e7   :  { %v2275_v52 = vshll.u32 %v1737_v8, 16  ;;  %v702_v38 = vmax.f32 %v615_v9, 0.0  ;;  %v604_v49 = vpop.f32.mrf.mxu0  ;;  %v617_v39 = vadd.f32 %v11699_v48, %v616_v6  ;;  %v1153_v12 = vshll.u32 %v761_v18, 16  ;;  %v10932_v9 = vld [vmem:[#allocation2 + $0x54] sm:$0xff]  ;;  %v1578_v51 = vld [vmem:[#allocation2 + $0x128] sm:$0x1] }
 0x1e8   :  { %v2789_v5 = vpop.f32.mrf.mxu1  ;;  %v2267_v26 = vrot.slane %v2265_v4, 5  ;;  %v2271_v46 = vrot.slane %v2269_v27, 4  ;;  %v1152_v15 = vrot.slane %v1150_v47, 7  ;;  %v605_v58 = vadd.f32 %v11699_v48, %v604_v49  ;;  %v3220_v8 = vpop.f32.mrf.mxu2  ;;  %v253_v6 = vld [vmem:[#allocation2 + $0x14c] sm:$0x1] }
 0x1e9   :  { %v11923_v7 = vadd.f32 %v3217_v59, %v2789_v5  ;;  %v2277_v4 = vrot.slane %v2275_v52, 5  ;;  %v144_v27 = vsel %vm11236_vm3, 0, %v143_v3  ;;  %v766_v54 = vpack.c.bf16 %v702_v38, %v702_v38 }
 0x1ea   :  { %v2272_v42 = vor.u32 %v2271_v46, %v2267_v26  ;;  %v1155_v43 = vor.u32 %v1153_v12, %v1152_v15  ;;  %v1157_v45 = vrot.slane %v1152_v15, 4  ;;  %v698_v19 = vmax.f32 %v605_v58, 0.0  ;;  %10478 = vmatmul.msk.bf16.gmra.mxu0 %vm2617_vm8, %v10932_v9  ;;  %145 = vst [vmem:[#allocation2 + $0x144] sm:$0x1] %v144_v27  ;;  %v619_v46 = vpop.f32.mrf.mxu3  ;;  %v15423_v20 = vld [vmem:[#allocation22_spill] sm:$0xff] }
 0x1eb   :  { %15152 = vst [vmem:[#allocation23_spill] sm:$0xff] %v11923_v7  ;;  %v2268_v17 = vsel %vm11282_vm11, %v2263_v34, %v2267_v26  ;;  %v1193_v18 = vshrl.u32 %v766_v54, 16  ;;  %v1196_v47 = vshll.u32 %v766_v54, 16  ;;  %v254_v52 = vsel %vm11256_vm6, 0, %v253_v6 }
 0x1ec   :  { %v2273_v59 = vrot.slane %v2272_v42, 4  ;;  %v1156_v49 = vsel %vm11330_vm5, %v1148_v14, %v1155_v43  ;;  %v1579_v12 = vsel %vm11236_vm3, %v1157_v45, %v1578_v51  ;;  %v762_v15 = vpack.c.bf16 %v698_v19, %v698_v19  ;;  %255 = vst [vmem:[#allocation2 + $0x14c] sm:$0x1] %v254_v52  ;;  %v1695_v5 = vld [vmem:[#allocation2 + $0x120] sm:$0xf] }
 0x1ed   :  { %v703_v38 = vmax.f32 %v617_v39, 0.0  ;;  %1577 = vst.msk [vmem:[#allocation2 + $0x124] sm:$0xf] %vm44_vm4, %v1156_v49  ;;  %v1195_v34 = vrot.slane %v1193_v18, 7  ;;  %v2280_v26 = vshrl.u32 %v1695_v5, 16  ;;  %v2283_v3 = vshll.u32 %v1695_v5, 16 }
 0x1ee   :  { %v2278_v42 = vsel %vm11282_vm11, %v2273_v59, %v2277_v4  ;;  %1580 = vst [vmem:[#allocation2 + $0x128] sm:$0x1] %v1579_v12  ;;  %v1159_v58 = vshrl.u32 %v762_v15, 16  ;;  %v2563_v9 = vunpack.c.l.b16 %v2268_v17  ;;  %v1162_v27 = vshll.u32 %v762_v15, 16  ;;  %v146_v19 = vld [vmem:[#allocation2 + $0x150] sm:$0x1] }
 0x1ef   :  { %v2564_v43 = vunpack.c.l.b16 %v2278_v42  ;;  %v767_v14 = vpack.c.bf16 %v703_v38, %v703_v38  ;;  %v606_v45 = vpop.f32.mrf.mxu0  ;;  %v1198_v54 = vor.u32 %v1196_v47, %v1195_v34  ;;  %v2282_v39 = vrot.slane %v2280_v26, 4  ;;  %v1581_v49 = vld [vmem:[#allocation2 + $0x12c] sm:$0xf]  ;;  %v256_v12 = vld [vmem:[#allocation2 + $0x158] sm:$0x1] }
 0x1f0   :  { %v2792_v51 = vpop.f32.mrf.mxu1  ;;  %v2285_v6 = vrot.slane %v2283_v3, 5  ;;  %v11939_v52 = vrot.slane %v1159_v58, 7  ;;  %v607_v4 = vadd.f32 %v11699_v48, %v606_v45  ;;  %v3222_v5 = vpop.f32.mrf.mxu2  ;;  %v147_v47 = vsel %vm11236_vm3, 0, %v146_v19 }
 0x1f1   :  { %v11942_v59 = vadd.f32 %v3220_v8, %v2792_v51  ;;  %v2606_v18 = vpack.c.b16 %v2564_v43, %v2563_v9  ;;  %v1595_v17 = vld [vmem:[#allocation2 + $0x144] sm:$0xf]  ;;  %v1201_v42 = vshrl.u32 %v767_v14, 16  ;;  %v1204_v38 = vshll.u32 %v767_v14, 16  ;;  %148 = vst [vmem:[#allocation2 + $0x150] sm:$0x1] %v147_v47 }
 0x1f2   :  { %v2286_v15 = vor.u32 %v2285_v6, %v2282_v39  ;;  %v1164_v26 = vor.u32 %v1162_v27, %v11939_v52  ;;  %v699_v3 = vmax.f32 %v607_v4, 0.0  ;;  %v1596_v58 = vsel %vm11309_vm14, %v1198_v54, %v1595_v17 }
 0x1f3   :  { %15153 = vst [vmem:[#allocation24_spill] sm:$0xff] %v11942_v59  ;;  %10107 = vmatmul.msk.bf16.gmra.mxu1 %vm2617_vm8, %v2606_v18  ;;  %v1199_v9 = vrot.slane %v1195_v34, 4  ;;  %v1203_v43 = vrot.slane %v1201_v42, 7  ;;  %v1599_v45 = vld [vmem:[#allocation2 + $0x14c] sm:$0x1]  ;;  %v620_v14 = vadd.f32 %v11699_v48, %v619_v46  ;;  %v257_v54 = vsel %vm11256_vm6, 0, %v256_v12  ;;  %v621_v18 = vpop.f32.mrf.mxu3 }
 0x1f4   :  { %1597 = vst [vmem:[#allocation2 + $0x144] sm:$0xf] %v1596_v58  ;;  %v1582_v27 = vsel %vm11309_vm14, %v1164_v26, %v1581_v49  ;;  %v763_v39 = vpack.c.bf16 %v699_v3, %v699_v3  ;;  %v10916_v6 = vld [vmem:[#allocation2 + $0x120] sm:$0xff]  ;;  %v2287_v4 = vrot.slane %v2286_v15, 4  ;;  %v622_v46 = vadd.f32 %v11699_v48, %v621_v18  ;;  %v1585_v18 = vld [vmem:[#allocation2 + $0x134] sm:$0x1] }
 0x1f5   :  { %v1696_v19 = vld [vmem:[#allocation2 + $0x124] sm:$0xf]  ;;  %1583 = vst [vmem:[#allocation2 + $0x12c] sm:$0xf] %v1582_v27  ;;  %v1206_v34 = vor.u32 %v1204_v38, %v1203_v43  ;;  %v1208_v17 = vrot.slane %v1203_v43, 4  ;;  %10268 = vmatmul.msk.bf16.gmra.mxu2 %vm2617_vm8, %v10916_v6  ;;  %v704_v27 = vmax.f32 %v620_v14, 0.0 }
 0x1f6   :  { %v1738_v42 = vld [vmem:[#allocation2 + $0x128] sm:$0x1]  ;;  %v2289_v47 = vshll.u32 %v1696_v19, 16  ;;  %v1167_v58 = vshrl.u32 %v763_v39, 16  ;;  %v1170_v8 = vshll.u32 %v763_v39, 16  ;;  %v2293_v49 = vshrl.u32 %v1696_v19, 16 }
 0x1f7   :  { %v2299_v26 = vshll.u32 %v1738_v42, 16  ;;  %258 = vst [vmem:[#allocation2 + $0x158] sm:$0x1] %v257_v54  ;;  %v609_v3 = vpop.f32.mrf.mxu0  ;;  %v1207_v12 = vsel %vm11330_vm5, %v1199_v9, %v1206_v34  ;;  %v1600_v38 = vsel %vm11236_vm3, %v1208_v17, %v1599_v45  ;;  %v11966_v48 = vld [vmem:[%s15109_s2] ss:$0 sm:$0xff]  ;;  %v1165_v9 = vrot.slane %v11939_v52, 4 }
 0x1f8   :  { %v2794_v15 = vpop.f32.mrf.mxu1  ;;  %v2291_v43 = vrot.slane %v2289_v47, 5  ;;  %v1169_v51 = vrot.slane %v1167_v58, 7  ;;  %v610_v39 = vadd.f32 %v11966_v48, %v609_v3  ;;  %v10933_v19 = vld [vmem:[#allocation2 + $0x60] sm:$0xff]  ;;  %1598 = vst.msk [vmem:[#allocation2 + $0x148] sm:$0xf] %vm44_vm4, %v1207_v12  ;;  %v2295_v54 = vrot.slane %v2293_v49, 4  ;;  %v3225_v45 = vpop.f32.mrf.mxu2 }
 0x1f9   :  { %v11969_v6 = vadd.f32 %v3222_v5, %v2794_v15  ;;  %1601 = vst [vmem:[#allocation2 + $0x14c] sm:$0x1] %v1600_v38  ;;  %v768_v34 = vpack.c.bf16 %v704_v27, %v704_v27  ;;  %v705_v17 = vmax.f32 %v622_v46, 0.0  ;;  %v2301_v3 = vrot.slane %v2299_v26, 5  ;;  %v1602_v27 = vld [vmem:[#allocation2 + $0x150] sm:$0xf] }
 0x1fa   :  { %v2292_v14 = vsel %vm11282_vm11, %v2287_v4, %v2291_v43  ;;  %v1172_v42 = vor.u32 %v1170_v8, %v1169_v51  ;;  %v1174_v47 = vrot.slane %v1169_v51, 4  ;;  %v700_v58 = vmax.f32 %v610_v39, 0.0  ;;  %10479 = vmatmul.msk.bf16.gmra.mxu0 %vm2617_vm8, %v10933_v19 }
 0x1fb   :  { %15154 = vst [vmem:[#allocation25_spill] sm:$0xff] %v11969_v6  ;;  %v2296_v5 = vor.u32 %v2295_v54, %v2291_v43  ;;  %v1210_v15 = vshrl.u32 %v768_v34, 16  ;;  %v1213_v12 = vshll.u32 %v768_v34, 16  ;;  %v769_v49 = vpack.c.bf16 %v705_v17, %v705_v17  ;;  %v624_v8 = vpop.f32.mrf.mxu3 }
 0x1fc   :  { %v1173_v52 = vsel %vm11330_vm5, %v1165_v9, %v1172_v42  ;;  %v1586_v38 = vsel %vm11236_vm3, %v1174_v47, %v1585_v18  ;;  %v764_v6 = vpack.c.bf16 %v700_v58, %v700_v58  ;;  %v1697_v46 = vld [vmem:[#allocation2 + $0x12c] sm:$0xf]  ;;  %v2565_v51 = vunpack.c.l.b16 %v2292_v14  ;;  %v10569_v14 = vld [vmem:[%s15110_s3 + $0xa] sm:$0x3] }
 0x1fd   :  { %v2297_v4 = vrot.slane %v2296_v5, 4  ;;  %1584 = vst.msk [vmem:[#allocation2 + $0x130] sm:$0xf] %vm44_vm4, %v1173_v52  ;;  %v1212_v39 = vrot.slane %v1210_v15, 7  ;;  %v1218_v43 = vshrl.u32 %v769_v49, 16  ;;  %v1221_v26 = vshll.u32 %v769_v49, 16 }
 0x1fe   :  { %1587 = vst [vmem:[#allocation2 + $0x134] sm:$0x1] %v1586_v38  ;;  %v1176_v19 = vshrl.u32 %v764_v6, 16  ;;  %v1179_v54 = vshll.u32 %v764_v6, 16  ;;  %v2304_v34 = vshrl.u32 %v1697_v46, 16 }
 0x1ff   :  { %v2302_v9 = vsel %vm11282_vm11, %v2297_v4, %v2301_v3  ;;  %v611_v17 = vpop.f32.mrf.mxu0  ;;  %v1215_v47 = vor.u32 %v1213_v12, %v1212_v39  ;;  %v1216_v58 = vrot.slane %v1212_v39, 4  ;;  %v1220_v5 = vrot.slane %v1218_v43, 7  ;;  %v1606_v6 = vld [vmem:[#allocation2 + $0x158] sm:$0x1]  ;;  %v149_v38 = vld [vmem:[#allocation2 + $0x15c] sm:$0x1] }
 0x200   :  { %v2797_v18 = vpop.f32.mrf.mxu1  ;;  %v2566_v42 = vunpack.c.l.b16 %v2302_v9  ;;  %v11986_v15 = vrot.slane %v1176_v19, 7  ;;  %v612_v49 = vadd.f32 %v11966_v48, %v611_v17  ;;  %v625_v3 = vadd.f32 %v11966_v48, %v624_v8  ;;  %v1588_v4 = vld [vmem:[#allocation2 + $0x138] sm:$0xf]  ;;  %v3227_v9 = vpop.f32.mrf.mxu2 }
 0x201   :  { %v11989_v52 = vadd.f32 %v3225_v45, %v2797_v18  ;;  %v1603_v12 = vsel %vm11309_vm14, %v1215_v47, %v1602_v27  ;;  %v1223_v39 = vor.u32 %v1221_v26, %v1220_v5  ;;  %v1225_v43 = vrot.slane %v1220_v5, 4  ;;  %v259_v26 = vld [vmem:[#allocation2 + $0x164] sm:$0x1] }
 0x202   :  { %v2607_v59 = vpack.c.b16 %v2566_v42, %v2565_v51  ;;  %v1181_v7 = vor.u32 %v1179_v54, %v11986_v15  ;;  %v701_v19 = vmax.f32 %v612_v49, 0.0  ;;  %1604 = vst [vmem:[#allocation2 + $0x150] sm:$0xf] %v1603_v12  ;;  %v2306_v55 = vrot.slane %v2304_v34, 4  ;;  %v12003_v18 = vld [vmem:[#allocation2 + $0x24] sm:$0xf] }
 0x203   :  { %15155 = vst [vmem:[#allocation26_spill] sm:$0xff] %v11989_v52  ;;  %v2307_v17 = vshll.u32 %v1697_v46, 16  ;;  %v1224_v45 = vsel %vm11330_vm5, %v1216_v58, %v1223_v39  ;;  %v1607_v8 = vsel %vm11236_vm3, %v1225_v43, %v1606_v6  ;;  %v6467_v51 = vsel %vm2714_vm7, %v10569_v14, 0  ;;  %v626_v47 = vpop.f32.mrf.mxu3  ;;  %v155_v52 = vld [vmem:[#allocation2 + $0x174] sm:$0x1] }
 0x204   :  { %10108 = vmatmul.msk.bf16.gmra.mxu1 %vm2617_vm8, %v2607_v59  ;;  %v150_v27 = vsel %vm11236_vm3, 0, %v149_v38  ;;  %v1589_v54 = vsel %vm11309_vm14, %v1181_v7, %v1588_v4  ;;  %v765_v46 = vpack.c.bf16 %v701_v19, %v701_v19  ;;  %v10917_v34 = vld [vmem:[#allocation2 + $0x12c] sm:$0xff]  ;;  %1605 = vst.msk [vmem:[#allocation2 + $0x154] sm:$0xf] %vm44_vm4, %v1224_v45  ;;  %6476 = vmatpush.bf16.msrb.mxu2 %v6467_v51  ;;  %v15156_v58 = vunpack.c.l.b16 %v11888_v0 }
 0x205   :  { %v1698_v59 = vld [vmem:[#allocation2 + $0x130] sm:$0xf]  ;;  %v2309_v42 = vrot.slane %v2307_v17, 5  ;;  %v15157_v5 = vunpack.c.l.b16 %v11920_v30  ;;  %1590 = vst [vmem:[#allocation2 + $0x138] sm:$0xf] %v1589_v54  ;;  %v627_v7 = vadd.f32 %v11966_v48, %v626_v47  ;;  %v4763_v4 = vor.u32 %v11906_v62, %v11891_v13  ;;  %10269 = vmatmul.msk.bf16.gmra.mxu2 %vm2617_vm8, %v10917_v34 }
 0x206   :  { %v1739_v49 = vld [vmem:[#allocation2 + $0x134] sm:$0x1]  ;;  %v2313_v6 = vshll.u32 %v1698_v59, 16  ;;  %v2317_v38 = vshrl.u32 %v1698_v59, 16  ;;  %v1184_v12 = vshrl.u32 %v765_v46, 16  ;;  %v4771_v0 = vshrl.u32 %v12003_v18, 16 }
 0x207   :  { %v12012_v14 = vpack.c.b16 %v15157_v5, %v15156_v58  ;;  %1608 = vst [vmem:[#allocation2 + $0x158] sm:$0x1] %v1607_v8  ;;  %v2310_v39 = vor.u32 %v2309_v42, %v2306_v55  ;;  %v2323_v43 = vshll.u32 %v1739_v49, 16  ;;  %v12019_v19 = vpop.f32.mrf.mxu0  ;;  %v706_v51 = vmax.f32 %v625_v3, 0.0  ;;  %v10934_v34 = vld [vmem:[#allocation2 + $0x6c] sm:$0xff] }
 0x208   :  { %v2799_v30 = vpop.f32.mrf.mxu1  ;;  %15158 = vst [vmem:[#allocation27_spill] sm:$0xff] %v12019_v19  ;;  %v2315_v17 = vrot.slane %v2313_v6, 5  ;;  %v2319_v45 = vrot.slane %v2317_v38, 4  ;;  %v260_v54 = vsel %vm11256_vm6, 0, %v259_v26  ;;  %v1186_v59 = vrot.slane %v1184_v12, 7  ;;  %v3230_v58 = vpop.f32.mrf.mxu2 }
 0x209   :  { %151 = vst [vmem:[#allocation2 + $0x15c] sm:$0x1] %v150_v27  ;;  %v1187_v62 = vshll.u32 %v765_v46, 16  ;;  %v12023_v47 = vadd.f32 %v3227_v9, %v2799_v30  ;;  %v2311_v8 = vrot.slane %v2310_v39, 4  ;;  %v1182_v55 = vrot.slane %v11986_v15, 4 }
 0x20a   :  { %261 = vst [vmem:[#allocation2 + $0x164] sm:$0x1] %v260_v54  ;;  %v1592_v42 = vld [vmem:[#allocation2 + $0x140] sm:$0x1]  ;;  %v2320_v5 = vor.u32 %v2319_v45, %v2315_v17  ;;  %v770_v49 = vpack.c.bf16 %v706_v51, %v706_v51  ;;  %v707_v6 = vmax.f32 %v627_v7, 0.0  ;;  %v1191_v3 = vrot.slane %v1186_v59, 4  ;;  %10480 = vmatmul.msk.bf16.gmra.mxu0 %vm2617_vm8, %v10934_v34 }
 0x20b   :  { %15159 = vst [vmem:[#allocation28_spill] sm:$0xff] %v12023_v47  ;;  %v152_v38 = vld [vmem:[#allocation2 + $0x168] sm:$0x1]  ;;  %v1189_v27 = vor.u32 %v1187_v62, %v1186_v59  ;;  %v2316_v26 = vsel %vm11282_vm11, %v2311_v8, %v2315_v17  ;;  %v2325_v12 = vrot.slane %v2323_v43, 5  ;;  %v629_v59 = vpop.f32.mrf.mxu3 }
 0x20c   :  { %v153_v9 = vsel %vm11236_vm3, 0, %v152_v38  ;;  %v2321_v46 = vrot.slane %v2320_v5, 4  ;;  %v1227_v39 = vshrl.u32 %v770_v49, 16  ;;  %v1230_v15 = vshll.u32 %v770_v49, 16  ;;  %v1699_v54 = vld [vmem:[#allocation2 + $0x138] sm:$0xf] }
 0x20d   :  { %154 = vst [vmem:[#allocation2 + $0x168] sm:$0x1] %v153_v9  ;;  %v1190_v30 = vsel %vm11330_vm5, %v1182_v55, %v1189_v27  ;;  %v1593_v7 = vsel %vm11236_vm3, %v1191_v3, %v1592_v42  ;;  %v2567_v45 = vunpack.c.l.b16 %v2316_v26  ;;  %v771_v51 = vpack.c.bf16 %v707_v6, %v707_v6 }
 0x20e   :  { %1591 = vst.msk [vmem:[#allocation2 + $0x13c] sm:$0xf] %vm44_vm4, %v1190_v30  ;;  %v2326_v17 = vsel %vm11282_vm11, %v2321_v46, %v2325_v12  ;;  %v1229_v62 = vrot.slane %v1227_v39, 7  ;;  %v2328_v43 = vshrl.u32 %v1699_v54, 16  ;;  %v2331_v34 = vshll.u32 %v1699_v54, 16 }
 0x20f   :  { %1594 = vst [vmem:[#allocation2 + $0x140] sm:$0x1] %v1593_v7  ;;  %v2568_v8 = vunpack.c.l.b16 %v2326_v17  ;;  %v1235_v49 = vshrl.u32 %v771_v51, 16  ;;  %v1238_v55 = vshll.u32 %v771_v51, 16  ;;  %v630_v38 = vadd.f32 %v11966_v48, %v629_v59  ;;  %v12039_v27 = vpop.f32.mrf.mxu0  ;;  %v262_v54 = vld [vmem:[#allocation2 + $0x170] sm:$0x1] }
 0x210   :  { %v1609_v5 = vld [vmem:[#allocation2 + $0x15c] sm:$0xf]  ;;  %v2802_v42 = vpop.f32.mrf.mxu1  ;;  %15160 = vst [vmem:[#allocation29_spill] sm:$0xff] %v12039_v27  ;;  %v1232_v6 = vor.u32 %v1230_v15, %v1229_v62  ;;  %v1233_v3 = vrot.slane %v1229_v62, 4  ;;  %v12041_v26 = vrot.slane %v4763_v4, 4  ;;  %v15161_v9 = vshll.u32 %v11879_v1, 16  ;;  %v3232_v59 = vpop.f32.mrf.mxu2 }
 0x211   :  { %v12047_v12 = vadd.f32 %v3230_v58, %v2802_v42  ;;  %v2608_v39 = vpack.c.b16 %v2568_v8, %v2567_v45  ;;  %v1237_v30 = vrot.slane %v1235_v49, 7  ;;  %v708_v7 = vmax.f32 %v630_v38, 0.0  ;;  %v12049_v51 = vld [vmem:[#allocation2 + $0x28] sm:$0xf]  ;;  %v1613_v15 = vld [vmem:[#allocation2 + $0x164] sm:$0x1] }
 0x212   :  { %v12045_v46 = vrot.slane %v15161_v9, 5  ;;  %v1610_v17 = vsel %vm11309_vm14, %v1232_v6, %v1609_v5  ;;  %v2330_v62 = vrot.slane %v2328_v43, 4  ;;  %v2333_v4 = vrot.slane %v2331_v34, 5  ;;  %v1701_v8 = vld [vmem:[#allocation2 + $0x144] sm:$0xf] }
 0x213   :  { %15162 = vst [vmem:[#allocation30_spill] sm:$0xff] %v12047_v12  ;;  %v263_v1 = vsel %vm11256_vm6, 0, %v262_v54  ;;  %v1240_v9 = vor.u32 %v1238_v55, %v1237_v30  ;;  %v1242_v58 = vrot.slane %v1237_v30, 4  ;;  %v772_v42 = vpack.c.bf16 %v708_v7, %v708_v7  ;;  %v631_v30 = vpop.f32.mrf.mxu3  ;;  %v1702_v7 = vld [vmem:[#allocation2 + $0x148] sm:$0xf] }
 0x214   :  { %1611 = vst [vmem:[#allocation2 + $0x15c] sm:$0xf] %v1610_v17  ;;  %v12057_v45 = vrot.slane %v4771_v0, 4  ;;  %10109 = vmatmul.msk.bf16.gmra.mxu1 %vm2617_vm8, %v2608_v39  ;;  %v4774_v5 = vshll.u32 %v12003_v18, 16  ;;  %v4780_v49 = vshll.u32 %v12049_v51, 16  ;;  %v2334_v17 = vor.u32 %v2333_v4, %v2330_v62 }
 0x215   :  { %264 = vst [vmem:[#allocation2 + $0x170] sm:$0x1] %v263_v1  ;;  %v1241_v0 = vsel %vm11330_vm5, %v1233_v3, %v1240_v9  ;;  %v1614_v55 = vsel %vm11236_vm3, %v1242_v58, %v1613_v15  ;;  %v1700_v38 = vld [vmem:[#allocation2 + $0x13c] sm:$0xf]  ;;  %v1244_v6 = vshrl.u32 %v772_v42, 16  ;;  %v1247_v39 = vshll.u32 %v772_v42, 16  ;;  %10570 = vmatmul.msk.bf16.vlgmr.msrb.gmra.mxu2 %vm2617_vm8, %v11854_v24 }
 0x216   :  { %1612 = vst.msk [vmem:[#allocation2 + $0x160] sm:$0xf] %vm44_vm4, %v1241_v0  ;;  %v1740_v54 = vld [vmem:[#allocation2 + $0x140] sm:$0x1]  ;;  %v2337_v1 = vshll.u32 %v1700_v38, 16  ;;  %v2341_v34 = vshrl.u32 %v1700_v38, 16  ;;  %v632_v18 = vadd.f32 %v11966_v48, %v631_v30 }
 0x217   :  { %1615 = vst [vmem:[#allocation2 + $0x164] sm:$0x1] %v1614_v55  ;;  %v2347_v3 = vshll.u32 %v1740_v54, 16  ;;  %v12078_v9 = vrot.slane %v1244_v6, 7  ;;  %v2352_v15 = vshrl.u32 %v1701_v8, 16  ;;  %v2355_v58 = vshll.u32 %v1701_v8, 16  ;;  %v12080_v43 = vpop.f32.mrf.mxu0 }
 0x218   :  { %v2804_v42 = vpop.f32.mrf.mxu1  ;;  %15163 = vst [vmem:[#allocation31_spill] sm:$0xff] %v12080_v43  ;;  %v2339_v27 = vrot.slane %v2337_v1, 5  ;;  %v2343_v0 = vrot.slane %v2341_v34, 4  ;;  %v1616_v19 = vld [vmem:[#allocation2 + $0x168] sm:$0xf]  ;;  %v709_v62 = vmax.f32 %v632_v18, 0.0  ;;  %v3235_v6 = vpop.f32.mrf.mxu2 }
 0x219   :  { %v12082_v4 = vrot.slane %v4774_v5, 5  ;;  %v12084_v38 = vadd.f32 %v3232_v59, %v2804_v42  ;;  %v10935_v30 = vld [vmem:[#allocation2 + $0x78] sm:$0xff]  ;;  %v1249_v24 = vor.u32 %v1247_v39, %v12078_v9  ;;  %v2361_v55 = vshll.u32 %v1702_v7, 16 }
 0x21a   :  { %v2365_v54 = vshrl.u32 %v1702_v7, 16  ;;  %v2335_v12 = vrot.slane %v2334_v17, 4  ;;  %v2344_v47 = vor.u32 %v2343_v0, %v2339_v27  ;;  %v773_v8 = vpack.c.bf16 %v709_v62, %v709_v62  ;;  %10481 = vmatmul.msk.bf16.gmra.mxu0 %vm2617_vm8, %v10935_v30 }
 0x21b   :  { %15164 = vst [vmem:[#allocation32_spill] sm:$0xff] %v12084_v38  ;;  %v4784_v43 = vshrl.u32 %v12049_v51, 16  ;;  %v2349_v34 = vrot.slane %v2347_v3, 5  ;;  %v1617_v5 = vsel %vm11309_vm14, %v1249_v24, %v1616_v19  ;;  %v2354_v59 = vrot.slane %v2352_v15, 4  ;;  %v634_v30 = vpop.f32.mrf.mxu3 }
 0x21c   :  { %v2357_v1 = vrot.slane %v2355_v58, 5  ;;  %v2340_v39 = vsel %vm11282_vm11, %v2335_v12, %v2339_v27  ;;  %v2345_v18 = vrot.slane %v2344_v47, 4  ;;  %1618 = vst [vmem:[#allocation2 + $0x168] sm:$0xf] %v1617_v5  ;;  %v1252_v7 = vshrl.u32 %v773_v8, 16 }
 0x21d   :  { %v1255_v17 = vshll.u32 %v773_v8, 16  ;;  %v12093_v42 = vrot.slane %v2361_v55, 5  ;;  %v2367_v0 = vrot.slane %v2365_v54, 4  ;;  %v156_v62 = vsel %vm11236_vm3, 0, %v155_v52  ;;  %v1741_v27 = vld [vmem:[#allocation2 + $0x14c] sm:$0x1] }
 0x21e   :  { %v12097_v3 = vrot.slane %v4780_v49, 5  ;;  %v2350_v19 = vsel %vm11282_vm11, %v2345_v18, %v2349_v34  ;;  %v1250_v15 = vrot.slane %v12078_v9, 4  ;;  %v1254_v58 = vrot.slane %v1252_v7, 7  ;;  %157 = vst [vmem:[#allocation2 + $0x174] sm:$0x1] %v156_v62 }
 0x21f   :  { %v635_v47 = vadd.f32 %v11966_v48, %v634_v30  ;;  %v2569_v12 = vunpack.c.l.b16 %v2340_v39  ;;  %v2570_v24 = vunpack.c.l.b16 %v2350_v19  ;;  %v1620_v55 = vld [vmem:[#allocation2 + $0x170] sm:$0x1]  ;;  %v2358_v54 = vor.u32 %v2357_v1, %v2354_v59  ;;  %v12103_v52 = vpop.f32.mrf.mxu0  ;;  %v5922_v30 = vld [vmem:[#allocation2 + $0x24] sm:$0xe]  ;;  %v265_v19 = vld [vmem:[#allocation2 + $0x17c] sm:$0x1] }
 0x220   :  { %v4786_v8 = vrot.slane %v4784_v43, 4  ;;  %v2807_v5 = vpop.f32.mrf.mxu1  ;;  %15165 = vst [vmem:[#allocation33_spill] sm:$0xff] %v12103_v52  ;;  %v1257_v49 = vor.u32 %v1255_v17, %v1254_v58  ;;  %v1259_v38 = vrot.slane %v1254_v58, 4  ;;  %v6064_v34 = vrot.slane %v12049_v51, 5  ;;  %v3237_v59 = vpop.f32.mrf.mxu2 }
 0x221   :  { %v710_v9 = vmax.f32 %v635_v47, 0.0  ;;  %v12108_v18 = vadd.f32 %v3235_v6, %v2807_v5  ;;  %v2609_v7 = vpack.c.b16 %v2570_v24, %v2569_v12  ;;  %v2368_v62 = vor.u32 %v2367_v0, %v12093_v42 }
 0x222   :  { %v2371_v39 = vshll.u32 %v1741_v27, 16  ;;  %v1258_v43 = vsel %vm11330_vm5, %v1250_v15, %v1257_v49  ;;  %v1621_v1 = vsel %vm11236_vm3, %v1259_v38, %v1620_v55  ;;  %v4777_v51 = vor.u32 %v12082_v4, %v12057_v45 }
 0x223   :  { %15166 = vst [vmem:[#allocation34_spill] sm:$0xff] %v12108_v18  ;;  %v774_v17 = vpack.c.bf16 %v710_v9, %v710_v9  ;;  %10110 = vmatmul.msk.bf16.vlgmr.msrb.gmra.mxu3 %vm2617_vm8, %v2609_v7  ;;  %v2359_v6 = vrot.slane %v2358_v54, 4  ;;  %v266_v0 = vsel %vm11256_vm6, 0, %v265_v19  ;;  %v4787_v58 = vor.u32 %v4786_v8, %v12097_v3  ;;  %v1703_v8 = vld [vmem:[#allocation2 + $0x150] sm:$0xf] }
 0x224   :  { %1619 = vst.msk [vmem:[#allocation2 + $0x16c] sm:$0xf] %vm44_vm4, %v1258_v43  ;;  %v4790_v27 = vshll.u32 %v12105_v11, 16  ;;  %v15167_v15 = vpack.c.b16 %v11861_v35, %v11904_v33  ;;  %v10539_v38 = vrot.slane %v5922_v30, 9  ;;  %v6067_v45 = vrot.slane %v12105_v11, 5  ;;  %v636_v11 = vpop.f32.mrf.mxu3 }
 0x225   :  { %1622 = vst [vmem:[#allocation2 + $0x170] sm:$0x1] %v1621_v1  ;;  %v1261_v4 = vshrl.u32 %v774_v17, 16  ;;  %v1264_v47 = vshll.u32 %v774_v17, 16  ;;  %v2369_v12 = vrot.slane %v2368_v62, 4  ;;  %v2373_v24 = vrot.slane %v2371_v39, 5  ;;  %10571 = vmatmul.msk.bf16.gmra.mxu2 %vm2617_vm8, %v12012_v14 }
 0x226   :  { %10505 = vmatmul.msk.bf16.vlgmr.msrb.gmra.mxu1 %vm2617_vm8, %v15167_v15  ;;  %v15168_v55 = vsel %vm11282_vm11, %v11895_v53, %v11891_v13  ;;  %v15169_v35 = vsel %vm11282_vm11, %v12041_v26, %v12045_v46  ;;  %267 = vst [vmem:[#allocation2 + $0x17c] sm:$0x1] %v266_v0  ;;  %v12144_v5 = vsel %vm11316_vm15, %v10539_v38, %v6064_v34  ;;  %v6066_v49 = vrot.slane %v6064_v34, 4  ;;  %v1704_v53 = vld [vmem:[#allocation2 + $0x154] sm:$0xf]  ;;  %v10936_v15 = vld [vmem:[#allocation2 + $0x84] sm:$0xff] }
 0x227   :  { %v12133_v54 = vunpack.c.l.b16 %v15168_v55  ;;  %v12140_v33 = vunpack.c.l.b16 %v15169_v35  ;;  %v12146_v9 = vrot.slane %v1261_v4, 7  ;;  %v637_v13 = vadd.f32 %v11966_v48, %v636_v11  ;;  %v1623_v46 = vld [vmem:[#allocation2 + $0x174] sm:$0xf]  ;;  %v12154_v19 = vpop.f32.mrf.mxu0 }
 0x228   :  { %v2364_v26 = vsel %vm11282_vm11, %v2359_v6, %v12093_v42  ;;  %v4778_v7 = vrot.slane %v4777_v51, 4  ;;  %v4788_v62 = vrot.slane %v4787_v58, 4  ;;  %v4792_v39 = vrot.slane %v4790_v27, 5  ;;  %v2809_v30 = vpop.f32.mrf.mxu1  ;;  %15170 = vst [vmem:[#allocation35_spill] sm:$0xff] %v12154_v19  ;;  %v158_v6 = vld [vmem:[#allocation2 + $0x180] sm:$0x1]  ;;  %v3240_v51 = vpop.f32.mrf.mxu2 }
 0x229   :  { %v1266_v34 = vor.u32 %v1264_v47, %v12146_v9  ;;  %v711_v43 = vmax.f32 %v637_v13, 0.0  ;;  %v2376_v1 = vshrl.u32 %v1703_v8, 16  ;;  %v2379_v17 = vshll.u32 %v1703_v8, 16  ;;  %v12176_v13 = vld [vmem:[#allocation2 + $0x34] sm:$0xf] }
 0x22a   :  { %v12157_v0 = vadd.f32 %v3237_v59, %v2809_v30  ;;  %v2374_v14 = vsel %vm11282_vm11, %v2369_v12, %v2373_v24  ;;  %v2385_v38 = vshll.u32 %v1704_v53, 16  ;;  %v2389_v42 = vshrl.u32 %v1704_v53, 16  ;;  %10482 = vmatmul.msk.bf16.gmra.mxu0 %vm2617_vm8, %v10936_v15 }
 0x22b   :  { %v5557_v58 = vpack.c.b16 %v12140_v33, %v12133_v54  ;;  %v1624_v27 = vsel %vm11309_vm14, %v1266_v34, %v1623_v46  ;;  %v775_v4 = vpack.c.bf16 %v711_v43, %v711_v43  ;;  %v159_v47 = vsel %vm11236_vm3, 0, %v158_v6  ;;  %v5923_v54 = vld [vmem:[#allocation2 + $0x30] sm:$0xe]  ;;  %v1742_v34 = vld [vmem:[#allocation2 + $0x158] sm:$0x1] }
 0x22c   :  { %15171 = vst [vmem:[#allocation36_spill] sm:$0xff] %v12157_v0  ;;  %v6068_v59 = vsel %vm11316_vm15, %v6066_v49, %v6067_v45  ;;  %v6278_v12 = vunpack.c.l.b16 %v12144_v5  ;;  %v4783_v24 = vsel %vm11282_vm11, %v4778_v7, %v12097_v3  ;;  %v4793_v55 = vsel %vm11282_vm11, %v4788_v62, %v4792_v39  ;;  %v639_v46 = vpop.f32.mrf.mxu3 }
 0x22d   :  { %1625 = vst [vmem:[#allocation2 + $0x174] sm:$0xf] %v1624_v27  ;;  %v2571_v35 = vunpack.c.l.b16 %v2364_v26  ;;  %v2572_v33 = vunpack.c.l.b16 %v2374_v14  ;;  %v1269_v11 = vshrl.u32 %v775_v4, 16  ;;  %v1272_v8 = vshll.u32 %v775_v4, 16  ;;  %v1627_v26 = vld [vmem:[#allocation2 + $0x17c] sm:$0x1] }
 0x22e   :  { %160 = vst [vmem:[#allocation2 + $0x180] sm:$0x1] %v159_v47  ;;  %v2378_v53 = vrot.slane %v2376_v1, 4  ;;  %v2381_v45 = vrot.slane %v2379_v17, 5  ;;  %v12178_v49 = vrot.slane %v2385_v38, 5  ;;  %v2391_v5 = vrot.slane %v2389_v42, 4 }
 0x22f   :  { %v6279_v30 = vunpack.c.l.b16 %v6068_v59  ;;  %v1267_v3 = vrot.slane %v12146_v9, 4  ;;  %v1271_v7 = vrot.slane %v1269_v11, 7  ;;  %v640_v62 = vadd.f32 %v11966_v48, %v639_v46  ;;  %v12187_v14 = vpop.f32.mrf.mxu0  ;;  %v4635_v9 = vld [vmem:[#allocation2 + $0x30] sm:$0xf]  ;;  %v12192_v11 = vld [vmem:[#allocation2 + $0x38] sm:$0x1] }
 0x230   :  { %v12182_v39 = vunpack.c.l.b16 %v4783_v24  ;;  %v12184_v43 = vunpack.c.l.b16 %v4793_v55  ;;  %v10540_v15 = vrot.slane %v5923_v54, 9  ;;  %v6071_v1 = vrot.slane %v12176_v13, 5  ;;  %v2812_v17 = vpop.f32.mrf.mxu1  ;;  %15172 = vst [vmem:[#allocation37_spill] sm:$0xff] %v12187_v14  ;;  %v268_v55 = vld [vmem:[#allocation2 + $0x188] sm:$0x1]  ;;  %v3242_v54 = vpop.f32.mrf.mxu2 }
 0x231   :  { %v2610_v38 = vpack.c.b16 %v2572_v33, %v2571_v35  ;;  %v1274_v42 = vor.u32 %v1272_v8, %v1271_v7  ;;  %v1276_v6 = vrot.slane %v1271_v7, 4  ;;  %v712_v27 = vmax.f32 %v640_v62, 0.0 }
 0x232   :  { %v12189_v4 = vadd.f32 %v3240_v51, %v2812_v17  ;;  %v2382_v47 = vor.u32 %v2381_v45, %v2378_v53  ;;  %v2392_v59 = vor.u32 %v2391_v5, %v12178_v49  ;;  %v2395_v24 = vshll.u32 %v1742_v34, 16 }
 0x233   :  { %v1275_v46 = vsel %vm11330_vm5, %v1267_v3, %v1274_v42  ;;  %v1628_v35 = vsel %vm11236_vm3, %v1276_v6, %v1627_v26  ;;  %v776_v33 = vpack.c.bf16 %v712_v27, %v712_v27  ;;  %v269_v8 = vsel %vm11256_vm6, 0, %v268_v55  ;;  %10111 = vmatmul.msk.bf16.gmra.mxu3 %vm2617_vm8, %v2610_v38 }
 0x234   :  { %15173 = vst [vmem:[#allocation38_spill] sm:$0xff] %v12189_v4  ;;  %v4795_v51 = vshrl.u32 %v4635_v9, 16  ;;  %v4798_v53 = vshll.u32 %v4635_v9, 16  ;;  %v4804_v45 = vshll.u32 %v12176_v13, 16  ;;  %v4808_v5 = vshrl.u32 %v12176_v13, 16  ;;  %v641_v6 = vpop.f32.mrf.mxu3 }
 0x235   :  { %1626 = vst.msk [vmem:[#allocation2 + $0x178] sm:$0xf] %vm44_vm4, %v1275_v46  ;;  %v6340_v3 = vpack.c.b16 %v6279_v30, %v6278_v12  ;;  %v6074_v7 = vrot.slane %v12192_v11, 5  ;;  %v1278_v34 = vshrl.u32 %v776_v33, 16  ;;  %v1281_v62 = vshll.u32 %v776_v33, 16 }
 0x236   :  { %10506 = vmatmul.msk.bf16.gmra.mxu1 %vm2617_vm8, %v5557_v58  ;;  %1629 = vst [vmem:[#allocation2 + $0x17c] sm:$0x1] %v1628_v35  ;;  %v2383_v26 = vrot.slane %v2382_v47, 4  ;;  %v12210_v38 = vsel %vm11316_vm15, %v10540_v15, %v6071_v1  ;;  %v6073_v42 = vrot.slane %v6071_v1, 4  ;;  %v1705_v13 = vld [vmem:[#allocation2 + $0x15c] sm:$0xf]  ;;  %v642_v30 = vadd.f32 %v11966_v48, %v641_v6 }
 0x237   :  { %270 = vst [vmem:[#allocation2 + $0x188] sm:$0x1] %v269_v8  ;;  %v2393_v27 = vrot.slane %v2392_v59, 4  ;;  %v2397_v58 = vrot.slane %v2395_v24, 5  ;;  %v12212_v12 = vrot.slane %v1278_v34, 7  ;;  %10572 = vmatmul.msk.bf16.gmra.mxu2 %vm2617_vm8, %v6340_v3  ;;  %v4797_v55 = vrot.slane %v4795_v51, 4  ;;  %v12218_v1 = vpop.f32.mrf.mxu0 }
 0x238   :  { %v1706_v9 = vld [vmem:[#allocation2 + $0x160] sm:$0xf]  ;;  %v4800_v46 = vrot.slane %v4798_v53, 5  ;;  %v12216_v35 = vrot.slane %v4804_v45, 5  ;;  %v4810_v15 = vrot.slane %v4808_v5, 4  ;;  %v2814_v33 = vpop.f32.mrf.mxu1  ;;  %15174 = vst [vmem:[#allocation39_spill] sm:$0xff] %v12218_v1  ;;  %v2388_v3 = vsel %vm11282_vm11, %v2383_v26, %v12178_v49  ;;  %v3245_v14 = vpop.f32.mrf.mxu2 }
 0x239   :  { %v1630_v47 = vld [vmem:[#allocation2 + $0x180] sm:$0xf]  ;;  %v1283_v8 = vor.u32 %v1281_v62, %v12212_v12  ;;  %v713_v59 = vmax.f32 %v642_v30, 0.0  ;;  %v2400_v24 = vshrl.u32 %v1705_v13, 16  ;;  %v2403_v34 = vshll.u32 %v1705_v13, 16  ;;  %v10937_v6 = vld [vmem:[#allocation2 + $0x90] sm:$0xff] }
 0x23a   :  { %v12221_v17 = vadd.f32 %v3242_v54, %v2814_v33  ;;  %v2409_v51 = vshll.u32 %v1706_v9, 16  ;;  %v2413_v53 = vshrl.u32 %v1706_v9, 16  ;;  %v161_v45 = vld [vmem:[#allocation2 + $0x18c] sm:$0x1]  ;;  %v2398_v5 = vsel %vm11282_vm11, %v2393_v27, %v2397_v58  ;;  %10483 = vmatmul.msk.bf16.gmra.mxu0 %vm2617_vm8, %v10937_v6  ;;  %v12237_v33 = vld [vmem:[#allocation2 + $0x40] sm:$0xf] }
 0x23b   :  { %v1631_v62 = vsel %vm11309_vm14, %v1283_v8, %v1630_v47  ;;  %v777_v30 = vpack.c.bf16 %v713_v59, %v713_v59  ;;  %v162_v54 = vsel %vm11236_vm3, 0, %v161_v45  ;;  %v6075_v13 = vsel %vm11316_vm15, %v6073_v42, %v6074_v7 }
 0x23c   :  { %15175 = vst [vmem:[#allocation40_spill] sm:$0xff] %v12221_v17  ;;  %v4801_v49 = vor.u32 %v4800_v46, %v4797_v55  ;;  %v4811_v26 = vor.u32 %v4810_v15, %v12216_v35  ;;  %v4814_v9 = vshll.u32 %v12192_v11, 16  ;;  %v2402_v47 = vrot.slane %v2400_v24, 4  ;;  %v644_v19 = vpop.f32.mrf.mxu3  ;;  %v1743_v46 = vld [vmem:[#allocation2 + $0x164] sm:$0x1] }
 0x23d   :  { %1632 = vst [vmem:[#allocation2 + $0x180] sm:$0xf] %v1631_v62  ;;  %v1286_v27 = vshrl.u32 %v777_v30, 16  ;;  %v1289_v58 = vshll.u32 %v777_v30, 16  ;;  %v2405_v8 = vrot.slane %v2403_v34, 5  ;;  %v2573_v59 = vunpack.c.l.b16 %v2388_v3 }
 0x23e   :  { %163 = vst [vmem:[#allocation2 + $0x18c] sm:$0x1] %v162_v54  ;;  %v2574_v45 = vunpack.c.l.b16 %v2398_v5  ;;  %v12239_v1 = vrot.slane %v2409_v51, 5  ;;  %v2415_v6 = vrot.slane %v2413_v53, 4  ;;  %v6281_v7 = vunpack.c.l.b16 %v6075_v13  ;;  %v1634_v15 = vld [vmem:[#allocation2 + $0x188] sm:$0x1] }
 0x23f   :  { %v1284_v42 = vrot.slane %v12212_v12, 4  ;;  %v1288_v55 = vrot.slane %v1286_v27, 7  ;;  %v645_v11 = vadd.f32 %v11966_v48, %v644_v19  ;;  %v4802_v62 = vrot.slane %v4801_v49, 4  ;;  %v12244_v3 = vpop.f32.mrf.mxu0  ;;  %v271_v19 = vld [vmem:[#allocation2 + $0x194] sm:$0x1] }
 0x240   :  { %v4812_v52 = vrot.slane %v4811_v26, 4  ;;  %v4816_v30 = vrot.slane %v4814_v9, 5  ;;  %v15116_v24 = vrot.slane %v12237_v33, 5  ;;  %v2817_v34 = vpop.f32.mrf.mxu1  ;;  %15176 = vst [vmem:[#allocation41_spill] sm:$0xff] %v12244_v3  ;;  %v2406_v53 = vor.u32 %v2405_v8, %v2402_v47  ;;  %v3247_v4 = vpop.f32.mrf.mxu2 }
 0x241   :  { %v1291_v51 = vor.u32 %v1289_v58, %v1288_v55  ;;  %v1293_v5 = vrot.slane %v1288_v55, 4  ;;  %v714_v54 = vmax.f32 %v645_v11, 0.0  ;;  %v12246_v13 = vadd.f32 %v3245_v14, %v2817_v34  ;;  %v12267_v11 = vld [vmem:[#allocation2 + $0x44] sm:$0x1] }
 0x242   :  { %v2611_v12 = vpack.c.b16 %v2574_v45, %v2573_v59  ;;  %v2416_v27 = vor.u32 %v2415_v6, %v12239_v1  ;;  %v2419_v17 = vshll.u32 %v1743_v46, 16  ;;  %v272_v58 = vsel %vm11256_vm6, 0, %v271_v19  ;;  %v4638_v19 = vld [vmem:[#allocation2 + $0x3c] sm:$0xf] }
 0x243   :  { %15177 = vst [vmem:[#allocation42_spill] sm:$0xff] %v12246_v13  ;;  %v1292_v49 = vsel %vm11330_vm5, %v1284_v42, %v1291_v51  ;;  %v1635_v26 = vsel %vm11236_vm3, %v1293_v5, %v1634_v15  ;;  %v778_v9 = vpack.c.bf16 %v714_v54, %v714_v54  ;;  %v6280_v14 = vunpack.c.l.b16 %v12210_v38 }
 0x244   :  { %10112 = vmatmul.msk.bf16.gmra.mxu3 %vm2617_vm8, %v2611_v12  ;;  %1633 = vst.msk [vmem:[#allocation2 + $0x184] sm:$0xf] %vm44_vm4, %v1292_v49  ;;  %v4807_v47 = vsel %vm11282_vm11, %v4802_v62, %v12216_v35  ;;  %v15178_v8 = vpack.c.b16 %v12184_v43, %v12182_v39  ;;  %v2407_v59 = vrot.slane %v2406_v53, 4  ;;  %v4817_v45 = vsel %vm11282_vm11, %v4812_v52, %v4816_v30  ;;  %v646_v15 = vpop.f32.mrf.mxu3  ;;  %v1707_v62 = vld [vmem:[#allocation2 + $0x168] sm:$0xf] }
 0x245   :  { %1636 = vst [vmem:[#allocation2 + $0x188] sm:$0x1] %v1635_v26  ;;  %v1295_v6 = vshrl.u32 %v778_v9, 16  ;;  %v1298_v42 = vshll.u32 %v778_v9, 16  ;;  %v6341_v55 = vpack.c.b16 %v6281_v7, %v6280_v14  ;;  %v2417_v38 = vrot.slane %v2416_v27, 4  ;;  %v10938_v26 = vld [vmem:[#allocation2 + $0x9c] sm:$0xff] }
 0x246   :  { %10507 = vmatmul.msk.bf16.gmra.mxu1 %vm2617_vm8, %v15178_v8  ;;  %v2421_v46 = vrot.slane %v2419_v17, 5  ;;  %273 = vst [vmem:[#allocation2 + $0x194] sm:$0x1] %v272_v58  ;;  %v6080_v35 = vrot.slane %v15116_v24, 4  ;;  %v647_v43 = vadd.f32 %v11966_v48, %v646_v15  ;;  %v12275_v52 = vunpack.c.l.b16 %v4807_v47  ;;  %v1637_v7 = vld [vmem:[#allocation2 + $0x18c] sm:$0xf] }
 0x247   :  { %v12271_v39 = vrot.slane %v1295_v6, 7  ;;  %10573 = vmatmul.msk.bf16.gmra.mxu2 %vm2617_vm8, %v6341_v55  ;;  %v12277_v30 = vunpack.c.l.b16 %v4817_v45  ;;  %v1708_v17 = vld [vmem:[#allocation2 + $0x16c] sm:$0xf]  ;;  %v4828_v34 = vshll.u32 %v12237_v33, 16  ;;  %v4832_v51 = vshrl.u32 %v12237_v33, 16  ;;  %v12281_v53 = vpop.f32.mrf.mxu0 }
 0x248   :  { %v2819_v5 = vpop.f32.mrf.mxu1  ;;  %15179 = vst [vmem:[#allocation43_spill] sm:$0xff] %v12281_v53  ;;  %v2412_v48 = vsel %vm11282_vm11, %v2407_v59, %v12239_v1  ;;  %v6081_v54 = vrot.slane %v12267_v11, 5  ;;  %v715_v27 = vmax.f32 %v647_v43, 0.0  ;;  %v2422_v9 = vsel %vm11282_vm11, %v2417_v38, %v2421_v46  ;;  %v5924_v58 = vld [vmem:[#allocation2 + $0x3c] sm:$0xe]  ;;  %v3250_v8 = vpop.f32.mrf.mxu2 }
 0x249   :  { %v1300_v12 = vor.u32 %v1298_v42, %v12271_v39  ;;  %v12288_v49 = vadd.f32 %v3247_v4, %v2819_v5  ;;  %v2424_v14 = vshrl.u32 %v1707_v62, 16  ;;  %v2427_v47 = vshll.u32 %v1707_v62, 16 }
 0x24a   :  { %v779_v1 = vpack.c.bf16 %v715_v27, %v715_v27  ;;  %v2433_v59 = vshll.u32 %v1708_v17, 16  ;;  %v2437_v6 = vshrl.u32 %v1708_v17, 16  ;;  %10484 = vmatmul.msk.bf16.gmra.mxu0 %vm2617_vm8, %v10938_v26  ;;  %v4819_v42 = vshrl.u32 %v4638_v19, 16  ;;  %v1744_v26 = vld [vmem:[#allocation2 + $0x170] sm:$0x1] }
 0x24b   :  { %15180 = vst [vmem:[#allocation44_spill] sm:$0xff] %v12288_v49  ;;  %v1638_v45 = vsel %vm11309_vm14, %v1300_v12, %v1637_v7  ;;  %v4822_v4 = vshll.u32 %v4638_v19, 16  ;;  %v12295_v55 = vrot.slane %v4828_v34, 5  ;;  %v4834_v15 = vrot.slane %v4832_v51, 4 }
 0x24c   :  { %1639 = vst [vmem:[#allocation2 + $0x18c] sm:$0xf] %v1638_v45  ;;  %v10541_v43 = vrot.slane %v5924_v58, 9  ;;  %v6082_v38 = vsel %vm11316_vm15, %v6080_v35, %v6081_v54  ;;  %v1303_v46 = vshrl.u32 %v779_v1, 16  ;;  %v1306_v62 = vshll.u32 %v779_v1, 16 }
 0x24d   :  { %v2575_v5 = vunpack.c.l.b16 %v2412_v48  ;;  %v2576_v24 = vunpack.c.l.b16 %v2422_v9  ;;  %v2426_v7 = vrot.slane %v2424_v14, 4  ;;  %v2429_v12 = vrot.slane %v2427_v47, 5  ;;  %v1641_v51 = vld [vmem:[#allocation2 + $0x194] sm:$0x1] }
 0x24e   :  { %v1301_v17 = vrot.slane %v12271_v39, 4  ;;  %v1305_v27 = vrot.slane %v1303_v46, 7  ;;  %v12300_v45 = vrot.slane %v2433_v59, 5  ;;  %v2439_v19 = vrot.slane %v2437_v6, 4  ;;  %v12311_v59 = vld [vmem:[#allocation2 + $0x4c] sm:$0xf] }
 0x24f   :  { %v5559_v34 = vpack.c.b16 %v12277_v30, %v12275_v52  ;;  %v4821_v58 = vrot.slane %v4819_v42, 4  ;;  %v4824_v53 = vrot.slane %v4822_v4, 5  ;;  %v4835_v35 = vor.u32 %v4834_v15, %v12295_v55  ;;  %v12305_v48 = vpop.f32.mrf.mxu0 }
 0x250   :  { %v2822_v54 = vpop.f32.mrf.mxu1  ;;  %15181 = vst [vmem:[#allocation45_spill] sm:$0xff] %v12305_v48  ;;  %v15182_v9 = vrot.slane %v12237_v33, 5  ;;  %v6283_v14 = vunpack.c.l.b16 %v6082_v38  ;;  %v1308_v47 = vor.u32 %v1306_v62, %v1305_v27  ;;  %v1310_v1 = vrot.slane %v1305_v27, 4  ;;  %v3252_v4 = vpop.f32.mrf.mxu2  ;;  %v12325_v27 = vld [vmem:[#allocation2 + $0x50] sm:$0x1] }
 0x251   :  { %v12313_v6 = vadd.f32 %v3250_v8, %v2822_v54  ;;  %v2612_v52 = vpack.c.b16 %v2576_v24, %v2575_v5  ;;  %v2443_v30 = vshll.u32 %v1744_v26, 16  ;;  %v4838_v42 = vshll.u32 %v12267_v11, 16  ;;  %v4641_v11 = vld [vmem:[#allocation2 + $0x48] sm:$0xf] }
 0x252   :  { %v6079_v39 = vsel %vm11316_vm15, %v10541_v43, %v15182_v9  ;;  %v1309_v15 = vsel %vm11330_vm5, %v1301_v17, %v1308_v47  ;;  %v1642_v33 = vsel %vm11236_vm3, %v1310_v1, %v1641_v51  ;;  %v2430_v46 = vor.u32 %v2429_v12, %v2426_v7  ;;  %v1709_v7 = vld [vmem:[#allocation2 + $0x174] sm:$0xf]  ;;  %v1710_v51 = vld [vmem:[#allocation2 + $0x178] sm:$0xf]  ;;  %v5925_v9 = vld [vmem:[#allocation2 + $0x48] sm:$0xe] }
 0x253   :  { %15183 = vst [vmem:[#allocation46_spill] sm:$0xff] %v12313_v6  ;;  %v2440_v43 = vor.u32 %v2439_v19, %v12300_v45  ;;  %v6282_v38 = vunpack.c.l.b16 %v6079_v39  ;;  %v4825_v8 = vor.u32 %v4824_v53, %v4821_v58  ;;  %v4836_v24 = vrot.slane %v4835_v35, 4 }
 0x254   :  { %10113 = vmatmul.msk.bf16.gmra.mxu3 %vm2617_vm8, %v2612_v52  ;;  %1640 = vst.msk [vmem:[#allocation2 + $0x190] sm:$0xf] %vm44_vm4, %v1309_v15  ;;  %v6085_v62 = vrot.slane %v12311_v59, 5  ;;  %v4840_v17 = vrot.slane %v4838_v42, 5  ;;  %v2431_v12 = vrot.slane %v2430_v46, 4  ;;  %v2445_v19 = vrot.slane %v2443_v30, 5 }
 0x255   :  { %1643 = vst [vmem:[#allocation2 + $0x194] sm:$0x1] %v1642_v33  ;;  %v6342_v5 = vpack.c.b16 %v6283_v14, %v6282_v38  ;;  %v2441_v26 = vrot.slane %v2440_v43, 4  ;;  %v4826_v54 = vrot.slane %v4825_v8, 4  ;;  %v2448_v39 = vshrl.u32 %v1709_v7, 16  ;;  %v10939_v42 = vld [vmem:[#allocation2 + $0xa8] sm:$0xff] }
 0x256   :  { %10508 = vmatmul.msk.bf16.gmra.mxu1 %vm2617_vm8, %v5559_v34  ;;  %v4841_v53 = vsel %vm11282_vm11, %v4836_v24, %v4840_v17  ;;  %v6087_v58 = vrot.slane %v6085_v62, 4  ;;  %v2451_v14 = vshll.u32 %v1709_v7, 16  ;;  %v4843_v47 = vshrl.u32 %v4641_v11, 16 }
 0x257   :  { %10574 = vmatmul.msk.bf16.gmra.mxu2 %vm2617_vm8, %v6342_v5  ;;  %v12330_v34 = vpop.f32.mrf.mxu0  ;;  %v4846_v1 = vshll.u32 %v4641_v11, 16  ;;  %v6088_v30 = vrot.slane %v12325_v27, 5  ;;  %v2457_v15 = vshll.u32 %v1710_v51, 16  ;;  %v2461_v33 = vshrl.u32 %v1710_v51, 16 }
 0x258   :  { %v2824_v35 = vpop.f32.mrf.mxu1  ;;  %15184 = vst [vmem:[#allocation47_spill] sm:$0xff] %v12330_v34  ;;  %v3255_v46 = vpop.f32.mrf.mxu2  ;;  %v2436_v43 = vsel %vm11282_vm11, %v2431_v12, %v12300_v45  ;;  %v2446_v38 = vsel %vm11282_vm11, %v2441_v26, %v2445_v19  ;;  %v4852_v8 = vshll.u32 %v12311_v59, 16  ;;  %v4856_v24 = vshrl.u32 %v12311_v59, 16 }
 0x259   :  { %v12332_v52 = vadd.f32 %v3252_v4, %v2824_v35  ;;  %v4831_v4 = vsel %vm11282_vm11, %v4826_v54, %v12295_v55  ;;  %v5501_v11 = vunpack.c.l.b16 %v4841_v53  ;;  %v10542_v5 = vrot.slane %v5925_v9, 9  ;;  %v12354_v54 = vld [vmem:[#allocation2 + $0x58] sm:$0xf] }
 0x25a   :  { %10485 = vmatmul.msk.bf16.gmra.mxu0 %vm2617_vm8, %v10939_v42  ;;  %v6089_v17 = vsel %vm11316_vm15, %v6087_v58, %v6088_v30  ;;  %v2450_v7 = vrot.slane %v2448_v39, 4  ;;  %v2453_v45 = vrot.slane %v2451_v14, 5  ;;  %v4845_v12 = vrot.slane %v4843_v47, 4  ;;  %v1745_v42 = vld [vmem:[#allocation2 + $0x17c] sm:$0x1] }
 0x25b   :  { %15185 = vst [vmem:[#allocation48_spill] sm:$0xff] %v12332_v52  ;;  %v4848_v51 = vrot.slane %v4846_v1, 5  ;;  %v2577_v26 = vunpack.c.l.b16 %v2436_v43  ;;  %v2578_v19 = vunpack.c.l.b16 %v2446_v38  ;;  %v12348_v35 = vrot.slane %v2457_v15, 5  ;;  %v4644_v1 = vld [vmem:[#allocation2 + $0x54] sm:$0xf] }
 0x25c   :  { %v2463_v59 = vrot.slane %v2461_v33, 4  ;;  %v5500_v34 = vunpack.c.l.b16 %v4831_v4  ;;  %v12350_v48 = vrot.slane %v4852_v8, 5  ;;  %v4858_v3 = vrot.slane %v4856_v24, 4 }
 0x25d   :  { %v6086_v55 = vsel %vm11316_vm15, %v10542_v5, %v6085_v62  ;;  %v6285_v39 = vunpack.c.l.b16 %v6089_v17  ;;  %v2454_v14 = vor.u32 %v2453_v45, %v2450_v7  ;;  %v4849_v47 = vor.u32 %v4848_v51, %v4845_v12  ;;  %v12368_v7 = vld [vmem:[#allocation2 + $0x5c] sm:$0x1]  ;;  %v164_v45 = vld [vmem:[#allocation2 + $0x198] sm:$0x1] }
 0x25e   :  { %v5560_v9 = vpack.c.b16 %v5501_v11, %v5500_v34  ;;  %v2613_v15 = vpack.c.b16 %v2578_v19, %v2577_v26  ;;  %v2464_v33 = vor.u32 %v2463_v59, %v12348_v35  ;;  %v2467_v43 = vshll.u32 %v1745_v42, 16  ;;  %v1711_v26 = vld [vmem:[#allocation2 + $0x180] sm:$0xf] }
 0x25f   :  { %v12356_v58 = vpop.f32.mrf.mxu0  ;;  %v6284_v8 = vunpack.c.l.b16 %v6086_v55  ;;  %v4859_v62 = vor.u32 %v4858_v3, %v12350_v48  ;;  %v4862_v24 = vshll.u32 %v12325_v27, 16  ;;  %v15117_v4 = vrot.slane %v12354_v54, 5  ;;  %v1712_v55 = vld [vmem:[#allocation2 + $0x184] sm:$0xf] }
 0x260   :  { %v2827_v53 = vpop.f32.mrf.mxu1  ;;  %15186 = vst [vmem:[#allocation49_spill] sm:$0xff] %v12356_v58  ;;  %v3257_v38 = vpop.f32.mrf.mxu2  ;;  %v4867_v34 = vshrl.u32 %v4644_v1, 16  ;;  %v4870_v11 = vshll.u32 %v4644_v1, 16  ;;  %v4876_v5 = vshll.u32 %v12354_v54, 16  ;;  %v2455_v17 = vrot.slane %v2454_v14, 4 }
 0x261   :  { %v12358_v30 = vadd.f32 %v3255_v46, %v2827_v53  ;;  %v4880_v46 = vshrl.u32 %v12354_v54, 16  ;;  %v6343_v12 = vpack.c.b16 %v6285_v39, %v6284_v8  ;;  %v2465_v3 = vrot.slane %v2464_v33, 4 }
 0x262   :  { %v2469_v51 = vrot.slane %v2467_v43, 5  ;;  %v4850_v27 = vrot.slane %v4849_v47, 4  ;;  %v4860_v19 = vrot.slane %v4859_v62, 4  ;;  %v4864_v59 = vrot.slane %v4862_v24, 5 }
 0x263   :  { %15187 = vst [vmem:[#allocation50_spill] sm:$0xff] %v12358_v30  ;;  %v6094_v42 = vrot.slane %v15117_v4, 4  ;;  %v165_v53 = vsel %vm11236_vm3, 0, %v164_v45  ;;  %v4872_v14 = vrot.slane %v4870_v11, 5  ;;  %v12375_v1 = vrot.slane %v4876_v5, 5  ;;  %v10940_v45 = vld [vmem:[#allocation2 + $0xb4] sm:$0xff] }
 0x264   :  { %10114 = vmatmul.msk.bf16.gmra.mxu3 %vm2617_vm8, %v2613_v15  ;;  %v4882_v39 = vrot.slane %v4880_v46, 4  ;;  %166 = vst [vmem:[#allocation2 + $0x198] sm:$0x1] %v165_v53  ;;  %v2460_v33 = vsel %vm11282_vm11, %v2455_v17, %v12348_v35  ;;  %v6095_v43 = vrot.slane %v12368_v7, 5  ;;  %v2472_v8 = vshrl.u32 %v1711_v26, 16 }
 0x265   :  { %v2475_v62 = vshll.u32 %v1711_v26, 16  ;;  %v2481_v11 = vshll.u32 %v1712_v55, 16  ;;  %v2485_v5 = vshrl.u32 %v1712_v55, 16  ;;  %v4865_v35 = vsel %vm11282_vm11, %v4860_v19, %v4864_v59  ;;  %v5926_v17 = vld [vmem:[#allocation2 + $0x54] sm:$0xe] }
 0x266   :  { %10509 = vmatmul.msk.bf16.gmra.mxu1 %vm2617_vm8, %v5560_v9  ;;  %v4869_v9 = vrot.slane %v4867_v34, 4  ;;  %v2470_v34 = vsel %vm11282_vm11, %v2465_v3, %v2469_v51  ;;  %v6096_v26 = vsel %vm11316_vm15, %v6094_v42, %v6095_v43  ;;  %v2579_v53 = vunpack.c.l.b16 %v2460_v33  ;;  %v11004_v51 = vld [vmem:[%s15109_s2] ss:$0 sm:$0xff]  ;;  %v1746_v4 = vld [vmem:[#allocation2 + $0x188] sm:$0x1] }
 0x267   :  { %10575 = vmatmul.msk.bf16.gmra.mxu2 %vm2617_vm8, %v6343_v12  ;;  %v12377_v47 = vpop.f32.mrf.mxu0  ;;  %v4855_v12 = vsel %vm11282_vm11, %v4850_v27, %v12350_v48  ;;  %v4883_v3 = vor.u32 %v4882_v39, %v12375_v1  ;;  %v274_v48 = vld [vmem:[#allocation2 + $0x1a0] sm:$0x1]  ;;  %v2580_v27 = vunpack.c.l.b16 %v2470_v34  ;;  %v2474_v19 = vrot.slane %v2472_v8, 4 }
 0x268   :  { %v2829_v15 = vpop.f32.mrf.mxu1  ;;  %15188 = vst [vmem:[#allocation51_spill] sm:$0xff] %v12377_v47  ;;  %v3260_v46 = vpop.f32.mrf.mxu2  ;;  %v2477_v59 = vrot.slane %v2475_v62, 5  ;;  %v275_v42 = vsel %vm11256_vm6, 0, %v274_v48  ;;  %v10543_v43 = vrot.slane %v5926_v17, 9  ;;  %v12401_v47 = vrot.slane %v2481_v11, 5 }
 0x269   :  { %v12383_v24 = vadd.f32 %v3257_v38, %v2829_v15  ;;  %v649_v38 = vpop.f32.mrf.mxu3  ;;  %v4873_v15 = vor.u32 %v4872_v14, %v4869_v9  ;;  %v2487_v33 = vrot.slane %v2485_v5, 4  ;;  %276 = vst [vmem:[#allocation2 + $0x1a0] sm:$0x1] %v275_v42  ;;  %v5502_v14 = vunpack.c.l.b16 %v4855_v12  ;;  %v12410_v42 = vld [vmem:[#allocation2 + $0x64] sm:$0xf] }
 0x26a   :  { %10486 = vmatmul.msk.bf16.gmra.mxu0 %vm2617_vm8, %v10940_v45  ;;  %v650_v55 = vadd.f32 %v11004_v51, %v649_v38  ;;  %v5503_v39 = vunpack.c.l.b16 %v4865_v35  ;;  %v4886_v45 = vshll.u32 %v12368_v7, 16  ;;  %v15190_v38 = vrot.slane %v12354_v54, 5 }
 0x26b   :  { %15189 = vst [vmem:[#allocation52_spill] sm:$0xff] %v12383_v24  ;;  %v6287_v8 = vunpack.c.l.b16 %v6096_v26  ;;  %v4874_v62 = vrot.slane %v4873_v15, 4  ;;  %v2614_v11 = vpack.c.b16 %v2580_v27, %v2579_v53  ;;  %v2478_v17 = vor.u32 %v2477_v59, %v2474_v19  ;;  %v1644_v19 = vld [vmem:[#allocation2 + $0x198] sm:$0xf] }
 0x26c   :  { %v716_v9 = vmax.f32 %v650_v55, 0.0  ;;  %v6093_v34 = vsel %vm11316_vm15, %v10543_v43, %v15190_v38  ;;  %v2491_v5 = vshll.u32 %v1746_v4, 16  ;;  %v4884_v55 = vrot.slane %v4883_v3, 4 }
 0x26d   :  { %v2488_v7 = vor.u32 %v2487_v33, %v12401_v47  ;;  %v5561_v43 = vpack.c.b16 %v5503_v39, %v5502_v14  ;;  %v6286_v26 = vunpack.c.l.b16 %v6093_v34  ;;  %v4888_v15 = vrot.slane %v4886_v45, 5  ;;  %v12423_v39 = vld [vmem:[#allocation2 + $0x68] sm:$0x1] }
 0x26e   :  { %v780_v58 = vpack.c.bf16 %v716_v9, %v716_v9  ;;  %v4879_v4 = vsel %vm11282_vm11, %v4874_v62, %v12375_v1  ;;  %v15118_v3 = vrot.slane %v12410_v42, 5  ;;  %v2479_v27 = vrot.slane %v2478_v17, 4  ;;  %v4647_v1 = vld [vmem:[#allocation2 + $0x60] sm:$0xf]  ;;  %v1714_v17 = vld [vmem:[#allocation2 + $0x190] sm:$0xf] }
 0x26f   :  { %v12408_v48 = vpop.f32.mrf.mxu0  ;;  %v2489_v59 = vrot.slane %v2488_v7, 4  ;;  %v2493_v33 = vrot.slane %v2491_v5, 5  ;;  %v12425_v38 = vunpack.c.l.b16 %v4879_v4  ;;  %v4904_v21 = vshrl.u32 %v12410_v42, 16 }
 0x270   :  { %v2832_v24 = vpop.f32.mrf.mxu1  ;;  %15191 = vst [vmem:[#allocation53_spill] sm:$0xff] %v12408_v48  ;;  %v1312_v54 = vshrl.u32 %v780_v58, 16  ;;  %v1315_v35 = vshll.u32 %v780_v58, 16  ;;  %v3262_v30 = vpop.f32.mrf.mxu2  ;;  %v4889_v58 = vsel %vm11282_vm11, %v4884_v55, %v4888_v15  ;;  %v2484_v7 = vsel %vm11282_vm11, %v2479_v27, %v12401_v47 }
 0x271   :  { %v12412_v12 = vadd.f32 %v3260_v46, %v2832_v24  ;;  %v651_v9 = vpop.f32.mrf.mxu3  ;;  %v6344_v46 = vpack.c.b16 %v6287_v8, %v6286_v26  ;;  %v6101_v8 = vrot.slane %v15118_v3, 4  ;;  %v10941_v26 = vld [vmem:[#allocation2 + $0xc0] sm:$0xff]  ;;  %v2494_v15 = vsel %vm11282_vm11, %v2489_v59, %v2493_v33 }
 0x272   :  { %v1314_v53 = vrot.slane %v1312_v54, 7  ;;  %v652_v24 = vadd.f32 %v11004_v51, %v651_v9  ;;  %v12428_v51 = vunpack.c.l.b16 %v4889_v58  ;;  %v6102_v54 = vrot.slane %v12423_v39, 5  ;;  %v5927_v9 = vld [vmem:[#allocation2 + $0x60] sm:$0xe] }
 0x273   :  { %15192 = vst [vmem:[#allocation54_spill] sm:$0xff] %v12412_v12  ;;  %v2505_v47 = vshll.u32 %v1714_v17, 16  ;;  %v2509_v27 = vshrl.u32 %v1714_v17, 16  ;;  %v4894_v3 = vshll.u32 %v4647_v1, 16  ;;  %v4906_v33 = vrot.slane %v4904_v21, 4 }
 0x274   :  { %10115 = vmatmul.msk.bf16.gmra.mxu3 %vm2617_vm8, %v2614_v11  ;;  %v1317_v14 = vor.u32 %v1315_v35, %v1314_v53  ;;  %v717_v45 = vmax.f32 %v652_v24, 0.0  ;;  %v1713_v11 = vld [vmem:[#allocation2 + $0x18c] sm:$0xf]  ;;  %v4900_v35 = vshll.u32 %v12410_v42, 16  ;;  %v2582_v48 = vunpack.c.l.b16 %v2494_v15 }
 0x275   :  { %v2496_v58 = vshrl.u32 %v1713_v11, 16  ;;  %v2507_v52 = vrot.slane %v2505_v47, 5  ;;  %v5562_v44 = vpack.c.b16 %v12428_v51, %v12425_v38  ;;  %v4651_v47 = vld [vmem:[#allocation2 + $0x70] sm:$0xf]  ;;  %v10310_v38 = vld [vmem:[%s15110_s3 + $0x4] sm:$0x3] }
 0x276   :  { %10510 = vmatmul.msk.bf16.gmra.mxu1 %vm2617_vm8, %v5561_v43  ;;  %v1645_v34 = vsel %vm11309_vm14, %v1317_v14, %v1644_v19  ;;  %v781_v62 = vpack.c.bf16 %v717_v45, %v717_v45  ;;  %v2499_v19 = vshll.u32 %v1713_v11, 16  ;;  %v1318_v14 = vrot.slane %v1314_v53, 4 }
 0x277   :  { %10576 = vmatmul.msk.bf16.gmra.mxu2 %vm2617_vm8, %v6344_v46  ;;  %v12434_v55 = vpop.f32.mrf.mxu0  ;;  %1646 = vst [vmem:[#allocation2 + $0x198] sm:$0xf] %v1645_v34  ;;  %v4891_v34 = vshrl.u32 %v4647_v1, 16  ;;  %v12449_v59 = vrot.slane %v4900_v35, 5  ;;  %v2498_v12 = vrot.slane %v2496_v58, 4  ;;  %v3833_v51 = vsel %vm2714_vm7, %v10310_v38, 0 }
 0x278   :  { %v2834_v5 = vpop.f32.mrf.mxu1  ;;  %15193 = vst [vmem:[#allocation55_spill] sm:$0xff] %v12434_v55  ;;  %v1320_v4 = vshrl.u32 %v781_v62, 16  ;;  %v1323_v24 = vshll.u32 %v781_v62, 16  ;;  %v3265_v46 = vpop.f32.mrf.mxu2  ;;  %v1648_v55 = vld [vmem:[#allocation2 + $0x1a0] sm:$0x1]  ;;  %v2581_v62 = vunpack.c.l.b16 %v2484_v7  ;;  %v2501_v17 = vrot.slane %v2499_v19, 5  ;;  %3842 = vmatpush.bf16.msrb.mxu3 %v3833_v51 }
 0x279   :  { %v12442_v43 = vadd.f32 %v3262_v30, %v2834_v5  ;;  %v10544_v30 = vrot.slane %v5927_v9, 9  ;;  %v6103_v5 = vsel %vm11316_vm15, %v6101_v8, %v6102_v54  ;;  %v1747_v9 = vld [vmem:[#allocation2 + $0x194] sm:$0x1]  ;;  %v4893_v8 = vrot.slane %v4891_v34, 4 }
 0x27a   :  { %10487 = vmatmul.msk.bf16.gmra.mxu0 %vm2617_vm8, %v10941_v26  ;;  %v1322_v45 = vrot.slane %v1320_v4, 7  ;;  %v2511_v26 = vrot.slane %v2509_v27, 4  ;;  %v4896_v54 = vrot.slane %v4894_v3, 5  ;;  %v15196_v7 = vrot.slane %v12410_v42, 5 }
 0x27b   :  { %15194 = vst [vmem:[#allocation56_spill] sm:$0xff] %v12442_v43  ;;  %v2615_v4 = vpack.c.b16 %v2582_v48, %v2581_v62  ;;  %v2502_v58 = vor.u32 %v2501_v17, %v2498_v12  ;;  %v2515_v42 = vshll.u32 %v1747_v9, 16  ;;  %v4910_v48 = vshll.u32 %v12423_v39, 16  ;;  %v5928_v17 = vld [vmem:[#allocation2 + $0x6c] sm:$0xe] }
 0x27c   :  { %v1325_v43 = vor.u32 %v1323_v24, %v1322_v45  ;;  %v1327_v11 = vrot.slane %v1322_v45, 4  ;;  %v6100_v21 = vsel %vm11316_vm15, %v10544_v30, %v15196_v7  ;;  %v2512_v19 = vor.u32 %v2511_v26, %v2507_v52  ;;  %v7262_v7 = vld [vmem:[#allocation2 + $0x1c] sm:$0xf] }
 0x27d   :  { %v6288_v27 = vunpack.c.l.b16 %v6100_v21  ;;  %v6106_v12 = vrot.slane %v4651_v47, 5  ;;  %v2503_v34 = vrot.slane %v2502_v58, 4  ;;  %v4912_v62 = vrot.slane %v4910_v48, 5  ;;  %v4650_v58 = vld [vmem:[#allocation2 + $0x6c] sm:$0xf] }
 0x27e   :  { %v1326_v53 = vsel %vm11330_vm5, %v1318_v14, %v1325_v43  ;;  %v1649_v1 = vsel %vm11236_vm3, %v1327_v11, %v1648_v55  ;;  %v6289_v43 = vunpack.c.l.b16 %v6103_v5  ;;  %v4907_v55 = vor.u32 %v4906_v33, %v12449_v59  ;;  %v12477_v11 = vld [vmem:[#allocation2 + $0x74] sm:$0x1] }
 0x27f   :  { %v12455_v35 = vpop.f32.mrf.mxu0  ;;  %1647 = vst.msk [vmem:[#allocation2 + $0x19c] sm:$0xf] %vm44_vm4, %v1326_v53  ;;  %v4897_v14 = vor.u32 %v4896_v54, %v4893_v8  ;;  %v2513_v30 = vrot.slane %v2512_v19, 4  ;;  %v2517_v5 = vrot.slane %v2515_v42, 5  ;;  %v10942_v53 = vld [vmem:[#allocation2 + $0xe4] sm:$0xff]  ;;  %v6108_v8 = vrot.slane %v6106_v12, 4 }
 0x280   :  { %15195 = vst [vmem:[#allocation57_spill] sm:$0xff] %v12455_v35  ;;  %v3267_v3 = vpop.f32.mrf.mxu2  ;;  %v4908_v45 = vrot.slane %v4907_v55, 4  ;;  %v4924_v54 = vshll.u32 %v4651_v47, 16  ;;  %v10545_v55 = vrot.slane %v5928_v17, 9  ;;  %v4915_v51 = vshrl.u32 %v4650_v58, 16 }
 0x281   :  { %v2837_v15 = vpop.f32.mrf.mxu1  ;;  %1650 = vst [vmem:[#allocation2 + $0x1a0] sm:$0x1] %v1649_v1  ;;  %v4898_v33 = vrot.slane %v4897_v14, 4  ;;  %v8685_v14 = vrot.slane %v7262_v7, 5  ;;  %v12500_v7 = vld [vmem:[#allocation2 + $0x7c] sm:$0xf] }
 0x282   :  { %v12465_v24 = vadd.f32 %v3265_v46, %v2837_v15  ;;  %v6345_v46 = vpack.c.b16 %v6289_v43, %v6288_v27  ;;  %v4913_v9 = vsel %vm11282_vm11, %v4908_v45, %v4912_v62  ;;  %v4928_v43 = vshrl.u32 %v4651_v47, 16  ;;  %v8555_v27 = vld [vmem:[#allocation2 + $0x18] sm:$0xe] }
 0x283   :  { %v4903_v1 = vsel %vm11282_vm11, %v4898_v33, %v12449_v59  ;;  %v6109_v59 = vrot.slane %v12477_v11, 5  ;;  %v5507_v42 = vunpack.c.l.b16 %v4913_v9  ;;  %v6107_v38 = vsel %vm11316_vm15, %v10545_v55, %v6106_v12 }
 0x284   :  { %15197 = vst [vmem:[#allocation58_spill] sm:$0xff] %v12465_v24  ;;  %10116 = vmatmul.msk.bf16.gmra.mxu3 %vm2617_vm8, %v2615_v4  ;;  %v2508_v4 = vsel %vm11282_vm11, %v2503_v34, %v2507_v52  ;;  %v5506_v19 = vunpack.c.l.b16 %v4903_v1  ;;  %v4918_v47 = vshll.u32 %v4650_v58, 16  ;;  %v4930_v45 = vrot.slane %v4928_v43, 4  ;;  %v7263_v34 = vld [vmem:[#allocation2 + $0x20] sm:$0x1] }
 0x285   :  { %v6110_v52 = vsel %vm11316_vm15, %v6108_v8, %v6109_v59  ;;  %v6290_v12 = vunpack.c.l.b16 %v6107_v38  ;;  %v4917_v43 = vrot.slane %v4915_v51, 4  ;;  %v7266_v58 = vld [vmem:[#allocation2 + $0x2c] sm:$0x1] }
 0x286   :  { %10511 = vmatmul.msk.bf16.gmra.mxu1 %vm2617_vm8, %v5562_v44  ;;  %v2518_v44 = vsel %vm11282_vm11, %v2513_v30, %v2517_v5  ;;  %v10796_v30 = vrot.slane %v8555_v27, 9  ;;  %v8687_v5 = vrot.slane %v8685_v14, 4  ;;  %v5563_v62 = vpack.c.b16 %v5507_v42, %v5506_v19 }
 0x287   :  { %10577 = vmatmul.msk.bf16.gmra.mxu2 %vm2617_vm8, %v6345_v46  ;;  %v12475_v39 = vpop.f32.mrf.mxu0  ;;  %v2584_v48 = vunpack.c.l.b16 %v2518_v44  ;;  %v12496_v46 = vrot.slane %v4924_v54, 5  ;;  %v6291_v17 = vunpack.c.l.b16 %v6110_v52  ;;  %v8688_v54 = vrot.slane %v7263_v34, 5  ;;  %v8557_v52 = vld [vmem:[#allocation2 + $0x30] sm:$0xe] }
 0x288   :  { %15198 = vst [vmem:[#allocation59_spill] sm:$0xff] %v12475_v39  ;;  %v3270_v15 = vpop.f32.mrf.mxu2  ;;  %v8686_v8 = vsel %vm11316_vm15, %v10796_v30, %v8685_v14  ;;  %v4920_v55 = vrot.slane %v4918_v47, 5  ;;  %v4934_v14 = vshll.u32 %v12477_v11, 16  ;;  %v8695_v34 = vrot.slane %v7266_v58, 5 }
 0x289   :  { %v2839_v26 = vpop.f32.mrf.mxu1  ;;  %v4931_v59 = vor.u32 %v4930_v45, %v12496_v46  ;;  %v8689_v19 = vsel %vm11316_vm15, %v8687_v5, %v8688_v54  ;;  %v8909_v38 = vunpack.c.l.b16 %v8686_v8 }
 0x28a   :  { %v12484_v21 = vadd.f32 %v3267_v3, %v2839_v26  ;;  %10488 = vmatmul.msk.bf16.gmra.mxu0 %vm2617_vm8, %v10942_v53  ;;  %v2583_v3 = vunpack.c.l.b16 %v2508_v4  ;;  %v7265_v26 = vld [vmem:[#allocation2 + $0x28] sm:$0xf]  ;;  %v8556_v53 = vld [vmem:[#allocation2 + $0x24] sm:$0xe]  ;;  %v8910_v51 = vunpack.c.l.b16 %v8689_v19  ;;  %v4921_v30 = vor.u32 %v4920_v55, %v4917_v43  ;;  %v10943_v43 = vld [vmem:[#allocation2 + $0xf0] sm:$0xff] }
 0x28b   :  { %v10797_v42 = vrot.slane %v8556_v53, 9  ;;  %v8692_v27 = vrot.slane %v7265_v26, 5  ;;  %v4932_v5 = vrot.slane %v4931_v59, 4  ;;  %v7269_v53 = vld [vmem:[#allocation2 + $0x38] sm:$0x1]  ;;  %v10798_v26 = vrot.slane %v8557_v52, 9 }
 0x28c   :  { %15199 = vst [vmem:[#allocation60_spill] sm:$0xff] %v12484_v21  ;;  %v2616_v9 = vpack.c.b16 %v2584_v48, %v2583_v3  ;;  %v6346_v3 = vpack.c.b16 %v6291_v17, %v6290_v12  ;;  %v7268_v48 = vld [vmem:[#allocation2 + $0x34] sm:$0xf]  ;;  %v12518_v17 = vpack.c.b16 %v8910_v51, %v8909_v38  ;;  %v4936_v12 = vrot.slane %v4934_v14, 5  ;;  %v5929_v55 = vld [vmem:[#allocation2 + $0x78] sm:$0xe] }
 0x28d   :  { %v8693_v47 = vsel %vm11316_vm15, %v10797_v42, %v8692_v27  ;;  %v8694_v45 = vrot.slane %v8692_v27, 4  ;;  %v8702_v27 = vrot.slane %v7269_v53, 5  ;;  %v4922_v52 = vrot.slane %v4921_v30, 4  ;;  %v4653_v53 = vld [vmem:[#allocation2 + $0x78] sm:$0xf] }
 0x28e   :  { %v8911_v8 = vunpack.c.l.b16 %v8693_v47  ;;  %v4937_v14 = vsel %vm11282_vm11, %v4932_v5, %v4936_v12  ;;  %v4948_v47 = vshll.u32 %v12500_v7, 16 }
 0x28f   :  { %v12498_v33 = vpop.f32.mrf.mxu0  ;;  %v8696_v11 = vsel %vm11316_vm15, %v8694_v45, %v8695_v34  ;;  %v4952_v45 = vshrl.u32 %v12500_v7, 16  ;;  %v10546_v34 = vrot.slane %v5929_v55, 9  ;;  %v7271_v55 = vld [vmem:[#allocation2 + $0x40] sm:$0xf] }
 0x290   :  { %15200 = vst [vmem:[#allocation61_spill] sm:$0xff] %v12498_v33  ;;  %v3272_v44 = vpop.f32.mrf.mxu2  ;;  %v8912_v54 = vunpack.c.l.b16 %v8696_v11  ;;  %v5930_v33 = vld [vmem:[#allocation2 + $0x84] sm:$0xe] }
 0x291   :  { %v2842_v1 = vpop.f32.mrf.mxu1 }
 0x292   :  { %v12504_v4 = vadd.f32 %v3270_v15, %v2842_v1  ;;  %v6113_v15 = vrot.slane %v12500_v7, 5  ;;  %v8699_v1 = vrot.slane %v7268_v48, 5  ;;  %v12531_v51 = vpack.c.b16 %v8912_v54, %v8911_v8 }
 0x293   :  { %v5509_v8 = vunpack.c.l.b16 %v4937_v14  ;;  %v4939_v7 = vshrl.u32 %v4653_v53, 16  ;;  %v4942_v54 = vshll.u32 %v4653_v53, 16 }
 0x294   :  { %15201 = vst [vmem:[#allocation62_spill] sm:$0xff] %v12504_v4  ;;  %10117 = vmatmul.msk.bf16.gmra.mxu3 %vm2617_vm8, %v2616_v9  ;;  %v6115_v59 = vrot.slane %v6113_v15, 4  ;;  %v8700_v19 = vsel %vm11316_vm15, %v10798_v26, %v8699_v1  ;;  %v8701_v42 = vrot.slane %v8699_v1, 4  ;;  %v4927_v26 = vsel %vm11282_vm11, %v4922_v52, %v12496_v46  ;;  %v10918_v52 = vld [vmem:[#allocation2 + $0x138] sm:$0xff] }
 0x295   :  { %v8913_v11 = vunpack.c.l.b16 %v8700_v19  ;;  %v6114_v5 = vsel %vm11316_vm15, %v10546_v34, %v6113_v15  ;;  %v4657_v15 = vld [vmem:[#allocation2 + $0x88] sm:$0xf]  ;;  %v7272_v34 = vld [vmem:[#allocation2 + $0x44] sm:$0x1] }
 0x296   :  { %10512 = vmatmul.msk.bf16.gmra.mxu1 %vm2617_vm8, %v5563_v62  ;;  %v12516_v62 = vld [vmem:[#allocation2 + $0x80] sm:$0x1]  ;;  %v6292_v14 = vunpack.c.l.b16 %v6114_v5  ;;  %v8709_v5 = vrot.slane %v7272_v34, 5  ;;  %v4656_v34 = vld [vmem:[#allocation2 + $0x84] sm:$0xf] }
 0x297   :  { %10578 = vmatmul.msk.bf16.gmra.mxu2 %vm2617_vm8, %v6346_v3  ;;  %v12522_v9 = vpop.f32.mrf.mxu0  ;;  %v6116_v48 = vrot.slane %v12516_v62, 5 }
 0x298   :  { %15202 = vst [vmem:[#allocation63_spill] sm:$0xff] %v12522_v9  ;;  %v12528_v38 = vpop.f32.mrf.mxu2 }
 0x299   :  { %v2844_v58 = vpop.f32.mrf.mxu1  ;;  %15204 = vst [vmem:[#allocation65_spill] sm:$0xff] %v12528_v38  ;;  %v6117_v1 = vsel %vm11316_vm15, %v6115_v59, %v6116_v48 }
 0x29a   :  { %v12526_v3 = vadd.f32 %v3272_v44, %v2844_v58  ;;  %10489 = vmatmul.msk.bf16.gmra.mxu0 %vm2617_vm8, %v10943_v43  ;;  %v8703_v44 = vsel %vm11316_vm15, %v8701_v42, %v8702_v27  ;;  %v4950_v58 = vrot.slane %v4948_v47, 5  ;;  %v4954_v43 = vrot.slane %v4952_v45, 4 }
 0x29b   :  { %v8914_v30 = vunpack.c.l.b16 %v8703_v44  ;;  %v5508_v42 = vunpack.c.l.b16 %v4927_v26  ;;  %v6293_v27 = vunpack.c.l.b16 %v6117_v1  ;;  %v8558_v44 = vld [vmem:[#allocation2 + $0x3c] sm:$0xe]  ;;  %v4941_v47 = vrot.slane %v4939_v7, 4 }
 0x29c   :  { %15203 = vst [vmem:[#allocation64_spill] sm:$0xff] %v12526_v3  ;;  %v4944_v45 = vrot.slane %v4942_v54, 5  ;;  %v4955_v53 = vor.u32 %v4954_v43, %v4950_v58  ;;  %v4958_v1 = vshll.u32 %v12516_v62, 16 }
 0x29d   :  { %v12547_v12 = vpack.c.b16 %v8914_v30, %v8913_v11  ;;  %v5564_v59 = vpack.c.b16 %v5509_v8, %v5508_v42  ;;  %v8706_v11 = vrot.slane %v7271_v55, 5  ;;  %v10799_v30 = vrot.slane %v8558_v44, 9 }
 0x29e   :  { %v6347_v26 = vpack.c.b16 %v6293_v27, %v6292_v14  ;;  %v4945_v55 = vor.u32 %v4944_v45, %v4941_v47  ;;  %v4956_v7 = vrot.slane %v4955_v53, 4  ;;  %v4658_v27 = vld [vmem:[#allocation2 + $0x8c] sm:$0x1]  ;;  %v4960_v14 = vrot.slane %v4958_v1, 5 }
 0x29f   :  { %v12549_v19 = vpop.f32.mrf.mxu0  ;;  %v8707_v8 = vsel %vm11316_vm15, %v10799_v30, %v8706_v11  ;;  %v8708_v42 = vrot.slane %v8706_v11, 4  ;;  %v4976_v47 = vshrl.u32 %v4657_v15, 16 }
 0x2a0   :  { %15205 = vst [vmem:[#allocation66_spill] sm:$0xff] %v12549_v19  ;;  %v12553_v48 = vpop.f32.mrf.mxu2  ;;  %v6120_v19 = vrot.slane %v4657_v15, 5  ;;  %v8915_v44 = vunpack.c.l.b16 %v8707_v8  ;;  %v4946_v53 = vrot.slane %v4945_v55, 4  ;;  %v4961_v8 = vsel %vm11282_vm11, %v4956_v7, %v4960_v14 }
 0x2a1   :  { %15207 = vst [vmem:[#allocation68_spill] sm:$0xff] %v12553_v48  ;;  %v8710_v54 = vsel %vm11316_vm15, %v8708_v42, %v8709_v5  ;;  %v6123_v42 = vrot.slane %v4658_v27, 5  ;;  %v4963_v5 = vshrl.u32 %v4656_v34, 16 }
 0x2a2   :  { %v8916_v62 = vunpack.c.l.b16 %v8710_v54  ;;  %v6122_v11 = vrot.slane %v6120_v19, 4  ;;  %v4966_v54 = vshll.u32 %v4656_v34, 16  ;;  %v4951_v1 = vsel %vm11282_vm11, %v4946_v53, %v4950_v58  ;;  %v8559_v58 = vld [vmem:[#allocation2 + $0x48] sm:$0xe] }
 0x2a3   :  { %v12551_v46 = vpop.f32.mrf.mxu1  ;;  %v5510_v14 = vunpack.c.l.b16 %v4951_v1  ;;  %v10919_v53 = vld [vmem:[#allocation2 + $0x144] sm:$0xff] }
 0x2a4   :  { %15206 = vst [vmem:[#allocation67_spill] sm:$0xff] %v12551_v46  ;;  %10270 = vmatmul.msk.bf16.vlgmr.msra.gmra.mxu3 %vm2617_vm8, %v10918_v52  ;;  %v12571_v45 = vpack.c.b16 %v8916_v62, %v8915_v44  ;;  %v6124_v39 = vsel %vm11316_vm15, %v6122_v11, %v6123_v42  ;;  %v4978_v62 = vrot.slane %v4976_v47, 4  ;;  %v4968_v48 = vrot.slane %v4966_v54, 5  ;;  %v4660_v47 = vld [vmem:[#allocation2 + $0x94] sm:$0xf] }
 0x2a5   :  { %v6295_v34 = vunpack.c.l.b16 %v6124_v39  ;;  %v6127_v54 = vrot.slane %v4660_v47, 5 }
 0x2a6   :  { %10513 = vmatmul.msk.bf16.gmra.mxu1 %vm2617_vm8, %v5564_v59  ;;  %v12560_v9 = vpop.f32.mrf.mxu3  ;;  %v10944_v59 = vld [vmem:[#allocation2 + $0xfc] sm:$0xff] }
 0x2a7   :  { %15208 = vst [vmem:[#allocation69_spill] sm:$0xff] %v12560_v9  ;;  %10579 = vmatmul.msk.bf16.gmra.mxu2 %vm2617_vm8, %v6347_v26  ;;  %v12565_v43 = vpop.f32.mrf.mxu0  ;;  %v4972_v26 = vshll.u32 %v4657_v15, 16  ;;  %v5511_v15 = vunpack.c.l.b16 %v4961_v8  ;;  %v7287_v9 = vld [vmem:[#allocation2 + $0x80] sm:$0x1] }
 0x2a8   :  { %15209 = vst [vmem:[#allocation70_spill] sm:$0xff] %v12565_v43  ;;  %v12569_v30 = vpop.f32.mrf.mxu2  ;;  %v10547_v43 = vrot.slane %v5930_v33, 9 }
 0x2a9   :  { %15211 = vst [vmem:[#allocation72_spill] sm:$0xff] %v12569_v30  ;;  %v4974_v44 = vrot.slane %v4972_v26, 5  ;;  %v4965_v30 = vrot.slane %v4963_v5, 4  ;;  %v5565_v11 = vpack.c.b16 %v5511_v15, %v5510_v14  ;;  %v4982_v5 = vshll.u32 %v4658_v27, 16 }
 0x2aa   :  { %10490 = vmatmul.msk.bf16.gmra.mxu0 %vm2617_vm8, %v10944_v59  ;;  %v6121_v55 = vsel %vm11316_vm15, %v10547_v43, %v6120_v19  ;;  %v7274_v59 = vld [vmem:[#allocation2 + $0x4c] sm:$0xf]  ;;  %v10800_v19 = vrot.slane %v8559_v58, 9 }
 0x2ab   :  { %v12567_v52 = vpop.f32.mrf.mxu1  ;;  %v6294_v8 = vunpack.c.l.b16 %v6121_v55  ;;  %v4979_v26 = vor.u32 %v4978_v62, %v4974_v44  ;;  %v8713_v38 = vrot.slane %v7274_v59, 5  ;;  %v4969_v43 = vor.u32 %v4968_v48, %v4965_v30  ;;  %v5931_v48 = vld [vmem:[#allocation2 + $0x90] sm:$0xe] }
 0x2ac   :  { %15210 = vst [vmem:[#allocation71_spill] sm:$0xff] %v12567_v52  ;;  %v7275_v52 = vld [vmem:[#allocation2 + $0x50] sm:$0x1]  ;;  %v4984_v58 = vrot.slane %v4982_v5, 5  ;;  %v10548_v5 = vrot.slane %v5931_v48, 9 }
 0x2ad   :  { %v6348_v39 = vpack.c.b16 %v6295_v34, %v6294_v8  ;;  %v8714_v1 = vsel %vm11316_vm15, %v10800_v19, %v8713_v38  ;;  %v8715_v15 = vrot.slane %v8713_v38, 4  ;;  %v8716_v14 = vrot.slane %v7275_v52, 5  ;;  %v4661_v34 = vld [vmem:[#allocation2 + $0x98] sm:$0x1] }
 0x2ae   :  { %v12580_v35 = vpop.f32.mrf.mxu3  ;;  %v4980_v62 = vrot.slane %v4979_v26, 4  ;;  %v8917_v27 = vunpack.c.l.b16 %v8714_v1  ;;  %v4970_v38 = vrot.slane %v4969_v43, 4  ;;  %v6129_v52 = vrot.slane %v6127_v54, 4  ;;  %v4659_v1 = vld [vmem:[#allocation2 + $0x90] sm:$0xf] }
 0x2af   :  { %15212 = vst [vmem:[#allocation73_spill] sm:$0xff] %v12580_v35  ;;  %v12584_v7 = vpop.f32.mrf.mxu0  ;;  %v8717_v55 = vsel %vm11316_vm15, %v8715_v15, %v8716_v14  ;;  %v4996_v19 = vshll.u32 %v4660_v47, 16  ;;  %v6130_v14 = vrot.slane %v4661_v34, 5  ;;  %v6128_v43 = vsel %vm11316_vm15, %v10548_v5, %v6127_v54  ;;  %v7277_v48 = vld [vmem:[#allocation2 + $0x58] sm:$0xf] }
 0x2b0   :  { %15213 = vst [vmem:[#allocation74_spill] sm:$0xff] %v12584_v7  ;;  %v12588_v42 = vpop.f32.mrf.mxu2  ;;  %v8918_v30 = vunpack.c.l.b16 %v8717_v55  ;;  %v4985_v26 = vsel %vm11282_vm11, %v4980_v62, %v4984_v58  ;;  %v4975_v55 = vsel %vm11282_vm11, %v4970_v38, %v4974_v44  ;;  %v4990_v58 = vshll.u32 %v4659_v1, 16  ;;  %v10920_v38 = vld [vmem:[#allocation2 + $0x150] sm:$0xff]  ;;  %v4663_v5 = vld [vmem:[#allocation2 + $0xa0] sm:$0xf] }
 0x2b1   :  { %15215 = vst [vmem:[#allocation76_spill] sm:$0xff] %v12588_v42  ;;  %v6296_v54 = vunpack.c.l.b16 %v6128_v43 }
 0x2b2   :  { %v12607_v15 = vpack.c.b16 %v8918_v30, %v8917_v27  ;;  %v4998_v27 = vrot.slane %v4996_v19, 5  ;;  %v8720_v19 = vrot.slane %v7277_v48, 5 }
 0x2b3   :  { %v12586_v33 = vpop.f32.mrf.mxu1 }
 0x2b4   :  { %15214 = vst [vmem:[#allocation75_spill] sm:$0xff] %v12586_v33  ;;  %10271 = vmatmul.msk.bf16.gmra.mxu3 %vm2617_vm8, %v10919_v53  ;;  %v8560_v33 = vld [vmem:[#allocation2 + $0x54] sm:$0xe]  ;;  %v8722_v43 = vrot.slane %v8720_v19, 4 }
 0x2b6   :  { %10514 = vmatmul.msk.bf16.gmra.mxu1 %vm2617_vm8, %v5565_v11  ;;  %v12594_v7 = vpop.f32.mrf.mxu3  ;;  %v10945_v11 = vld [vmem:[#allocation2 + $0x108] sm:$0xff] }
 0x2b7   :  { %15216 = vst [vmem:[#allocation77_spill] sm:$0xff] %v12594_v7  ;;  %10580 = vmatmul.msk.bf16.gmra.mxu2 %vm2617_vm8, %v6348_v39  ;;  %v12599_v59 = vpop.f32.mrf.mxu0  ;;  %v5000_v39 = vshrl.u32 %v4660_v47, 16  ;;  %v4987_v47 = vshrl.u32 %v4659_v1, 16  ;;  %v7278_v1 = vld [vmem:[#allocation2 + $0x5c] sm:$0x1] }
 0x2b8   :  { %15217 = vst [vmem:[#allocation78_spill] sm:$0xff] %v12599_v59  ;;  %v5513_v59 = vunpack.c.l.b16 %v4985_v26  ;;  %v7281_v7 = vld [vmem:[#allocation2 + $0x68] sm:$0x1] }
 0x2b9   :  { %v5002_v30 = vrot.slane %v5000_v39, 4  ;;  %v10801_v39 = vrot.slane %v8560_v33, 9 }
 0x2ba   :  { %v12603_v8 = vpop.f32.mrf.mxu2  ;;  %10491 = vmatmul.msk.bf16.gmra.mxu0 %vm2617_vm8, %v10945_v11  ;;  %v5512_v11 = vunpack.c.l.b16 %v4975_v55  ;;  %v5006_v55 = vshll.u32 %v4661_v34, 16 }
 0x2bb   :  { %v12601_v53 = vpop.f32.mrf.mxu1  ;;  %15219 = vst [vmem:[#allocation80_spill] sm:$0xff] %v12603_v8  ;;  %v6131_v8 = vsel %vm11316_vm15, %v6129_v52, %v6130_v14  ;;  %v4989_v52 = vrot.slane %v4987_v47, 4  ;;  %v4992_v14 = vrot.slane %v4990_v58, 5 }
 0x2bc   :  { %15218 = vst [vmem:[#allocation79_spill] sm:$0xff] %v12601_v53  ;;  %v6297_v53 = vunpack.c.l.b16 %v6131_v8  ;;  %v5566_v26 = vpack.c.b16 %v5513_v59, %v5512_v11  ;;  %v8721_v59 = vsel %vm11316_vm15, %v10801_v39, %v8720_v19  ;;  %v8723_v11 = vrot.slane %v7278_v1, 5 }
 0x2bd   :  { %v4993_v47 = vor.u32 %v4992_v14, %v4989_v52  ;;  %v5008_v48 = vrot.slane %v5006_v55, 5  ;;  %v8919_v34 = vunpack.c.l.b16 %v8721_v59  ;;  %v5932_v14 = vld [vmem:[#allocation2 + $0x9c] sm:$0xe]  ;;  %v5020_v59 = vshll.u32 %v4663_v5, 16 }
 0x2be   :  { %v12616_v62 = vpop.f32.mrf.mxu3  ;;  %v6349_v8 = vpack.c.b16 %v6297_v53, %v6296_v54  ;;  %v12635_v53 = vld [vmem:[#allocation2 + $0xa4] sm:$0x1]  ;;  %v10946_v54 = vld [vmem:[#allocation2 + $0x114] sm:$0xff]  ;;  %v4662_v55 = vld [vmem:[#allocation2 + $0x9c] sm:$0xf] }
 0x2bf   :  { %15220 = vst [vmem:[#allocation81_spill] sm:$0xff] %v12616_v62  ;;  %v12618_v42 = vpop.f32.mrf.mxu0  ;;  %v5003_v62 = vor.u32 %v5002_v30, %v4998_v27  ;;  %v8724_v30 = vsel %vm11316_vm15, %v8722_v43, %v8723_v11  ;;  %v4994_v52 = vrot.slane %v4993_v47, 4  ;;  %v5024_v43 = vshrl.u32 %v4663_v5, 16 }
 0x2c0   :  { %15221 = vst [vmem:[#allocation82_spill] sm:$0xff] %v12618_v42  ;;  %v6134_v42 = vrot.slane %v4663_v5, 5 }
 0x2c1   :  { %v5004_v58 = vrot.slane %v5003_v62, 4  ;;  %v4999_v11 = vsel %vm11282_vm11, %v4994_v52, %v4998_v27  ;;  %v8561_v27 = vld [vmem:[#allocation2 + $0x60] sm:$0xe] }
 0x2c2   :  { %v12622_v46 = vpop.f32.mrf.mxu2  ;;  %v6136_v1 = vrot.slane %v6134_v42, 4 }
 0x2c3   :  { %v12620_v44 = vpop.f32.mrf.mxu1  ;;  %15223 = vst [vmem:[#allocation84_spill] sm:$0xff] %v12622_v46  ;;  %v5009_v62 = vsel %vm11282_vm11, %v5004_v58, %v5008_v48  ;;  %v5011_v58 = vshrl.u32 %v4662_v55, 16  ;;  %v5014_v48 = vshll.u32 %v4662_v55, 16  ;;  %v5026_v46 = vrot.slane %v5024_v43, 4 }
 0x2c4   :  { %15222 = vst [vmem:[#allocation83_spill] sm:$0xff] %v12620_v44  ;;  %10272 = vmatmul.msk.bf16.gmra.mxu3 %vm2617_vm8, %v10920_v38  ;;  %v8920_v38 = vunpack.c.l.b16 %v8724_v30  ;;  %v5515_v30 = vunpack.c.l.b16 %v5009_v62  ;;  %v10921_v62 = vld [vmem:[#allocation2 + $0x15c] sm:$0xff]  ;;  %v5030_v43 = vshll.u32 %v12635_v53, 16 }
 0x2c5   :  { %v5013_v55 = vrot.slane %v5011_v58, 4 }
 0x2c6   :  { %10515 = vmatmul.msk.bf16.gmra.mxu1 %vm2617_vm8, %v5566_v26  ;;  %v12643_v39 = vpack.c.b16 %v8920_v38, %v8919_v34  ;;  %v5514_v34 = vunpack.c.l.b16 %v4999_v11  ;;  %v5016_v11 = vrot.slane %v5014_v48, 5 }
 0x2c7   :  { %v12628_v44 = vpop.f32.mrf.mxu3  ;;  %10581 = vmatmul.msk.bf16.gmra.mxu2 %vm2617_vm8, %v6349_v8  ;;  %v12633_v33 = vpop.f32.mrf.mxu0  ;;  %v6137_v8 = vrot.slane %v12635_v53, 5 }
 0x2c8   :  { %15224 = vst [vmem:[#allocation85_spill] sm:$0xff] %v12628_v44  ;;  %v5017_v58 = vor.u32 %v5016_v11, %v5013_v55 }
 0x2c9   :  { %15225 = vst [vmem:[#allocation86_spill] sm:$0xff] %v12633_v33  ;;  %v10549_v33 = vrot.slane %v5932_v14, 9  ;;  %v6138_v47 = vsel %vm11316_vm15, %v6136_v1, %v6137_v8  ;;  %v5567_v14 = vpack.c.b16 %v5515_v30, %v5514_v34  ;;  %v4666_v1 = vld [vmem:[#allocation2 + $0xac] sm:$0xf] }
 0x2ca   :  { %v12639_v19 = vpop.f32.mrf.mxu2  ;;  %10492 = vmatmul.msk.bf16.gmra.mxu0 %vm2617_vm8, %v10946_v54  ;;  %v5022_v54 = vrot.slane %v5020_v59, 5  ;;  %v6299_v44 = vunpack.c.l.b16 %v6138_v47  ;;  %v6141_v47 = vrot.slane %v4666_v1, 5  ;;  %v5018_v11 = vrot.slane %v5017_v58, 4 }
 0x2cb   :  { %v12637_v26 = vpop.f32.mrf.mxu1  ;;  %15227 = vst [vmem:[#allocation88_spill] sm:$0xff] %v12639_v19  ;;  %v6135_v38 = vsel %vm11316_vm15, %v10549_v33, %v6134_v42  ;;  %v10802_v33 = vrot.slane %v8561_v27, 9 }
 0x2cc   :  { %15226 = vst [vmem:[#allocation87_spill] sm:$0xff] %v12637_v26  ;;  %v7280_v26 = vld [vmem:[#allocation2 + $0x64] sm:$0xf]  ;;  %v5027_v42 = vor.u32 %v5026_v46, %v5022_v54 }
 0x2cd   :  { %v8727_v35 = vrot.slane %v7280_v26, 5 }
 0x2ce   :  { %v5028_v26 = vrot.slane %v5027_v42, 4  ;;  %v5933_v42 = vld [vmem:[#allocation2 + $0xa8] sm:$0xe] }
 0x2cf   :  { %v12651_v19 = vpop.f32.mrf.mxu3  ;;  %v12655_v5 = vpop.f32.mrf.mxu0  ;;  %v8728_v30 = vsel %vm11316_vm15, %v10802_v33, %v8727_v35  ;;  %v8729_v34 = vrot.slane %v8727_v35, 4  ;;  %v5032_v35 = vrot.slane %v5030_v43, 5  ;;  %v5044_v33 = vshll.u32 %v4666_v1, 16 }
 0x2d0   :  { %15228 = vst [vmem:[#allocation89_spill] sm:$0xff] %v12651_v19  ;;  %v6298_v19 = vunpack.c.l.b16 %v6135_v38  ;;  %v8921_v53 = vunpack.c.l.b16 %v8728_v30 }
 0x2d1   :  { %15229 = vst [vmem:[#allocation90_spill] sm:$0xff] %v12655_v5  ;;  %v8730_v5 = vrot.slane %v7281_v7, 5  ;;  %v6143_v7 = vrot.slane %v6141_v47, 4 }
 0x2d2   :  { %v12659_v8 = vpop.f32.mrf.mxu2  ;;  %v6350_v59 = vpack.c.b16 %v6299_v44, %v6298_v19  ;;  %v4667_v44 = vld [vmem:[#allocation2 + $0xb0] sm:$0x1]  ;;  %v4665_v19 = vld [vmem:[#allocation2 + $0xa8] sm:$0xf] }
 0x2d3   :  { %v12657_v52 = vpop.f32.mrf.mxu1  ;;  %15231 = vst [vmem:[#allocation92_spill] sm:$0xff] %v12659_v8  ;;  %v8731_v46 = vsel %vm11316_vm15, %v8729_v34, %v8730_v5  ;;  %v5048_v8 = vshrl.u32 %v4666_v1, 16  ;;  %v5033_v5 = vsel %vm11282_vm11, %v5028_v26, %v5032_v35  ;;  %v6144_v30 = vrot.slane %v4667_v44, 5 }
 0x2d4   :  { %15230 = vst [vmem:[#allocation91_spill] sm:$0xff] %v12657_v52  ;;  %10273 = vmatmul.msk.bf16.gmra.mxu3 %vm2617_vm8, %v10921_v62  ;;  %v8922_v27 = vunpack.c.l.b16 %v8731_v46  ;;  %v5023_v34 = vsel %vm11282_vm11, %v5018_v11, %v5022_v54  ;;  %v5035_v46 = vshrl.u32 %v4665_v19, 16  ;;  %v5038_v43 = vshll.u32 %v4665_v19, 16  ;;  %v8562_v19 = vld [vmem:[#allocation2 + $0x6c] sm:$0xe] }
 0x2d5   :  { %v6145_v1 = vsel %vm11316_vm15, %v6143_v7, %v6144_v30  ;;  %v5050_v58 = vrot.slane %v5048_v8, 4  ;;  %v5516_v35 = vunpack.c.l.b16 %v5023_v34 }
 0x2d6   :  { %10516 = vmatmul.msk.bf16.gmra.mxu1 %vm2617_vm8, %v5567_v14  ;;  %v10947_v14 = vld [vmem:[#allocation2 + $0x120] sm:$0xff]  ;;  %v6301_v52 = vunpack.c.l.b16 %v6145_v1  ;;  %v5037_v54 = vrot.slane %v5035_v46, 4  ;;  %v5040_v11 = vrot.slane %v5038_v43, 5 }
 0x2d7   :  { %v12666_v38 = vpop.f32.mrf.mxu3  ;;  %10582 = vmatmul.msk.bf16.gmra.mxu2 %vm2617_vm8, %v6350_v59  ;;  %v12671_v48 = vpop.f32.mrf.mxu0  ;;  %v12677_v59 = vpack.c.b16 %v8922_v27, %v8921_v53  ;;  %v5517_v53 = vunpack.c.l.b16 %v5033_v5  ;;  %v7284_v5 = vld [vmem:[#allocation2 + $0x74] sm:$0x1] }
 0x2d8   :  { %15232 = vst [vmem:[#allocation93_spill] sm:$0xff] %v12666_v38  ;;  %v10922_v38 = vld [vmem:[#allocation2 + $0x168] sm:$0xff]  ;;  %v5041_v46 = vor.u32 %v5040_v11, %v5037_v54 }
 0x2d9   :  { %15233 = vst [vmem:[#allocation94_spill] sm:$0xff] %v12671_v48  ;;  %v10550_v48 = vrot.slane %v5933_v42, 9  ;;  %v10948_v11 = vld [vmem:[#allocation2 + $0x12c] sm:$0xff] }
 0x2da   :  { %v12675_v55 = vpop.f32.mrf.mxu2  ;;  %10493 = vmatmul.msk.bf16.gmra.mxu0 %vm2617_vm8, %v10947_v14  ;;  %v7283_v14 = vld [vmem:[#allocation2 + $0x70] sm:$0xf] }
 0x2db   :  { %v12673_v62 = vpop.f32.mrf.mxu1  ;;  %15235 = vst [vmem:[#allocation96_spill] sm:$0xff] %v12675_v55  ;;  %v5046_v55 = vrot.slane %v5044_v33, 5  ;;  %v6142_v27 = vsel %vm11316_vm15, %v10550_v48, %v6141_v47  ;;  %v5568_v33 = vpack.c.b16 %v5517_v53, %v5516_v35  ;;  %v5054_v47 = vshll.u32 %v4667_v44, 16  ;;  %v4669_v48 = vld [vmem:[#allocation2 + $0xb8] sm:$0xf] }
 0x2dc   :  { %15234 = vst [vmem:[#allocation95_spill] sm:$0xff] %v12673_v62  ;;  %v6300_v30 = vunpack.c.l.b16 %v6142_v27  ;;  %v8737_v53 = vrot.slane %v7284_v5, 5  ;;  %v6148_v27 = vrot.slane %v4669_v48, 5 }
 0x2dd   :  { %v5051_v7 = vor.u32 %v5050_v58, %v5046_v55 }
 0x2de   :  { %v6351_v34 = vpack.c.b16 %v6301_v52, %v6300_v30  ;;  %v6150_v5 = vrot.slane %v6148_v27, 4 }
 0x2df   :  { %v12686_v62 = vpop.f32.mrf.mxu3  ;;  %v12690_v26 = vpop.f32.mrf.mxu0  ;;  %v5052_v43 = vrot.slane %v5051_v7, 4  ;;  %v5042_v7 = vrot.slane %v5041_v46, 4 }
 0x2e0   :  { %15236 = vst [vmem:[#allocation97_spill] sm:$0xff] %v12686_v62  ;;  %v8734_v62 = vrot.slane %v7283_v14, 5  ;;  %v5056_v14 = vrot.slane %v5054_v47, 5  ;;  %v4668_v47 = vld [vmem:[#allocation2 + $0xb4] sm:$0xf] }
 0x2e1   :  { %15237 = vst [vmem:[#allocation98_spill] sm:$0xff] %v12690_v26  ;;  %v10803_v26 = vrot.slane %v8562_v19, 9 }
 0x2e2   :  { %v12694_v8 = vpop.f32.mrf.mxu2  ;;  %v8736_v58 = vrot.slane %v8734_v62, 4 }
 0x2e3   :  { %v12692_v42 = vpop.f32.mrf.mxu1  ;;  %15239 = vst [vmem:[#allocation100_spill] sm:$0xff] %v12694_v8  ;;  %v8735_v1 = vsel %vm11316_vm15, %v10803_v26, %v8734_v62  ;;  %v5057_v62 = vsel %vm11282_vm11, %v5052_v43, %v5056_v14  ;;  %v4670_v26 = vld [vmem:[#allocation2 + $0xbc] sm:$0x1]  ;;  %v5072_v8 = vshrl.u32 %v4669_v48, 16 }
 0x2e4   :  { %15238 = vst [vmem:[#allocation99_spill] sm:$0xff] %v12692_v42  ;;  %10274 = vmatmul.msk.bf16.gmra.mxu3 %vm2617_vm8, %v10922_v38  ;;  %v8738_v38 = vsel %vm11316_vm15, %v8736_v58, %v8737_v53  ;;  %v8923_v19 = vunpack.c.l.b16 %v8735_v1  ;;  %v5047_v1 = vsel %vm11282_vm11, %v5042_v7, %v5046_v55  ;;  %v6151_v53 = vrot.slane %v4670_v26, 5  ;;  %v10923_v7 = vld [vmem:[#allocation2 + $0x174] sm:$0xff] }
 0x2e5   :  { %v8924_v52 = vunpack.c.l.b16 %v8738_v38  ;;  %v5519_v46 = vunpack.c.l.b16 %v5057_v62  ;;  %v5074_v42 = vrot.slane %v5072_v8, 4  ;;  %v4672_v8 = vld [vmem:[#allocation2 + $0xc4] sm:$0xf] }
 0x2e6   :  { %10517 = vmatmul.msk.bf16.gmra.mxu1 %vm2617_vm8, %v5568_v33  ;;  %v5934_v33 = vld [vmem:[#allocation2 + $0xb4] sm:$0xe]  ;;  %v6152_v14 = vsel %vm11316_vm15, %v6150_v5, %v6151_v53 }
 0x2e7   :  { %v12700_v35 = vpop.f32.mrf.mxu3  ;;  %10583 = vmatmul.msk.bf16.gmra.mxu2 %vm2617_vm8, %v6351_v34  ;;  %v12705_v44 = vpop.f32.mrf.mxu0  ;;  %v5068_v34 = vshll.u32 %v4669_v48, 16  ;;  %v12713_v58 = vpack.c.b16 %v8924_v52, %v8923_v19  ;;  %v10551_v38 = vrot.slane %v5934_v33, 9  ;;  %v5518_v48 = vunpack.c.l.b16 %v5047_v1  ;;  %v7286_v19 = vld [vmem:[#allocation2 + $0x7c] sm:$0xf]  ;;  %v8563_v52 = vld [vmem:[#allocation2 + $0x78] sm:$0xe] }
 0x2e8   :  { %15240 = vst [vmem:[#allocation101_spill] sm:$0xff] %v12700_v35  ;;  %v6303_v33 = vunpack.c.l.b16 %v6152_v14  ;;  %v8741_v1 = vrot.slane %v7286_v19, 5  ;;  %v8744_v14 = vrot.slane %v7287_v9, 5  ;;  %v10949_v9 = vld [vmem:[#allocation2 + $0x138] sm:$0xff] }
 0x2e9   :  { %15241 = vst [vmem:[#allocation102_spill] sm:$0xff] %v12705_v44  ;;  %v5059_v44 = vshrl.u32 %v4668_v47, 16  ;;  %v6149_v55 = vsel %vm11316_vm15, %v10551_v38, %v6148_v27  ;;  %v5569_v62 = vpack.c.b16 %v5519_v46, %v5518_v48  ;;  %v5078_v27 = vshll.u32 %v4670_v26, 16 }
 0x2ea   :  { %v12711_v30 = vpop.f32.mrf.mxu2  ;;  %10494 = vmatmul.msk.bf16.gmra.mxu0 %vm2617_vm8, %v10948_v11  ;;  %v6302_v53 = vunpack.c.l.b16 %v6149_v55  ;;  %v8743_v46 = vrot.slane %v8741_v1, 4  ;;  %v6155_v48 = vrot.slane %v4672_v8, 5 }
 0x2eb   :  { %v12707_v54 = vpop.f32.mrf.mxu1  ;;  %15243 = vst [vmem:[#allocation104_spill] sm:$0xff] %v12711_v30  ;;  %v5062_v30 = vshll.u32 %v4668_v47, 16  ;;  %v5080_v26 = vrot.slane %v5078_v27, 5  ;;  %v4671_v27 = vld [vmem:[#allocation2 + $0xc0] sm:$0xf] }
 0x2ec   :  { %15242 = vst [vmem:[#allocation103_spill] sm:$0xff] %v12707_v54  ;;  %v5070_v54 = vrot.slane %v5068_v34, 5  ;;  %v10804_v34 = vrot.slane %v8563_v52, 9  ;;  %v8745_v19 = vsel %vm11316_vm15, %v8743_v46, %v8744_v14  ;;  %v5092_v46 = vshll.u32 %v4672_v8, 16 }
 0x2ed   :  { %v5064_v5 = vrot.slane %v5062_v30, 5  ;;  %v8926_v55 = vunpack.c.l.b16 %v8745_v19  ;;  %v5096_v14 = vshrl.u32 %v4672_v8, 16  ;;  %v7289_v8 = vld [vmem:[#allocation2 + $0x88] sm:$0xf] }
 0x2ee   :  { %v5075_v47 = vor.u32 %v5074_v42, %v5070_v54  ;;  %v8742_v38 = vsel %vm11316_vm15, %v10804_v34, %v8741_v1  ;;  %v6157_v1 = vrot.slane %v6155_v48, 4 }
 0x2ef   :  { %v12718_v43 = vpop.f32.mrf.mxu3  ;;  %v12722_v35 = vpop.f32.mrf.mxu0  ;;  %v8925_v52 = vunpack.c.l.b16 %v8742_v38 }
 0x2f0   :  { %15244 = vst [vmem:[#allocation105_spill] sm:$0xff] %v12718_v43  ;;  %v5061_v43 = vrot.slane %v5059_v44, 4  ;;  %v6352_v44 = vpack.c.b16 %v6303_v33, %v6302_v53  ;;  %v5076_v42 = vrot.slane %v5075_v47, 4  ;;  %v5935_v33 = vld [vmem:[#allocation2 + $0xc0] sm:$0xe] }
 0x2f1   :  { %15245 = vst [vmem:[#allocation106_spill] sm:$0xff] %v12722_v35  ;;  %v12745_v53 = vpack.c.b16 %v8926_v55, %v8925_v52  ;;  %v10552_v19 = vrot.slane %v5935_v33, 9  ;;  %v8564_v33 = vld [vmem:[#allocation2 + $0x84] sm:$0xe] }
 0x2f2   :  { %v12728_v3 = vpop.f32.mrf.mxu2  ;;  %v5065_v30 = vor.u32 %v5064_v5, %v5061_v43  ;;  %v5081_v47 = vsel %vm11282_vm11, %v5076_v42, %v5080_v26  ;;  %v5083_v42 = vshrl.u32 %v4671_v27, 16  ;;  %v5086_v26 = vshll.u32 %v4671_v27, 16 }
 0x2f3   :  { %v12726_v11 = vpop.f32.mrf.mxu1  ;;  %15247 = vst [vmem:[#allocation108_spill] sm:$0xff] %v12728_v3  ;;  %v5098_v3 = vrot.slane %v5096_v14, 4  ;;  %v8748_v27 = vrot.slane %v7289_v8, 5 }
 0x2f4   :  { %15246 = vst [vmem:[#allocation107_spill] sm:$0xff] %v12726_v11  ;;  %10275 = vmatmul.msk.bf16.gmra.mxu3 %vm2617_vm8, %v10923_v7  ;;  %v5066_v5 = vrot.slane %v5065_v30, 4  ;;  %v6156_v30 = vsel %vm11316_vm15, %v10552_v19, %v6155_v48  ;;  %v3315_v11 = vld [vmem:[#allocation2] sm:$0xe]  ;;  %v5088_v48 = vrot.slane %v5086_v26, 5 }
 0x2f5   :  { %15251 = vst [vmem:[#allocation112_spill] sm:$0xff] %v12745_v53  ;;  %v10278_v19 = vrot.slane %v3315_v11, 9 }
 0x2f6   :  { %10518 = vmatmul.msk.bf16.gmra.mxu1 %vm2617_vm8, %v5569_v62  ;;  %v12741_v62 = vld [vmem:[#allocation2 + $0xc8] sm:$0x1] }
 0x2f7   :  { %v12734_v35 = vpop.f32.mrf.mxu3  ;;  %10584 = vmatmul.msk.bf16.gmra.mxu2 %vm2617_vm8, %v6352_v44  ;;  %v12739_v7 = vpop.f32.mrf.mxu0  ;;  %v6158_v38 = vrot.slane %v12741_v62, 5  ;;  %v5071_v44 = vsel %vm11282_vm11, %v5066_v5, %v5070_v54 }
 0x2f8   :  { %15248 = vst [vmem:[#allocation109_spill] sm:$0xff] %v12734_v35  ;;  %v5085_v35 = vrot.slane %v5083_v42, 4  ;;  %v15257_v42 = vrot.slane %v11274_v40, 5 }
 0x2f9   :  { %15249 = vst [vmem:[#allocation110_spill] sm:$0xff] %v12739_v7  ;;  %v5521_v7 = vunpack.c.l.b16 %v5081_v47  ;;  %v6159_v52 = vsel %vm11316_vm15, %v6157_v1, %v6158_v38  ;;  %v10924_v47 = vld [vmem:[#allocation2 + $0x180] sm:$0xff]  ;;  %v6304_v38 = vunpack.c.l.b16 %v6156_v30  ;;  %v5102_v30 = vshll.u32 %v12741_v62, 16 }
 0x2fa   :  { %v12747_v43 = vpop.f32.mrf.mxu2  ;;  %10495 = vmatmul.msk.bf16.gmra.mxu0 %vm2617_vm8, %v10949_v9  ;;  %v5520_v9 = vunpack.c.l.b16 %v5071_v44  ;;  %v6305_v54 = vunpack.c.l.b16 %v6159_v52  ;;  %v4675_v52 = vld [vmem:[#allocation2 + $0xe8] sm:$0xf]  ;;  %v3417_v11 = vsel %vm11316_vm15, %v10278_v19, %v15257_v42  ;;  %v5089_v62 = vor.u32 %v5088_v48, %v5085_v35  ;;  %v5936_v48 = vld [vmem:[#allocation2 + $0xe4] sm:$0xe] }
 0x2fb   :  { %v12743_v34 = vpop.f32.mrf.mxu1  ;;  %15252 = vst [vmem:[#allocation113_spill] sm:$0xff] %v12747_v43  ;;  %v12761_v43 = vrot.slane %v5092_v46, 5  ;;  %v3641_v46 = vunpack.c.l.b16 %v11322_v29  ;;  %v10602_v29 = vld [vmem:[%s15110_s3 + $0xc] sm:$0x3] }
 0x2fc   :  { %15250 = vst [vmem:[#allocation111_spill] sm:$0xff] %v12743_v34  ;;  %v5570_v1 = vpack.c.b16 %v5521_v7, %v5520_v9  ;;  %v6353_v7 = vpack.c.b16 %v6305_v54, %v6304_v38  ;;  %v3640_v9 = vunpack.c.l.b16 %v3417_v11  ;;  %v5090_v35 = vrot.slane %v5089_v62, 4 }
 0x2fd   :  { %v5099_v44 = vor.u32 %v5098_v3, %v12761_v43  ;;  %v7026_v3 = vsel %vm2714_vm7, %v10602_v29, 0  ;;  %v4676_v29 = vld [vmem:[#allocation2 + $0xec] sm:$0x1] }
 0x2fe   :  { %7035 = vmatpush.bf16.msra.mxu3 %v7026_v3 }
 0x2ff   :  { %v12757_v55 = vpop.f32.mrf.mxu3  ;;  %v12763_v34 = vpop.f32.mrf.mxu0  ;;  %v5100_v40 = vrot.slane %v5099_v44, 4  ;;  %v5116_v44 = vshll.u32 %v4675_v52, 16 }
 0x300   :  { %15253 = vst [vmem:[#allocation114_spill] sm:$0xff] %v12757_v55  ;;  %v7290_v55 = vld [vmem:[#allocation2 + $0x8c] sm:$0x1] }
 0x301   :  { %15254 = vst [vmem:[#allocation115_spill] sm:$0xff] %v12763_v34  ;;  %v10805_v34 = vrot.slane %v8564_v33, 9  ;;  %v8751_v26 = vrot.slane %v7290_v55, 5  ;;  %v8750_v33 = vrot.slane %v8748_v27, 4 }
 0x302   :  { %v12769_v14 = vpop.f32.mrf.mxu2 }
 0x303   :  { %v12765_v5 = vpop.f32.mrf.mxu1  ;;  %15256 = vst [vmem:[#allocation117_spill] sm:$0xff] %v12769_v14  ;;  %v8749_v8 = vsel %vm11316_vm15, %v10805_v34, %v8748_v27  ;;  %v8752_v55 = vsel %vm11316_vm15, %v8750_v33, %v8751_v26  ;;  %v10950_v34 = vld [vmem:[#allocation2 + $0x144] sm:$0xff]  ;;  %v5104_v27 = vrot.slane %v5102_v30, 5  ;;  %v5120_v26 = vshrl.u32 %v4675_v52, 16  ;;  %v10828_v30 = vld [vmem:[%s15110_s3 + $0x10] sm:$0x3] }
 0x304   :  { %15255 = vst [vmem:[#allocation116_spill] sm:$0xff] %v12765_v5  ;;  %10276 = vmatmul.msk.bf16.gmra.mxu3 %vm2617_vm8, %v10924_v47  ;;  %v6162_v47 = vrot.slane %v4675_v52, 5  ;;  %v8927_v19 = vunpack.c.l.b16 %v8749_v8  ;;  %v8928_v42 = vunpack.c.l.b16 %v8752_v55  ;;  %v4674_v14 = vld [vmem:[#allocation2 + $0xe4] sm:$0xf]  ;;  %v6165_v8 = vrot.slane %v4676_v29, 5 }
 0x305   :  { %v9102_v62 = vsel %vm2714_vm7, %v10828_v30, 0  ;;  %v10553_v52 = vrot.slane %v5936_v48, 9 }
 0x306   :  { %10519 = vmatmul.msk.bf16.gmra.mxu1 %vm2617_vm8, %v5570_v1  ;;  %v12787_v1 = vpack.c.b16 %v3641_v46, %v3640_v9  ;;  %v6164_v3 = vrot.slane %v6162_v47, 4  ;;  %v5105_v46 = vsel %vm11282_vm11, %v5100_v40, %v5104_v27  ;;  %v10763_v9 = vld [vmem:[%s15110_s3 + $0xe] sm:$0x3]  ;;  %v5095_v40 = vsel %vm11282_vm11, %v5090_v35, %v12761_v43 }
 0x307   :  { %v12784_v54 = vpop.f32.mrf.mxu3  ;;  %10585 = vmatmul.msk.bf16.gmra.mxu2 %vm2617_vm8, %v6353_v7  ;;  %v12791_v38 = vpop.f32.mrf.mxu0  ;;  %v12795_v7 = vpack.c.b16 %v8928_v42, %v8927_v19  ;;  %v8320_v33 = vsel %vm2714_vm7, %v10763_v9, 0  ;;  %9111 = vmatpush.bf16.msra.mxu1 %v9102_v62  ;;  %v5523_v42 = vunpack.c.l.b16 %v5105_v46  ;;  %v5107_v27 = vshrl.u32 %v4674_v14, 16  ;;  %v10925_v35 = vld [vmem:[#allocation2 + $0x18c] sm:$0xff] }
 0x308   :  { %15258 = vst [vmem:[#allocation118_spill] sm:$0xff] %v12784_v54  ;;  %8329 = vmatpush.bf16.msra.mxu0 %v8320_v33  ;;  %v5118_v9 = vrot.slane %v5116_v44, 5  ;;  %v6163_v5 = vsel %vm11316_vm15, %v10553_v52, %v6162_v47  ;;  %v7292_v44 = vld [vmem:[#allocation2 + $0x94] sm:$0xf] }
 0x309   :  { %15259 = vst [vmem:[#allocation119_spill] sm:$0xff] %v12791_v38  ;;  %v5110_v38 = vshll.u32 %v4674_v14, 16  ;;  %v5109_v62 = vrot.slane %v5107_v27, 4  ;;  %v4678_v14 = vld [vmem:[#allocation2 + $0xf4] sm:$0xf] }
 0x30a   :  { %15261 = vst [vmem:[#allocation121_spill] sm:$0xff] %v12795_v7  ;;  %10496 = vmatmul.msk.bf16.gmra.mxu0 %vm2617_vm8, %v10950_v34  ;;  %v12808_v55 = vpop.f32.mrf.mxu2  ;;  %v6166_v34 = vsel %vm11316_vm15, %v6164_v3, %v6165_v8  ;;  %v6306_v3 = vunpack.c.l.b16 %v6163_v5  ;;  %v6169_v52 = vrot.slane %v4678_v14, 5 }
 0x30b   :  { %v12793_v11 = vpop.f32.mrf.mxu1  ;;  %15262 = vst [vmem:[#allocation122_spill] sm:$0xff] %v12808_v55  ;;  %v5522_v55 = vunpack.c.l.b16 %v5095_v40  ;;  %v6307_v48 = vunpack.c.l.b16 %v6166_v34  ;;  %v5112_v46 = vrot.slane %v5110_v38, 5  ;;  %v5126_v40 = vshll.u32 %v4676_v29, 16  ;;  %v5937_v38 = vld [vmem:[#allocation2 + $0xf0] sm:$0xe] }
 0x30c   :  { %15260 = vst [vmem:[#allocation120_spill] sm:$0xff] %v12793_v11  ;;  %v5122_v11 = vrot.slane %v5120_v26, 4 }
 0x30d   :  { %v5571_v33 = vpack.c.b16 %v5523_v42, %v5522_v55  ;;  %v6354_v26 = vpack.c.b16 %v6307_v48, %v6306_v3  ;;  %v5113_v47 = vor.u32 %v5112_v46, %v5109_v62  ;;  %v8755_v42 = vrot.slane %v7292_v44, 5  ;;  %v8565_v48 = vld [vmem:[#allocation2 + $0x90] sm:$0xe]  ;;  %v7293_v62 = vld [vmem:[#allocation2 + $0x98] sm:$0x1] }
 0x30e   :  { %v5123_v8 = vor.u32 %v5122_v11, %v5118_v9  ;;  %v10951_v11 = vld [vmem:[#allocation2 + $0x150] sm:$0xff]  ;;  %v5128_v27 = vrot.slane %v5126_v40, 5  ;;  %v6171_v3 = vrot.slane %v6169_v52, 4  ;;  %v5144_v44 = vshrl.u32 %v4678_v14, 16 }
 0x30f   :  { %v12813_v19 = vpop.f32.mrf.mxu3  ;;  %v12817_v30 = vpop.f32.mrf.mxu0  ;;  %v5114_v29 = vrot.slane %v5113_v47, 4 }
 0x310   :  { %15263 = vst [vmem:[#allocation123_spill] sm:$0xff] %v12813_v19  ;;  %v5124_v55 = vrot.slane %v5123_v8, 4  ;;  %v4677_v8 = vld [vmem:[#allocation2 + $0xf0] sm:$0xf] }
 0x311   :  { %15264 = vst [vmem:[#allocation124_spill] sm:$0xff] %v12817_v30  ;;  %v5119_v40 = vsel %vm11282_vm11, %v5114_v29, %v5118_v9 }
 0x312   :  { %v5129_v46 = vsel %vm11282_vm11, %v5124_v55, %v5128_v27  ;;  %v5131_v55 = vshrl.u32 %v4677_v8, 16  ;;  %v5134_v27 = vshll.u32 %v4677_v8, 16 }
 0x313   :  { %v12821_v43 = vpop.f32.mrf.mxu1  ;;  %v5525_v19 = vunpack.c.l.b16 %v5129_v46 }
 0x314   :  { %15265 = vst [vmem:[#allocation125_spill] sm:$0xff] %v12821_v43  ;;  %10277 = vmatmul.msk.bf16.gmra.mxu3 %vm2617_vm8, %v10925_v35  ;;  %v12827_v43 = vpop.f32.mrf.mxu2  ;;  %v4679_v35 = vld [vmem:[#allocation2 + $0xf8] sm:$0x1]  ;;  %v5133_v8 = vrot.slane %v5131_v55, 4  ;;  %v11006_v55 = vld [vmem:[#allocation2 + $0x14] sm:$0x1] }
 0x315   :  { %15267 = vst [vmem:[#allocation127_spill] sm:$0xff] %v12827_v43  ;;  %v8757_v43 = vrot.slane %v8755_v42, 4 }
 0x316   :  { %10520 = vmatmul.msk.bf16.gmra.mxu1 %vm2617_vm8, %v5571_v33  ;;  %v10554_v33 = vrot.slane %v5937_v38, 9  ;;  %v8758_v38 = vrot.slane %v7293_v62, 5 }
 0x317   :  { %v12825_v30 = vpop.f32.mrf.mxu3  ;;  %10586 = vmatmul.msk.bf16.gmra.mxu2 %vm2617_vm8, %v6354_v26  ;;  %v12830_v34 = vpop.f32.mrf.mxu0  ;;  %v5140_v26 = vshll.u32 %v4678_v14, 16 }
 0x318   :  { %15266 = vst [vmem:[#allocation126_spill] sm:$0xff] %v12825_v30  ;;  %v10806_v30 = vrot.slane %v8565_v48, 9  ;;  %v6170_v47 = vsel %vm11316_vm15, %v10554_v33, %v6169_v52  ;;  %v5146_v48 = vrot.slane %v5144_v44, 4  ;;  %v8759_v9 = vsel %vm11316_vm15, %v8757_v43, %v8758_v38  ;;  %v4681_v44 = vld [vmem:[#allocation2 + $0x100] sm:$0xf] }
 0x319   :  { %15268 = vst [vmem:[#allocation128_spill] sm:$0xff] %v12830_v34  ;;  %v6172_v34 = vrot.slane %v4679_v35, 5  ;;  %v12847_v54 = vrot.slane %v5140_v26, 5  ;;  %v5524_v52 = vunpack.c.l.b16 %v5119_v40  ;;  %v8930_v33 = vunpack.c.l.b16 %v8759_v9  ;;  %v3316_v9 = vld [vmem:[#allocation2 + $0xc] sm:$0xe] }
 0x31a   :  { %10497 = vmatmul.msk.bf16.gmra.mxu0 %vm2617_vm8, %v10951_v11  ;;  %v8756_v14 = vsel %vm11316_vm15, %v10806_v30, %v8755_v42  ;;  %v6308_v4 = vunpack.c.l.b16 %v6170_v47  ;;  %v11005_v30 = vld [vmem:[#allocation2 + $0x10] sm:$0xf]  ;;  %v5136_v26 = vrot.slane %v5134_v27, 5  ;;  %v6176_v47 = vrot.slane %v4681_v44, 5 }
 0x31b   :  { %v12832_v5 = vpop.f32.mrf.mxu1  ;;  %v6173_v11 = vsel %vm11316_vm15, %v6171_v3, %v6172_v34  ;;  %v8929_v3 = vunpack.c.l.b16 %v8756_v14  ;;  %v3423_v42 = vrot.slane %v11005_v30, 5  ;;  %v5147_v43 = vor.u32 %v5146_v48, %v12847_v54 }
 0x31c   :  { %15269 = vst [vmem:[#allocation129_spill] sm:$0xff] %v12832_v5  ;;  %v12853_v62 = vpop.f32.mrf.mxu2  ;;  %v6309_v34 = vunpack.c.l.b16 %v6173_v11  ;;  %v5150_v11 = vshll.u32 %v4679_v35, 16  ;;  %v3426_v27 = vrot.slane %v11006_v55, 5  ;;  %v10279_v48 = vrot.slane %v3316_v9, 9  ;;  %v5938_v35 = vld [vmem:[#allocation2 + $0xfc] sm:$0xe] }
 0x31d   :  { %15272 = vst [vmem:[#allocation132_spill] sm:$0xff] %v12853_v62  ;;  %v12860_v40 = vpack.c.b16 %v8930_v33, %v8929_v3  ;;  %v10952_v3 = vld [vmem:[#allocation2 + $0x15c] sm:$0xff]  ;;  %v5164_v55 = vshll.u32 %v4681_v44, 16 }
 0x31e   :  { %v6355_v38 = vpack.c.b16 %v6309_v34, %v6308_v4  ;;  %v12870_v4 = vld [vmem:[#allocation2 + $0x104] sm:$0x1]  ;;  %v3424_v34 = vsel %vm11316_vm15, %v10279_v48, %v3423_v42  ;;  %v4680_v62 = vld [vmem:[#allocation2 + $0xfc] sm:$0xf] }
 0x31f   :  { %v12841_v5 = vpop.f32.mrf.mxu3  ;;  %v12851_v29 = vpop.f32.mrf.mxu0  ;;  %15274 = vst [vmem:[#allocation134_spill] sm:$0xff] %v12860_v40 }
 0x320   :  { %15270 = vst [vmem:[#allocation130_spill] sm:$0xff] %v12841_v5  ;;  %v5572_v5 = vpack.c.b16 %v5525_v19, %v5524_v52  ;;  %v3425_v19 = vrot.slane %v3423_v42, 4  ;;  %v5137_v52 = vor.u32 %v5136_v26, %v5133_v8  ;;  %v6178_v8 = vrot.slane %v6176_v47, 4 }
 0x321   :  { %15271 = vst [vmem:[#allocation131_spill] sm:$0xff] %v12851_v29  ;;  %v10555_v29 = vrot.slane %v5938_v35, 9  ;;  %v3642_v42 = vunpack.c.l.b16 %v3424_v34  ;;  %v5155_v35 = vshrl.u32 %v4680_v62, 16 }
 0x323   :  { %v12855_v46 = vpop.f32.mrf.mxu1 }
 0x324   :  { %15273 = vst [vmem:[#allocation133_spill] sm:$0xff] %v12855_v46  ;;  %10311 = vmatmul.msk.bf16.vlgmr.msrb.gmra.mxu3 %vm2617_vm8, %v12787_v1  ;;  %v5148_v1 = vrot.slane %v5147_v43, 4  ;;  %v12876_v26 = vpop.f32.mrf.mxu2  ;;  %v5138_v43 = vrot.slane %v5137_v52, 4  ;;  %v6177_v52 = vsel %vm11316_vm15, %v10555_v29, %v6176_v47  ;;  %v12891_v46 = vrot.slane %v5164_v55, 5  ;;  %v8566_v47 = vld [vmem:[#allocation2 + $0x9c] sm:$0xe] }
 0x325   :  { %15278 = vst [vmem:[#allocation138_spill] sm:$0xff] %v12876_v26  ;;  %v5158_v26 = vshll.u32 %v4680_v62, 16  ;;  %v5157_v62 = vrot.slane %v5155_v35, 4 }
 0x326   :  { %10521 = vmatmul.msk.bf16.gmra.mxu1 %vm2617_vm8, %v5572_v5  ;;  %v5152_v5 = vrot.slane %v5150_v11, 5  ;;  %v5168_v11 = vshrl.u32 %v4681_v44, 16 }
 0x327   :  { %v12863_v14 = vpop.f32.mrf.mxu3  ;;  %10587 = vmatmul.msk.bf16.gmra.mxu2 %vm2617_vm8, %v6355_v38  ;;  %v12866_v30 = vpop.f32.mrf.mxu0  ;;  %v3427_v38 = vsel %vm11316_vm15, %v3425_v19, %v3426_v27  ;;  %v5143_v19 = vsel %vm11282_vm11, %v5138_v43, %v12847_v54  ;;  %v11007_v54 = vld [vmem:[#allocation2 + $0x1c] sm:$0xf] }
 0x328   :  { %15275 = vst [vmem:[#allocation135_spill] sm:$0xff] %v12863_v14  ;;  %v5153_v9 = vsel %vm11282_vm11, %v5148_v1, %v5152_v5  ;;  %v3643_v48 = vunpack.c.l.b16 %v3427_v38  ;;  %v7296_v1 = vld [vmem:[#allocation2 + $0xa4] sm:$0x1]  ;;  %v5170_v34 = vrot.slane %v5168_v11, 4  ;;  %v5526_v14 = vunpack.c.l.b16 %v5143_v19  ;;  %v4684_v11 = vld [vmem:[#allocation2 + $0x10c] sm:$0xf] }
 0x329   :  { %15276 = vst [vmem:[#allocation136_spill] sm:$0xff] %v12866_v30  ;;  %v7295_v30 = vld [vmem:[#allocation2 + $0xa0] sm:$0xf]  ;;  %v3430_v43 = vrot.slane %v11007_v54, 5  ;;  %v8765_v24 = vrot.slane %v7296_v1, 5 }
 0x32a   :  { %10498 = vmatmul.msk.bf16.gmra.mxu0 %vm2617_vm8, %v10952_v3  ;;  %v5527_v3 = vunpack.c.l.b16 %v5153_v9  ;;  %v8762_v5 = vrot.slane %v7295_v30, 5  ;;  %v3705_v21 = vpack.c.b16 %v3643_v48, %v3642_v42  ;;  %v5160_v30 = vrot.slane %v5158_v26, 5 }
 0x32b   :  { %v12868_v33 = vpop.f32.mrf.mxu1  ;;  %v5171_v55 = vor.u32 %v5170_v34, %v12891_v46  ;;  %v3432_v54 = vrot.slane %v3430_v43, 4  ;;  %v6183_v26 = vrot.slane %v4684_v11, 5 }
 0x32c   :  { %15277 = vst [vmem:[#allocation137_spill] sm:$0xff] %v12868_v33  ;;  %v6179_v33 = vrot.slane %v12870_v4, 5  ;;  %v12902_v42 = vpop.f32.mrf.mxu2 }
 0x32d   :  { %15282 = vst [vmem:[#allocation142_spill] sm:$0xff] %v12902_v42  ;;  %v5172_v1 = vrot.slane %v5171_v55, 4  ;;  %v5188_v42 = vshll.u32 %v4684_v11, 16 }
 0x32e   :  { %v6180_v44 = vsel %vm11316_vm15, %v6178_v8, %v6179_v33  ;;  %v5573_v33 = vpack.c.b16 %v5527_v3, %v5526_v14  ;;  %v6310_v8 = vunpack.c.l.b16 %v6177_v52  ;;  %v5174_v14 = vshll.u32 %v12870_v4, 16  ;;  %v11008_v3 = vld [vmem:[#allocation2 + $0x20] sm:$0x1] }
 0x32f   :  { %v12885_v27 = vpop.f32.mrf.mxu3  ;;  %v12893_v38 = vpop.f32.mrf.mxu0  ;;  %v6311_v29 = vunpack.c.l.b16 %v6180_v44  ;;  %v3433_v52 = vrot.slane %v11008_v3, 5  ;;  %v4685_v3 = vld [vmem:[#allocation2 + $0x110] sm:$0x1] }
 0x330   :  { %15279 = vst [vmem:[#allocation139_spill] sm:$0xff] %v12885_v27  ;;  %v8764_v27 = vrot.slane %v8762_v5, 4 }
 0x331   :  { %15280 = vst [vmem:[#allocation140_spill] sm:$0xff] %v12893_v38  ;;  %v10807_v38 = vrot.slane %v8566_v47, 9  ;;  %v6356_v48 = vpack.c.b16 %v6311_v29, %v6310_v8  ;;  %v3434_v34 = vsel %vm11316_vm15, %v3432_v54, %v3433_v52  ;;  %v12914_v29 = vld [vmem:[#allocation2 + $0xac] sm:$0xf]  ;;  %v5176_v8 = vrot.slane %v5174_v14, 5 }
 0x332   :  { %v8766_v19 = vsel %vm11316_vm15, %v8764_v27, %v8765_v24  ;;  %v3317_v24 = vld [vmem:[#allocation2 + $0x18] sm:$0xe]  ;;  %v5161_v27 = vor.u32 %v5160_v30, %v5157_v62  ;;  %v6185_v62 = vrot.slane %v6183_v26, 4  ;;  %v4683_v54 = vld [vmem:[#allocation2 + $0x108] sm:$0xf] }
 0x333   :  { %v12895_v9 = vpop.f32.mrf.mxu1  ;;  %v8763_v44 = vsel %vm11316_vm15, %v10807_v38, %v8762_v5  ;;  %v8932_v4 = vunpack.c.l.b16 %v8766_v19  ;;  %v5192_v5 = vshrl.u32 %v4684_v11, 16  ;;  %v5177_v55 = vsel %vm11282_vm11, %v5172_v1, %v5176_v8 }
 0x334   :  { %15281 = vst [vmem:[#allocation141_spill] sm:$0xff] %v12895_v9  ;;  %10312 = vmatmul.msk.bf16.gmra.mxu3 %vm2617_vm8, %v3705_v21  ;;  %v8931_v38 = vunpack.c.l.b16 %v8763_v44  ;;  %v5939_v9 = vld [vmem:[#allocation2 + $0x108] sm:$0xe]  ;;  %v5162_v30 = vrot.slane %v5161_v27, 4  ;;  %v8769_v19 = vrot.slane %v12914_v29, 5  ;;  %v6186_v11 = vrot.slane %v4685_v3, 5 }
 0x335   :  { %v5194_v27 = vrot.slane %v5192_v5, 4  ;;  %v5529_v1 = vunpack.c.l.b16 %v5177_v55  ;;  %v5179_v29 = vshrl.u32 %v4683_v54, 16  ;;  %v5182_v8 = vshll.u32 %v4683_v54, 16  ;;  %v8567_v54 = vld [vmem:[#allocation2 + $0xa8] sm:$0xe] }
 0x336   :  { %10522 = vmatmul.msk.bf16.gmra.mxu1 %vm2617_vm8, %v5573_v33  ;;  %v10953_v33 = vld [vmem:[#allocation2 + $0x168] sm:$0xff]  ;;  %v12921_v52 = vpack.c.b16 %v8932_v4, %v8931_v38  ;;  %v5167_v44 = vsel %vm11282_vm11, %v5162_v30, %v12891_v46  ;;  %v6187_v4 = vsel %vm11316_vm15, %v6185_v62, %v6186_v11  ;;  %v7299_v38 = vld [vmem:[#allocation2 + $0xb0] sm:$0x1] }
 0x337   :  { %v12905_v21 = vpop.f32.mrf.mxu3  ;;  %10588 = vmatmul.msk.bf16.gmra.mxu2 %vm2617_vm8, %v6356_v48  ;;  %v12910_v35 = vpop.f32.mrf.mxu0  ;;  %v10280_v48 = vrot.slane %v3317_v24, 9  ;;  %v10556_v24 = vrot.slane %v5939_v9, 9  ;;  %v5528_v46 = vunpack.c.l.b16 %v5167_v44  ;;  %v8772_v11 = vrot.slane %v7299_v38, 5  ;;  %v11010_v38 = vld [vmem:[#allocation2 + $0x2c] sm:$0x1] }
 0x338   :  { %15283 = vst [vmem:[#allocation143_spill] sm:$0xff] %v12905_v21 }
 0x339   :  { %15284 = vst [vmem:[#allocation144_spill] sm:$0xff] %v12910_v35  ;;  %v3431_v14 = vsel %vm11316_vm15, %v10280_v48, %v3430_v43  ;;  %v3645_v35 = vunpack.c.l.b16 %v3434_v34  ;;  %v12935_v43 = vpop.f32.mrf.mxu2  ;;  %v8771_v48 = vrot.slane %v8769_v19, 4  ;;  %v6184_v9 = vsel %vm11316_vm15, %v10556_v24, %v6183_v26 }
 0x33a   :  { %10499 = vmatmul.msk.bf16.gmra.mxu0 %vm2617_vm8, %v10953_v33  ;;  %15286 = vst [vmem:[#allocation146_spill] sm:$0xff] %v12921_v52  ;;  %v12929_v33 = vrot.slane %v5188_v42, 5  ;;  %v3644_v34 = vunpack.c.l.b16 %v3431_v14  ;;  %v11009_v42 = vld [vmem:[#allocation2 + $0x28] sm:$0xf]  ;;  %v5574_v6 = vpack.c.b16 %v5529_v1, %v5528_v46  ;;  %v5184_v14 = vrot.slane %v5182_v8, 5 }
 0x33b   :  { %v12916_v47 = vpop.f32.mrf.mxu1  ;;  %15288 = vst [vmem:[#allocation148_spill] sm:$0xff] %v12935_v43  ;;  %v3437_v5 = vrot.slane %v11009_v42, 5  ;;  %v5181_v43 = vrot.slane %v5179_v29, 4  ;;  %v4687_v52 = vld [vmem:[#allocation2 + $0x118] sm:$0xf]  ;;  %v6312_v44 = vunpack.c.l.b16 %v6184_v9  ;;  %v8773_v26 = vsel %vm11316_vm15, %v8771_v48, %v8772_v11 }
 0x33c   :  { %15285 = vst [vmem:[#allocation145_spill] sm:$0xff] %v12916_v47  ;;  %v3706_v55 = vpack.c.b16 %v3645_v35, %v3644_v34  ;;  %v5195_v62 = vor.u32 %v5194_v27, %v12929_v33  ;;  %v10808_v35 = vrot.slane %v8567_v54, 9  ;;  %v3318_v34 = vld [vmem:[#allocation2 + $0x24] sm:$0xe]  ;;  %v6190_v42 = vrot.slane %v4687_v52, 5 }
 0x33d   :  { %v3439_v24 = vrot.slane %v3437_v5, 4  ;;  %v3440_v1 = vrot.slane %v11010_v38, 5  ;;  %v5185_v8 = vor.u32 %v5184_v14, %v5181_v43  ;;  %v7301_v48 = vld [vmem:[#allocation2 + $0xb8] sm:$0xf]  ;;  %v8934_v54 = vunpack.c.l.b16 %v8773_v26  ;;  %v5940_v14 = vld [vmem:[#allocation2 + $0x114] sm:$0xe] }
 0x33e   :  { %v5196_v27 = vrot.slane %v5195_v62, 4  ;;  %v8770_v46 = vsel %vm11316_vm15, %v10808_v35, %v8769_v19  ;;  %v12957_v62 = vld [vmem:[#allocation2 + $0x11c] sm:$0x1] }
 0x33f   :  { %v12931_v47 = vpop.f32.mrf.mxu3  ;;  %v12937_v21 = vpop.f32.mrf.mxu0  ;;  %v8933_v35 = vunpack.c.l.b16 %v8770_v46  ;;  %v5186_v38 = vrot.slane %v5185_v8, 4  ;;  %v10557_v8 = vrot.slane %v5940_v14, 9 }
 0x340   :  { %15287 = vst [vmem:[#allocation147_spill] sm:$0xff] %v12931_v47  ;;  %v6313_v47 = vunpack.c.l.b16 %v6187_v4 }
 0x341   :  { %15289 = vst [vmem:[#allocation149_spill] sm:$0xff] %v12937_v21  ;;  %v5198_v21 = vshll.u32 %v4685_v3, 16  ;;  %v12959_v11 = vpop.f32.mrf.mxu2  ;;  %v6191_v14 = vsel %vm11316_vm15, %v10557_v8, %v6190_v42  ;;  %v4690_v8 = vld [vmem:[#allocation2 + $0x124] sm:$0xf] }
 0x342   :  { %v6357_v4 = vpack.c.b16 %v6313_v47, %v6312_v44  ;;  %v3441_v47 = vsel %vm11316_vm15, %v3439_v24, %v3440_v1  ;;  %15293 = vst [vmem:[#allocation153_spill] sm:$0xff] %v12959_v11  ;;  %v5212_v44 = vshll.u32 %v4687_v52, 16  ;;  %v6193_v1 = vrot.slane %v12957_v62, 5 }
 0x343   :  { %v12941_v30 = vpop.f32.mrf.mxu1  ;;  %v5200_v3 = vrot.slane %v5198_v21, 5  ;;  %v6192_v21 = vrot.slane %v6190_v42, 4  ;;  %v3647_v24 = vunpack.c.l.b16 %v3441_v47  ;;  %v12969_v11 = vpack.c.b16 %v8934_v54, %v8933_v35 }
 0x344   :  { %15290 = vst [vmem:[#allocation150_spill] sm:$0xff] %v12941_v30  ;;  %10313 = vmatmul.msk.bf16.gmra.mxu3 %vm2617_vm8, %v3706_v55  ;;  %v10281_v55 = vrot.slane %v3318_v34, 9  ;;  %v4686_v34 = vld [vmem:[#allocation2 + $0x114] sm:$0xf]  ;;  %v8776_v30 = vrot.slane %v7301_v48, 5  ;;  %v6314_v42 = vunpack.c.l.b16 %v6191_v14 }
 0x345   :  { %v5201_v19 = vsel %vm11282_vm11, %v5196_v27, %v5200_v3  ;;  %15295 = vst [vmem:[#allocation155_spill] sm:$0xff] %v12969_v11  ;;  %v5191_v27 = vsel %vm11282_vm11, %v5186_v38, %v12929_v33  ;;  %v5203_v48 = vshrl.u32 %v4686_v34, 16 }
 0x346   :  { %10523 = vmatmul.msk.bf16.gmra.mxu1 %vm2617_vm8, %v5574_v6  ;;  %v10954_v6 = vld [vmem:[#allocation2 + $0x174] sm:$0xff]  ;;  %v3438_v26 = vsel %vm11316_vm15, %v10281_v55, %v3437_v5  ;;  %v5531_v46 = vunpack.c.l.b16 %v5201_v19  ;;  %v8778_v54 = vrot.slane %v8776_v30, 4  ;;  %v5530_v19 = vunpack.c.l.b16 %v5191_v27 }
 0x347   :  { %v12948_v29 = vpop.f32.mrf.mxu3  ;;  %10589 = vmatmul.msk.bf16.gmra.mxu2 %vm2617_vm8, %v6357_v4  ;;  %v12953_v9 = vpop.f32.mrf.mxu0  ;;  %v8568_v4 = vld [vmem:[#allocation2 + $0xb4] sm:$0xe]  ;;  %v3646_v11 = vunpack.c.l.b16 %v3438_v26 }
 0x348   :  { %15291 = vst [vmem:[#allocation151_spill] sm:$0xff] %v12948_v29  ;;  %v10809_v3 = vrot.slane %v8568_v4, 9  ;;  %v12976_v29 = vrot.slane %v5212_v44, 5 }
 0x349   :  { %15292 = vst [vmem:[#allocation152_spill] sm:$0xff] %v12953_v9  ;;  %v5216_v9 = vshrl.u32 %v4687_v52, 16  ;;  %v6194_v52 = vsel %vm11316_vm15, %v6192_v21, %v6193_v1  ;;  %v11011_v21 = vld [vmem:[#allocation2 + $0x34] sm:$0xf]  ;;  %v12991_v27 = vpop.f32.mrf.mxu2 }
 0x34a   :  { %10500 = vmatmul.msk.bf16.gmra.mxu0 %vm2617_vm8, %v10954_v6  ;;  %v5206_v6 = vshll.u32 %v4686_v34, 16  ;;  %v8777_v47 = vsel %vm11316_vm15, %v10809_v3, %v8776_v30  ;;  %v3444_v4 = vrot.slane %v11011_v21, 5  ;;  %v6315_v34 = vunpack.c.l.b16 %v6194_v52  ;;  %15299 = vst [vmem:[#allocation159_spill] sm:$0xff] %v12991_v27 }
 0x34b   :  { %v12961_v43 = vpop.f32.mrf.mxu1  ;;  %v5218_v55 = vrot.slane %v5216_v9, 4  ;;  %v3707_v9 = vpack.c.b16 %v3647_v24, %v3646_v11  ;;  %v8935_v1 = vunpack.c.l.b16 %v8777_v47  ;;  %v5575_v30 = vpack.c.b16 %v5531_v46, %v5530_v19  ;;  %v7304_v46 = vld [vmem:[#allocation2 + $0xc4] sm:$0xf] }
 0x34c   :  { %15294 = vst [vmem:[#allocation154_spill] sm:$0xff] %v12961_v43  ;;  %v7302_v43 = vld [vmem:[#allocation2 + $0xbc] sm:$0x1]  ;;  %v5208_v26 = vrot.slane %v5206_v6, 5  ;;  %v5222_v11 = vshll.u32 %v12957_v62, 16  ;;  %v6358_v24 = vpack.c.b16 %v6315_v34, %v6314_v42  ;;  %v3446_v52 = vrot.slane %v3444_v4, 4 }
 0x34d   :  { %v8779_v35 = vrot.slane %v7302_v43, 5  ;;  %v5205_v43 = vrot.slane %v5203_v48, 4  ;;  %v6197_v47 = vrot.slane %v4690_v8, 5  ;;  %v10955_v34 = vld [vmem:[#allocation2 + $0x180] sm:$0xff] }
 0x34f   :  { %v12978_v5 = vpop.f32.mrf.mxu3  ;;  %v12982_v33 = vpop.f32.mrf.mxu0  ;;  %v8780_v44 = vsel %vm11316_vm15, %v8778_v54, %v8779_v35  ;;  %v3319_v54 = vld [vmem:[#allocation2 + $0x30] sm:$0xe]  ;;  %v5209_v6 = vor.u32 %v5208_v26, %v5205_v43  ;;  %v11012_v35 = vld [vmem:[#allocation2 + $0x38] sm:$0x1]  ;;  %v13009_v43 = vld [vmem:[#allocation2 + $0x128] sm:$0x1] }
 0x350   :  { %15296 = vst [vmem:[#allocation156_spill] sm:$0xff] %v12978_v5  ;;  %v8936_v3 = vunpack.c.l.b16 %v8780_v44  ;;  %v3447_v19 = vrot.slane %v11012_v35, 5  ;;  %v10282_v14 = vrot.slane %v3319_v54, 9  ;;  %v8569_v44 = vld [vmem:[#allocation2 + $0xc0] sm:$0xe]  ;;  %v6199_v35 = vrot.slane %v6197_v47, 4 }
 0x351   :  { %15297 = vst [vmem:[#allocation157_spill] sm:$0xff] %v12982_v33  ;;  %v5219_v33 = vor.u32 %v5218_v55, %v12976_v29  ;;  %v5210_v26 = vrot.slane %v5209_v6, 4  ;;  %v13017_v6 = vpop.f32.mrf.mxu2 }
 0x352   :  { %v12994_v21 = vpack.c.b16 %v8936_v3, %v8935_v1  ;;  %v5224_v1 = vrot.slane %v5222_v11, 5  ;;  %v7305_v3 = vld [vmem:[#allocation2 + $0xc8] sm:$0x1]  ;;  %v3445_v42 = vsel %vm11316_vm15, %v10282_v14, %v3444_v4  ;;  %v10810_v11 = vrot.slane %v8569_v44, 9  ;;  %15304 = vst [vmem:[#allocation164_spill] sm:$0xff] %v13017_v6 }
 0x353   :  { %v12988_v38 = vpop.f32.mrf.mxu1  ;;  %v5220_v55 = vrot.slane %v5219_v33, 4  ;;  %v3448_v33 = vsel %vm11316_vm15, %v3446_v52, %v3447_v19  ;;  %v8786_v27 = vrot.slane %v7305_v3, 5  ;;  %v3648_v4 = vunpack.c.l.b16 %v3445_v42 }
 0x354   :  { %15298 = vst [vmem:[#allocation158_spill] sm:$0xff] %v12988_v38  ;;  %10314 = vmatmul.msk.bf16.gmra.mxu3 %vm2617_vm8, %v3707_v9  ;;  %v6200_v14 = vrot.slane %v13009_v43, 5  ;;  %v3649_v19 = vunpack.c.l.b16 %v3448_v33 }
 0x355   :  { %15300 = vst [vmem:[#allocation160_spill] sm:$0xff] %v12994_v21  ;;  %v5225_v54 = vsel %vm11282_vm11, %v5220_v55, %v5224_v1  ;;  %v5215_v55 = vsel %vm11282_vm11, %v5210_v26, %v12976_v29 }
 0x356   :  { %10524 = vmatmul.msk.bf16.gmra.mxu1 %vm2617_vm8, %v5575_v30  ;;  %v8783_v30 = vrot.slane %v7304_v46, 5  ;;  %v4689_v46 = vld [vmem:[#allocation2 + $0x120] sm:$0xf]  ;;  %v5533_v3 = vunpack.c.l.b16 %v5225_v54  ;;  %v5532_v29 = vunpack.c.l.b16 %v5215_v55  ;;  %v4693_v55 = vld [vmem:[#allocation2 + $0x130] sm:$0xf] }
 0x357   :  { %v12998_v48 = vpop.f32.mrf.mxu3  ;;  %10590 = vmatmul.msk.bf16.gmra.mxu2 %vm2617_vm8, %v6358_v24  ;;  %v13001_v9 = vpop.f32.mrf.mxu0  ;;  %v5941_v24 = vld [vmem:[#allocation2 + $0x120] sm:$0xe]  ;;  %v5227_v42 = vshrl.u32 %v4689_v46, 16 }
 0x358   :  { %15301 = vst [vmem:[#allocation161_spill] sm:$0xff] %v12998_v48  ;;  %v8785_v38 = vrot.slane %v8783_v30, 4  ;;  %v8784_v52 = vsel %vm11316_vm15, %v10810_v11, %v8783_v30  ;;  %v10558_v44 = vrot.slane %v5941_v24, 9  ;;  %v5230_v48 = vshll.u32 %v4689_v46, 16 }
 0x359   :  { %15302 = vst [vmem:[#allocation162_spill] sm:$0xff] %v13001_v9  ;;  %v5236_v9 = vshll.u32 %v4690_v8, 16  ;;  %v8937_v33 = vunpack.c.l.b16 %v8784_v52 }
 0x35a   :  { %10501 = vmatmul.msk.bf16.gmra.mxu0 %vm2617_vm8, %v10955_v34  ;;  %v8787_v1 = vsel %vm11316_vm15, %v8785_v38, %v8786_v27  ;;  %v6201_v34 = vsel %vm11316_vm15, %v6199_v35, %v6200_v14  ;;  %v6198_v26 = vsel %vm11316_vm15, %v10558_v44, %v6197_v47  ;;  %v3708_v27 = vpack.c.b16 %v3649_v19, %v3648_v4  ;;  %v11013_v14 = vld [vmem:[#allocation2 + $0x40] sm:$0xf]  ;;  %v7261_v4 = vld [vmem:[#allocation2 + $0x18] sm:$0xf]  ;;  %v11014_v19 = vld [vmem:[#allocation2 + $0x1c] sm:$0xf] }
 0x35b   :  { %v13003_v62 = vpop.f32.mrf.mxu1  ;;  %v13028_v30 = vrot.slane %v5236_v9, 5  ;;  %v8938_v6 = vunpack.c.l.b16 %v8787_v1  ;;  %v6317_v54 = vunpack.c.l.b16 %v6201_v34  ;;  %v5576_v35 = vpack.c.b16 %v5533_v3, %v5532_v29 }
 0x35c   :  { %15303 = vst [vmem:[#allocation163_spill] sm:$0xff] %v13003_v62  ;;  %v5240_v62 = vshrl.u32 %v4690_v8, 16  ;;  %v3451_v46 = vrot.slane %v11013_v14, 5  ;;  %v6316_v9 = vunpack.c.l.b16 %v6198_v26  ;;  %v5232_v52 = vrot.slane %v5230_v48, 5  ;;  %v3320_v48 = vld [vmem:[#allocation2 + $0x3c] sm:$0xe] }
 0x35d   :  { %v13036_v24 = vpack.c.b16 %v8938_v6, %v8937_v33  ;;  %v5246_v44 = vshll.u32 %v13009_v43, 16  ;;  %v7367_v6 = vshll.u32 %v11014_v19, 16  ;;  %v6204_v33 = vrot.slane %v4693_v55, 5  ;;  %v11015_v26 = vld [vmem:[#allocation2 + $0x44] sm:$0x1] }
 0x35e   :  { %v5242_v11 = vrot.slane %v5240_v62, 4  ;;  %v5229_v62 = vrot.slane %v5227_v42, 4  ;;  %v6359_v47 = vpack.c.b16 %v6317_v54, %v6316_v9  ;;  %v3453_v3 = vrot.slane %v3451_v46, 4 }
 0x35f   :  { %v13024_v8 = vpop.f32.mrf.mxu3  ;;  %v13030_v5 = vpop.f32.mrf.mxu0  ;;  %15308 = vst [vmem:[#allocation168_spill] sm:$0xff] %v13036_v24  ;;  %v7371_v29 = vshrl.u32 %v11014_v19, 16  ;;  %v7358_v43 = vshrl.u32 %v7261_v4, 16  ;;  %v7361_v14 = vshll.u32 %v7261_v4, 16  ;;  %v13053_v19 = vrot.slane %v7367_v6, 5 }
 0x360   :  { %15305 = vst [vmem:[#allocation165_spill] sm:$0xff] %v13024_v8  ;;  %v5243_v1 = vor.u32 %v5242_v11, %v13028_v30  ;;  %v5233_v42 = vor.u32 %v5232_v52, %v5229_v62  ;;  %v6206_v62 = vrot.slane %v6204_v33, 4  ;;  %v4692_v52 = vld [vmem:[#allocation2 + $0x12c] sm:$0xf] }
 0x361   :  { %15306 = vst [vmem:[#allocation166_spill] sm:$0xff] %v13030_v5  ;;  %v10956_v5 = vld [vmem:[#allocation2 + $0x18c] sm:$0xff]  ;;  %v7360_v8 = vrot.slane %v7358_v43, 4  ;;  %v7363_v24 = vrot.slane %v7361_v14, 5 }
 0x362   :  { %v5244_v11 = vrot.slane %v5243_v1, 4  ;;  %v7373_v1 = vrot.slane %v7371_v29, 4 }
 0x363   :  { %v13034_v38 = vpop.f32.mrf.mxu1 }
 0x364   :  { %15307 = vst [vmem:[#allocation167_spill] sm:$0xff] %v13034_v38  ;;  %10315 = vmatmul.msk.bf16.gmra.mxu3 %vm2617_vm8, %v3708_v27  ;;  %v13044_v27 = vpop.f32.mrf.mxu2  ;;  %v5248_v38 = vrot.slane %v5246_v44, 5  ;;  %v5264_v44 = vshrl.u32 %v4693_v55, 16 }
 0x365   :  { %15310 = vst [vmem:[#allocation170_spill] sm:$0xff] %v13044_v27  ;;  %v10283_v27 = vrot.slane %v3320_v48, 9 }
 0x366   :  { %10525 = vmatmul.msk.bf16.gmra.mxu1 %vm2617_vm8, %v5576_v35  ;;  %v3454_v35 = vrot.slane %v11015_v26, 5  ;;  %v5234_v26 = vrot.slane %v5233_v42, 4  ;;  %v5249_v4 = vsel %vm11282_vm11, %v5244_v11, %v5248_v38  ;;  %v5254_v42 = vshll.u32 %v4692_v52, 16 }
 0x367   :  { %v13042_v34 = vpop.f32.mrf.mxu3  ;;  %10591 = vmatmul.msk.bf16.gmra.mxu2 %vm2617_vm8, %v6359_v47  ;;  %v13047_v54 = vpop.f32.mrf.mxu0  ;;  %v3452_v6 = vsel %vm11316_vm15, %v10283_v27, %v3451_v46  ;;  %v5535_v38 = vunpack.c.l.b16 %v5249_v4  ;;  %v7374_v46 = vor.u32 %v7373_v1, %v13053_v19  ;;  %v5266_v43 = vrot.slane %v5264_v44, 4 }
 0x368   :  { %15309 = vst [vmem:[#allocation169_spill] sm:$0xff] %v13042_v34  ;;  %v13051_v34 = vld [vmem:[#allocation2 + $0x134] sm:$0x1]  ;;  %v3455_v47 = vsel %vm11316_vm15, %v3453_v3, %v3454_v35  ;;  %v5239_v29 = vsel %vm11282_vm11, %v5234_v26, %v13028_v30  ;;  %v3650_v27 = vunpack.c.l.b16 %v3452_v6  ;;  %v5256_v1 = vrot.slane %v5254_v42, 5 }
 0x369   :  { %15311 = vst [vmem:[#allocation171_spill] sm:$0xff] %v13047_v54  ;;  %v5942_v54 = vld [vmem:[#allocation2 + $0x12c] sm:$0xe]  ;;  %v6207_v48 = vrot.slane %v13051_v34, 5  ;;  %v3651_v3 = vunpack.c.l.b16 %v3455_v47  ;;  %v5534_v47 = vunpack.c.l.b16 %v5239_v29  ;;  %v7364_v44 = vor.u32 %v7363_v24, %v7360_v8 }
 0x36a   :  { %10502 = vmatmul.msk.bf16.gmra.mxu0 %vm2617_vm8, %v10956_v5  ;;  %v5251_v5 = vshrl.u32 %v4692_v52, 16  ;;  %v10559_v11 = vrot.slane %v5942_v54, 9  ;;  %v11016_v52 = vld [vmem:[#allocation2 + $0x20] sm:$0x1]  ;;  %v7375_v13 = vrot.slane %v7374_v46, 4 }
 0x36b   :  { %v13049_v9 = vpop.f32.mrf.mxu1  ;;  %v7377_v26 = vshll.u32 %v11016_v52, 16  ;;  %v3709_v4 = vpack.c.b16 %v3651_v3, %v3650_v27  ;;  %v5577_v6 = vpack.c.b16 %v5535_v38, %v5534_v47  ;;  %v5270_v3 = vshll.u32 %v13051_v34, 16  ;;  %v3321_v38 = vld [vmem:[#allocation2 + $0x48] sm:$0xe]  ;;  %v11018_v27 = vld [vmem:[#allocation2 + $0x50] sm:$0x1] }
 0x36c   :  { %15312 = vst [vmem:[#allocation172_spill] sm:$0xff] %v13049_v9  ;;  %v5260_v9 = vshll.u32 %v4693_v55, 16  ;;  %v6208_v55 = vsel %vm11316_vm15, %v6206_v62, %v6207_v48  ;;  %v6205_v30 = vsel %vm11316_vm15, %v10559_v11, %v6204_v33  ;;  %v5253_v48 = vrot.slane %v5251_v5, 4  ;;  %v4696_v11 = vld [vmem:[#allocation2 + $0x13c] sm:$0xf] }
 0x36d   :  { %v6319_v62 = vunpack.c.l.b16 %v6208_v55  ;;  %v6318_v29 = vunpack.c.l.b16 %v6205_v30  ;;  %v7379_v52 = vrot.slane %v7377_v26, 5  ;;  %v13085_v5 = vld [vmem:[#allocation2 + $0x24] sm:$0xf]  ;;  %v6211_v24 = vrot.slane %v4696_v11, 5  ;;  %v13094_v26 = vld [vmem:[#allocation2 + $0x140] sm:$0x1] }
 0x36e   :  { %v13071_v21 = vrot.slane %v5260_v9, 5  ;;  %v11017_v9 = vld [vmem:[#allocation2 + $0x4c] sm:$0xf]  ;;  %v7365_v55 = vrot.slane %v7364_v44, 4  ;;  %v5272_v44 = vrot.slane %v5270_v3, 5 }
 0x36f   :  { %v13066_v35 = vpop.f32.mrf.mxu3  ;;  %v13073_v14 = vpop.f32.mrf.mxu0  ;;  %v3458_v49 = vrot.slane %v11017_v9, 5  ;;  %v7380_v46 = vsel %vm11282_vm11, %v7375_v13, %v7379_v52  ;;  %v10957_v13 = vld [vmem:[#allocation2 + $0x198] sm:$0xff] }
 0x370   :  { %15313 = vst [vmem:[#allocation173_spill] sm:$0xff] %v13066_v35  ;;  %v13077_v35 = vpop.f32.mrf.mxu2  ;;  %v5267_v33 = vor.u32 %v5266_v43, %v13071_v21  ;;  %v3461_v43 = vrot.slane %v11018_v27, 5  ;;  %v7370_v34 = vsel %vm11282_vm11, %v7365_v55, %v13053_v19  ;;  %v5943_v52 = vld [vmem:[#allocation2 + $0x138] sm:$0xe]  ;;  %v6213_v27 = vrot.slane %v6211_v24, 4 }
 0x371   :  { %15314 = vst [vmem:[#allocation174_spill] sm:$0xff] %v13073_v14  ;;  %v6360_v14 = vpack.c.b16 %v6319_v62, %v6318_v29  ;;  %v3460_v8 = vrot.slane %v3458_v49, 4  ;;  %v5288_v62 = vshrl.u32 %v4696_v11, 16  ;;  %v4695_v29 = vld [vmem:[#allocation2 + $0x138] sm:$0xf]  ;;  %v8127_v0 = vunpack.c.l.b16 %v7370_v34 }
 0x372   :  { %15315 = vst [vmem:[#allocation175_spill] sm:$0xff] %v13077_v35  ;;  %v5268_v47 = vrot.slane %v5267_v33, 4  ;;  %v10560_v35 = vrot.slane %v5943_v52, 9 }
 0x373   :  { %v13079_v54 = vpop.f32.mrf.mxu1  ;;  %v3462_v33 = vsel %vm11316_vm15, %v3460_v8, %v3461_v43  ;;  %v6214_v8 = vrot.slane %v13094_v26, 5  ;;  %v5278_v43 = vshll.u32 %v4695_v29, 16 }
 0x374   :  { %15316 = vst [vmem:[#allocation176_spill] sm:$0xff] %v13079_v54  ;;  %10316 = vmatmul.msk.bf16.gmra.mxu3 %vm2617_vm8, %v3709_v4  ;;  %v5257_v54 = vor.u32 %v5256_v1, %v5253_v48  ;;  %v5284_v4 = vshll.u32 %v4696_v11, 16  ;;  %v7382_v48 = vshrl.u32 %v13085_v5, 16  ;;  %v5273_v3 = vsel %vm11282_vm11, %v5268_v47, %v5272_v44 }
 0x375   :  { %v6215_v47 = vsel %vm11316_vm15, %v6213_v27, %v6214_v8  ;;  %v5280_v40 = vrot.slane %v5278_v43, 5 }
 0x376   :  { %10526 = vmatmul.msk.bf16.gmra.mxu1 %vm2617_vm8, %v5577_v6  ;;  %v10284_v6 = vrot.slane %v3321_v38, 9  ;;  %v5258_v9 = vrot.slane %v5257_v54, 4 }
 0x377   :  { %v13087_v42 = vpop.f32.mrf.mxu3  ;;  %10592 = vmatmul.msk.bf16.gmra.mxu2 %vm2617_vm8, %v6360_v14  ;;  %v13092_v30 = vpop.f32.mrf.mxu0  ;;  %v13102_v14 = vunpack.c.l.b16 %v7380_v46  ;;  %v5275_v46 = vshrl.u32 %v4695_v29, 16 }
 0x378   :  { %15317 = vst [vmem:[#allocation177_spill] sm:$0xff] %v13087_v42  ;;  %v13106_v11 = vpop.f32.mrf.mxu2  ;;  %v3459_v38 = vsel %vm11316_vm15, %v10284_v6, %v3458_v49  ;;  %v5263_v54 = vsel %vm11282_vm11, %v5258_v9, %v13071_v21  ;;  %v7385_v49 = vshll.u32 %v13085_v5, 16  ;;  %v13122_v6 = vld [vmem:[#allocation2 + $0xf4] sm:$0xf]  ;;  %v5537_v21 = vunpack.c.l.b16 %v5273_v3 }
 0x379   :  { %15318 = vst [vmem:[#allocation178_spill] sm:$0xff] %v13092_v30  ;;  %v11019_v30 = vld [vmem:[#allocation2 + $0x28] sm:$0xf]  ;;  %v5536_v29 = vunpack.c.l.b16 %v5263_v54  ;;  %v5277_v5 = vrot.slane %v5275_v46, 4  ;;  %v8797_v3 = vrot.slane %v13122_v6, 5 }
 0x37a   :  { %v7391_v19 = vshll.u32 %v11019_v30, 16  ;;  %v7395_v55 = vshrl.u32 %v11019_v30, 16  ;;  %15320 = vst [vmem:[#allocation180_spill] sm:$0xff] %v13106_v11  ;;  %10503 = vmatmul.msk.bf16.gmra.mxu0 %vm2617_vm8, %v10957_v13  ;;  %v5290_v30 = vrot.slane %v5288_v62, 4  ;;  %v3653_v11 = vunpack.c.l.b16 %v3462_v33  ;;  %v13141_v6 = vld [vmem:[#allocation2 + $0x30] sm:$0xf] }
 0x37b   :  { %v13100_v1 = vpop.f32.mrf.mxu1  ;;  %v13119_v13 = vrot.slane %v7382_v48, 4  ;;  %v6212_v62 = vsel %vm11316_vm15, %v10560_v35, %v6211_v24  ;;  %v11020_v48 = vld [vmem:[#allocation2 + $0x58] sm:$0xf]  ;;  %v5578_v8 = vpack.c.b16 %v5537_v21, %v5536_v29  ;;  %v3322_v35 = vld [vmem:[#allocation2 + $0x54] sm:$0xe]  ;;  %v5294_v24 = vshll.u32 %v13094_v26, 16 }
 0x37c   :  { %15319 = vst [vmem:[#allocation179_spill] sm:$0xff] %v13100_v1  ;;  %v13117_v1 = vrot.slane %v5284_v4, 5  ;;  %v13128_v9 = vrot.slane %v7391_v19, 5  ;;  %v7397_v44 = vrot.slane %v7395_v55, 4  ;;  %v3652_v4 = vunpack.c.l.b16 %v3459_v38  ;;  %v11021_v38 = vld [vmem:[#allocation2 + $0x2c] sm:$0x1] }
 0x37d   :  { %v3465_v33 = vrot.slane %v11020_v48, 5  ;;  %v6321_v19 = vunpack.c.l.b16 %v6215_v47  ;;  %v7387_v55 = vrot.slane %v7385_v49, 5  ;;  %v7401_v54 = vshll.u32 %v11021_v38, 16  ;;  %v11022_v48 = vld [vmem:[#allocation2 + $0x5c] sm:$0x1] }
 0x37e   :  { %v3710_v27 = vpack.c.b16 %v3653_v11, %v3652_v4  ;;  %v6320_v46 = vunpack.c.l.b16 %v6212_v62  ;;  %v7311_v11 = vld [vmem:[#allocation2 + $0xf8] sm:$0x1]  ;;  %v8191_v49 = vpack.c.b16 %v13102_v14, %v8127_v0  ;;  %v5281_v21 = vor.u32 %v5280_v40, %v5277_v5  ;;  %v8571_v47 = vld [vmem:[#allocation2 + $0xf0] sm:$0xe]  ;;  %v13147_v62 = vld [vmem:[#allocation2 + $0x14c] sm:$0x1] }
 0x37f   :  { %v13124_v42 = vpop.f32.mrf.mxu3  ;;  %v13132_v52 = vpop.f32.mrf.mxu0  ;;  %v3467_v43 = vrot.slane %v3465_v33, 4  ;;  %v8799_v4 = vrot.slane %v8797_v3, 4  ;;  %v10285_v38 = vrot.slane %v3322_v35, 9  ;;  %v5296_v18 = vrot.slane %v5294_v24, 5 }
 0x380   :  { %15321 = vst [vmem:[#allocation181_spill] sm:$0xff] %v13124_v42  ;;  %v5291_v42 = vor.u32 %v5290_v30, %v13117_v1  ;;  %v7398_v30 = vor.u32 %v7397_v44, %v13128_v9  ;;  %v13145_v26 = vpop.f32.mrf.mxu2  ;;  %v6361_v29 = vpack.c.b16 %v6321_v19, %v6320_v46  ;;  %v7388_v44 = vor.u32 %v7387_v55, %v13119_v13  ;;  %v4698_v19 = vld [vmem:[#allocation2 + $0x144] sm:$0xf] }
 0x381   :  { %15322 = vst [vmem:[#allocation182_spill] sm:$0xff] %v13132_v52  ;;  %v3468_v52 = vrot.slane %v11022_v48, 5  ;;  %v7403_v48 = vrot.slane %v7401_v54, 5  ;;  %v7406_v0 = vshrl.u32 %v13141_v6, 16  ;;  %v8800_v40 = vrot.slane %v7311_v11, 5 }
 0x382   :  { %v5292_v34 = vrot.slane %v5291_v42, 4  ;;  %15324 = vst [vmem:[#allocation184_spill] sm:$0xff] %v13145_v26  ;;  %v3466_v42 = vsel %vm11316_vm15, %v10285_v38, %v3465_v33  ;;  %v7399_v5 = vrot.slane %v7398_v30, 4  ;;  %v10812_v13 = vrot.slane %v8571_v47, 9  ;;  %v11024_v26 = vld [vmem:[#allocation2 + $0x64] sm:$0xf] }
 0x383   :  { %v13136_v7 = vpop.f32.mrf.mxu1  ;;  %v3469_v14 = vsel %vm11316_vm15, %v3467_v43, %v3468_v52  ;;  %v5282_v54 = vrot.slane %v5281_v21, 4  ;;  %v6221_v24 = vrot.slane %v13147_v62, 5  ;;  %v8801_v46 = vsel %vm11316_vm15, %v8799_v4, %v8800_v40  ;;  %v11023_v40 = vld [vmem:[#allocation2 + $0x34] sm:$0xf] }
 0x384   :  { %15323 = vst [vmem:[#allocation183_spill] sm:$0xff] %v13136_v7  ;;  %10317 = vmatmul.msk.bf16.gmra.mxu3 %vm2617_vm8, %v3710_v27  ;;  %v4699_v27 = vld [vmem:[#allocation2 + $0x148] sm:$0xf]  ;;  %v5297_v35 = vsel %vm11282_vm11, %v5292_v34, %v5296_v18  ;;  %v8798_v52 = vsel %vm11316_vm15, %v10812_v13, %v8797_v3  ;;  %v5299_v30 = vshrl.u32 %v4698_v19, 16  ;;  %v5302_v47 = vshll.u32 %v4698_v19, 16 }
 0x385   :  { %v6218_v53 = vrot.slane %v4699_v27, 5  ;;  %v5312_v38 = vshrl.u32 %v4699_v27, 16  ;;  %v8942_v21 = vunpack.c.l.b16 %v8801_v46  ;;  %v7389_v18 = vrot.slane %v7388_v44, 4 }
 0x386   :  { %10527 = vmatmul.msk.bf16.gmra.mxu1 %vm2617_vm8, %v5578_v8  ;;  %v5944_v8 = vld [vmem:[#allocation2 + $0x144] sm:$0xe]  ;;  %v7404_v34 = vsel %vm11282_vm11, %v7399_v5, %v7403_v48  ;;  %v7409_v4 = vshll.u32 %v13141_v6, 16  ;;  %v5287_v3 = vsel %vm11282_vm11, %v5282_v54, %v13117_v1  ;;  %v5539_v13 = vunpack.c.l.b16 %v5297_v35 }
 0x387   :  { %v13150_v7 = vpop.f32.mrf.mxu3  ;;  %10593 = vmatmul.msk.bf16.gmra.mxu2 %vm2617_vm8, %v6361_v29  ;;  %v13158_v55 = vpop.f32.mrf.mxu0  ;;  %v10561_v33 = vrot.slane %v5944_v8, 9  ;;  %v5308_v29 = vshll.u32 %v4699_v27, 16  ;;  %v6220_v43 = vrot.slane %v6218_v53, 4  ;;  %v3654_v8 = vunpack.c.l.b16 %v3466_v42 }
 0x388   :  { %15325 = vst [vmem:[#allocation185_spill] sm:$0xff] %v13150_v7  ;;  %v8941_v27 = vunpack.c.l.b16 %v8798_v52  ;;  %v5314_v44 = vrot.slane %v5312_v38, 4  ;;  %v5301_v48 = vrot.slane %v5299_v30, 4  ;;  %v5304_v42 = vrot.slane %v5302_v47, 5  ;;  %v13186_v5 = vpop.f32.mrf.mxu2 }
 0x389   :  { %15326 = vst [vmem:[#allocation186_spill] sm:$0xff] %v13158_v55  ;;  %v7415_v55 = vshll.u32 %v11023_v40, 16  ;;  %v6219_v19 = vsel %vm11316_vm15, %v10561_v33, %v6218_v53  ;;  %v6222_v6 = vsel %vm11316_vm15, %v6220_v43, %v6221_v24  ;;  %v7394_v1 = vsel %vm11282_vm11, %v7389_v18, %v13128_v9  ;;  %v7270_v43 = vld [vmem:[#allocation2 + $0x3c] sm:$0xf] }
 0x38a   :  { %10764 = vmatmul.msk.bf16.vlgmr.msra.gmra.mxu0 %vm2617_vm8, %v8191_v49  ;;  %v13178_v49 = vrot.slane %v5308_v29, 5  ;;  %15329 = vst [vmem:[#allocation189_spill] sm:$0xff] %v13186_v5  ;;  %v7408_v54 = vrot.slane %v7406_v0, 4  ;;  %v7411_v53 = vrot.slane %v7409_v4, 5  ;;  %v7419_v35 = vshrl.u32 %v11023_v40, 16 }
 0x38b   :  { %v13165_v11 = vpop.f32.mrf.mxu1  ;;  %v5538_v38 = vunpack.c.l.b16 %v5287_v3  ;;  %v8130_v52 = vunpack.c.l.b16 %v7404_v34  ;;  %v3472_v24 = vrot.slane %v11024_v26, 5  ;;  %v6322_v47 = vunpack.c.l.b16 %v6219_v19  ;;  %v11025_v26 = vld [vmem:[#allocation2 + $0x38] sm:$0x1] }
 0x38c   :  { %15327 = vst [vmem:[#allocation187_spill] sm:$0xff] %v13165_v11  ;;  %v3655_v11 = vunpack.c.l.b16 %v3469_v14  ;;  %v13184_v14 = vpack.c.b16 %v8942_v21, %v8941_v27  ;;  %v6323_v21 = vunpack.c.l.b16 %v6222_v6  ;;  %v5315_v27 = vor.u32 %v5314_v44, %v13178_v49 }
 0x38d   :  { %v5318_v5 = vshll.u32 %v13147_v62, 16  ;;  %v5579_v9 = vpack.c.b16 %v5539_v13, %v5538_v38  ;;  %v8129_v0 = vunpack.c.l.b16 %v7394_v1  ;;  %v5305_v18 = vor.u32 %v5304_v42, %v5301_v48  ;;  %v11027_v62 = vld [vmem:[#allocation2 + $0x40] sm:$0xf]  ;;  %v4702_v38 = vld [vmem:[#allocation2 + $0x154] sm:$0xf] }
 0x38e   :  { %v3711_v29 = vpack.c.b16 %v3655_v11, %v3654_v8  ;;  %v13197_v4 = vrot.slane %v7415_v55, 5  ;;  %v3323_v11 = vld [vmem:[#allocation2 + $0x60] sm:$0xe]  ;;  %v7412_v34 = vor.u32 %v7411_v53, %v7408_v54  ;;  %v7421_v40 = vrot.slane %v7419_v35, 4  ;;  %v13203_v54 = vld [vmem:[#allocation2 + $0x158] sm:$0x1] }
 0x38f   :  { %v13180_v46 = vpop.f32.mrf.mxu3  ;;  %v13191_v33 = vpop.f32.mrf.mxu0  ;;  %v7425_v8 = vshll.u32 %v11025_v26, 16  ;;  %v7430_v3 = vshrl.u32 %v7270_v43, 16  ;;  %v3474_v44 = vrot.slane %v3472_v24, 4  ;;  %v7433_v6 = vshll.u32 %v7270_v43, 16  ;;  %v13201_v1 = vld [vmem:[#allocation2 + $0x100] sm:$0xf] }
 0x390   :  { %15328 = vst [vmem:[#allocation188_spill] sm:$0xff] %v13180_v46  ;;  %v7439_v13 = vshll.u32 %v11027_v62, 16  ;;  %v6362_v55 = vpack.c.b16 %v6323_v21, %v6322_v47  ;;  %v8192_v48 = vpack.c.b16 %v8130_v52, %v8129_v0  ;;  %v5316_v42 = vrot.slane %v5315_v27, 4  ;;  %v4701_v52 = vld [vmem:[#allocation2 + $0x150] sm:$0xf] }
 0x391   :  { %15330 = vst [vmem:[#allocation190_spill] sm:$0xff] %v13191_v33  ;;  %v11026_v33 = vld [vmem:[#allocation2 + $0x68] sm:$0x1]  ;;  %v10286_v35 = vrot.slane %v3323_v11, 9  ;;  %v5306_v26 = vrot.slane %v5305_v18, 4  ;;  %v13208_v43 = vrot.slane %v7412_v34, 4  ;;  %v7422_v46 = vor.u32 %v7421_v40, %v13197_v4  ;;  %v13221_v34 = vpop.f32.mrf.mxu2 }
 0x392   :  { %v3475_v19 = vrot.slane %v11026_v33, 5  ;;  %v5945_v33 = vld [vmem:[#allocation2 + $0x150] sm:$0xe]  ;;  %v7427_v47 = vrot.slane %v7425_v8, 5  ;;  %v13211_v21 = vrot.slane %v7430_v3, 4  ;;  %v6228_v18 = vrot.slane %v13203_v54, 5 }
 0x393   :  { %v13193_v30 = vpop.f32.mrf.mxu1  ;;  %v3473_v27 = vsel %vm11316_vm15, %v10286_v35, %v3472_v24  ;;  %15334 = vst [vmem:[#allocation194_spill] sm:$0xff] %v13221_v34  ;;  %v10562_v8 = vrot.slane %v5945_v33, 9  ;;  %v5332_v3 = vshll.u32 %v4702_v38, 16  ;;  %v5311_v24 = vsel %vm11282_vm11, %v5306_v26, %v13178_v49 }
 0x394   :  { %15331 = vst [vmem:[#allocation191_spill] sm:$0xff] %v13193_v30  ;;  %10318 = vmatmul.msk.bf16.gmra.mxu3 %vm2617_vm8, %v3711_v29  ;;  %v5320_v29 = vrot.slane %v5318_v5, 5  ;;  %v6225_v30 = vrot.slane %v4702_v38, 5  ;;  %v3476_v0 = vsel %vm11316_vm15, %v3474_v44, %v3475_v19  ;;  %v5323_v19 = vshrl.u32 %v4701_v52, 16 }
 0x395   :  { %v5326_v44 = vshll.u32 %v4701_v52, 16  ;;  %v3656_v11 = vunpack.c.l.b16 %v3473_v27  ;;  %v13231_v34 = vrot.slane %v7433_v6, 5  ;;  %v3657_v33 = vunpack.c.l.b16 %v3476_v0 }
 0x396   :  { %10528 = vmatmul.msk.bf16.gmra.mxu1 %vm2617_vm8, %v5579_v9  ;;  %v7443_v9 = vshrl.u32 %v11027_v62, 16  ;;  %v5321_v40 = vsel %vm11282_vm11, %v5316_v42, %v5320_v29  ;;  %v6227_v35 = vrot.slane %v6225_v30, 4  ;;  %v9501_v42 = vld [vmem:[%s15112_s5] sm:$0x3]  ;;  %v7314_v29 = vld [vmem:[#allocation2 + $0x104] sm:$0x1] }
 0x397   :  { %v13205_v53 = vpop.f32.mrf.mxu3  ;;  %10594 = vmatmul.msk.bf16.gmra.mxu2 %vm2617_vm8, %v6362_v55  ;;  %v13213_v5 = vpop.f32.mrf.mxu0  ;;  %v5336_v55 = vshrl.u32 %v4702_v38, 16  ;;  %v5541_v38 = vunpack.c.l.b16 %v5321_v40  ;;  %v15336_v49 = vrot.slane %v13201_v1, 5  ;;  %v13241_v52 = vrot.slane %v5332_v3, 5 }
 0x398   :  { %15332 = vst [vmem:[#allocation192_spill] sm:$0xff] %v13205_v53  ;;  %v5540_v53 = vunpack.c.l.b16 %v5311_v24  ;;  %v6229_v27 = vsel %vm11316_vm15, %v6227_v35, %v6228_v18  ;;  %v5325_v0 = vrot.slane %v5323_v19, 4  ;;  %v5328_v40 = vrot.slane %v5326_v44, 5  ;;  %v11029_v18 = vld [vmem:[#allocation2 + $0x70] sm:$0xf] }
 0x399   :  { %15333 = vst [vmem:[#allocation193_spill] sm:$0xff] %v13213_v5  ;;  %v7423_v5 = vrot.slane %v7422_v46, 4  ;;  %v8806_v26 = vrot.slane %v15336_v49, 4  ;;  %v5338_v46 = vrot.slane %v5336_v55, 4  ;;  %v8807_v7 = vrot.slane %v7314_v29, 5 }
 0x39a   :  { %10765 = vmatmul.msk.bf16.gmra.mxu0 %vm2617_vm8, %v8192_v48  ;;  %v6226_v48 = vsel %vm11316_vm15, %v10562_v8, %v6225_v30  ;;  %v7418_v24 = vsel %vm11282_vm11, %v13208_v43, %v13197_v4  ;;  %v7445_v30 = vrot.slane %v7443_v9, 4  ;;  %v11028_v8 = vld [vmem:[#allocation2 + $0x44] sm:$0x1]  ;;  %v3479_v35 = vrot.slane %v11029_v18, 5  ;;  %v7273_v19 = vld [vmem:[#allocation2 + $0x48] sm:$0xf] }
 0x39b   :  { %v13223_v62 = vpop.f32.mrf.mxu1  ;;  %v7449_v3 = vshll.u32 %v11028_v8, 16  ;;  %v7428_v49 = vsel %vm11282_vm11, %v7423_v5, %v7427_v47  ;;  %v13259_v44 = vsel %vm11316_vm15, %v8806_v26, %v8807_v7  ;;  %v6324_v4 = vunpack.c.l.b16 %v6226_v48  ;;  %v3324_v5 = vld [vmem:[#allocation2 + $0x6c] sm:$0xe]  ;;  %v11030_v26 = vld [vmem:[#allocation2 + $0x74] sm:$0x1] }
 0x39c   :  { %15335 = vst [vmem:[#allocation195_spill] sm:$0xff] %v13223_v62  ;;  %v9603_v62 = vsel %vm2714_vm7, %v9501_v42, 0  ;;  %v13251_v42 = vrot.slane %v7439_v13, 5  ;;  %v6325_v13 = vunpack.c.l.b16 %v6229_v27  ;;  %v5339_v9 = vor.u32 %v5338_v46, %v13241_v52 }
 0x39d   :  { %9612 = vmatpush.bf16.msra.mxu2 %v9603_v62  ;;  %v3712_v62 = vpack.c.b16 %v3657_v33, %v3656_v11  ;;  %v5342_v43 = vshll.u32 %v13203_v54, 16  ;;  %v5580_v8 = vpack.c.b16 %v5541_v38, %v5540_v53  ;;  %v5329_v11 = vor.u32 %v5328_v40, %v5325_v0  ;;  %v13265_v33 = vpop.f32.mrf.mxu2  ;;  %v8572_v54 = vld [vmem:[#allocation2 + $0xfc] sm:$0xe]  ;;  %v4705_v40 = vld [vmem:[#allocation2 + $0x160] sm:$0xf] }
 0x39e   :  { %15340 = vst [vmem:[#allocation199_spill] sm:$0xff] %v13265_v33  ;;  %v8132_v47 = vunpack.c.l.b16 %v7428_v49  ;;  %v7446_v18 = vor.u32 %v7445_v30, %v13251_v42  ;;  %v7454_v7 = vshrl.u32 %v7273_v19, 16  ;;  %v8131_v48 = vunpack.c.l.b16 %v7418_v24 }
 0x39f   :  { %v13243_v6 = vpop.f32.mrf.mxu3  ;;  %v13253_v55 = vpop.f32.mrf.mxu0  ;;  %v3481_v27 = vrot.slane %v3479_v35, 4  ;;  %v13270_v46 = vrot.slane %v7449_v3, 5  ;;  %v6363_v53 = vpack.c.b16 %v6325_v13, %v6324_v4  ;;  %v5340_v38 = vrot.slane %v5339_v9, 4  ;;  %v4704_v13 = vld [vmem:[#allocation2 + $0x15c] sm:$0xf] }
 0x3a0   :  { %15337 = vst [vmem:[#allocation196_spill] sm:$0xff] %v13243_v6  ;;  %v5344_v0 = vrot.slane %v5342_v43, 5  ;;  %v10287_v49 = vrot.slane %v3324_v5, 9  ;;  %v5330_v33 = vrot.slane %v5329_v11, 4  ;;  %v6232_v6 = vrot.slane %v4705_v40, 5 }
 0x3a1   :  { %15338 = vst [vmem:[#allocation197_spill] sm:$0xff] %v13253_v55  ;;  %v3482_v55 = vrot.slane %v11030_v26, 5  ;;  %v5946_v26 = vld [vmem:[#allocation2 + $0x15c] sm:$0xe]  ;;  %v8193_v3 = vpack.c.b16 %v8132_v47, %v8131_v48  ;;  %v7447_v4 = vrot.slane %v7446_v18, 4  ;;  %v13280_v9 = vrot.slane %v7454_v7, 4 }
 0x3a2   :  { %v10813_v11 = vrot.slane %v8572_v54, 9  ;;  %v5345_v47 = vsel %vm11282_vm11, %v5340_v38, %v5344_v0  ;;  %v10563_v5 = vrot.slane %v5946_v26, 9  ;;  %v5356_v18 = vshll.u32 %v4705_v40, 16 }
 0x3a3   :  { %v13261_v29 = vpop.f32.mrf.mxu1  ;;  %v5360_v7 = vshrl.u32 %v4705_v40, 16  ;;  %v5335_v48 = vsel %vm11282_vm11, %v5330_v33, %v13241_v52  ;;  %v5543_v26 = vunpack.c.l.b16 %v5345_v47 }
 0x3a4   :  { %15339 = vst [vmem:[#allocation198_spill] sm:$0xff] %v13261_v29  ;;  %10319 = vmatmul.msk.bf16.gmra.mxu3 %vm2617_vm8, %v3712_v62  ;;  %v13272_v29 = vld [vmem:[#allocation2 + $0x164] sm:$0x1]  ;;  %v7436_v62 = vor.u32 %v13231_v34, %v13211_v21  ;;  %v3480_v21 = vsel %vm11316_vm15, %v10287_v49, %v3479_v35  ;;  %v3483_v34 = vsel %vm11316_vm15, %v3481_v27, %v3482_v55  ;;  %v5347_v35 = vshrl.u32 %v4704_v13, 16  ;;  %v11031_v27 = vld [vmem:[#allocation2 + $0x4c] sm:$0xf] }
 0x3a5   :  { %v7463_v54 = vshll.u32 %v11031_v27, 16  ;;  %v7467_v49 = vshrl.u32 %v11031_v27, 16  ;;  %v3658_v0 = vunpack.c.l.b16 %v3480_v21  ;;  %v3659_v40 = vunpack.c.l.b16 %v3483_v34  ;;  %v13302_v52 = vpop.f32.mrf.mxu2 }
 0x3a6   :  { %10529 = vmatmul.msk.bf16.gmra.mxu1 %vm2617_vm8, %v5580_v8  ;;  %v7457_v8 = vshll.u32 %v7273_v19, 16  ;;  %v6235_v19 = vrot.slane %v13272_v29, 5  ;;  %15344 = vst [vmem:[#allocation202_spill] sm:$0xff] %v13302_v52  ;;  %v5542_v33 = vunpack.c.l.b16 %v5335_v48 }
 0x3a7   :  { %v3844_v30 = vpop.f32.mrf.mxu3  ;;  %10595 = vmatmul.msk.bf16.gmra.mxu2 %vm2617_vm8, %v6363_v53  ;;  %v13282_v43 = vpop.f32.mrf.mxu0  ;;  %v6234_v53 = vrot.slane %v6232_v6, 4  ;;  %v13315_v47 = vrot.slane %v7463_v54, 5  ;;  %v7469_v48 = vrot.slane %v7467_v49, 4 }
 0x3a8   :  { %v13277_v24 = vadd.f32 %v3844_v30, %v11481_v61  ;;  %15341 = vst [vmem:[#allocation200_spill] sm:$0xff] %v13282_v43  ;;  %v5350_v30 = vshll.u32 %v4704_v13, 16  ;;  %v7459_v55 = vrot.slane %v7457_v8, 5  ;;  %v15343_v43 = vrot.slane %v13201_v1, 5 }
 0x3a9   :  { %v13306_v8 = vrot.slane %v5356_v18, 5  ;;  %v5362_v13 = vrot.slane %v5360_v7, 4  ;;  %v6236_v1 = vsel %vm11316_vm15, %v6234_v53, %v6235_v19  ;;  %v13319_v18 = vld [vmem:[#allocation2 + $0x7c] sm:$0xf]  ;;  %v5581_v54 = vpack.c.b16 %v5543_v26, %v5542_v33 }
 0x3aa   :  { %10766 = vmatmul.msk.bf16.gmra.mxu0 %vm2617_vm8, %v8193_v3  ;;  %v8805_v38 = vsel %vm11316_vm15, %v10813_v11, %v15343_v43  ;;  %v6233_v3 = vsel %vm11316_vm15, %v10563_v5, %v6232_v6  ;;  %v5349_v43 = vrot.slane %v5347_v35, 4  ;;  %v5352_v21 = vrot.slane %v5350_v30, 5 }
 0x3ab   :  { %v13289_v61 = vpop.f32.mrf.mxu1  ;;  %v8943_v34 = vunpack.c.l.b16 %v8805_v38  ;;  %v7437_v11 = vrot.slane %v7436_v62, 4  ;;  %v3713_v5 = vpack.c.b16 %v3659_v40, %v3658_v0  ;;  %v3486_v7 = vrot.slane %v13319_v18, 5  ;;  %v11034_v40 = vld [vmem:[#allocation2 + $0x80] sm:$0x1] }
 0x3ac   :  { %15342 = vst [vmem:[#allocation201_spill] sm:$0xff] %v13289_v61  ;;  %v8944_v61 = vunpack.c.l.b16 %v13259_v44  ;;  %v7452_v44 = vsel %vm11282_vm11, %v7447_v4, %v13270_v46  ;;  %v7460_v19 = vor.u32 %v7459_v55, %v13280_v9  ;;  %v6326_v62 = vunpack.c.l.b16 %v6233_v3 }
 0x3ad   :  { %v6327_v30 = vunpack.c.l.b16 %v6236_v1  ;;  %v5363_v46 = vor.u32 %v5362_v13, %v13306_v8  ;;  %v5366_v4 = vshll.u32 %v13272_v29, 16  ;;  %v7442_v49 = vsel %vm11282_vm11, %v7437_v11, %v13251_v42  ;;  %v3325_v13 = vld [vmem:[#allocation2 + $0x78] sm:$0xe] }
 0x3ae   :  { %v13323_v53 = vpack.c.b16 %v8944_v61, %v8943_v34  ;;  %v5353_v38 = vor.u32 %v5352_v21, %v5349_v43  ;;  %v8134_v0 = vunpack.c.l.b16 %v7452_v44  ;;  %v7470_v9 = vor.u32 %v7469_v48, %v13315_v47  ;;  %v11033_v61 = vld [vmem:[#allocation2 + $0x50] sm:$0x1]  ;;  %v4708_v43 = vld [vmem:[#allocation2 + $0x16c] sm:$0xf] }
 0x3af   :  { %v13308_v27 = vpop.f32.mrf.mxu3  ;;  %v13317_v6 = vpop.f32.mrf.mxu0  ;;  %v7473_v55 = vshll.u32 %v11033_v61, 16  ;;  %v3489_v3 = vrot.slane %v11034_v40, 5  ;;  %v3488_v1 = vrot.slane %v3486_v7, 4  ;;  %v13335_v29 = vrot.slane %v7460_v19, 4  ;;  %v13337_v21 = vld [vmem:[#allocation2 + $0x10c] sm:$0xf] }
 0x3b0   :  { %15345 = vst [vmem:[#allocation203_spill] sm:$0xff] %v13308_v27  ;;  %v6364_v26 = vpack.c.b16 %v6327_v30, %v6326_v62  ;;  %v8133_v33 = vunpack.c.l.b16 %v7442_v49  ;;  %v5364_v34 = vrot.slane %v5363_v46, 4  ;;  %v5368_v42 = vrot.slane %v5366_v4, 5  ;;  %v13339_v48 = vld [vmem:[#allocation2 + $0x170] sm:$0x1]  ;;  %v13341_v61 = vpop.f32.mrf.mxu2 }
 0x3b1   :  { %15346 = vst [vmem:[#allocation204_spill] sm:$0xff] %v13317_v6  ;;  %v5354_v44 = vrot.slane %v5353_v38, 4  ;;  %v6239_v18 = vrot.slane %v4708_v43, 5  ;;  %v7471_v62 = vrot.slane %v7470_v9, 4  ;;  %v7475_v30 = vrot.slane %v7473_v55, 5 }
 0x3b2   :  { %15348 = vst [vmem:[#allocation206_spill] sm:$0xff] %v13341_v61  ;;  %v8194_v19 = vpack.c.b16 %v8134_v0, %v8133_v33  ;;  %v4707_v46 = vld [vmem:[#allocation2 + $0x168] sm:$0xf]  ;;  %v10288_v49 = vrot.slane %v3325_v13, 9  ;;  %v5380_v40 = vshll.u32 %v4708_v43, 16  ;;  %v5384_v38 = vshrl.u32 %v4708_v43, 16 }
 0x3b3   :  { %v13325_v35 = vpop.f32.mrf.mxu1  ;;  %v13349_v6 = vld [vmem:[#allocation2 + $0x54] sm:$0xf]  ;;  %v5369_v0 = vsel %vm11282_vm11, %v5364_v34, %v5368_v42  ;;  %v6242_v55 = vrot.slane %v13339_v48, 5  ;;  %v5359_v13 = vsel %vm11282_vm11, %v5354_v44, %v13306_v8  ;;  %v5371_v33 = vshrl.u32 %v4707_v46, 16 }
 0x3b4   :  { %15347 = vst [vmem:[#allocation205_spill] sm:$0xff] %v13325_v35  ;;  %10320 = vmatmul.msk.bf16.gmra.mxu3 %vm2617_vm8, %v3713_v5  ;;  %v5947_v5 = vld [vmem:[#allocation2 + $0x168] sm:$0xe]  ;;  %v15119_v35 = vrot.slane %v13337_v21, 5  ;;  %v5374_v43 = vshll.u32 %v4707_v46, 16  ;;  %v7478_v34 = vshrl.u32 %v13349_v6, 16  ;;  %v3487_v8 = vsel %vm11316_vm15, %v10288_v49, %v3486_v7 }
 0x3b5   :  { %v10564_v9 = vrot.slane %v5947_v5, 9  ;;  %v7481_v42 = vshll.u32 %v13349_v6, 16  ;;  %v13373_v44 = vrot.slane %v5380_v40, 5  ;;  %v5386_v5 = vrot.slane %v5384_v38, 4  ;;  %v11035_v40 = vld [vmem:[#allocation2 + $0x58] sm:$0xf] }
 0x3b6   :  { %10530 = vmatmul.msk.bf16.gmra.mxu1 %vm2617_vm8, %v5581_v54  ;;  %v3660_v49 = vunpack.c.l.b16 %v3487_v8  ;;  %v7487_v38 = vshll.u32 %v11035_v40, 16  ;;  %v13395_v27 = vrot.slane %v7478_v34, 4 }
 0x3b7   :  { %v3849_v11 = vpop.f32.mrf.mxu3  ;;  %10596 = vmatmul.msk.bf16.gmra.mxu2 %vm2617_vm8, %v6364_v26  ;;  %v13347_v4 = vpop.f32.mrf.mxu0  ;;  %v6241_v26 = vrot.slane %v6239_v18, 4  ;;  %v7483_v34 = vrot.slane %v7481_v42, 5 }
 0x3b8   :  { %v13344_v54 = vadd.f32 %v3849_v11, %v11533_v10  ;;  %15350 = vst [vmem:[#allocation208_spill] sm:$0xff] %v13347_v4  ;;  %v3490_v10 = vsel %vm11316_vm15, %v3488_v1, %v3489_v3  ;;  %v7466_v3 = vsel %vm11282_vm11, %v13335_v29, %v13315_v47  ;;  %v7476_v1 = vsel %vm11282_vm11, %v7471_v62, %v7475_v30  ;;  %v7317_v11 = vld [vmem:[#allocation2 + $0x110] sm:$0x1] }
 0x3b9   :  { %v3661_v46 = vunpack.c.l.b16 %v3490_v10  ;;  %v5544_v4 = vunpack.c.l.b16 %v5359_v13  ;;  %v5545_v47 = vunpack.c.l.b16 %v5369_v0  ;;  %v6240_v29 = vsel %vm11316_vm15, %v10564_v9, %v6239_v18  ;;  %v8573_v10 = vld [vmem:[#allocation2 + $0x108] sm:$0xe] }
 0x3ba   :  { %15349 = vst [vmem:[#allocation207_spill] sm:$0xff] %v13344_v54  ;;  %10767 = vmatmul.msk.bf16.gmra.mxu0 %vm2617_vm8, %v8194_v19  ;;  %v8813_v19 = vrot.slane %v15119_v35, 4  ;;  %v6243_v6 = vsel %vm11316_vm15, %v6241_v26, %v6242_v55  ;;  %v5373_v30 = vrot.slane %v5371_v33, 4  ;;  %v8814_v61 = vrot.slane %v7317_v11, 5  ;;  %v11036_v0 = vld [vmem:[#allocation2 + $0x88] sm:$0xf]  ;;  %v13390_v26 = vpop.f32.mrf.mxu2 }
 0x3bb   :  { %v13352_v52 = vpop.f32.mrf.mxu1  ;;  %v7491_v35 = vshrl.u32 %v11035_v40, 16  ;;  %v3493_v54 = vrot.slane %v11036_v0, 5  ;;  %v5387_v18 = vor.u32 %v5386_v5, %v13373_v44  ;;  %v5390_v9 = vshll.u32 %v13339_v48, 16  ;;  %15354 = vst [vmem:[#allocation212_spill] sm:$0xff] %v13390_v26  ;;  %v3326_v48 = vld [vmem:[#allocation2 + $0x84] sm:$0xe] }
 0x3bc   :  { %15351 = vst [vmem:[#allocation209_spill] sm:$0xff] %v13352_v52  ;;  %v5376_v52 = vrot.slane %v5374_v43, 5  ;;  %v8815_v55 = vsel %vm11316_vm15, %v8813_v19, %v8814_v61  ;;  %v3714_v33 = vpack.c.b16 %v3661_v46, %v3660_v49  ;;  %v6328_v43 = vunpack.c.l.b16 %v6240_v29 }
 0x3bd   :  { %v6329_v11 = vunpack.c.l.b16 %v6243_v6  ;;  %v8136_v8 = vunpack.c.l.b16 %v7476_v1  ;;  %v10814_v0 = vrot.slane %v8573_v10, 9  ;;  %v8135_v5 = vunpack.c.l.b16 %v7466_v3  ;;  %v7279_v1 = vld [vmem:[#allocation2 + $0x60] sm:$0xf]  ;;  %v4711_v3 = vld [vmem:[#allocation2 + $0x178] sm:$0xf] }
 0x3be   :  { %v13397_v61 = vrot.slane %v7487_v38, 5  ;;  %v7493_v19 = vrot.slane %v7491_v35, 4  ;;  %v3495_v46 = vrot.slane %v3493_v54, 4  ;;  %v5388_v29 = vrot.slane %v5387_v18, 4  ;;  %v11038_v18 = vld [vmem:[#allocation2 + $0x5c] sm:$0x1] }
 0x3bf   :  { %v3851_v62 = vpop.f32.mrf.mxu3  ;;  %v13384_v13 = vpop.f32.mrf.mxu0  ;;  %v5392_v6 = vrot.slane %v5390_v9, 5  ;;  %v15356_v49 = vrot.slane %v13337_v21, 5  ;;  %v8946_v38 = vunpack.c.l.b16 %v8815_v55  ;;  %v10289_v35 = vrot.slane %v3326_v48, 9 }
 0x3c0   :  { %v13382_v7 = vadd.f32 %v3851_v62, %v11542_v50  ;;  %15353 = vst [vmem:[#allocation211_spill] sm:$0xff] %v13384_v13  ;;  %v11037_v62 = vld [vmem:[#allocation2 + $0x8c] sm:$0x1]  ;;  %v5582_v13 = vpack.c.b16 %v5545_v47, %v5544_v4  ;;  %v6365_v4 = vpack.c.b16 %v6329_v11, %v6328_v43  ;;  %v8195_v47 = vpack.c.b16 %v8136_v8, %v8135_v5  ;;  %v4710_v43 = vld [vmem:[#allocation2 + $0x174] sm:$0xf] }
 0x3c1   :  { %v3496_v40 = vrot.slane %v11037_v62, 5  ;;  %v6246_v62 = vrot.slane %v4711_v3, 5  ;;  %v7497_v9 = vshll.u32 %v11038_v18, 16  ;;  %v7494_v21 = vor.u32 %v7493_v19, %v13397_v61 }
 0x3c2   :  { %15352 = vst [vmem:[#allocation210_spill] sm:$0xff] %v13382_v7  ;;  %v5377_v7 = vor.u32 %v5376_v52, %v5373_v30  ;;  %v8812_v52 = vsel %vm11316_vm15, %v10814_v0, %v15356_v49  ;;  %v13404_v30 = vld [vmem:[#allocation2 + $0x17c] sm:$0x1]  ;;  %v7502_v11 = vshrl.u32 %v7279_v1, 16  ;;  %v3494_v42 = vsel %vm11316_vm15, %v10289_v35, %v3493_v54 }
 0x3c3   :  { %v13392_v50 = vpop.f32.mrf.mxu1  ;;  %v8945_v8 = vunpack.c.l.b16 %v8812_v52  ;;  %v5393_v55 = vsel %vm11282_vm11, %v5388_v29, %v5392_v6  ;;  %v5404_v19 = vshll.u32 %v4711_v3, 16  ;;  %v5408_v49 = vshrl.u32 %v4711_v3, 16 }
 0x3c4   :  { %15355 = vst [vmem:[#allocation213_spill] sm:$0xff] %v13392_v50  ;;  %10321 = vmatmul.msk.bf16.gmra.mxu3 %vm2617_vm8, %v3714_v33  ;;  %v5378_v33 = vrot.slane %v5377_v7, 4  ;;  %v3497_v7 = vsel %vm11316_vm15, %v3495_v46, %v3496_v40  ;;  %v6248_v54 = vrot.slane %v6246_v62, 4  ;;  %v5398_v35 = vshll.u32 %v4710_v43, 16  ;;  %v13427_v40 = vpop.f32.mrf.mxu2 }
 0x3c5   :  { %15359 = vst [vmem:[#allocation216_spill] sm:$0xff] %v13427_v40  ;;  %v7484_v46 = vor.u32 %v7483_v34, %v13395_v27  ;;  %v7499_v29 = vrot.slane %v7497_v9, 5  ;;  %v7505_v6 = vshll.u32 %v7279_v1, 16  ;;  %v3663_v18 = vunpack.c.l.b16 %v3497_v7  ;;  %v11039_v9 = vld [vmem:[#allocation2 + $0x64] sm:$0xf] }
 0x3c6   :  { %10531 = vmatmul.msk.bf16.gmra.mxu1 %vm2617_vm8, %v5582_v13  ;;  %v5948_v13 = vld [vmem:[#allocation2 + $0x174] sm:$0xe]  ;;  %v5383_v52 = vsel %vm11282_vm11, %v5378_v33, %v13373_v44  ;;  %v7495_v3 = vrot.slane %v7494_v21, 4  ;;  %v5410_v44 = vrot.slane %v5408_v49, 4  ;;  %v5400_v27 = vrot.slane %v5398_v35, 5 }
 0x3c7   :  { %v3854_v10 = vpop.f32.mrf.mxu3  ;;  %10597 = vmatmul.msk.bf16.gmra.mxu2 %vm2617_vm8, %v6365_v4  ;;  %v13411_v0 = vpop.f32.mrf.mxu0  ;;  %v10565_v48 = vrot.slane %v5948_v13, 9  ;;  %v13422_v4 = vpack.c.b16 %v8946_v38, %v8945_v8  ;;  %v3662_v13 = vunpack.c.l.b16 %v3494_v42  ;;  %v7504_v38 = vrot.slane %v7502_v11, 4 }
 0x3c8   :  { %v13407_v50 = vadd.f32 %v3854_v10, %v11557_v23  ;;  %15357 = vst [vmem:[#allocation214_spill] sm:$0xff] %v13411_v0  ;;  %v6249_v23 = vrot.slane %v13404_v30, 5  ;;  %v5395_v10 = vshrl.u32 %v4710_v43, 16  ;;  %v5546_v8 = vunpack.c.l.b16 %v5383_v52 }
 0x3c9   :  { %v5547_v0 = vunpack.c.l.b16 %v5393_v55  ;;  %v6247_v43 = vsel %vm11316_vm15, %v10565_v48, %v6246_v62  ;;  %v7507_v34 = vrot.slane %v7505_v6, 5  ;;  %v7511_v21 = vshll.u32 %v11039_v9, 16  ;;  %v11040_v62 = vld [vmem:[#allocation2 + $0x94] sm:$0xf] }
 0x3ca   :  { %10768 = vmatmul.msk.bf16.gmra.mxu0 %vm2617_vm8, %v8195_v47  ;;  %v6250_v47 = vsel %vm11316_vm15, %v6248_v54, %v6249_v23  ;;  %v5397_v40 = vrot.slane %v5395_v10, 4  ;;  %v7515_v11 = vshrl.u32 %v11039_v9, 16  ;;  %v3715_v7 = vpack.c.b16 %v3663_v18, %v3662_v13  ;;  %v11041_v9 = vld [vmem:[#allocation2 + $0x98] sm:$0x1] }
 0x3cb   :  { %v13420_v5 = vpop.f32.mrf.mxu1  ;;  %v7485_v55 = vrot.slane %v7484_v46, 4  ;;  %v3500_v48 = vrot.slane %v11040_v62, 5  ;;  %v6330_v23 = vunpack.c.l.b16 %v6247_v43  ;;  %v6331_v52 = vunpack.c.l.b16 %v6250_v47  ;;  %v4714_v47 = vld [vmem:[#allocation2 + $0x184] sm:$0xf] }
 0x3cc   :  { %15358 = vst [vmem:[#allocation215_spill] sm:$0xff] %v13420_v5  ;;  %v13431_v5 = vrot.slane %v5404_v19, 5  ;;  %v7500_v19 = vsel %vm11282_vm11, %v7495_v3, %v7499_v29  ;;  %v5414_v54 = vshll.u32 %v13404_v30, 16  ;;  %v5583_v10 = vpack.c.b16 %v5547_v0, %v5546_v8  ;;  %v3327_v29 = vld [vmem:[#allocation2 + $0x90] sm:$0xe] }
 0x3cd   :  { %v7490_v35 = vsel %vm11282_vm11, %v7485_v55, %v13397_v61  ;;  %v5401_v6 = vor.u32 %v5400_v27, %v5397_v40  ;;  %v8138_v46 = vunpack.c.l.b16 %v7500_v19  ;;  %v7508_v13 = vor.u32 %v7507_v34, %v7504_v38  ;;  %v13457_v61 = vld [vmem:[#allocation2 + $0x188] sm:$0x1]  ;;  %v5949_v34 = vld [vmem:[#allocation2 + $0x180] sm:$0xe] }
 0x3ce   :  { %v13452_v18 = vrot.slane %v7511_v21, 5  ;;  %v7517_v3 = vrot.slane %v7515_v11, 4  ;;  %v6366_v30 = vpack.c.b16 %v6331_v52, %v6330_v23  ;;  %v8137_v0 = vunpack.c.l.b16 %v7490_v35  ;;  %v4713_v23 = vld [vmem:[#allocation2 + $0x180] sm:$0xf]  ;;  %v11042_v35 = vld [vmem:[#allocation2 + $0x68] sm:$0x1] }
 0x3cf   :  { %v3856_v33 = vpop.f32.mrf.mxu3  ;;  %v13440_v42 = vpop.f32.mrf.mxu0  ;;  %v5416_v43 = vrot.slane %v5414_v54, 5  ;;  %v10290_v27 = vrot.slane %v3327_v29, 9  ;;  %v5402_v38 = vrot.slane %v5401_v6, 4  ;;  %v6253_v21 = vrot.slane %v4714_v47, 5 }
 0x3d0   :  { %v13438_v1 = vadd.f32 %v3856_v33, %v11566_v63  ;;  %15360 = vst [vmem:[#allocation217_spill] sm:$0xff] %v13440_v42  ;;  %v5411_v63 = vor.u32 %v5410_v44, %v13431_v5  ;;  %v3502_v33 = vrot.slane %v3500_v48, 4  ;;  %v13455_v44 = vpop.f32.mrf.mxu2  ;;  %v8196_v55 = vpack.c.b16 %v8138_v46, %v8137_v0 }
 0x3d1   :  { %15362 = vst [vmem:[#allocation219_spill] sm:$0xff] %v13455_v44  ;;  %v7509_v19 = vrot.slane %v7508_v13, 4  ;;  %v7518_v62 = vor.u32 %v7517_v3, %v13452_v18  ;;  %v10566_v29 = vrot.slane %v5949_v34, 9  ;;  %v5428_v13 = vshll.u32 %v4714_v47, 16  ;;  %v11066_v44 = vld [vmem:[#allocation2 + $0xb0] sm:$0x1] }
 0x3d2   :  { %v5412_v8 = vrot.slane %v5411_v63, 4  ;;  %v3501_v63 = vsel %vm11316_vm15, %v10290_v27, %v3500_v48  ;;  %v5432_v3 = vshrl.u32 %v4714_v47, 16  ;;  %v6255_v48 = vrot.slane %v6253_v21, 4 }
 0x3d3   :  { %v13444_v49 = vpop.f32.mrf.mxu1  ;;  %v5419_v0 = vshrl.u32 %v4713_v23, 16  ;;  %v3664_v27 = vunpack.c.l.b16 %v3501_v63  ;;  %v7665_v26 = vshll.u32 %v11066_v44, 16 }
 0x3d4   :  { %15361 = vst [vmem:[#allocation218_spill] sm:$0xff] %v13444_v49  ;;  %10322 = vmatmul.msk.bf16.gmra.mxu3 %vm2617_vm8, %v3715_v7  ;;  %v3503_v7 = vrot.slane %v11041_v9, 5  ;;  %v5417_v46 = vsel %vm11282_vm11, %v5412_v8, %v5416_v43  ;;  %v7282_v43 = vld [vmem:[#allocation2 + $0x6c] sm:$0xf] }
 0x3d5   :  { %v5549_v47 = vunpack.c.l.b16 %v5417_v46 }
 0x3d6   :  { %10532 = vmatmul.msk.bf16.gmra.mxu1 %vm2617_vm8, %v5583_v10  ;;  %v3504_v54 = vsel %vm11316_vm15, %v3502_v33, %v3503_v7  ;;  %v6256_v10 = vrot.slane %v13457_v61, 5  ;;  %v7519_v33 = vrot.slane %v7518_v62, 4  ;;  %v7514_v7 = vsel %vm11282_vm11, %v7509_v19, %v13452_v18 }
 0x3d7   :  { %v3859_v40 = vpop.f32.mrf.mxu3  ;;  %10598 = vmatmul.msk.bf16.gmra.mxu2 %vm2617_vm8, %v6366_v30  ;;  %v13464_v52 = vpop.f32.mrf.mxu0  ;;  %v5407_v30 = vsel %vm11282_vm11, %v5402_v38, %v13431_v5  ;;  %v3665_v9 = vunpack.c.l.b16 %v3504_v54  ;;  %v6254_v38 = vsel %vm11316_vm15, %v10566_v29, %v6253_v21  ;;  %v5421_v62 = vrot.slane %v5419_v0, 4  ;;  %v11044_v29 = vld [vmem:[#allocation2 + $0x70] sm:$0xf] }
 0x3d8   :  { %v13460_v11 = vadd.f32 %v3859_v40, %v11581_v41  ;;  %15363 = vst [vmem:[#allocation220_spill] sm:$0xff] %v13464_v52  ;;  %v7521_v41 = vshll.u32 %v11042_v35, 16  ;;  %v5422_v40 = vshll.u32 %v4713_v23, 16  ;;  %v5548_v34 = vunpack.c.l.b16 %v5407_v30  ;;  %v13488_v63 = vpop.f32.mrf.mxu2 }
 0x3d9   :  { %v13482_v35 = vrot.slane %v5428_v13, 5  ;;  %v5434_v52 = vrot.slane %v5432_v3, 4  ;;  %15365 = vst [vmem:[#allocation222_spill] sm:$0xff] %v13488_v63  ;;  %v7526_v54 = vshrl.u32 %v7282_v43, 16  ;;  %v3716_v13 = vpack.c.b16 %v3665_v9, %v3664_v27  ;;  %v11043_v3 = vld [vmem:[#allocation2 + $0xa0] sm:$0xf] }
 0x3da   :  { %10769 = vmatmul.msk.bf16.gmra.mxu0 %vm2617_vm8, %v8196_v55  ;;  %v7523_v8 = vrot.slane %v7521_v41, 5  ;;  %v6257_v55 = vsel %vm11316_vm15, %v6255_v48, %v6256_v10  ;;  %v5424_v23 = vrot.slane %v5422_v40, 5  ;;  %v7529_v41 = vshll.u32 %v7282_v43, 16  ;;  %v3328_v27 = vld [vmem:[#allocation2 + $0x9c] sm:$0xe] }
 0x3db   :  { %v13471_v6 = vpop.f32.mrf.mxu1  ;;  %v3507_v21 = vrot.slane %v11043_v3, 5  ;;  %v7535_v30 = vshll.u32 %v11044_v29, 16  ;;  %v7539_v10 = vshrl.u32 %v11044_v29, 16  ;;  %v6332_v0 = vunpack.c.l.b16 %v6254_v38 }
 0x3dc   :  { %15364 = vst [vmem:[#allocation221_spill] sm:$0xff] %v13471_v6  ;;  %v7524_v19 = vsel %vm11282_vm11, %v7519_v33, %v7523_v8  ;;  %v6333_v40 = vunpack.c.l.b16 %v6257_v55  ;;  %v5584_v42 = vpack.c.b16 %v5549_v47, %v5548_v34  ;;  %v5425_v33 = vor.u32 %v5424_v23, %v5421_v62  ;;  %v4717_v6 = vld [vmem:[#allocation2 + $0x190] sm:$0xf]  ;;  %v13505_v47 = vld [vmem:[#allocation2 + $0x194] sm:$0x1] }
 0x3dd   :  { %v8139_v8 = vunpack.c.l.b16 %v7514_v7  ;;  %v8140_v43 = vunpack.c.l.b16 %v7524_v19  ;;  %v7528_v9 = vrot.slane %v7526_v54, 4  ;;  %v7531_v3 = vrot.slane %v7529_v41, 5  ;;  %v5950_v62 = vld [vmem:[#allocation2 + $0x18c] sm:$0xe]  ;;  %v11045_v19 = vld [vmem:[#allocation2 + $0xa4] sm:$0x1] }
 0x3de   :  { %v13503_v29 = vrot.slane %v7535_v30, 5  ;;  %v6367_v38 = vpack.c.b16 %v6333_v40, %v6332_v0  ;;  %v3509_v55 = vrot.slane %v3507_v21, 4  ;;  %v5426_v34 = vrot.slane %v5425_v33, 4  ;;  %v11046_v0 = vld [vmem:[#allocation2 + $0x74] sm:$0x1] }
 0x3df   :  { %v3861_v5 = vpop.f32.mrf.mxu3  ;;  %v13495_v46 = vpop.f32.mrf.mxu0  ;;  %v6260_v7 = vrot.slane %v4717_v6, 5  ;;  %v3510_v54 = vrot.slane %v11045_v19, 5  ;;  %v7532_v30 = vor.u32 %v7531_v3, %v7528_v9  ;;  %v7545_v40 = vshll.u32 %v11046_v0, 16 }
 0x3e0   :  { %v13491_v18 = vadd.f32 %v3861_v5, %v11590_v22  ;;  %15367 = vst [vmem:[#allocation224_spill] sm:$0xff] %v13495_v46  ;;  %v5435_v22 = vor.u32 %v5434_v52, %v13482_v35  ;;  %v5438_v5 = vshll.u32 %v13457_v61, 16  ;;  %v7541_v46 = vrot.slane %v7539_v10, 4 }
 0x3e1   :  { %v5452_v9 = vshll.u32 %v4717_v6, 16  ;;  %v5456_v3 = vshrl.u32 %v4717_v6, 16  ;;  %v7547_v0 = vrot.slane %v7545_v40, 5 }
 0x3e2   :  { %15366 = vst [vmem:[#allocation223_spill] sm:$0xff] %v13491_v18  ;;  %v5440_v52 = vrot.slane %v5438_v5, 5  ;;  %v7542_v10 = vor.u32 %v7541_v46, %v13503_v29  ;;  %v13514_v5 = vpop.f32.mrf.mxu2  ;;  %v5431_v46 = vsel %vm11282_vm11, %v5426_v34, %v13482_v35 }
 0x3e3   :  { %v13497_v48 = vpop.f32.mrf.mxu1  ;;  %15371 = vst [vmem:[#allocation228_spill] sm:$0xff] %v13514_v5  ;;  %v13533_v34 = vrot.slane %v5452_v9, 5  ;;  %v11048_v9 = vld [vmem:[#allocation2 + $0xac] sm:$0xf] }
 0x3e4   :  { %15368 = vst [vmem:[#allocation225_spill] sm:$0xff] %v13497_v48  ;;  %10323 = vmatmul.msk.bf16.gmra.mxu3 %vm2617_vm8, %v3716_v13  ;;  %v5436_v48 = vrot.slane %v5435_v22, 4  ;;  %v10291_v13 = vrot.slane %v3328_v27, 9  ;;  %v4716_v22 = vld [vmem:[#allocation2 + $0x18c] sm:$0xf]  ;;  %v6262_v27 = vrot.slane %v6260_v7, 4 }
 0x3e5   :  { %v5446_v19 = vshll.u32 %v4716_v22, 16 }
 0x3e6   :  { %10533 = vmatmul.msk.bf16.gmra.mxu1 %vm2617_vm8, %v5584_v42  ;;  %v8197_v42 = vpack.c.b16 %v8140_v43, %v8139_v8  ;;  %v5441_v8 = vsel %vm11282_vm11, %v5436_v48, %v5440_v52  ;;  %v10567_v43 = vrot.slane %v5950_v62, 9  ;;  %v5550_v52 = vunpack.c.l.b16 %v5431_v46 }
 0x3e7   :  { %v3864_v61 = vpop.f32.mrf.mxu3  ;;  %10599 = vmatmul.msk.bf16.gmra.mxu2 %vm2617_vm8, %v6367_v38  ;;  %v13511_v41 = vpop.f32.mrf.mxu0  ;;  %v6263_v38 = vrot.slane %v13505_v47, 5  ;;  %v5551_v62 = vunpack.c.l.b16 %v5441_v8  ;;  %v11047_v8 = vld [vmem:[#allocation2 + $0x7c] sm:$0xf] }
 0x3e8   :  { %v13508_v23 = vadd.f32 %v3864_v61, %v11607_v60  ;;  %15370 = vst [vmem:[#allocation227_spill] sm:$0xff] %v13511_v41  ;;  %v3511_v60 = vsel %vm11316_vm15, %v3509_v55, %v3510_v54  ;;  %v5443_v61 = vshrl.u32 %v4716_v22, 16  ;;  %v3508_v55 = vsel %vm11316_vm15, %v10291_v13, %v3507_v21 }
 0x3e9   :  { %v7533_v54 = vrot.slane %v7532_v30, 4  ;;  %v3667_v48 = vunpack.c.l.b16 %v3511_v60  ;;  %v7543_v41 = vrot.slane %v7542_v10, 4  ;;  %v6261_v35 = vsel %vm11316_vm15, %v10567_v43, %v6260_v7 }
 0x3ea   :  { %15369 = vst [vmem:[#allocation226_spill] sm:$0xff] %v13508_v23  ;;  %10770 = vmatmul.msk.bf16.gmra.mxu0 %vm2617_vm8, %v8197_v42  ;;  %v6264_v6 = vsel %vm11316_vm15, %v6262_v27, %v6263_v38  ;;  %v5458_v42 = vrot.slane %v5456_v3, 4  ;;  %v3666_v21 = vunpack.c.l.b16 %v3508_v55  ;;  %v5445_v13 = vrot.slane %v5443_v61, 4 }
 0x3eb   :  { %v13516_v33 = vpop.f32.mrf.mxu1  ;;  %v5448_v30 = vrot.slane %v5446_v19, 5  ;;  %v7559_v46 = vshll.u32 %v11047_v8, 16  ;;  %v7563_v5 = vshrl.u32 %v11047_v8, 16  ;;  %v6334_v38 = vunpack.c.l.b16 %v6261_v35  ;;  %v13546_v19 = vpop.f32.mrf.mxu2 }
 0x3ec   :  { %15372 = vst [vmem:[#allocation229_spill] sm:$0xff] %v13516_v33  ;;  %v7285_v33 = vld [vmem:[#allocation2 + $0x78] sm:$0xf]  ;;  %v3717_v43 = vpack.c.b16 %v3667_v48, %v3666_v21  ;;  %v6335_v27 = vunpack.c.l.b16 %v6264_v6  ;;  %v3514_v3 = vrot.slane %v11048_v9, 5  ;;  %v5585_v63 = vpack.c.b16 %v5551_v62, %v5550_v52  ;;  %v3329_v48 = vld [vmem:[#allocation2 + $0xa8] sm:$0xe] }
 0x3ed   :  { %v7550_v10 = vshrl.u32 %v7285_v33, 16  ;;  %v7553_v60 = vshll.u32 %v7285_v33, 16  ;;  %v5462_v61 = vshll.u32 %v13505_v47, 16  ;;  %15376 = vst [vmem:[#allocation233_spill] sm:$0xff] %v13546_v19  ;;  %v7538_v33 = vsel %vm11282_vm11, %v7533_v54, %v13503_v29 }
 0x3ee   :  { %v5449_v55 = vor.u32 %v5448_v30, %v5445_v13  ;;  %v13553_v35 = vrot.slane %v7559_v46, 5  ;;  %v3516_v47 = vrot.slane %v3514_v3, 4  ;;  %v8141_v8 = vunpack.c.l.b16 %v7538_v33  ;;  %v11049_v13 = vld [vmem:[#allocation2 + $0xb0] sm:$0x1] }
 0x3ef   :  { %v3866_v49 = vpop.f32.mrf.mxu3  ;;  %v13538_v40 = vpop.f32.mrf.mxu0  ;;  %v7552_v52 = vrot.slane %v7550_v10, 4  ;;  %v7555_v62 = vrot.slane %v7553_v60, 5  ;;  %v5464_v9 = vrot.slane %v5462_v61, 5  ;;  %v3517_v30 = vrot.slane %v11049_v13, 5  ;;  %v5951_v10 = vld [vmem:[#allocation2 + $0x198] sm:$0xe] }
 0x3f0   :  { %v13536_v22 = vadd.f32 %v3866_v49, %v11619_v36  ;;  %15374 = vst [vmem:[#allocation231_spill] sm:$0xff] %v13538_v40  ;;  %v7548_v36 = vsel %vm11282_vm11, %v7543_v41, %v7547_v0  ;;  %v5459_v49 = vor.u32 %v5458_v42, %v13533_v34  ;;  %v7565_v41 = vrot.slane %v7563_v5, 4  ;;  %v4720_v42 = vld [vmem:[#allocation2 + $0x19c] sm:$0xf]  ;;  %v13555_v40 = vld [vmem:[#allocation2 + $0x1a0] sm:$0x1] }
 0x3f1   :  { %v6368_v0 = vpack.c.b16 %v6335_v27, %v6334_v38  ;;  %v8142_v6 = vunpack.c.l.b16 %v7548_v36  ;;  %v6267_v29 = vrot.slane %v4720_v42, 5  ;;  %v5450_v5 = vrot.slane %v5449_v55, 4  ;;  %v11050_v27 = vld [vmem:[#allocation2 + $0x80] sm:$0x1] }
 0x3f2   :  { %15373 = vst [vmem:[#allocation230_spill] sm:$0xff] %v13536_v22  ;;  %v7556_v46 = vor.u32 %v7555_v62, %v7552_v52  ;;  %v7566_v38 = vor.u32 %v7565_v41, %v13553_v35  ;;  %v7569_v36 = vshll.u32 %v11050_v27, 16  ;;  %v6270_v55 = vrot.slane %v13555_v40, 5 }
 0x3f3   :  { %v13540_v7 = vpop.f32.mrf.mxu1  ;;  %v8198_v33 = vpack.c.b16 %v8142_v6, %v8141_v8  ;;  %v10568_v52 = vrot.slane %v5951_v10, 9  ;;  %v6269_v62 = vrot.slane %v6267_v29, 4  ;;  %v5476_v41 = vshll.u32 %v4720_v42, 16 }
 0x3f4   :  { %15375 = vst [vmem:[#allocation232_spill] sm:$0xff] %v13540_v7  ;;  %10324 = vmatmul.msk.bf16.gmra.mxu3 %vm2617_vm8, %v3717_v43  ;;  %v5460_v43 = vrot.slane %v5459_v49, 4  ;;  %v4719_v49 = vld [vmem:[#allocation2 + $0x198] sm:$0xf]  ;;  %v5455_v6 = vsel %vm11282_vm11, %v5450_v5, %v13533_v34  ;;  %v7567_v13 = vrot.slane %v7566_v38, 4 }
 0x3f5   :  { %v5470_v8 = vshll.u32 %v4719_v49, 16  ;;  %v5552_v19 = vunpack.c.l.b16 %v5455_v6  ;;  %v6268_v34 = vsel %vm11316_vm15, %v10568_v52, %v6267_v29  ;;  %v5478_v5 = vrot.slane %v5476_v41, 5 }
 0x3f6   :  { %10534 = vmatmul.msk.bf16.gmra.mxu1 %vm2617_vm8, %v5585_v63  ;;  %v10292_v63 = vrot.slane %v3329_v48, 9  ;;  %v3518_v48 = vsel %vm11316_vm15, %v3516_v47, %v3517_v30  ;;  %v7571_v47 = vrot.slane %v7569_v36, 5  ;;  %v11051_v30 = vld [vmem:[#allocation2 + $0x88] sm:$0xf] }
 0x3f7   :  { %v3869_v21 = vpop.f32.mrf.mxu3  ;;  %10600 = vmatmul.msk.bf16.gmra.mxu2 %vm2617_vm8, %v6368_v0  ;;  %v13561_v60 = vpop.f32.mrf.mxu0  ;;  %v5465_v0 = vsel %vm11282_vm11, %v5460_v43, %v5464_v9  ;;  %v7583_v27 = vshll.u32 %v11051_v30, 16  ;;  %v3669_v9 = vunpack.c.l.b16 %v3518_v48  ;;  %v7587_v7 = vshrl.u32 %v11051_v30, 16 }
 0x3f8   :  { %v13558_v54 = vadd.f32 %v3869_v21, %v11638_v31  ;;  %15378 = vst [vmem:[#allocation235_spill] sm:$0xff] %v13561_v60  ;;  %v3515_v31 = vsel %vm11316_vm15, %v10292_v63, %v3514_v3  ;;  %v5467_v21 = vshrl.u32 %v4719_v49, 16  ;;  %v5480_v3 = vshrl.u32 %v4720_v42, 16  ;;  %v13577_v60 = vpop.f32.mrf.mxu2 }
 0x3f9   :  { %v7557_v63 = vrot.slane %v7556_v46, 4  ;;  %15380 = vst [vmem:[#allocation237_spill] sm:$0xff] %v13577_v60  ;;  %v3668_v43 = vunpack.c.l.b16 %v3515_v31  ;;  %v5553_v10 = vunpack.c.l.b16 %v5465_v0  ;;  %v6271_v42 = vsel %vm11316_vm15, %v6269_v62, %v6270_v55 }
 0x3fa   :  { %15377 = vst [vmem:[#allocation234_spill] sm:$0xff] %v13558_v54  ;;  %10771 = vmatmul.msk.bf16.gmra.mxu0 %vm2617_vm8, %v8198_v33  ;;  %v5469_v38 = vrot.slane %v5467_v21, 4  ;;  %v5472_v36 = vrot.slane %v5470_v8, 5  ;;  %v5482_v49 = vrot.slane %v5480_v3, 4  ;;  %v7572_v0 = vsel %vm11282_vm11, %v7567_v13, %v7571_v47  ;;  %v11052_v21 = vld [vmem:[#allocation2 + $0xb8] sm:$0xf] }
 0x3fb   :  { %v13564_v61 = vpop.f32.mrf.mxu1  ;;  %v7562_v48 = vsel %vm11282_vm11, %v7557_v63, %v13553_v35  ;;  %v3718_v55 = vpack.c.b16 %v3669_v9, %v3668_v43  ;;  %v6336_v62 = vunpack.c.l.b16 %v6268_v34  ;;  %v6337_v41 = vunpack.c.l.b16 %v6271_v42  ;;  %v3330_v42 = vld [vmem:[#allocation2 + $0xb4] sm:$0xe]  ;;  %v15469_v54 = vld [vmem:[#allocation42_spill] sm:$0xff] }
 0x3fc   :  { %15379 = vst [vmem:[#allocation236_spill] sm:$0xff] %v13564_v61  ;;  %v7288_v61 = vld [vmem:[#allocation2 + $0x84] sm:$0xf]  ;;  %v5586_v6 = vpack.c.b16 %v5553_v10, %v5552_v19  ;;  %v3521_v8 = vrot.slane %v11052_v21, 5  ;;  %v13595_v3 = vrot.slane %v7583_v27, 5  ;;  %v7589_v30 = vrot.slane %v7587_v7, 4 }
 0x3fd   :  { %v7574_v29 = vshrl.u32 %v7288_v61, 16  ;;  %v5483_v35 = vor.u32 %v5482_v49, %v5478_v5  ;;  %v5486_v63 = vshll.u32 %v13555_v40, 16  ;;  %v6369_v13 = vpack.c.b16 %v6337_v41, %v6336_v62  ;;  %v11054_v62 = vld [vmem:[#allocation2 + $0x8c] sm:$0x1] }
 0x3fe   :  { %v8143_v47 = vunpack.c.l.b16 %v7562_v48  ;;  %v8144_v43 = vunpack.c.l.b16 %v7572_v0  ;;  %v3523_v34 = vrot.slane %v3521_v8, 4  ;;  %v7590_v10 = vor.u32 %v7589_v30, %v13595_v3  ;;  %v11053_v48 = vld [vmem:[#allocation2 + $0xbc] sm:$0x1] }
 0x3ff   :  { %v3871_v33 = vpop.f32.mrf.mxu3  ;;  %v13586_v31 = vpop.f32.mrf.mxu0  ;;  %v3524_v0 = vrot.slane %v11053_v48, 5  ;;  %v7593_v41 = vshll.u32 %v11054_v62, 16 }
 0x400   :  { %v13584_v46 = vadd.f32 %v3871_v33, %v11649_v16  ;;  %15382 = vst [vmem:[#allocation239_spill] sm:$0xff] %v13586_v31  ;;  %v7577_v16 = vshll.u32 %v7288_v61, 16  ;;  %v5473_v33 = vor.u32 %v5472_v36, %v5469_v38  ;;  %v7576_v61 = vrot.slane %v7574_v29, 4  ;;  %v13601_v27 = vpop.f32.mrf.mxu2 }
 0x401   :  { %15384 = vst [vmem:[#allocation241_spill] sm:$0xff] %v13601_v27  ;;  %v5484_v38 = vrot.slane %v5483_v35, 4  ;;  %v5488_v36 = vrot.slane %v5486_v63, 5  ;;  %v8199_v29 = vpack.c.b16 %v8144_v43, %v8143_v47 }
 0x402   :  { %15381 = vst [vmem:[#allocation238_spill] sm:$0xff] %v13584_v46  ;;  %v7579_v19 = vrot.slane %v7577_v16, 5  ;;  %v5474_v40 = vrot.slane %v5473_v33, 4  ;;  %v10293_v16 = vrot.slane %v3330_v42, 9  ;;  %v7591_v33 = vrot.slane %v7590_v10, 4 }
 0x403   :  { %v13593_v52 = vpop.f32.mrf.mxu1  ;;  %v5489_v21 = vsel %vm11282_vm11, %v5484_v38, %v5488_v36  ;;  %v7328_v42 = vld [vmem:[#allocation2 + $0x13c] sm:$0xf]  ;;  %v11056_v38 = vld [vmem:[#allocation2 + $0x94] sm:$0xf] }
 0x404   :  { %15383 = vst [vmem:[#allocation240_spill] sm:$0xff] %v13593_v52  ;;  %10325 = vmatmul.msk.bf16.gmra.mxu3 %vm2617_vm8, %v3718_v55  ;;  %v7580_v30 = vor.u32 %v7579_v19, %v7576_v61  ;;  %v3522_v35 = vsel %vm11316_vm15, %v10293_v16, %v3521_v8  ;;  %v11055_v19 = vld [vmem:[#allocation2 + $0xdc] sm:$0xf]  ;;  %v7291_v8 = vld [vmem:[#allocation2 + $0x90] sm:$0xf]  ;;  %v7607_v36 = vshll.u32 %v11056_v38, 16 }
 0x405   :  { %v3528_v10 = vrot.slane %v11055_v19, 5  ;;  %v3331_v16 = vld [vmem:[#allocation2 + $0xd8] sm:$0xe] }
 0x406   :  { %10535 = vmatmul.msk.bf16.gmra.mxu1 %vm2617_vm8, %v5586_v6  ;;  %v5479_v6 = vsel %vm11282_vm11, %v5474_v40, %v5478_v5  ;;  %v7581_v5 = vrot.slane %v7580_v30, 4 }
 0x407   :  { %v3874_v9 = vpop.f32.mrf.mxu3  ;;  %10601 = vmatmul.msk.bf16.gmra.mxu2 %vm2617_vm8, %v6369_v13  ;;  %v13607_v49 = vpop.f32.mrf.mxu0  ;;  %v7595_v13 = vrot.slane %v7593_v41, 5  ;;  %v5554_v43 = vunpack.c.l.b16 %v5479_v6  ;;  %v8839_v6 = vrot.slane %v7328_v42, 5  ;;  %v11057_v42 = vld [vmem:[#allocation2 + $0xe0] sm:$0x1] }
 0x408   :  { %v13604_v7 = vadd.f32 %v3874_v9, %v11667_v2  ;;  %v3525_v2 = vsel %vm11316_vm15, %v3523_v34, %v3524_v0  ;;  %v5555_v9 = vunpack.c.l.b16 %v5489_v21  ;;  %v8577_v34 = vld [vmem:[#allocation2 + $0x138] sm:$0xe]  ;;  %v3670_v0 = vunpack.c.l.b16 %v3522_v35 }
 0x409   :  { %v3671_v63 = vunpack.c.l.b16 %v3525_v2  ;;  %v7596_v40 = vsel %vm11282_vm11, %v7591_v33, %v7595_v13  ;;  %v7611_v2 = vshrl.u32 %v11056_v38, 16  ;;  %v7586_v30 = vsel %vm11282_vm11, %v7581_v5, %v13595_v3  ;;  %v7331_v13 = vld [vmem:[#allocation2 + $0x148] sm:$0xf] }
 0x40a   :  { %15385 = vst [vmem:[#allocation242_spill] sm:$0xff] %v13604_v7  ;;  %10772 = vmatmul.msk.bf16.gmra.mxu0 %vm2617_vm8, %v8199_v29  ;;  %v7329_v29 = vld [vmem:[#allocation2 + $0x140] sm:$0x1]  ;;  %v5587_v21 = vpack.c.b16 %v5555_v9, %v5554_v43  ;;  %v8146_v33 = vunpack.c.l.b16 %v7596_v40  ;;  %v7598_v35 = vshrl.u32 %v7291_v8, 16  ;;  %v8841_v19 = vrot.slane %v8839_v6, 4 }
 0x40b   :  { %v13609_v55 = vpop.f32.mrf.mxu1  ;;  %v3719_v41 = vpack.c.b16 %v3671_v63, %v3670_v0  ;;  %v8842_v31 = vrot.slane %v7329_v29, 5  ;;  %v10294_v63 = vrot.slane %v3331_v16, 9  ;;  %v3531_v43 = vrot.slane %v11057_v42, 5  ;;  %v7332_v9 = vld [vmem:[#allocation2 + $0x14c] sm:$0x1] }
 0x40c   :  { %15386 = vst [vmem:[#allocation243_spill] sm:$0xff] %v13609_v55  ;;  %v8846_v0 = vrot.slane %v7331_v13, 5  ;;  %v7601_v38 = vshll.u32 %v7291_v8, 16  ;;  %v13636_v3 = vrot.slane %v7607_v36, 5  ;;  %v7613_v5 = vrot.slane %v7611_v2, 4 }
 0x40d   :  { %v8843_v40 = vsel %vm11316_vm15, %v8841_v19, %v8842_v31  ;;  %v8849_v42 = vrot.slane %v7332_v9, 5  ;;  %v3529_v8 = vsel %vm11316_vm15, %v10294_v63, %v3528_v10 }
 0x40e   :  { %v8848_v55 = vrot.slane %v8846_v0, 4  ;;  %v7614_v19 = vor.u32 %v7613_v5, %v13636_v3  ;;  %v3672_v63 = vunpack.c.l.b16 %v3529_v8 }
 0x40f   :  { %v3876_v47 = vpop.f32.mrf.mxu3  ;;  %v13625_v61 = vpop.f32.mrf.mxu0 }
 0x410   :  { %v13621_v48 = vadd.f32 %v3876_v47, %v11677_v57  ;;  %v10818_v57 = vrot.slane %v8577_v34, 9  ;;  %v3530_v34 = vrot.slane %v3528_v10, 4 }
 0x412   :  { %15387 = vst [vmem:[#allocation244_spill] sm:$0xff] %v13621_v48  ;;  %v8840_v47 = vsel %vm11316_vm15, %v10818_v57, %v8839_v6  ;;  %v8954_v6 = vunpack.c.l.b16 %v8843_v40  ;;  %v3532_v36 = vsel %vm11316_vm15, %v3530_v34, %v3531_v43  ;;  %v11058_v43 = vld [vmem:[#allocation2 + $0x98] sm:$0x1] }
 0x413   :  { %v13627_v62 = vpop.f32.mrf.mxu1  ;;  %v8953_v57 = vunpack.c.l.b16 %v8840_v47  ;;  %v7600_v47 = vrot.slane %v7598_v35, 4  ;;  %v3673_v34 = vunpack.c.l.b16 %v3532_v36  ;;  %v7617_v40 = vshll.u32 %v11058_v43, 16 }
 0x414   :  { %15388 = vst [vmem:[#allocation245_spill] sm:$0xff] %v13627_v62  ;;  %10326 = vmatmul.msk.bf16.gmra.mxu3 %vm2617_vm8, %v3719_v41  ;;  %v8578_v41 = vld [vmem:[#allocation2 + $0x144] sm:$0xe] }
 0x415   :  { %v10819_v29 = vrot.slane %v8578_v41, 9  ;;  %v13649_v31 = vpack.c.b16 %v8954_v6, %v8953_v57  ;;  %v7615_v57 = vrot.slane %v7614_v19, 4  ;;  %v7619_v5 = vrot.slane %v7617_v40, 5  ;;  %v8579_v40 = vld [vmem:[#allocation2 + $0x150] sm:$0xe] }
 0x416   :  { %10536 = vmatmul.msk.bf16.gmra.mxu1 %vm2617_vm8, %v5587_v21  ;;  %v8145_v21 = vunpack.c.l.b16 %v7586_v30  ;;  %v7603_v30 = vrot.slane %v7601_v38, 5 }
 0x417   :  { %v3879_v62 = vpop.f32.mrf.mxu3  ;;  %v13643_v52 = vpop.f32.mrf.mxu0 }
 0x418   :  { %v13641_v16 = vadd.f32 %v3879_v62, %v11702_v37  ;;  %v8200_v13 = vpack.c.b16 %v8146_v33, %v8145_v21  ;;  %v8847_v37 = vsel %vm11316_vm15, %v10819_v29, %v8846_v0  ;;  %v8850_v62 = vsel %vm11316_vm15, %v8848_v55, %v8849_v42  ;;  %v7294_v29 = vld [vmem:[#allocation2 + $0x9c] sm:$0xf]  ;;  %v11059_v21 = vld [vmem:[#allocation2 + $0xa0] sm:$0xf] }
 0x419   :  { %v8955_v9 = vunpack.c.l.b16 %v8847_v37  ;;  %v8956_v10 = vunpack.c.l.b16 %v8850_v62  ;;  %v7604_v35 = vor.u32 %v7603_v30, %v7600_v47  ;;  %v3720_v55 = vpack.c.b16 %v3673_v34, %v3672_v63  ;;  %v11060_v37 = vld [vmem:[#allocation2 + $0xe8] sm:$0xf]  ;;  %v7335_v62 = vld [vmem:[#allocation2 + $0x158] sm:$0x1] }
 0x41a   :  { %15389 = vst [vmem:[#allocation246_spill] sm:$0xff] %v13641_v16  ;;  %10773 = vmatmul.msk.bf16.gmra.mxu0 %vm2617_vm8, %v8200_v13  ;;  %v7631_v42 = vshll.u32 %v11059_v21, 16  ;;  %v7635_v8 = vshrl.u32 %v11059_v21, 16  ;;  %v7620_v13 = vsel %vm11282_vm11, %v7615_v57, %v7619_v5  ;;  %v3535_v47 = vrot.slane %v11060_v37, 5  ;;  %v15393_v21 = vld [vmem:[#allocation14_spill] sm:$0xff] }
 0x41b   :  { %v13651_v2 = vpop.f32.mrf.mxu1  ;;  %v13659_v41 = vpack.c.b16 %v8956_v10, %v8955_v9  ;;  %v7605_v36 = vrot.slane %v7604_v35, 4  ;;  %v7622_v19 = vshrl.u32 %v7294_v29, 16  ;;  %v8148_v10 = vunpack.c.l.b16 %v7620_v13 }
 0x41c   :  { %15390 = vst [vmem:[#allocation247_spill] sm:$0xff] %v13651_v2  ;;  %v7625_v63 = vshll.u32 %v7294_v29, 16  ;;  %v7633_v34 = vrot.slane %v7631_v42, 5  ;;  %v7637_v43 = vrot.slane %v7635_v8, 4  ;;  %v3537_v35 = vrot.slane %v3535_v47, 4 }
 0x41d   :  { %v7610_v30 = vsel %vm11282_vm11, %v7605_v36, %v13636_v3  ;;  %v10820_v57 = vrot.slane %v8579_v40, 9  ;;  %v8856_v5 = vrot.slane %v7335_v62, 5  ;;  %v11061_v3 = vld [vmem:[#allocation2 + $0xec] sm:$0x1] }
 0x41e   :  { %v3538_v36 = vrot.slane %v11061_v3, 5  ;;  %v7627_v13 = vrot.slane %v7625_v63, 5 }
 0x41f   :  { %v3881_v33 = vpop.f32.mrf.mxu3  ;;  %v13664_v38 = vpop.f32.mrf.mxu0 }
 0x420   :  { %v13662_v0 = vadd.f32 %v3881_v33, %v11720_v32  ;;  %v7334_v32 = vld [vmem:[#allocation2 + $0x154] sm:$0xf] }
 0x421   :  { %v8853_v9 = vrot.slane %v7334_v32, 5  ;;  %v7624_v32 = vrot.slane %v7622_v19, 4 }
 0x422   :  { %15391 = vst [vmem:[#allocation248_spill] sm:$0xff] %v13662_v0  ;;  %v11069_v0 = vld [vmem:[#allocation2 + $0x104] sm:$0x1] }
 0x423   :  { %v13666_v6 = vpop.f32.mrf.mxu1  ;;  %v8854_v29 = vsel %vm11316_vm15, %v10820_v57, %v8853_v9  ;;  %v3552_v16 = vrot.slane %v11069_v0, 5  ;;  %v11070_v0 = vld [vmem:[#allocation2 + $0xbc] sm:$0x1] }
 0x424   :  { %15392 = vst [vmem:[#allocation249_spill] sm:$0xff] %v13666_v6  ;;  %10327 = vmatmul.msk.bf16.gmra.mxu3 %vm2617_vm8, %v3720_v55  ;;  %v8855_v55 = vrot.slane %v8853_v9, 4  ;;  %v3332_v6 = vld [vmem:[#allocation2 + $0xe4] sm:$0xe]  ;;  %v8957_v40 = vunpack.c.l.b16 %v8854_v29  ;;  %v11062_v9 = vld [vmem:[#allocation2 + $0xa4] sm:$0x1] }
 0x425   :  { %v7641_v57 = vshll.u32 %v11062_v9, 16 }
 0x426   :  { %10829 = vmatmul.msk.bf16.vlgmr.msra.gmra.mxu1 %vm2617_vm8, %v12518_v17  ;;  %v8147_v17 = vunpack.c.l.b16 %v7610_v30  ;;  %v8857_v62 = vsel %vm11316_vm15, %v8855_v55, %v8856_v5  ;;  %v3539_v30 = vsel %vm11316_vm15, %v3537_v35, %v3538_v36  ;;  %v15396_v5 = vld [vmem:[#allocation15_spill] sm:$0xff]  ;;  %v11063_v36 = vld [vmem:[#allocation2 + $0xac] sm:$0xf] }
 0x427   :  { %v3884_v33 = vpop.f32.mrf.mxu3  ;;  %v13679_v2 = vpop.f32.mrf.mxu0  ;;  %v8958_v27 = vunpack.c.l.b16 %v8857_v62  ;;  %v7659_v62 = vshrl.u32 %v11063_v36, 16 }
 0x428   :  { %v13677_v37 = vadd.f32 %v3884_v33, %v15393_v21  ;;  %v8201_v8 = vpack.c.b16 %v8148_v10, %v8147_v17  ;;  %v10295_v33 = vrot.slane %v3332_v6, 9  ;;  %v7638_v21 = vor.u32 %v7637_v43, %v7633_v34 }
 0x429   :  { %v13692_v3 = vpack.c.b16 %v8958_v27, %v8957_v40  ;;  %v3675_v10 = vunpack.c.l.b16 %v3539_v30  ;;  %v7628_v17 = vor.u32 %v7627_v13, %v7624_v32  ;;  %v7643_v43 = vrot.slane %v7641_v57, 5  ;;  %v11064_v40 = vld [vmem:[#allocation2 + $0xf4] sm:$0xf]  ;;  %v7297_v13 = vld [vmem:[#allocation2 + $0xa8] sm:$0xf] }
 0x42a   :  { %15394 = vst [vmem:[#allocation14_spill] sm:$0xff] %v13677_v37  ;;  %10774 = vmatmul.msk.bf16.gmra.mxu0 %vm2617_vm8, %v8201_v8  ;;  %v3536_v19 = vsel %vm11316_vm15, %v10295_v33, %v3535_v47  ;;  %v7639_v55 = vrot.slane %v7638_v21, 4  ;;  %v7655_v8 = vshll.u32 %v11063_v36, 16  ;;  %v3542_v32 = vrot.slane %v11064_v40, 5  ;;  %v3333_v40 = vld [vmem:[#allocation2 + $0xf0] sm:$0xe] }
 0x42b   :  { %v13683_v42 = vpop.f32.mrf.mxu1  ;;  %v3674_v29 = vunpack.c.l.b16 %v3536_v19  ;;  %v7629_v33 = vrot.slane %v7628_v17, 4  ;;  %v7661_v19 = vrot.slane %v7659_v62, 4  ;;  %v7646_v57 = vshrl.u32 %v7297_v13, 16  ;;  %v8580_v17 = vld [vmem:[#allocation2 + $0x15c] sm:$0xe] }
 0x42c   :  { %15395 = vst [vmem:[#allocation250_spill] sm:$0xff] %v13683_v42  ;;  %v7644_v27 = vsel %vm11282_vm11, %v7639_v55, %v7643_v43  ;;  %v13708_v21 = vrot.slane %v7655_v8, 5  ;;  %v15399_v43 = vld [vmem:[#allocation16_spill] sm:$0xff]  ;;  %v3334_v37 = vld [vmem:[#allocation2 + $0xfc] sm:$0xe] }
 0x42d   :  { %v3721_v47 = vpack.c.b16 %v3675_v10, %v3674_v29  ;;  %v7634_v30 = vsel %vm11282_vm11, %v7629_v33, %v7633_v34  ;;  %v8150_v9 = vunpack.c.l.b16 %v7644_v27  ;;  %v7649_v10 = vshll.u32 %v7297_v13, 16  ;;  %v11065_v34 = vld [vmem:[#allocation2 + $0xf8] sm:$0x1] }
 0x42e   :  { %v3545_v8 = vrot.slane %v11065_v34, 5  ;;  %v7662_v62 = vor.u32 %v7661_v19, %v13708_v21  ;;  %v7648_v13 = vrot.slane %v7646_v57, 4 }
 0x42f   :  { %v3886_v63 = vpop.f32.mrf.mxu3  ;;  %v13697_v35 = vpop.f32.mrf.mxu0  ;;  %v7651_v60 = vrot.slane %v7649_v10, 5  ;;  %v7300_v10 = vld [vmem:[#allocation2 + $0xb4] sm:$0xf] }
 0x430   :  { %v13695_v6 = vadd.f32 %v3886_v63, %v15396_v5  ;;  %v7337_v63 = vld [vmem:[#allocation2 + $0x160] sm:$0xf]  ;;  %v3544_v5 = vrot.slane %v3542_v32, 4 }
 0x431   :  { %v8860_v29 = vrot.slane %v7337_v63, 5  ;;  %v7338_v63 = vld [vmem:[#allocation2 + $0x164] sm:$0x1]  ;;  %v7652_v34 = vor.u32 %v7651_v60, %v7648_v13  ;;  %v11067_v60 = vld [vmem:[#allocation2 + $0xb8] sm:$0xf] }
 0x432   :  { %15397 = vst [vmem:[#allocation15_spill] sm:$0xff] %v13695_v6  ;;  %v10296_v6 = vrot.slane %v3333_v40, 9  ;;  %v7667_v40 = vrot.slane %v7665_v26, 5  ;;  %v7679_v26 = vshll.u32 %v11067_v60, 16  ;;  %v7683_v13 = vshrl.u32 %v11067_v60, 16 }
 0x433   :  { %v13699_v42 = vpop.f32.mrf.mxu1 }
 0x434   :  { %15398 = vst [vmem:[#allocation251_spill] sm:$0xff] %v13699_v42  ;;  %10328 = vmatmul.msk.bf16.gmra.mxu3 %vm2617_vm8, %v3721_v47  ;;  %v8149_v47 = vunpack.c.l.b16 %v7634_v30  ;;  %v3546_v30 = vsel %vm11316_vm15, %v3544_v5, %v3545_v8  ;;  %v3543_v19 = vsel %vm11316_vm15, %v10296_v6, %v3542_v32  ;;  %v15403_v8 = vld [vmem:[#allocation17_spill] sm:$0xff]  ;;  %v7670_v32 = vshrl.u32 %v7300_v10, 16 }
 0x435   :  { %v3677_v57 = vunpack.c.l.b16 %v3546_v30 }
 0x436   :  { %10830 = vmatmul.msk.bf16.gmra.mxu1 %vm2617_vm8, %v12531_v51  ;;  %v10821_v51 = vrot.slane %v8580_v17, 9  ;;  %v8202_v27 = vpack.c.b16 %v8150_v9, %v8149_v47  ;;  %v8863_v9 = vrot.slane %v7338_v63, 5 }
 0x437   :  { %v3889_v55 = vpop.f32.mrf.mxu3  ;;  %v13713_v42 = vpop.f32.mrf.mxu0 }
 0x438   :  { %v13711_v36 = vadd.f32 %v3889_v55, %v15399_v43  ;;  %15401 = vst [vmem:[#allocation252_spill] sm:$0xff] %v13713_v42  ;;  %v8861_v17 = vsel %vm11316_vm15, %v10821_v51, %v8860_v29  ;;  %v8862_v55 = vrot.slane %v8860_v29, 4  ;;  %v7663_v43 = vrot.slane %v7662_v62, 4  ;;  %v11102_v42 = vld [vmem:[#allocation2 + $0x14c] sm:$0x1] }
 0x439   :  { %v8959_v47 = vunpack.c.l.b16 %v8861_v17  ;;  %v3676_v29 = vunpack.c.l.b16 %v3543_v19  ;;  %v7673_v62 = vshll.u32 %v7300_v10, 16  ;;  %v7340_v19 = vld [vmem:[#allocation2 + $0x16c] sm:$0xf]  ;;  %v7929_v18 = vshll.u32 %v11102_v42, 16 }
 0x43a   :  { %15400 = vst [vmem:[#allocation16_spill] sm:$0xff] %v13711_v36  ;;  %10775 = vmatmul.msk.bf16.gmra.mxu0 %vm2617_vm8, %v8202_v27  ;;  %v8864_v5 = vsel %vm11316_vm15, %v8862_v55, %v8863_v9  ;;  %v7668_v6 = vsel %vm11282_vm11, %v7663_v43, %v7667_v40  ;;  %v7653_v55 = vrot.slane %v7652_v34, 4  ;;  %v11068_v9 = vld [vmem:[#allocation2 + $0x100] sm:$0xf]  ;;  %v8867_v10 = vrot.slane %v7340_v19, 5  ;;  %v15488_v42 = vld [vmem:[#allocation52_spill] sm:$0xff] }
 0x43b   :  { %v13716_v33 = vpop.f32.mrf.mxu1  ;;  %v8960_v51 = vunpack.c.l.b16 %v8864_v5  ;;  %v3722_v30 = vpack.c.b16 %v3677_v57, %v3676_v29  ;;  %v7341_v5 = vld [vmem:[#allocation2 + $0x170] sm:$0x1]  ;;  %v8152_v57 = vunpack.c.l.b16 %v7668_v6  ;;  %v7672_v40 = vrot.slane %v7670_v32, 4  ;;  %v8581_v34 = vld [vmem:[#allocation2 + $0x168] sm:$0xe] }
 0x43c   :  { %15402 = vst [vmem:[#allocation253_spill] sm:$0xff] %v13716_v33  ;;  %v7658_v43 = vsel %vm11282_vm11, %v7653_v55, %v13708_v21  ;;  %v7685_v29 = vrot.slane %v7683_v13, 4 }
 0x43d   :  { %v13736_v17 = vpack.c.b16 %v8960_v51, %v8959_v47  ;;  %v7681_v47 = vrot.slane %v7679_v26, 5 }
 0x43f   :  { %v3891_v44 = vpop.f32.mrf.mxu3  ;;  %v13730_v27 = vpop.f32.mrf.mxu0  ;;  %v7686_v13 = vor.u32 %v7685_v29, %v7681_v47 }
 0x440   :  { %v13728_v33 = vadd.f32 %v3891_v44, %v15403_v8  ;;  %15405 = vst [vmem:[#allocation254_spill] sm:$0xff] %v13730_v27  ;;  %v3549_v44 = vrot.slane %v11068_v9, 5  ;;  %v7675_v8 = vrot.slane %v7673_v62, 5  ;;  %v10822_v9 = vrot.slane %v8581_v34, 9 }
 0x442   :  { %15404 = vst [vmem:[#allocation17_spill] sm:$0xff] %v13728_v33  ;;  %v3551_v60 = vrot.slane %v3549_v44, 4  ;;  %v15407_v33 = vld [vmem:[#allocation18_spill] sm:$0xff]  ;;  %v8868_v21 = vsel %vm11316_vm15, %v10822_v9, %v8867_v10  ;;  %v7687_v9 = vrot.slane %v7686_v13, 4  ;;  %v11072_v13 = vld [vmem:[#allocation2 + $0x10c] sm:$0xf] }
 0x443   :  { %v13734_v63 = vpop.f32.mrf.mxu1  ;;  %v8961_v55 = vunpack.c.l.b16 %v8868_v21 }
 0x444   :  { %15406 = vst [vmem:[#allocation255_spill] sm:$0xff] %v13734_v63  ;;  %10329 = vmatmul.msk.bf16.gmra.mxu3 %vm2617_vm8, %v3722_v30  ;;  %v8869_v30 = vrot.slane %v8867_v10, 4  ;;  %v8870_v63 = vrot.slane %v7341_v5, 5  ;;  %v3553_v5 = vsel %vm11316_vm15, %v3551_v60, %v3552_v16  ;;  %v7689_v10 = vshll.u32 %v11070_v0, 16 }
 0x446   :  { %10831 = vmatmul.msk.bf16.gmra.mxu1 %vm2617_vm8, %v12547_v12  ;;  %v8151_v12 = vunpack.c.l.b16 %v7658_v43  ;;  %v8871_v6 = vsel %vm11316_vm15, %v8869_v30, %v8870_v63  ;;  %v7676_v43 = vor.u32 %v7675_v8, %v7672_v40  ;;  %v15411_v30 = vld [vmem:[#allocation19_spill] sm:$0xff]  ;;  %v7691_v21 = vrot.slane %v7689_v10, 5 }
 0x447   :  { %v3894_v51 = vpop.f32.mrf.mxu3  ;;  %v13753_v62 = vpop.f32.mrf.mxu0  ;;  %v8962_v19 = vunpack.c.l.b16 %v8871_v6  ;;  %v11071_v6 = vld [vmem:[#allocation2 + $0xc4] sm:$0xf] }
 0x448   :  { %v13745_v36 = vadd.f32 %v3894_v51, %v15407_v33  ;;  %15410 = vst [vmem:[#allocation257_spill] sm:$0xff] %v13753_v62  ;;  %v8203_v26 = vpack.c.b16 %v8152_v57, %v8151_v12  ;;  %v10297_v33 = vrot.slane %v3334_v37, 9  ;;  %v3679_v51 = vunpack.c.l.b16 %v3553_v5  ;;  %v7343_v5 = vld [vmem:[#allocation2 + $0x178] sm:$0xf] }
 0x449   :  { %v13758_v34 = vpack.c.b16 %v8962_v19, %v8961_v55  ;;  %v7677_v29 = vrot.slane %v7676_v43, 4  ;;  %v7692_v60 = vsel %vm11282_vm11, %v7687_v9, %v7691_v21  ;;  %v3556_v55 = vrot.slane %v11072_v13, 5  ;;  %v7303_v19 = vld [vmem:[#allocation2 + $0xc0] sm:$0xf]  ;;  %v7344_v43 = vld [vmem:[#allocation2 + $0x17c] sm:$0x1] }
 0x44a   :  { %15408 = vst [vmem:[#allocation18_spill] sm:$0xff] %v13745_v36  ;;  %10776 = vmatmul.msk.bf16.gmra.mxu0 %vm2617_vm8, %v8203_v26  ;;  %v3550_v63 = vsel %vm11316_vm15, %v10297_v33, %v3549_v44  ;;  %v7703_v44 = vshll.u32 %v11071_v6, 16  ;;  %v7707_v26 = vshrl.u32 %v11071_v6, 16  ;;  %v8154_v0 = vunpack.c.l.b16 %v7692_v60 }
 0x44b   :  { %v13751_v32 = vpop.f32.mrf.mxu1  ;;  %v3678_v37 = vunpack.c.l.b16 %v3550_v63  ;;  %v7682_v16 = vsel %vm11282_vm11, %v7677_v29, %v7681_v47  ;;  %v8874_v10 = vrot.slane %v7343_v5, 5  ;;  %v7694_v63 = vshrl.u32 %v7303_v19, 16  ;;  %v8582_v29 = vld [vmem:[#allocation2 + $0x174] sm:$0xe] }
 0x44c   :  { %15409 = vst [vmem:[#allocation256_spill] sm:$0xff] %v13751_v32  ;;  %v8153_v47 = vunpack.c.l.b16 %v7682_v16  ;;  %v13776_v9 = vrot.slane %v7703_v44, 5  ;;  %v10823_v21 = vrot.slane %v8582_v29, 9  ;;  %v8877_v13 = vrot.slane %v7344_v43, 5  ;;  %v3335_v32 = vld [vmem:[#allocation2 + $0x108] sm:$0xe] }
 0x44d   :  { %v3723_v8 = vpack.c.b16 %v3679_v51, %v3678_v37  ;;  %v7697_v51 = vshll.u32 %v7303_v19, 16  ;;  %v3558_v37 = vrot.slane %v3556_v55, 4  ;;  %v8876_v6 = vrot.slane %v8874_v10, 4 }
 0x44e   :  { %v8875_v60 = vsel %vm11316_vm15, %v10823_v21, %v8874_v10  ;;  %v7696_v19 = vrot.slane %v7694_v63, 4  ;;  %v10298_v43 = vrot.slane %v3335_v32, 9 }
 0x44f   :  { %v3896_v57 = vpop.f32.mrf.mxu3  ;;  %v13771_v33 = vpop.f32.mrf.mxu0  ;;  %v8878_v44 = vsel %vm11316_vm15, %v8876_v6, %v8877_v13  ;;  %v7699_v5 = vrot.slane %v7697_v51, 5  ;;  %v8963_v29 = vunpack.c.l.b16 %v8875_v60  ;;  %v11074_v51 = vld [vmem:[#allocation2 + $0xc8] sm:$0x1]  ;;  %v13797_v6 = vld [vmem:[#allocation2 + $0xd0] sm:$0xf] }
 0x450   :  { %v13763_v12 = vadd.f32 %v3896_v57, %v15411_v30  ;;  %15414 = vst [vmem:[#allocation259_spill] sm:$0xff] %v13771_v33  ;;  %v7709_v57 = vrot.slane %v7707_v26, 4  ;;  %v8964_v36 = vunpack.c.l.b16 %v8878_v44  ;;  %v3557_v63 = vsel %vm11316_vm15, %v10298_v43, %v3556_v55  ;;  %v15419_v60 = vld [vmem:[#allocation21_spill] sm:$0xff] }
 0x451   :  { %v7713_v32 = vshll.u32 %v11074_v51, 16  ;;  %v7727_v55 = vshll.u32 %v13797_v6, 16  ;;  %v11075_v51 = vld [vmem:[#allocation2 + $0x118] sm:$0xf] }
 0x452   :  { %15412 = vst [vmem:[#allocation19_spill] sm:$0xff] %v13763_v12  ;;  %v8204_v12 = vpack.c.b16 %v8154_v0, %v8153_v47  ;;  %v7710_v47 = vor.u32 %v7709_v57, %v13776_v9  ;;  %v113_v0 = vld [vmem:[#allocation2 + $0xcc] sm:$0x1] }
 0x453   :  { %v13767_v40 = vpop.f32.mrf.mxu1  ;;  %v114_v10 = vsel %vm11236_vm3, 0, %v113_v0  ;;  %v3680_v0 = vunpack.c.l.b16 %v3557_v63  ;;  %v7715_v43 = vrot.slane %v7713_v32, 5 }
 0x454   :  { %15413 = vst [vmem:[#allocation258_spill] sm:$0xff] %v13767_v40  ;;  %10330 = vmatmul.msk.bf16.gmra.mxu3 %vm2617_vm8, %v3723_v8  ;;  %v15415_v8 = vld [vmem:[#allocation20_spill] sm:$0xff] }
 0x455   :  { %115 = vst [vmem:[#allocation2 + $0xcc] sm:$0x1] %v114_v10 }
 0x456   :  { %10832 = vmatmul.msk.bf16.gmra.mxu1 %vm2617_vm8, %v12571_v45  ;;  %v11073_v45 = vld [vmem:[#allocation2 + $0x110] sm:$0x1] }
 0x457   :  { %v3899_v30 = vpop.f32.mrf.mxu3  ;;  %v3559_v16 = vrot.slane %v11073_v45, 5  ;;  %v13801_v57 = vpop.f32.mrf.mxu0 }
 0x458   :  { %v13779_v40 = vadd.f32 %v3899_v30, %v15415_v8  ;;  %v223_v8 = vld [vmem:[#allocation2 + $0xd4] sm:$0x1]  ;;  %15418 = vst [vmem:[#allocation261_spill] sm:$0xff] %v13801_v57  ;;  %v15455_v57 = vld [vmem:[#allocation34_spill] sm:$0xff] }
 0x459   :  { %v3560_v30 = vsel %vm11316_vm15, %v3558_v37, %v3559_v16  ;;  %v224_v21 = vsel %vm11256_vm6, 0, %v223_v8  ;;  %v13799_v37 = vpack.c.b16 %v8964_v36, %v8963_v29  ;;  %v7711_v16 = vrot.slane %v7710_v47, 4 }
 0x45a   :  { %15416 = vst [vmem:[#allocation20_spill] sm:$0xff] %v13779_v40  ;;  %10777 = vmatmul.msk.bf16.gmra.mxu0 %vm2617_vm8, %v8204_v12  ;;  %v3681_v13 = vunpack.c.l.b16 %v3560_v30  ;;  %v7700_v12 = vor.u32 %v7699_v5, %v7696_v19  ;;  %v7731_v8 = vshrl.u32 %v13797_v6, 16  ;;  %v7729_v47 = vrot.slane %v7727_v55, 5 }
 0x45b   :  { %v13785_v26 = vpop.f32.mrf.mxu1  ;;  %225 = vst [vmem:[#allocation2 + $0xd4] sm:$0x1] %v224_v21  ;;  %v7716_v19 = vsel %vm11282_vm11, %v7711_v16, %v7715_v43  ;;  %v7346_v21 = vld [vmem:[#allocation2 + $0x184] sm:$0xf]  ;;  %v8583_v43 = vld [vmem:[#allocation2 + $0x180] sm:$0xe] }
 0x45c   :  { %15417 = vst [vmem:[#allocation260_spill] sm:$0xff] %v13785_v26  ;;  %v3724_v36 = vpack.c.b16 %v3681_v13, %v3680_v0  ;;  %v7701_v29 = vrot.slane %v7700_v12, 4  ;;  %v3563_v26 = vrot.slane %v11075_v51, 5  ;;  %v7306_v30 = vld [vmem:[#allocation2 + $0xcc] sm:$0xf]  ;;  %v7733_v13 = vrot.slane %v7731_v8, 4 }
 0x45d   :  { %v7718_v63 = vshrl.u32 %v7306_v30, 16  ;;  %v7721_v32 = vshll.u32 %v7306_v30, 16  ;;  %v7347_v12 = vld [vmem:[#allocation2 + $0x188] sm:$0x1]  ;;  %v3336_v51 = vld [vmem:[#allocation2 + $0x114] sm:$0xe] }
 0x45e   :  { %v7706_v5 = vsel %vm11282_vm11, %v7701_v29, %v13776_v9  ;;  %v3565_v0 = vrot.slane %v3563_v26, 4  ;;  %v10824_v29 = vrot.slane %v8583_v43, 9  ;;  %v11076_v8 = vld [vmem:[#allocation2 + $0x11c] sm:$0x1]  ;;  %v7734_v40 = vor.u32 %v7733_v13, %v7729_v47 }
 0x45f   :  { %v3901_v45 = vpop.f32.mrf.mxu3  ;;  %v7723_v9 = vrot.slane %v7721_v32, 5  ;;  %v13820_v28 = vpop.f32.mrf.mxu0  ;;  %v8155_v30 = vunpack.c.l.b16 %v7706_v5  ;;  %v10299_v43 = vrot.slane %v3336_v51, 9 }
 0x460   :  { %v13804_v44 = vadd.f32 %v3901_v45, %v15419_v60  ;;  %v8881_v45 = vrot.slane %v7346_v21, 5  ;;  %v8156_v60 = vunpack.c.l.b16 %v7716_v19  ;;  %15422 = vst [vmem:[#allocation263_spill] sm:$0xff] %v13820_v28  ;;  %v8884_v21 = vrot.slane %v7347_v12, 5 }
 0x461   :  { %v7735_v12 = vrot.slane %v7734_v40, 4 }
 0x462   :  { %15420 = vst [vmem:[#allocation21_spill] sm:$0xff] %v13804_v44  ;;  %v13818_v16 = vld [vmem:[#allocation2 + $0xd4] sm:$0x1]  ;;  %v8883_v55 = vrot.slane %v8881_v45, 4  ;;  %v3566_v44 = vrot.slane %v11076_v8, 5  ;;  %v8882_v7 = vsel %vm11316_vm15, %v10824_v29, %v8881_v45  ;;  %v8205_v32 = vpack.c.b16 %v8156_v60, %v8155_v30  ;;  %v15427_v29 = vld [vmem:[#allocation23_spill] sm:$0xff] }
 0x463   :  { %v13808_v10 = vpop.f32.mrf.mxu1  ;;  %v7737_v48 = vshll.u32 %v13818_v16, 16 }
 0x464   :  { %15421 = vst [vmem:[#allocation262_spill] sm:$0xff] %v13808_v10  ;;  %10331 = vmatmul.msk.bf16.gmra.mxu3 %vm2617_vm8, %v3724_v36  ;;  %v7720_v10 = vrot.slane %v7718_v63, 4  ;;  %v8885_v28 = vsel %vm11316_vm15, %v8883_v55, %v8884_v21  ;;  %v3567_v5 = vsel %vm11316_vm15, %v3565_v0, %v3566_v44  ;;  %v11077_v55 = vld [vmem:[#allocation2 + $0x124] sm:$0xf]  ;;  %v11078_v21 = vld [vmem:[#allocation2 + $0xf4] sm:$0xf] }
 0x465   :  { %v7739_v45 = vrot.slane %v7737_v48, 5  ;;  %v3683_v60 = vunpack.c.l.b16 %v3567_v5  ;;  %v7309_v48 = vld [vmem:[#allocation2 + $0xf0] sm:$0xf]  ;;  %v3570_v8 = vrot.slane %v11077_v55, 5  ;;  %v15431_v55 = vld [vmem:[#allocation24_spill] sm:$0xff] }
 0x466   :  { %10833 = vmatmul.msk.bf16.gmra.mxu1 %vm2617_vm8, %v12607_v15  ;;  %v7724_v19 = vor.u32 %v7723_v9, %v7720_v10  ;;  %v3564_v10 = vsel %vm11316_vm15, %v10299_v43, %v3563_v26  ;;  %v7349_v5 = vld [vmem:[#allocation2 + $0x190] sm:$0xf] }
 0x467   :  { %v3904_v36 = vpop.f32.mrf.mxu3  ;;  %v13846_v0 = vpop.f32.mrf.mxu0 }
 0x468   :  { %v13823_v15 = vadd.f32 %v3904_v36, %v15423_v20  ;;  %v8965_v20 = vunpack.c.l.b16 %v8882_v7  ;;  %v8966_v36 = vunpack.c.l.b16 %v8885_v28  ;;  %v7725_v13 = vrot.slane %v7724_v19, 4  ;;  %15429 = vst [vmem:[#allocation266_spill] sm:$0xff] %v13846_v0 }
 0x469   :  { %v3682_v7 = vunpack.c.l.b16 %v3564_v10  ;;  %v7740_v28 = vsel %vm11282_vm11, %v7735_v12, %v7739_v45  ;;  %v7751_v19 = vshll.u32 %v11078_v21, 16  ;;  %v7350_v10 = vld [vmem:[#allocation2 + $0x194] sm:$0x1]  ;;  %v8888_v12 = vrot.slane %v7349_v5, 5 }
 0x46a   :  { %15424 = vst [vmem:[#allocation22_spill] sm:$0xff] %v13823_v15  ;;  %10778 = vmatmul.msk.bf16.gmra.mxu0 %vm2617_vm8, %v8205_v32  ;;  %v13837_v9 = vpack.c.b16 %v8966_v36, %v8965_v20  ;;  %v7730_v44 = vsel %vm11282_vm11, %v7725_v13, %v7729_v47  ;;  %v7755_v32 = vshrl.u32 %v11078_v21, 16  ;;  %v8158_v20 = vunpack.c.l.b16 %v7740_v28  ;;  %v8584_v13 = vld [vmem:[#allocation2 + $0x18c] sm:$0xe] }
 0x46b   :  { %v13828_v63 = vpop.f32.mrf.mxu1  ;;  %v3725_v40 = vpack.c.b16 %v3683_v60, %v3682_v7  ;;  %v8157_v43 = vunpack.c.l.b16 %v7730_v44  ;;  %v7742_v47 = vshrl.u32 %v7309_v48, 16  ;;  %v7745_v36 = vshll.u32 %v7309_v48, 16  ;;  %v3337_v44 = vld [vmem:[#allocation2 + $0x120] sm:$0xe] }
 0x46c   :  { %15425 = vst [vmem:[#allocation264_spill] sm:$0xff] %v13828_v63  ;;  %v3572_v60 = vrot.slane %v3570_v8, 4  ;;  %v10825_v7 = vrot.slane %v8584_v13, 9  ;;  %v8890_v28 = vrot.slane %v8888_v12, 4  ;;  %v11079_v63 = vld [vmem:[#allocation2 + $0x128] sm:$0x1] }
 0x46d   :  { %15426 = vst [vmem:[#allocation265_spill] sm:$0xff] %v13837_v9  ;;  %v7744_v5 = vrot.slane %v7742_v47, 4  ;;  %v7747_v15 = vrot.slane %v7745_v36, 5  ;;  %v10300_v13 = vrot.slane %v3337_v44, 9  ;;  %v14020_v9 = vld [vmem:[#allocation2 + $0x134] sm:$0x1] }
 0x46e   :  { %v8889_v48 = vsel %vm11316_vm15, %v10825_v7, %v8888_v12  ;;  %v11080_v12 = vld [vmem:[#allocation2 + $0xf8] sm:$0x1] }
 0x46f   :  { %v3906_v51 = vpop.f32.mrf.mxu3  ;;  %v7761_v47 = vshll.u32 %v11080_v12, 16 }
 0x470   :  { %v13840_v30 = vadd.f32 %v3906_v51, %v15427_v29  ;;  %v7753_v51 = vrot.slane %v7751_v19, 5  ;;  %v7757_v29 = vrot.slane %v7755_v32, 4  ;;  %v8967_v32 = vunpack.c.l.b16 %v8889_v48 }
 0x472   :  { %15428 = vst [vmem:[#allocation23_spill] sm:$0xff] %v13840_v30 }
 0x473   :  { %v13848_v26 = vpop.f32.mrf.mxu1 }
 0x474   :  { %15430 = vst [vmem:[#allocation267_spill] sm:$0xff] %v13848_v26  ;;  %10332 = vmatmul.msk.bf16.gmra.mxu3 %vm2617_vm8, %v3725_v40  ;;  %v8206_v40 = vpack.c.b16 %v8158_v20, %v8157_v43  ;;  %v8891_v26 = vrot.slane %v7350_v10, 5  ;;  %v7758_v20 = vor.u32 %v7757_v29, %v7753_v51  ;;  %v13864_v10 = vpop.f32.mrf.mxu0  ;;  %v7763_v29 = vrot.slane %v7761_v47, 5 }
 0x475   :  { %15434 = vst [vmem:[#allocation269_spill] sm:$0xff] %v13864_v10 }
 0x476   :  { %10834 = vmatmul.msk.bf16.gmra.mxu1 %vm2617_vm8, %v12643_v39  ;;  %v3573_v39 = vrot.slane %v11079_v63, 5  ;;  %v8892_v19 = vsel %vm11316_vm15, %v8890_v28, %v8891_v26  ;;  %v3571_v63 = vsel %vm11316_vm15, %v10300_v13, %v3570_v8  ;;  %v7748_v26 = vor.u32 %v7747_v15, %v7744_v5  ;;  %v15436_v28 = vld [vmem:[#allocation25_spill] sm:$0xff] }
 0x477   :  { %v3909_v45 = vpop.f32.mrf.mxu3  ;;  %v7759_v44 = vrot.slane %v7758_v20, 4  ;;  %v11081_v13 = vld [vmem:[#allocation2 + $0x130] sm:$0xf] }
 0x478   :  { %v13854_v21 = vadd.f32 %v3909_v45, %v15431_v55  ;;  %v3574_v43 = vsel %vm11316_vm15, %v3572_v60, %v3573_v39  ;;  %v8968_v45 = vunpack.c.l.b16 %v8892_v19  ;;  %v3684_v60 = vunpack.c.l.b16 %v3571_v63 }
 0x479   :  { %v3685_v7 = vunpack.c.l.b16 %v3574_v43  ;;  %v7764_v8 = vsel %vm11282_vm11, %v7759_v44, %v7763_v29  ;;  %v3577_v12 = vrot.slane %v11081_v13, 5 }
 0x47a   :  { %15432 = vst [vmem:[#allocation24_spill] sm:$0xff] %v13854_v21  ;;  %10779 = vmatmul.msk.bf16.gmra.mxu0 %vm2617_vm8, %v8206_v40  ;;  %v13869_v36 = vpack.c.b16 %v8968_v45, %v8967_v32  ;;  %v7749_v40 = vrot.slane %v7748_v26, 4  ;;  %v7312_v32 = vld [vmem:[#allocation2 + $0xfc] sm:$0xf]  ;;  %v11082_v45 = vld [vmem:[#allocation2 + $0x100] sm:$0xf]  ;;  %v8160_v63 = vunpack.c.l.b16 %v7764_v8 }
 0x47b   :  { %v13858_v30 = vpop.f32.mrf.mxu1  ;;  %v3726_v19 = vpack.c.b16 %v3685_v7, %v3684_v60  ;;  %v7775_v43 = vshll.u32 %v11082_v45, 16  ;;  %v7779_v15 = vshrl.u32 %v11082_v45, 16  ;;  %v7766_v47 = vshrl.u32 %v7312_v32, 16  ;;  %v15440_v60 = vld [vmem:[#allocation26_spill] sm:$0xff]  ;;  %v11083_v45 = vld [vmem:[#allocation2 + $0x134] sm:$0x1] }
 0x47c   :  { %15433 = vst [vmem:[#allocation268_spill] sm:$0xff] %v13858_v30  ;;  %v7754_v5 = vsel %vm11282_vm11, %v7749_v40, %v7753_v51  ;;  %v13883_v20 = vpop.f32.mrf.mxu0  ;;  %v7769_v7 = vshll.u32 %v7312_v32, 16 }
 0x47d   :  { %15435 = vst [vmem:[#allocation270_spill] sm:$0xff] %v13869_v36  ;;  %v7777_v44 = vrot.slane %v7775_v43, 5  ;;  %v8159_v13 = vunpack.c.l.b16 %v7754_v5  ;;  %v7768_v51 = vrot.slane %v7766_v47, 4 }
 0x47e   :  { %15439 = vst [vmem:[#allocation272_spill] sm:$0xff] %v13883_v20  ;;  %v7771_v40 = vrot.slane %v7769_v7, 5 }
 0x47f   :  { %v3911_v55 = vpop.f32.mrf.mxu3  ;;  %v8207_v30 = vpack.c.b16 %v8160_v63, %v8159_v13  ;;  %v15444_v63 = vld [vmem:[#allocation28_spill] sm:$0xff] }
 0x480   :  { %v13872_v48 = vadd.f32 %v3911_v55, %v15436_v28  ;;  %v3579_v55 = vrot.slane %v3577_v12, 4  ;;  %v7781_v28 = vrot.slane %v7779_v15, 4  ;;  %v11084_v15 = vld [vmem:[#allocation2 + $0x104] sm:$0x1] }
 0x481   :  { %v7785_v5 = vshll.u32 %v11084_v15, 16 }
 0x482   :  { %15437 = vst [vmem:[#allocation25_spill] sm:$0xff] %v13872_v48  ;;  %v7782_v32 = vor.u32 %v7781_v28, %v7777_v44 }
 0x483   :  { %v13874_v39 = vpop.f32.mrf.mxu1  ;;  %v7787_v13 = vrot.slane %v7785_v5, 5 }
 0x484   :  { %15438 = vst [vmem:[#allocation271_spill] sm:$0xff] %v13874_v39  ;;  %10333 = vmatmul.msk.bf16.gmra.mxu3 %vm2617_vm8, %v3726_v19  ;;  %v3338_v19 = vld [vmem:[#allocation2 + $0x12c] sm:$0xe]  ;;  %v3580_v39 = vrot.slane %v11083_v45, 5 }
 0x485   :  { %v10301_v48 = vrot.slane %v3338_v19, 9  ;;  %v7315_v19 = vld [vmem:[#allocation2 + $0x108] sm:$0xf] }
 0x486   :  { %10835 = vmatmul.msk.bf16.gmra.mxu1 %vm2617_vm8, %v12677_v59  ;;  %v3581_v8 = vsel %vm11316_vm15, %v3579_v55, %v3580_v39  ;;  %v7790_v15 = vshrl.u32 %v7315_v19, 16  ;;  %v7793_v5 = vshll.u32 %v7315_v19, 16 }
 0x487   :  { %v3914_v26 = vpop.f32.mrf.mxu3  ;;  %v3578_v43 = vsel %vm11316_vm15, %v10301_v48, %v3577_v12  ;;  %v11085_v12 = vld [vmem:[#allocation2 + $0x13c] sm:$0xf] }
 0x488   :  { %v13886_v29 = vadd.f32 %v3914_v26, %v15440_v60  ;;  %v3687_v26 = vunpack.c.l.b16 %v3581_v8  ;;  %v7772_v60 = vor.u32 %v7771_v40, %v7768_v51  ;;  %v3686_v7 = vunpack.c.l.b16 %v3578_v43  ;;  %v11086_v51 = vld [vmem:[#allocation2 + $0x10c] sm:$0xf] }
 0x489   :  { %v3584_v28 = vrot.slane %v11085_v12, 5  ;;  %v7799_v40 = vshll.u32 %v11086_v51, 16  ;;  %v7803_v8 = vshrl.u32 %v11086_v51, 16  ;;  %v3339_v12 = vld [vmem:[#allocation2 + $0x138] sm:$0xe] }
 0x48a   :  { %15441 = vst [vmem:[#allocation26_spill] sm:$0xff] %v13886_v29  ;;  %10780 = vmatmul.msk.bf16.gmra.mxu0 %vm2617_vm8, %v8207_v30  ;;  %v7783_v29 = vrot.slane %v7782_v32, 4  ;;  %v3727_v55 = vpack.c.b16 %v3687_v26, %v3686_v7  ;;  %v7773_v30 = vrot.slane %v7772_v60, 4  ;;  %v11087_v51 = vld [vmem:[#allocation2 + $0x140] sm:$0x1] }
 0x48b   :  { %v13888_v59 = vpop.f32.mrf.mxu1  ;;  %v3586_v60 = vrot.slane %v3584_v28, 4 }
 0x48c   :  { %15442 = vst [vmem:[#allocation273_spill] sm:$0xff] %v13888_v59  ;;  %v13895_v59 = vpop.f32.mrf.mxu0  ;;  %v7788_v48 = vsel %vm11282_vm11, %v7783_v29, %v7787_v13  ;;  %v7778_v32 = vsel %vm11282_vm11, %v7773_v30, %v7777_v44  ;;  %v7801_v29 = vrot.slane %v7799_v40, 5  ;;  %v7792_v44 = vrot.slane %v7790_v15, 4 }
 0x48d   :  { %15443 = vst [vmem:[#allocation274_spill] sm:$0xff] %v13895_v59  ;;  %v8162_v43 = vunpack.c.l.b16 %v7788_v48  ;;  %v8161_v13 = vunpack.c.l.b16 %v7778_v32  ;;  %v7795_v30 = vrot.slane %v7793_v5, 5  ;;  %v10302_v48 = vrot.slane %v3339_v12, 9  ;;  %v11088_v32 = vld [vmem:[#allocation2 + $0x110] sm:$0x1] }
 0x48e   :  { %v7318_v12 = vld [vmem:[#allocation2 + $0x114] sm:$0xf] }
 0x48f   :  { %v3916_v45 = vpop.f32.mrf.mxu3 }
 0x490   :  { %v13898_v47 = vadd.f32 %v3916_v45, %v15444_v63  ;;  %v7805_v45 = vrot.slane %v7803_v8, 4  ;;  %v15447_v63 = vld [vmem:[#allocation30_spill] sm:$0xff]  ;;  %v3585_v8 = vsel %vm11316_vm15, %v10302_v48, %v3584_v28 }
 0x491   :  { %v3688_v5 = vunpack.c.l.b16 %v3585_v8 }
 0x492   :  { %15445 = vst [vmem:[#allocation28_spill] sm:$0xff] %v13898_v47  ;;  %v8208_v47 = vpack.c.b16 %v8162_v43, %v8161_v13  ;;  %v7806_v40 = vor.u32 %v7805_v45, %v7801_v29  ;;  %v15451_v43 = vld [vmem:[#allocation32_spill] sm:$0xff] }
 0x493   :  { %v13900_v39 = vpop.f32.mrf.mxu1 }
 0x494   :  { %15446 = vst [vmem:[#allocation275_spill] sm:$0xff] %v13900_v39  ;;  %10334 = vmatmul.msk.bf16.gmra.mxu3 %vm2617_vm8, %v3727_v55  ;;  %v3587_v55 = vrot.slane %v11087_v51, 5  ;;  %v13912_v39 = vpop.f32.mrf.mxu0  ;;  %v7796_v51 = vor.u32 %v7795_v30, %v7792_v44  ;;  %v7807_v21 = vrot.slane %v7806_v40, 4  ;;  %v3340_v44 = vld [vmem:[#allocation2 + $0x144] sm:$0xe] }
 0x495   :  { %15449 = vst [vmem:[#allocation276_spill] sm:$0xff] %v13912_v39  ;;  %v11089_v30 = vld [vmem:[#allocation2 + $0x148] sm:$0xf]  ;;  %v13932_v40 = vld [vmem:[#allocation2 + $0x19c] sm:$0xf]  ;;  %v10303_v59 = vrot.slane %v3340_v44, 9 }
 0x496   :  { %10836 = vmatmul.msk.bf16.gmra.mxu1 %vm2617_vm8, %v12713_v58  ;;  %v3588_v19 = vsel %vm11316_vm15, %v3586_v60, %v3587_v55  ;;  %v3591_v48 = vrot.slane %v11089_v30, 5 }
 0x497   :  { %v3919_v26 = vpop.f32.mrf.mxu3 }
 0x498   :  { %v13910_v7 = vadd.f32 %v3919_v26, %v15447_v63  ;;  %v7809_v26 = vshll.u32 %v11088_v32, 16  ;;  %v3689_v63 = vunpack.c.l.b16 %v3588_v19  ;;  %v3593_v20 = vrot.slane %v3591_v48, 4 }
 0x49a   :  { %15448 = vst [vmem:[#allocation30_spill] sm:$0xff] %v13910_v7  ;;  %10781 = vmatmul.msk.bf16.gmra.mxu0 %vm2617_vm8, %v8208_v47  ;;  %v7811_v13 = vrot.slane %v7809_v26, 5  ;;  %v3728_v45 = vpack.c.b16 %v3689_v63, %v3688_v5  ;;  %v7797_v47 = vrot.slane %v7796_v51, 4  ;;  %v13937_v26 = vld [vmem:[#allocation2 + $0x1a0] sm:$0x1]  ;;  %v8895_v51 = vrot.slane %v13932_v40, 5 }
 0x49b   :  { %v13914_v58 = vpop.f32.mrf.mxu1  ;;  %v8585_v63 = vld [vmem:[#allocation2 + $0x198] sm:$0xe]  ;;  %v7814_v5 = vshrl.u32 %v7318_v12, 16 }
 0x49c   :  { %15450 = vst [vmem:[#allocation277_spill] sm:$0xff] %v13914_v58  ;;  %v13921_v58 = vld [vmem:[#allocation2 + $0x118] sm:$0xf]  ;;  %v7812_v55 = vsel %vm11282_vm11, %v7807_v21, %v7811_v13  ;;  %v13934_v32 = vpop.f32.mrf.mxu0  ;;  %v7802_v21 = vsel %vm11282_vm11, %v7797_v47, %v7801_v29  ;;  %v7817_v13 = vshll.u32 %v7318_v12, 16  ;;  %v10826_v30 = vrot.slane %v8585_v63, 9 }
 0x49d   :  { %v7823_v28 = vshll.u32 %v13921_v58, 16  ;;  %v7827_v19 = vshrl.u32 %v13921_v58, 16  ;;  %15453 = vst [vmem:[#allocation278_spill] sm:$0xff] %v13934_v32  ;;  %v8897_v39 = vrot.slane %v8895_v51, 4  ;;  %v8898_v32 = vrot.slane %v13937_v26, 5 }
 0x49e   :  { %v8896_v0 = vsel %vm11316_vm15, %v10826_v30, %v8895_v51  ;;  %v8163_v46 = vunpack.c.l.b16 %v7802_v21  ;;  %v13954_v63 = vld [vmem:[#allocation2 + $0x11c] sm:$0x1]  ;;  %v7816_v44 = vrot.slane %v7814_v5, 4  ;;  %v7819_v36 = vrot.slane %v7817_v13, 5  ;;  %v15459_v30 = vld [vmem:[#allocation36_spill] sm:$0xff] }
 0x49f   :  { %v3921_v7 = vpop.f32.mrf.mxu3  ;;  %v7829_v10 = vrot.slane %v7827_v19, 4  ;;  %v8899_v29 = vsel %vm11316_vm15, %v8897_v39, %v8898_v32  ;;  %v8969_v47 = vunpack.c.l.b16 %v8896_v0  ;;  %v3592_v19 = vsel %vm11316_vm15, %v10303_v59, %v3591_v48  ;;  %v13969_v59 = vld [vmem:[#allocation2 + $0x124] sm:$0xf] }
 0x4a0   :  { %v13924_v15 = vadd.f32 %v3921_v7, %v15451_v43  ;;  %v11090_v7 = vld [vmem:[#allocation2 + $0x14c] sm:$0x1]  ;;  %v8970_v12 = vunpack.c.l.b16 %v8899_v29  ;;  %v7833_v0 = vshll.u32 %v13954_v63, 16  ;;  %v7820_v32 = vor.u32 %v7819_v36, %v7816_v44 }
 0x4a1   :  { %v3594_v8 = vrot.slane %v11090_v7, 5  ;;  %v15454_v43 = vld [vmem:[#allocation112_spill] sm:$0xff]  ;;  %v7825_v7 = vrot.slane %v7823_v28, 5  ;;  %v7847_v36 = vshll.u32 %v13969_v59, 16  ;;  %v7851_v44 = vshrl.u32 %v13969_v59, 16 }
 0x4a2   :  { %15452 = vst [vmem:[#allocation32_spill] sm:$0xff] %v13924_v15  ;;  %v8164_v15 = vunpack.c.l.b16 %v7812_v55  ;;  %v13960_v21 = vpack.c.b16 %v8970_v12, %v8969_v47  ;;  %v11091_v47 = vld [vmem:[#allocation2 + $0x154] sm:$0xf] }
 0x4a3   :  { %v13926_v60 = vpop.f32.mrf.mxu1  ;;  %v7830_v51 = vor.u32 %v7829_v10, %v7825_v7  ;;  %v3598_v12 = vrot.slane %v11091_v47, 5  ;;  %v7849_v47 = vrot.slane %v7847_v36, 5 }
 0x4a4   :  { %10335 = vmatmul.msk.bf16.gmra.mxu3 %vm2617_vm8, %v3728_v45  ;;  %v8209_v55 = vpack.c.b16 %v8164_v15, %v8163_v46  ;;  %15457 = vst [vmem:[#allocation34_spill] sm:$0xff] %v13960_v21  ;;  %v13964_v39 = vpop.f32.mrf.mxu0  ;;  %v3690_v46 = vunpack.c.l.b16 %v3592_v19  ;;  %v3341_v19 = vld [vmem:[#allocation2 + $0x150] sm:$0xe] }
 0x4a5   :  { %15458 = vst [vmem:[#allocation279_spill] sm:$0xff] %v13964_v39  ;;  %v7831_v13 = vrot.slane %v7830_v51, 4 }
 0x4a6   :  { %10837 = vmatmul.msk.bf16.gmra.mxu1 %vm2617_vm8, %v15454_v43 }
 0x4a7   :  { %v3924_v45 = vpop.f32.mrf.mxu3 }
 0x4a8   :  { %v13948_v43 = vadd.f32 %v3924_v45, %v15455_v57  ;;  %v3595_v57 = vsel %vm11316_vm15, %v3593_v20, %v3594_v8  ;;  %v7835_v20 = vrot.slane %v7833_v0, 5  ;;  %v7821_v8 = vrot.slane %v7820_v32, 4  ;;  %v11092_v0 = vld [vmem:[#allocation2 + $0x158] sm:$0x1] }
 0x4a9   :  { %v3691_v15 = vunpack.c.l.b16 %v3595_v57  ;;  %v15461_v57 = vld [vmem:[#allocation121_spill] sm:$0xff] }
 0x4aa   :  { %15456 = vst [vmem:[#allocation112_spill] sm:$0xff] %v13948_v43  ;;  %10782 = vmatmul.msk.bf16.gmra.mxu0 %vm2617_vm8, %v8209_v55  ;;  %v7836_v29 = vsel %vm11282_vm11, %v7831_v13, %v7835_v20  ;;  %v7321_v55 = vld [vmem:[#allocation2 + $0x120] sm:$0xf]  ;;  %v7826_v51 = vsel %vm11282_vm11, %v7821_v8, %v7825_v7  ;;  %v3600_v20 = vrot.slane %v3598_v12, 4  ;;  %v13989_v7 = vld [vmem:[#allocation2 + $0x128] sm:$0x1] }
 0x4ab   :  { %v13952_v28 = vpop.f32.mrf.mxu1  ;;  %v3729_v48 = vpack.c.b16 %v3691_v15, %v3690_v46  ;;  %v3601_v46 = vrot.slane %v11092_v0, 5  ;;  %v8166_v15 = vunpack.c.l.b16 %v7836_v29  ;;  %v7838_v32 = vshrl.u32 %v7321_v55, 16 }
 0x4ac   :  { %v13982_v43 = vpop.f32.mrf.mxu0  ;;  %v8165_v21 = vunpack.c.l.b16 %v7826_v51 }
 0x4ad   :  { %15462 = vst [vmem:[#allocation121_spill] sm:$0xff] %v13982_v43  ;;  %v7840_v8 = vrot.slane %v7838_v32, 4  ;;  %v3602_v36 = vsel %vm11316_vm15, %v3600_v20, %v3601_v46  ;;  %v14000_v32 = vld [vmem:[#allocation2 + $0x130] sm:$0xf]  ;;  %v11093_v20 = vld [vmem:[#allocation2 + $0x160] sm:$0xf] }
 0x4ae   :  { %v8210_v33 = vpack.c.b16 %v8166_v15, %v8165_v21  ;;  %v3693_v51 = vunpack.c.l.b16 %v3602_v36  ;;  %v15465_v15 = vld [vmem:[#allocation40_spill] sm:$0xff]  ;;  %v7875_v36 = vshrl.u32 %v14000_v32, 16 }
 0x4af   :  { %v3926_v5 = vpop.f32.mrf.mxu3 }
 0x4b0   :  { %v13967_v45 = vadd.f32 %v3926_v5, %v15459_v30  ;;  %v7841_v5 = vshll.u32 %v7321_v55, 16  ;;  %v10304_v30 = vrot.slane %v3341_v19, 9  ;;  %v7857_v19 = vshll.u32 %v13989_v7, 16 }
 0x4b1   :  { %v7877_v43 = vrot.slane %v7875_v36, 4 }
 0x4b2   :  { %15460 = vst [vmem:[#allocation36_spill] sm:$0xff] %v13967_v45  ;;  %v7853_v45 = vrot.slane %v7851_v44, 4  ;;  %v7843_v29 = vrot.slane %v7841_v5, 5  ;;  %v3599_v55 = vsel %vm11316_vm15, %v10304_v30, %v3598_v12  ;;  %v7859_v5 = vrot.slane %v7857_v19, 5  ;;  %v15468_v19 = vld [vmem:[#allocation134_spill] sm:$0xff] }
 0x4b3   :  { %v13971_v10 = vpop.f32.mrf.mxu1  ;;  %v3692_v0 = vunpack.c.l.b16 %v3599_v55  ;;  %v3605_v55 = vrot.slane %v11093_v20, 5 }
 0x4b4   :  { %10336 = vmatmul.msk.bf16.gmra.mxu3 %vm2617_vm8, %v3729_v48  ;;  %v15463_v48 = vld [vmem:[#allocation38_spill] sm:$0xff]  ;;  %v7854_v44 = vor.u32 %v7853_v45, %v7849_v47  ;;  %v14002_v12 = vpop.f32.mrf.mxu0 }
 0x4b5   :  { %15467 = vst [vmem:[#allocation280_spill] sm:$0xff] %v14002_v12  ;;  %v3730_v45 = vpack.c.b16 %v3693_v51, %v3692_v0  ;;  %v11094_v51 = vld [vmem:[#allocation2 + $0x164] sm:$0x1] }
 0x4b6   :  { %10838 = vmatmul.msk.bf16.gmra.mxu1 %vm2617_vm8, %v15461_v57  ;;  %v7855_v21 = vrot.slane %v7854_v44, 4  ;;  %v3342_v44 = vld [vmem:[#allocation2 + $0x15c] sm:$0xe] }
 0x4b7   :  { %v3929_v13 = vpop.f32.mrf.mxu3  ;;  %v10305_v20 = vrot.slane %v3342_v44, 9 }
 0x4b8   :  { %v13985_v39 = vadd.f32 %v3929_v13, %v15463_v48  ;;  %v7844_v13 = vor.u32 %v7843_v29, %v7840_v8  ;;  %v7324_v8 = vld [vmem:[#allocation2 + $0x12c] sm:$0xf]  ;;  %v7871_v29 = vshll.u32 %v14000_v32, 16 }
 0x4ba   :  { %15464 = vst [vmem:[#allocation38_spill] sm:$0xff] %v13985_v39  ;;  %10783 = vmatmul.msk.bf16.gmra.mxu0 %vm2617_vm8, %v8210_v33  ;;  %v7845_v46 = vrot.slane %v7844_v13, 4  ;;  %v7860_v33 = vsel %vm11282_vm11, %v7855_v21, %v7859_v5  ;;  %v3608_v13 = vrot.slane %v11094_v51, 5  ;;  %v7862_v21 = vshrl.u32 %v7324_v8, 16 }
 0x4bb   :  { %v13987_v57 = vpop.f32.mrf.mxu1  ;;  %v7873_v12 = vrot.slane %v7871_v29, 5 }
 0x4bc   :  { %v7850_v0 = vsel %vm11282_vm11, %v7845_v46, %v7849_v47  ;;  %v7864_v47 = vrot.slane %v7862_v21, 4  ;;  %v3606_v46 = vsel %vm11316_vm15, %v10305_v20, %v3605_v55  ;;  %v14026_v29 = vpop.f32.mrf.mxu0  ;;  %v15472_v21 = vld [vmem:[#allocation44_spill] sm:$0xff] }
 0x4bd   :  { %v7878_v44 = vor.u32 %v7877_v43, %v7873_v12  ;;  %15471 = vst [vmem:[#allocation42_spill] sm:$0xff] %v14026_v29  ;;  %v3694_v36 = vunpack.c.l.b16 %v3606_v46  ;;  %v7327_v46 = vld [vmem:[#allocation2 + $0x138] sm:$0xf] }
 0x4bf   :  { %v3931_v48 = vpop.f32.mrf.mxu3 }
 0x4c0   :  { %v13998_v39 = vadd.f32 %v3931_v48, %v15465_v15  ;;  %v8168_v48 = vunpack.c.l.b16 %v7860_v33  ;;  %v7865_v15 = vshll.u32 %v7324_v8, 16 }
 0x4c2   :  { %15466 = vst [vmem:[#allocation40_spill] sm:$0xff] %v13998_v39  ;;  %v3607_v39 = vrot.slane %v3605_v55, 4  ;;  %v7867_v8 = vrot.slane %v7865_v15, 5 }
 0x4c3   :  { %v14004_v30 = vpop.f32.mrf.mxu1 }
 0x4c4   :  { %10337 = vmatmul.msk.bf16.gmra.mxu3 %vm2617_vm8, %v3730_v45  ;;  %v8167_v45 = vunpack.c.l.b16 %v7850_v0  ;;  %v3609_v33 = vsel %vm11316_vm15, %v3607_v39, %v3608_v13  ;;  %v11095_v13 = vld [vmem:[#allocation2 + $0x13c] sm:$0xf] }
 0x4c5   :  { %v3695_v0 = vunpack.c.l.b16 %v3609_v33  ;;  %v7895_v43 = vshll.u32 %v11095_v13, 16  ;;  %v7899_v33 = vshrl.u32 %v11095_v13, 16 }
 0x4c6   :  { %10839 = vmatmul.msk.bf16.gmra.mxu1 %vm2617_vm8, %v15468_v19  ;;  %v8211_v19 = vpack.c.b16 %v8168_v48, %v8167_v45  ;;  %v7868_v48 = vor.u32 %v7867_v8, %v7864_v47  ;;  %v3343_v47 = vld [vmem:[#allocation2 + $0x168] sm:$0xe]  ;;  %v15475_v8 = vld [vmem:[#allocation146_spill] sm:$0xff] }
 0x4c7   :  { %v3934_v5 = vpop.f32.mrf.mxu3  ;;  %v3731_v39 = vpack.c.b16 %v3695_v0, %v3694_v36  ;;  %v7886_v0 = vshrl.u32 %v7327_v46, 16 }
 0x4c8   :  { %v14016_v62 = vadd.f32 %v3934_v5, %v15469_v54  ;;  %v7881_v54 = vshll.u32 %v14020_v9, 16  ;;  %v7879_v5 = vrot.slane %v7878_v44, 4  ;;  %v7869_v15 = vrot.slane %v7868_v48, 4 }
 0x4c9   :  { %v7897_v48 = vrot.slane %v7895_v43, 5 }
 0x4ca   :  { %15470 = vst [vmem:[#allocation134_spill] sm:$0xff] %v14016_v62  ;;  %10784 = vmatmul.msk.bf16.gmra.mxu0 %vm2617_vm8, %v8211_v19  ;;  %v7883_v55 = vrot.slane %v7881_v54, 5  ;;  %v11096_v62 = vld [vmem:[#allocation2 + $0x16c] sm:$0xf]  ;;  %v7874_v44 = vsel %vm11282_vm11, %v7869_v15, %v7873_v12  ;;  %v14042_v54 = vpop.f32.mrf.mxu0  ;;  %v7888_v12 = vrot.slane %v7886_v0, 4 }
 0x4cb   :  { %v14018_v22 = vpop.f32.mrf.mxu1  ;;  %v3612_v29 = vrot.slane %v11096_v62, 5  ;;  %15476 = vst [vmem:[#allocation146_spill] sm:$0xff] %v14042_v54  ;;  %v7330_v54 = vld [vmem:[#allocation2 + $0x144] sm:$0xf] }
 0x4cc   :  { %v7884_v19 = vsel %vm11282_vm11, %v7879_v5, %v7883_v55  ;;  %v11097_v55 = vld [vmem:[#allocation2 + $0x170] sm:$0x1] }
 0x4cd   :  { %v8170_v36 = vunpack.c.l.b16 %v7884_v19  ;;  %v3614_v62 = vrot.slane %v3612_v29, 4  ;;  %v3615_v13 = vrot.slane %v11097_v55, 5 }
 0x4cf   :  { %v3936_v51 = vpop.f32.mrf.mxu3  ;;  %v3616_v43 = vsel %vm11316_vm15, %v3614_v62, %v3615_v13  ;;  %v7910_v62 = vshrl.u32 %v7330_v54, 16 }
 0x4d0   :  { %v14031_v45 = vadd.f32 %v3936_v51, %v15472_v21  ;;  %v7889_v51 = vshll.u32 %v7327_v46, 16  ;;  %v10306_v21 = vrot.slane %v3343_v47, 9  ;;  %v11098_v47 = vld [vmem:[#allocation2 + $0x140] sm:$0x1] }
 0x4d2   :  { %15473 = vst [vmem:[#allocation44_spill] sm:$0xff] %v14031_v45  ;;  %v7901_v45 = vrot.slane %v7899_v33, 4  ;;  %v3613_v15 = vsel %vm11316_vm15, %v10306_v21, %v3612_v29  ;;  %v7891_v19 = vrot.slane %v7889_v51, 5  ;;  %v7905_v33 = vshll.u32 %v11098_v47, 16 }
 0x4d3   :  { %v14033_v20 = vpop.f32.mrf.mxu1  ;;  %v3696_v55 = vunpack.c.l.b16 %v3613_v15  ;;  %v7913_v51 = vshll.u32 %v7330_v54, 16 }
 0x4d4   :  { %15474 = vst [vmem:[#allocation281_spill] sm:$0xff] %v14033_v20  ;;  %10338 = vmatmul.msk.bf16.gmra.mxu3 %vm2617_vm8, %v3731_v39  ;;  %v15477_v39 = vld [vmem:[#allocation46_spill] sm:$0xff]  ;;  %v8169_v20 = vunpack.c.l.b16 %v7874_v44  ;;  %v7902_v46 = vor.u32 %v7901_v45, %v7897_v48  ;;  %v7892_v44 = vor.u32 %v7891_v19, %v7888_v12  ;;  %v7907_v29 = vrot.slane %v7905_v33, 5  ;;  %v11099_v45 = vld [vmem:[#allocation2 + $0x148] sm:$0xf] }
 0x4d5   :  { %v7919_v13 = vshll.u32 %v11099_v45, 16  ;;  %v11100_v12 = vld [vmem:[#allocation2 + $0x178] sm:$0xf]  ;;  %v7923_v19 = vshrl.u32 %v11099_v45, 16 }
 0x4d6   :  { %10840 = vmatmul.msk.bf16.gmra.mxu1 %vm2617_vm8, %v15475_v8  ;;  %v8212_v23 = vpack.c.b16 %v8170_v36, %v8169_v20  ;;  %v14054_v20 = vpop.f32.mrf.mxu0  ;;  %v15481_v36 = vld [vmem:[#allocation48_spill] sm:$0xff]  ;;  %v7893_v47 = vrot.slane %v7892_v44, 4  ;;  %v15485_v45 = vld [vmem:[#allocation50_spill] sm:$0xff] }
 0x4d7   :  { %v3939_v5 = vpop.f32.mrf.mxu3  ;;  %15480 = vst [vmem:[#allocation283_spill] sm:$0xff] %v14054_v20 }
 0x4d8   :  { %v14045_v27 = vadd.f32 %v3939_v5, %v15477_v39  ;;  %v3697_v5 = vunpack.c.l.b16 %v3616_v43  ;;  %v3619_v43 = vrot.slane %v11100_v12, 5  ;;  %v7898_v54 = vsel %vm11282_vm11, %v7893_v47, %v7897_v48 }
 0x4d9   :  { %v7925_v12 = vrot.slane %v7923_v19, 4 }
 0x4da   :  { %15478 = vst [vmem:[#allocation46_spill] sm:$0xff] %v14045_v27  ;;  %10785 = vmatmul.msk.bf16.gmra.mxu0 %vm2617_vm8, %v8212_v23  ;;  %v7903_v27 = vrot.slane %v7902_v46, 4  ;;  %v3732_v21 = vpack.c.b16 %v3697_v5, %v3696_v55  ;;  %v3344_v46 = vld [vmem:[#allocation2 + $0x174] sm:$0xe]  ;;  %v7912_v55 = vrot.slane %v7910_v62, 4  ;;  %v7915_v5 = vrot.slane %v7913_v51, 5 }
 0x4db   :  { %v14047_v8 = vpop.f32.mrf.mxu1  ;;  %v3621_v20 = vrot.slane %v3619_v43, 4 }
 0x4dc   :  { %15479 = vst [vmem:[#allocation282_spill] sm:$0xff] %v14047_v8  ;;  %v7908_v15 = vsel %vm11282_vm11, %v7903_v27, %v7907_v29  ;;  %v11101_v27 = vld [vmem:[#allocation2 + $0x17c] sm:$0x1]  ;;  %v7916_v51 = vor.u32 %v7915_v5, %v7912_v55 }
 0x4dd   :  { %v8172_v33 = vunpack.c.l.b16 %v7908_v15  ;;  %v3622_v29 = vrot.slane %v11101_v27, 5  ;;  %v7931_v27 = vrot.slane %v7929_v18, 5  ;;  %v3345_v18 = vld [vmem:[#allocation2 + $0x180] sm:$0xe] }
 0x4de   :  { %v14071_v8 = vpop.f32.mrf.mxu0 }
 0x4df   :  { %v3941_v39 = vpop.f32.mrf.mxu3  ;;  %15487 = vst [vmem:[#allocation50_spill] sm:$0xff] %v14071_v8  ;;  %v3623_v62 = vsel %vm11316_vm15, %v3621_v20, %v3622_v29  ;;  %v11103_v20 = vld [vmem:[#allocation2 + $0x154] sm:$0xf] }
 0x4e0   :  { %v14057_v0 = vadd.f32 %v3941_v39, %v15481_v36  ;;  %v15484_v39 = vld [vmem:[#allocation155_spill] sm:$0xff]  ;;  %v7921_v36 = vrot.slane %v7919_v13, 5  ;;  %v3699_v19 = vunpack.c.l.b16 %v3623_v62  ;;  %v7943_v55 = vshll.u32 %v11103_v20, 16 }
 0x4e1   :  { %v7947_v5 = vshrl.u32 %v11103_v20, 16  ;;  %v11105_v20 = vld [vmem:[#allocation2 + $0x188] sm:$0x1] }
 0x4e2   :  { %15482 = vst [vmem:[#allocation48_spill] sm:$0xff] %v14057_v0  ;;  %v10307_v0 = vrot.slane %v3344_v46, 9  ;;  %v7926_v13 = vor.u32 %v7925_v12, %v7921_v36  ;;  %v7333_v46 = vld [vmem:[#allocation2 + $0x150] sm:$0xf] }
 0x4e3   :  { %v14059_v23 = vpop.f32.mrf.mxu1 }
 0x4e4   :  { %15483 = vst [vmem:[#allocation284_spill] sm:$0xff] %v14059_v23  ;;  %10339 = vmatmul.msk.bf16.gmra.mxu3 %vm2617_vm8, %v3732_v21  ;;  %v8171_v21 = vunpack.c.l.b16 %v7898_v54  ;;  %v3620_v48 = vsel %vm11316_vm15, %v10307_v0, %v3619_v43  ;;  %v7934_v0 = vshrl.u32 %v7333_v46, 16  ;;  %v7937_v43 = vshll.u32 %v7333_v46, 16 }
 0x4e5   :  { %v3698_v15 = vunpack.c.l.b16 %v3620_v48 }
 0x4e6   :  { %10841 = vmatmul.msk.bf16.gmra.mxu1 %vm2617_vm8, %v15484_v39  ;;  %v8213_v39 = vpack.c.b16 %v8172_v33, %v8171_v21  ;;  %v7927_v33 = vrot.slane %v7926_v13, 4  ;;  %v14087_v62 = vpop.f32.mrf.mxu0  ;;  %v7936_v13 = vrot.slane %v7934_v0, 4 }
 0x4e7   :  { %v3944_v44 = vpop.f32.mrf.mxu3  ;;  %v3733_v21 = vpack.c.b16 %v3699_v19, %v3698_v15  ;;  %15490 = vst [vmem:[#allocation285_spill] sm:$0xff] %v14087_v62  ;;  %v7939_v15 = vrot.slane %v7937_v43, 5 }
 0x4e8   :  { %v14069_v23 = vadd.f32 %v3944_v44, %v15485_v45  ;;  %v7917_v44 = vrot.slane %v7916_v51, 4  ;;  %v7932_v12 = vsel %vm11282_vm11, %v7927_v33, %v7931_v27  ;;  %v15491_v51 = vld [vmem:[#allocation160_spill] sm:$0xff]  ;;  %v10308_v33 = vrot.slane %v3345_v18, 9 }
 0x4e9   :  { %v8174_v46 = vunpack.c.l.b16 %v7932_v12 }
 0x4ea   :  { %15486 = vst [vmem:[#allocation155_spill] sm:$0xff] %v14069_v23  ;;  %10786 = vmatmul.msk.bf16.gmra.mxu0 %vm2617_vm8, %v8213_v39  ;;  %v7922_v29 = vsel %vm11282_vm11, %v7917_v44, %v7921_v36  ;;  %v11104_v39 = vld [vmem:[#allocation2 + $0x184] sm:$0xf] }
 0x4eb   :  { %v14078_v47 = vpop.f32.mrf.mxu1  ;;  %v3626_v48 = vrot.slane %v11104_v39, 5  ;;  %v8173_v19 = vunpack.c.l.b16 %v7922_v29  ;;  %v3629_v39 = vrot.slane %v11105_v20, 5 }
 0x4ed   :  { %v3628_v27 = vrot.slane %v3626_v48, 4  ;;  %v8214_v62 = vpack.c.b16 %v8174_v46, %v8173_v19  ;;  %v3627_v43 = vsel %vm11316_vm15, %v10308_v33, %v3626_v48  ;;  %v15496_v19 = vld [vmem:[#allocation56_spill] sm:$0xff] }
 0x4ee   :  { %v14102_v29 = vpop.f32.mrf.mxu0  ;;  %v3700_v12 = vunpack.c.l.b16 %v3627_v43 }
 0x4ef   :  { %v3946_v54 = vpop.f32.mrf.mxu3  ;;  %15495 = vst [vmem:[#allocation286_spill] sm:$0xff] %v14102_v29  ;;  %v11109_v29 = vld [vmem:[#allocation2 + $0x194] sm:$0x1] }
 0x4f0   :  { %v14081_v45 = vadd.f32 %v3946_v54, %v15488_v42  ;;  %v7945_v54 = vrot.slane %v7943_v55, 5  ;;  %v7949_v42 = vrot.slane %v7947_v5, 4  ;;  %v3630_v55 = vsel %vm11316_vm15, %v3628_v27, %v3629_v39 }
 0x4f1   :  { %v3701_v18 = vunpack.c.l.b16 %v3630_v55  ;;  %v8570_v55 = vld [vmem:[#allocation2 + $0xcc] sm:$0xe] }
 0x4f2   :  { %15489 = vst [vmem:[#allocation52_spill] sm:$0xff] %v14081_v45  ;;  %v15493_v45 = vld [vmem:[#allocation54_spill] sm:$0xff]  ;;  %v7950_v8 = vor.u32 %v7949_v42, %v7945_v54 }
 0x4f3   :  { %v14092_v36 = vpop.f32.mrf.mxu1  ;;  %v3734_v39 = vpack.c.b16 %v3701_v18, %v3700_v12  ;;  %v10811_v18 = vrot.slane %v8570_v55, 9 }
 0x4f4   :  { %10340 = vmatmul.msk.bf16.gmra.mxu3 %vm2617_vm8, %v3733_v21  ;;  %15492 = vst [vmem:[#allocation160_spill] sm:$0xff] %v14092_v36  ;;  %v7940_v21 = vor.u32 %v7939_v15, %v7936_v13  ;;  %v7336_v13 = vld [vmem:[#allocation2 + $0x15c] sm:$0xf] }
 0x4f5   :  { %v7958_v33 = vshrl.u32 %v7336_v13, 16  ;;  %v7961_v27 = vshll.u32 %v7336_v13, 16 }
 0x4f6   :  { %10842 = vmatmul.msk.bf16.gmra.mxu1 %vm2617_vm8, %v15491_v51  ;;  %v11106_v51 = vld [vmem:[#allocation2 + $0x158] sm:$0x1]  ;;  %v7941_v5 = vrot.slane %v7940_v21, 4 }
 0x4f7   :  { %v3949_v44 = vpop.f32.mrf.mxu3  ;;  %v7953_v0 = vshll.u32 %v11106_v51, 16  ;;  %v7963_v13 = vrot.slane %v7961_v27, 5 }
 0x4f8   :  { %v14095_v23 = vadd.f32 %v3949_v44, %v15493_v45  ;;  %v7951_v45 = vrot.slane %v7950_v8, 4  ;;  %v7946_v48 = vsel %vm11282_vm11, %v7941_v5, %v7945_v54  ;;  %v8790_v8 = vrot.slane %v13797_v6, 5 }
 0x4f9   :  { %v7955_v44 = vrot.slane %v7953_v0, 5  ;;  %v11108_v0 = vld [vmem:[#allocation2 + $0x190] sm:$0xf]  ;;  %v7960_v5 = vrot.slane %v7958_v33, 4 }
 0x4fa   :  { %15494 = vst [vmem:[#allocation54_spill] sm:$0xff] %v14095_v23  ;;  %10787 = vmatmul.msk.bf16.gmra.mxu0 %vm2617_vm8, %v8214_v62  ;;  %v11107_v62 = vld [vmem:[#allocation2 + $0x160] sm:$0xf]  ;;  %v3633_v43 = vrot.slane %v11108_v0, 5  ;;  %v8792_v23 = vrot.slane %v8790_v8, 4  ;;  %v8791_v33 = vsel %vm11316_vm15, %v10811_v18, %v8790_v8 }
 0x4fb   :  { %v14107_v42 = vpop.f32.mrf.mxu1  ;;  %v7967_v20 = vshll.u32 %v11107_v62, 16  ;;  %v7956_v21 = vsel %vm11282_vm11, %v7951_v45, %v7955_v44  ;;  %v7971_v51 = vshrl.u32 %v11107_v62, 16  ;;  %v8793_v45 = vrot.slane %v13818_v16, 5 }
 0x4fc   :  { %15498 = vst [vmem:[#allocation287_spill] sm:$0xff] %v14107_v42  ;;  %v8176_v54 = vunpack.c.l.b16 %v7956_v21  ;;  %v3635_v0 = vrot.slane %v3633_v43, 4  ;;  %v3636_v42 = vrot.slane %v11109_v29, 5  ;;  %v7964_v21 = vor.u32 %v7963_v13, %v7960_v5 }
 0x4fd   :  { %v7969_v12 = vrot.slane %v7967_v20, 5  ;;  %v7973_v6 = vrot.slane %v7971_v51, 4  ;;  %v8794_v27 = vsel %vm11316_vm15, %v8792_v23, %v8793_v45  ;;  %v11110_v20 = vld [vmem:[#allocation2 + $0x164] sm:$0x1]  ;;  %v7339_v45 = vld [vmem:[#allocation2 + $0x168] sm:$0xf] }
 0x4fe   :  { %v7977_v51 = vshll.u32 %v11110_v20, 16  ;;  %v7965_v5 = vrot.slane %v7964_v21, 4 }
 0x4ff   :  { %v3951_v15 = vpop.f32.mrf.mxu3  ;;  %v7974_v16 = vor.u32 %v7973_v6, %v7969_v12 }
 0x500   :  { %v14105_v46 = vadd.f32 %v3951_v15, %v15496_v19  ;;  %v8175_v15 = vunpack.c.l.b16 %v7946_v48  ;;  %v3346_v19 = vld [vmem:[#allocation2 + $0x18c] sm:$0xe]  ;;  %v15500_v48 = vld [vmem:[#allocation58_spill] sm:$0xff]  ;;  %v7979_v23 = vrot.slane %v7977_v51, 5 }
 0x501   :  { %v10309_v62 = vrot.slane %v3346_v19, 9  ;;  %v3637_v19 = vsel %vm11316_vm15, %v3635_v0, %v3636_v42  ;;  %v7975_v18 = vrot.slane %v7974_v16, 4  ;;  %v7985_v42 = vshll.u32 %v7339_v45, 16 }
 0x502   :  { %15497 = vst [vmem:[#allocation56_spill] sm:$0xff] %v14105_v46  ;;  %v15499_v46 = vld [vmem:[#allocation168_spill] sm:$0xff]  ;;  %v3703_v13 = vunpack.c.l.b16 %v3637_v19 }
 0x503   :  { %v14127_v55 = vpop.f32.mrf.mxu1  ;;  %v3634_v29 = vsel %vm11316_vm15, %v10309_v62, %v3633_v43  ;;  %v7970_v43 = vsel %vm11282_vm11, %v7965_v5, %v7969_v12  ;;  %v7982_v62 = vshrl.u32 %v7339_v45, 16  ;;  %v7980_v21 = vsel %vm11282_vm11, %v7975_v18, %v7979_v23 }
 0x504   :  { %10341 = vmatmul.msk.bf16.gmra.mxu3 %vm2617_vm8, %v3734_v39  ;;  %v14118_v39 = vpop.f32.mrf.mxu0  ;;  %v3702_v8 = vunpack.c.l.b16 %v3634_v29  ;;  %v8177_v29 = vunpack.c.l.b16 %v7970_v43  ;;  %v8178_v19 = vunpack.c.l.b16 %v7980_v21 }
 0x505   :  { %v7984_v12 = vrot.slane %v7982_v62, 4 }
 0x506   :  { %10843 = vmatmul.msk.bf16.gmra.mxu1 %vm2617_vm8, %v15499_v46  ;;  %v8215_v46 = vpack.c.b16 %v8176_v54, %v8175_v15  ;;  %v8939_v15 = vunpack.c.l.b16 %v8791_v33  ;;  %v8940_v54 = vunpack.c.l.b16 %v8794_v27  ;;  %v11111_v33 = vld [vmem:[#allocation2 + $0x16c] sm:$0xf]  ;;  %v8216_v18 = vpack.c.b16 %v8178_v19, %v8177_v29 }
 0x507   :  { %v3954_v44 = vpop.f32.mrf.mxu3  ;;  %v7991_v27 = vshll.u32 %v11111_v33, 16  ;;  %v7995_v16 = vshrl.u32 %v11111_v33, 16 }
 0x508   :  { %v14121_v36 = vadd.f32 %v3954_v44, %v15500_v48  ;;  %v15502_v44 = vld [vmem:[#allocation60_spill] sm:$0xff]  ;;  %v8988_v20 = vpack.c.b16 %v8940_v54, %v8939_v15  ;;  %v7987_v15 = vrot.slane %v7985_v42, 5 }
 0x509   :  { %v7993_v54 = vrot.slane %v7991_v27, 5  ;;  %v7997_v5 = vrot.slane %v7995_v16, 4  ;;  %v15508_v27 = vld [vmem:[#allocation64_spill] sm:$0xff] }
 0x50a   :  { %15501 = vst [vmem:[#allocation168_spill] sm:$0xff] %v14121_v36  ;;  %10788 = vmatmul.msk.bf16.gmra.mxu0 %vm2617_vm8, %v8215_v46  ;;  %v3735_v46 = vpack.c.b16 %v3703_v13, %v3702_v8  ;;  %v15505_v8 = vld [vmem:[#allocation62_spill] sm:$0xff]  ;;  %v7988_v23 = vor.u32 %v7987_v15, %v7984_v12 }
 0x50b   :  { %v14144_v51 = vpop.f32.mrf.mxu1 }
 0x50c   :  { %v14139_v0 = vpop.f32.mrf.mxu0 }
 0x50d   :  { %15504 = vst [vmem:[#allocation60_spill] sm:$0xff] %v14139_v0 }
 0x50f   :  { %v3956_v6 = vpop.f32.mrf.mxu3 }
 0x510   :  { %v14135_v48 = vadd.f32 %v3956_v6, %v15502_v44  ;;  %v7998_v6 = vor.u32 %v7997_v5, %v7993_v54  ;;  %v11112_v44 = vld [vmem:[#allocation2 + $0x170] sm:$0x1]  ;;  %v11113_v5 = vld [vmem:[#allocation2 + $0x178] sm:$0xf] }
 0x511   :  { %v8001_v33 = vshll.u32 %v11112_v44, 16  ;;  %v15511_v44 = vld [vmem:[#allocation135_spill] sm:$0xff] }
 0x512   :  { %15503 = vst [vmem:[#allocation58_spill] sm:$0xff] %v14135_v48  ;;  %v7999_v43 = vrot.slane %v7998_v6, 4  ;;  %v15510_v6 = vld [vmem:[#allocation69_spill] sm:$0xff] }
 0x513   :  { %v8003_v21 = vrot.slane %v8001_v33, 5  ;;  %v14153_v62 = vpop.f32.mrf.mxu1  ;;  %v3276_v33 = vadd.f32 %v15511_v44, %v15510_v6  ;;  %v15514_v6 = vld [vmem:[#allocation73_spill] sm:$0xff]  ;;  %v15515_v44 = vld [vmem:[#allocation139_spill] sm:$0xff] }
 0x514   :  { %10342 = vmatmul.msk.bf16.gmra.mxu3 %vm2617_vm8, %v3735_v46  ;;  %v14150_v46 = vpop.f32.mrf.mxu0 }
 0x515   :  { %15507 = vst [vmem:[#allocation288_spill] sm:$0xff] %v14150_v46  ;;  %v8004_v19 = vsel %vm11282_vm11, %v7999_v43, %v8003_v21 }
 0x516   :  { %10844 = vmatmul.msk.bf16.gmra.mxu1 %vm2617_vm8, %v8988_v20  ;;  %v7989_v20 = vrot.slane %v7988_v23, 4  ;;  %v8019_v23 = vshrl.u32 %v11113_v5, 16 }
 0x517   :  { %v3959_v45 = vpop.f32.mrf.mxu3 }
 0x518   :  { %v14148_v13 = vadd.f32 %v3959_v45, %v15505_v8  ;;  %v7342_v45 = vld [vmem:[#allocation2 + $0x174] sm:$0xf]  ;;  %v10958_v8 = vld [vmem:[#allocation2 + $0x18] sm:$0xff]  ;;  %v7994_v29 = vsel %vm11282_vm11, %v7989_v20, %v7993_v54  ;;  %v8180_v54 = vunpack.c.l.b16 %v8004_v19  ;;  %v7345_v19 = vld [vmem:[#allocation2 + $0x180] sm:$0xf] }
 0x519   :  { %v8006_v12 = vshrl.u32 %v7342_v45, 16  ;;  %v8009_v15 = vshll.u32 %v7342_v45, 16  ;;  %v8021_v45 = vrot.slane %v8019_v23, 4 }
 0x51a   :  { %15506 = vst [vmem:[#allocation62_spill] sm:$0xff] %v14148_v13  ;;  %10789 = vmatmul.msk.bf16.gmra.mxu0 %vm2617_vm8, %v8216_v18  ;;  %v8015_v18 = vshll.u32 %v11113_v5, 16 }
 0x51b   :  { %v8011_v43 = vrot.slane %v8009_v15, 5  ;;  %v14171_v5 = vpop.f32.mrf.mxu1 }
 0x51c   :  { %v8017_v21 = vrot.slane %v8015_v18, 5 }
 0x51e   :  { %v8022_v36 = vor.u32 %v8021_v45, %v8017_v21  ;;  %v10959_v45 = vld [vmem:[#allocation2 + $0x24] sm:$0xff] }
 0x51f   :  { %v3961_v42 = vpop.f32.mrf.mxu3 }
 0x520   :  { %v14156_v16 = vadd.f32 %v3961_v42, %v15508_v27  ;;  %v14167_v42 = vpop.f32.mrf.mxu0  ;;  %v8179_v27 = vunpack.c.l.b16 %v7994_v29  ;;  %v3278_v29 = vadd.f32 %v15515_v44, %v15514_v6  ;;  %v8023_v15 = vrot.slane %v8022_v36, 4  ;;  %v15518_v44 = vld [vmem:[#allocation77_spill] sm:$0xff] }
 0x521   :  { %15512 = vst [vmem:[#allocation69_spill] sm:$0xff] %v14167_v42 }
 0x522   :  { %15509 = vst [vmem:[#allocation64_spill] sm:$0xff] %v14156_v16  ;;  %v8008_v16 = vrot.slane %v8006_v12, 4 }
 0x524   :  { %10731 = vmatmul.msk.bf16.vlgmr.msra.gmra.mxu3 %vm2617_vm8, %v10958_v8  ;;  %v8217_v8 = vpack.c.b16 %v8180_v54, %v8179_v27  ;;  %v8012_v48 = vor.u32 %v8011_v43, %v8008_v16  ;;  %v8033_v27 = vshll.u32 %v7345_v19, 16  ;;  %v11115_v16 = vld [vmem:[#allocation2 + $0x184] sm:$0xf] }
 0x525   :  { %v8039_v54 = vshll.u32 %v11115_v16, 16  ;;  %v8043_v43 = vshrl.u32 %v11115_v16, 16 }
 0x526   :  { %10845 = vmatmul.msk.bf16.gmra.mxu1 %vm2617_vm8, %v13184_v14  ;;  %v11114_v14 = vld [vmem:[#allocation2 + $0x17c] sm:$0x1]  ;;  %v8013_v12 = vrot.slane %v8012_v48, 4 }
 0x527   :  { %v3964_v20 = vpop.f32.mrf.mxu3  ;;  %v8025_v46 = vshll.u32 %v11114_v14, 16  ;;  %v14180_v14 = vpop.f32.mrf.mxu1  ;;  %v8045_v6 = vrot.slane %v8043_v43, 4  ;;  %v15522_v43 = vld [vmem:[#allocation81_spill] sm:$0xff] }
 0x528   :  { %v14169_v13 = vadd.f32 %v3964_v20, %v3276_v33  ;;  %v14176_v23 = vpop.f32.mrf.mxu0  ;;  %v8030_v20 = vshrl.u32 %v7345_v19, 16 }
 0x529   :  { %v8027_v18 = vrot.slane %v8025_v46, 5  ;;  %15516 = vst [vmem:[#allocation73_spill] sm:$0xff] %v14176_v23  ;;  %v8035_v46 = vrot.slane %v8033_v27, 5 }
 0x52a   :  { %15513 = vst [vmem:[#allocation135_spill] sm:$0xff] %v14169_v13  ;;  %10790 = vmatmul.msk.bf16.gmra.mxu0 %vm2617_vm8, %v8217_v8  ;;  %v8018_v8 = vsel %vm11282_vm11, %v8013_v12, %v8017_v21  ;;  %v8032_v36 = vrot.slane %v8030_v20, 4 }
 0x52b   :  { %v8028_v48 = vsel %vm11282_vm11, %v8023_v15, %v8027_v18  ;;  %v8181_v16 = vunpack.c.l.b16 %v8018_v8  ;;  %v11116_v15 = vld [vmem:[#allocation2 + $0x188] sm:$0x1]  ;;  %v15523_v8 = vld [vmem:[#allocation147_spill] sm:$0xff] }
 0x52c   :  { %v8036_v21 = vor.u32 %v8035_v46, %v8032_v36  ;;  %v8049_v18 = vshll.u32 %v11116_v15, 16  ;;  %v10960_v46 = vld [vmem:[#allocation2 + $0x30] sm:$0xff] }
 0x52e   :  { %v8037_v20 = vrot.slane %v8036_v21, 4 }
 0x52f   :  { %v3966_v42 = vpop.f32.mrf.mxu3 }
 0x530   :  { %v14178_v33 = vadd.f32 %v3966_v42, %v3278_v29  ;;  %v8041_v42 = vrot.slane %v8039_v54, 5  ;;  %v15519_v29 = vld [vmem:[#allocation143_spill] sm:$0xff]  ;;  %v8051_v54 = vrot.slane %v8049_v18, 5  ;;  %v15526_v18 = vld [vmem:[#allocation85_spill] sm:$0xff] }
 0x531   :  { %v3281_v19 = vadd.f32 %v15519_v29, %v15518_v44 }
 0x532   :  { %15517 = vst [vmem:[#allocation139_spill] sm:$0xff] %v14178_v33  ;;  %v8182_v33 = vunpack.c.l.b16 %v8028_v48  ;;  %v8046_v12 = vor.u32 %v8045_v6, %v8041_v42  ;;  %v3283_v48 = vadd.f32 %v15523_v8, %v15522_v43  ;;  %v8042_v36 = vsel %vm11282_vm11, %v8037_v20, %v8041_v42  ;;  %v15527_v43 = vld [vmem:[#allocation151_spill] sm:$0xff] }
 0x533   :  { %v3286_v8 = vadd.f32 %v15527_v43, %v15526_v18  ;;  %v8183_v42 = vunpack.c.l.b16 %v8042_v36 }
 0x534   :  { %10732 = vmatmul.msk.bf16.gmra.mxu3 %vm2617_vm8, %v10959_v45  ;;  %v14193_v45 = vpop.f32.mrf.mxu0  ;;  %v8218_v0 = vpack.c.b16 %v8182_v33, %v8181_v16  ;;  %v8047_v27 = vrot.slane %v8046_v12, 4  ;;  %v8818_v12 = vrot.slane %v13921_v58, 5 }
 0x535   :  { %15521 = vst [vmem:[#allocation143_spill] sm:$0xff] %v14193_v45  ;;  %v11118_v45 = vld [vmem:[#allocation2 + $0x194] sm:$0x1] }
 0x536   :  { %10846 = vmatmul.msk.bf16.gmra.mxu1 %vm2617_vm8, %v13323_v53  ;;  %v14196_v53 = vpop.f32.mrf.mxu1  ;;  %v8052_v33 = vsel %vm11282_vm11, %v8047_v27, %v8051_v54  ;;  %v8820_v58 = vrot.slane %v8818_v12, 4 }
 0x537   :  { %v3969_v13 = vpop.f32.mrf.mxu3  ;;  %v8184_v20 = vunpack.c.l.b16 %v8052_v33 }
 0x538   :  { %v14191_v23 = vadd.f32 %v3969_v13, %v3281_v19  ;;  %v7348_v13 = vld [vmem:[#allocation2 + $0x18c] sm:$0xf]  ;;  %v11117_v19 = vld [vmem:[#allocation2 + $0x190] sm:$0xf] }
 0x539   :  { %v8057_v6 = vshll.u32 %v7348_v13, 16  ;;  %v8063_v16 = vshll.u32 %v11117_v19, 16  ;;  %v8067_v21 = vshrl.u32 %v11117_v19, 16 }
 0x53a   :  { %15520 = vst [vmem:[#allocation77_spill] sm:$0xff] %v14191_v23  ;;  %10791 = vmatmul.msk.bf16.gmra.mxu0 %vm2617_vm8, %v8218_v0  ;;  %v8054_v0 = vshrl.u32 %v7348_v13, 16  ;;  %v8574_v23 = vld [vmem:[#allocation2 + $0x114] sm:$0xe] }
 0x53b   :  { %v8059_v54 = vrot.slane %v8057_v6, 5  ;;  %v10815_v36 = vrot.slane %v8574_v23, 9  ;;  %v15530_v6 = vld [vmem:[#allocation156_spill] sm:$0xff] }
 0x53c   :  { %v14207_v15 = vpop.f32.mrf.mxu0  ;;  %v8056_v27 = vrot.slane %v8054_v0, 4  ;;  %v15529_v0 = vld [vmem:[#allocation89_spill] sm:$0xff] }
 0x53d   :  { %15525 = vst [vmem:[#allocation147_spill] sm:$0xff] %v14207_v15  ;;  %v8219_v15 = vpack.c.b16 %v8184_v20, %v8183_v42 }
 0x53e   :  { %v14214_v13 = vpop.f32.mrf.mxu1  ;;  %v8060_v18 = vor.u32 %v8059_v54, %v8056_v27 }
 0x53f   :  { %v3971_v44 = vpop.f32.mrf.mxu3 }
 0x540   :  { %v14200_v29 = vadd.f32 %v3971_v44, %v3283_v48  ;;  %v8065_v48 = vrot.slane %v8063_v16, 5  ;;  %v8069_v44 = vrot.slane %v8067_v21, 4  ;;  %v3288_v16 = vadd.f32 %v15530_v6, %v15529_v0  ;;  %v15533_v6 = vld [vmem:[#allocation93_spill] sm:$0xff] }
 0x541   :  { %v8819_v21 = vsel %vm11316_vm15, %v10815_v36, %v8818_v12  ;;  %v8061_v42 = vrot.slane %v8060_v18, 4  ;;  %v8825_v0 = vrot.slane %v13969_v59, 5 }
 0x542   :  { %15524 = vst [vmem:[#allocation81_spill] sm:$0xff] %v14200_v29  ;;  %v8070_v43 = vor.u32 %v8069_v44, %v8065_v48  ;;  %v8947_v44 = vunpack.c.l.b16 %v8819_v21 }
 0x543   :  { %v8066_v12 = vsel %vm11282_vm11, %v8061_v42, %v8065_v48 }
 0x544   :  { %10733 = vmatmul.msk.bf16.gmra.mxu3 %vm2617_vm8, %v10960_v46  ;;  %v8821_v46 = vrot.slane %v13954_v63, 5  ;;  %v8071_v20 = vrot.slane %v8070_v43, 4 }
 0x546   :  { %10847 = vmatmul.msk.bf16.gmra.mxu1 %vm2617_vm8, %v13422_v4  ;;  %v8073_v4 = vshll.u32 %v11118_v45, 16  ;;  %v8822_v33 = vsel %vm11316_vm15, %v8820_v58, %v8821_v46  ;;  %v14228_v45 = vpop.f32.mrf.mxu2  ;;  %v10961_v58 = vld [vmem:[#allocation2 + $0x3c] sm:$0xff] }
 0x547   :  { %v3974_v19 = vpop.f32.mrf.mxu3  ;;  %v8948_v63 = vunpack.c.l.b16 %v8822_v33  ;;  %15531 = vst [vmem:[#allocation151_spill] sm:$0xff] %v14228_v45  ;;  %v8091_v33 = vshrl.u32 %v13932_v40, 16 }
 0x548   :  { %v14216_v29 = vadd.f32 %v3974_v19, %v3286_v8  ;;  %v14226_v8 = vpop.f32.mrf.mxu0  ;;  %v8075_v27 = vrot.slane %v8073_v4, 5  ;;  %v7351_v19 = vld [vmem:[#allocation2 + $0x198] sm:$0xf]  ;;  %v8087_v4 = vshll.u32 %v13932_v40, 16  ;;  %v8827_v40 = vrot.slane %v8825_v0, 4 }
 0x549   :  { %v8992_v46 = vpack.c.b16 %v8948_v63, %v8947_v44  ;;  %v8078_v18 = vshrl.u32 %v7351_v19, 16  ;;  %v8081_v43 = vshll.u32 %v7351_v19, 16  ;;  %v8185_v63 = vunpack.c.l.b16 %v8066_v12 }
 0x54a   :  { %15528 = vst [vmem:[#allocation85_spill] sm:$0xff] %v14216_v29  ;;  %10792 = vmatmul.msk.bf16.gmra.mxu0 %vm2617_vm8, %v8219_v15  ;;  %v14232_v15 = vpop.f32.mrf.mxu1  ;;  %v8076_v36 = vsel %vm11282_vm11, %v8071_v20, %v8075_v27  ;;  %v8089_v27 = vrot.slane %v8087_v4, 5  ;;  %v8093_v44 = vrot.slane %v8091_v33, 4  ;;  %v15536_v33 = vld [vmem:[#allocation97_spill] sm:$0xff] }
 0x54b   :  { %v8186_v48 = vunpack.c.l.b16 %v8076_v36  ;;  %v8083_v20 = vrot.slane %v8081_v43, 5 }
 0x54c   :  { %v8094_v36 = vor.u32 %v8093_v44, %v8089_v27 }
 0x54d   :  { %v8220_v59 = vpack.c.b16 %v8186_v48, %v8185_v63 }
 0x54e   :  { %v14249_v29 = vpop.f32.mrf.mxu2 }
 0x54f   :  { %v3976_v54 = vpop.f32.mrf.mxu3 }
 0x550   :  { %v14230_v23 = vadd.f32 %v3976_v54, %v3288_v16  ;;  %v15534_v16 = vld [vmem:[#allocation161_spill] sm:$0xff]  ;;  %v8080_v54 = vrot.slane %v8078_v18, 4  ;;  %v14245_v19 = vpop.f32.mrf.mxu0  ;;  %v8097_v18 = vshll.u32 %v13937_v26, 16 }
 0x551   :  { %v3291_v21 = vadd.f32 %v15534_v16, %v15533_v6  ;;  %v15537_v6 = vld [vmem:[#allocation165_spill] sm:$0xff] }
 0x552   :  { %15532 = vst [vmem:[#allocation89_spill] sm:$0xff] %v14230_v23  ;;  %v14252_v45 = vpop.f32.mrf.mxu1  ;;  %v8084_v12 = vor.u32 %v8083_v20, %v8080_v54  ;;  %v3293_v16 = vadd.f32 %v15537_v6, %v15536_v33  ;;  %v8099_v54 = vrot.slane %v8097_v18, 5  ;;  %v15540_v18 = vld [vmem:[#allocation169_spill] sm:$0xff] }
 0x554   :  { %10734 = vmatmul.msk.bf16.gmra.mxu3 %vm2617_vm8, %v10961_v58  ;;  %v8575_v58 = vld [vmem:[#allocation2 + $0x120] sm:$0xe]  ;;  %v8085_v48 = vrot.slane %v8084_v12, 4 }
 0x555   :  { %v10816_v43 = vrot.slane %v8575_v58, 9  ;;  %v10962_v58 = vld [vmem:[#allocation2 + $0x48] sm:$0xff] }
 0x556   :  { %10848 = vmatmul.msk.bf16.gmra.mxu1 %vm2617_vm8, %v8992_v46  ;;  %v8828_v46 = vrot.slane %v13989_v7, 5  ;;  %v14270_v33 = vpop.f32.mrf.mxu2 }
 0x557   :  { %v3979_v42 = vpop.f32.mrf.mxu3 }
 0x558   :  { %v14247_v23 = vadd.f32 %v3979_v42, %v3291_v21  ;;  %v8829_v4 = vsel %vm11316_vm15, %v8827_v40, %v8828_v46  ;;  %v8826_v21 = vsel %vm11316_vm15, %v10816_v43, %v8825_v0  ;;  %v8095_v42 = vrot.slane %v8094_v36, 4  ;;  %v14264_v44 = vpop.f32.mrf.mxu0  ;;  %v15539_v36 = vld [vmem:[#allocation101_spill] sm:$0xff] }
 0x559   :  { %v8950_v7 = vunpack.c.l.b16 %v8829_v4  ;;  %v8949_v26 = vunpack.c.l.b16 %v8826_v21  ;;  %v8090_v40 = vsel %vm11282_vm11, %v8085_v48, %v8089_v27  ;;  %v8832_v0 = vrot.slane %v14000_v32, 5 }
 0x55a   :  { %15535 = vst [vmem:[#allocation156_spill] sm:$0xff] %v14247_v23  ;;  %10793 = vmatmul.msk.bf16.gmra.mxu0 %vm2617_vm8, %v8220_v59  ;;  %v8100_v46 = vsel %vm11282_vm11, %v8095_v42, %v8099_v54  ;;  %v14274_v12 = vpop.f32.mrf.mxu1  ;;  %v3296_v43 = vadd.f32 %v15540_v18, %v15539_v36  ;;  %v8187_v4 = vunpack.c.l.b16 %v8090_v40  ;;  %v8835_v48 = vrot.slane %v14020_v9, 5  ;;  %v15567_v23 = vld [vmem:[#allocation12_spill] sm:$0xff] }
 0x55b   :  { %v8993_v59 = vpack.c.b16 %v8950_v7, %v8949_v26  ;;  %v8188_v6 = vunpack.c.l.b16 %v8100_v46  ;;  %v8834_v21 = vrot.slane %v8832_v0, 4  ;;  %v15542_v26 = vld [vmem:[#allocation105_spill] sm:$0xff] }
 0x55d   :  { %v8221_v7 = vpack.c.b16 %v8188_v6, %v8187_v4  ;;  %v8836_v54 = vsel %vm11316_vm15, %v8834_v21, %v8835_v48  ;;  %v10963_v6 = vld [vmem:[#allocation2 + $0x54] sm:$0xff] }
 0x55e   :  { %v14289_v40 = vpop.f32.mrf.mxu2  ;;  %v8952_v9 = vunpack.c.l.b16 %v8836_v54  ;;  %v15545_v21 = vld [vmem:[#allocation109_spill] sm:$0xff]  ;;  %v15548_v54 = vld [vmem:[#allocation114_spill] sm:$0xff] }
 0x55f   :  { %v3981_v63 = vpop.f32.mrf.mxu3 }
 0x560   :  { %v14262_v20 = vadd.f32 %v3981_v63, %v3293_v16  ;;  %v8576_v63 = vld [vmem:[#allocation2 + $0x12c] sm:$0xe]  ;;  %v14282_v42 = vpop.f32.mrf.mxu0 }
 0x561   :  { %v10817_v32 = vrot.slane %v8576_v63, 9  ;;  %v15546_v63 = vld [vmem:[#allocation177_spill] sm:$0xff] }
 0x562   :  { %15538 = vst [vmem:[#allocation93_spill] sm:$0xff] %v14262_v20  ;;  %v14293_v36 = vpop.f32.mrf.mxu1  ;;  %v15566_v20 = vld [vmem:[#allocation13_spill] sm:$0xff] }
 0x563   :  { %v8833_v46 = vsel %vm11316_vm15, %v10817_v32, %v8832_v0 }
 0x564   :  { %10735 = vmatmul.msk.bf16.gmra.mxu3 %vm2617_vm8, %v10962_v58  ;;  %v15543_v58 = vld [vmem:[#allocation173_spill] sm:$0xff]  ;;  %v8951_v4 = vunpack.c.l.b16 %v8833_v46 }
 0x566   :  { %10849 = vmatmul.msk.bf16.gmra.mxu1 %vm2617_vm8, %v8993_v59  ;;  %v3298_v59 = vadd.f32 %v15543_v58, %v15542_v26  ;;  %v14301_v26 = vpop.f32.mrf.mxu2  ;;  %v15549_v58 = vld [vmem:[#allocation181_spill] sm:$0xff] }
 0x567   :  { %v3984_v16 = vpop.f32.mrf.mxu3 }
 0x568   :  { %v14279_v27 = vadd.f32 %v3984_v16, %v3296_v43  ;;  %v8994_v16 = vpack.c.b16 %v8952_v9, %v8951_v4  ;;  %v10964_v4 = vld [vmem:[#allocation2 + $0x60] sm:$0xff] }
 0x56a   :  { %15541 = vst [vmem:[#allocation161_spill] sm:$0xff] %v14279_v27  ;;  %10794 = vmatmul.msk.bf16.gmra.mxu0 %vm2617_vm8, %v8221_v7  ;;  %v3301_v7 = vadd.f32 %v15546_v63, %v15545_v21  ;;  %v14305_v32 = vpop.f32.mrf.mxu1  ;;  %v15553_v21 = vld [vmem:[#allocation185_spill] sm:$0xff] }
 0x56e   :  { %v14311_v9 = vpop.f32.mrf.mxu2 }
 0x56f   :  { %v3986_v18 = vpop.f32.mrf.mxu3  ;;  %15551 = vst [vmem:[#allocation169_spill] sm:$0xff] %v14311_v9 }
 0x570   :  { %v14295_v43 = vadd.f32 %v3986_v18, %v3298_v59  ;;  %v3303_v59 = vadd.f32 %v15549_v58, %v15548_v54 }
 0x572   :  { %15544 = vst [vmem:[#allocation97_spill] sm:$0xff] %v14295_v43 }
 0x574   :  { %10736 = vmatmul.msk.bf16.gmra.mxu3 %vm2617_vm8, %v10963_v6  ;;  %v14313_v6 = vpop.f32.mrf.mxu1 }
 0x576   :  { %10850 = vmatmul.msk.bf16.gmra.mxu1 %vm2617_vm8, %v8994_v16  ;;  %v15552_v16 = vld [vmem:[#allocation118_spill] sm:$0xff]  ;;  %v14322_v54 = vpop.f32.mrf.mxu2 }
 0x577   :  { %v3989_v48 = vpop.f32.mrf.mxu3  ;;  %v3306_v63 = vadd.f32 %v15553_v21, %v15552_v16  ;;  %15555 = vst [vmem:[#allocation173_spill] sm:$0xff] %v14322_v54  ;;  %v15560_v16 = vld [vmem:[#allocation192_spill] sm:$0xff] }
 0x578   :  { %v14303_v0 = vadd.f32 %v3989_v48, %v3301_v7 }
 0x57a   :  { %15547 = vst [vmem:[#allocation165_spill] sm:$0xff] %v14303_v0 }
 0x57c   :  { %v14324_v58 = vpop.f32.mrf.mxu1 }
 0x57f   :  { %v3991_v46 = vpop.f32.mrf.mxu3 }
 0x580   :  { %v14309_v18 = vadd.f32 %v3991_v46, %v3303_v59  ;;  %v15556_v59 = vld [vmem:[#allocation123_spill] sm:$0xff]  ;;  %v15557_v46 = vld [vmem:[#allocation188_spill] sm:$0xff] }
 0x582   :  { %15550 = vst [vmem:[#allocation101_spill] sm:$0xff] %v14309_v18  ;;  %v3308_v18 = vadd.f32 %v15557_v46, %v15556_v59  ;;  %v15563_v59 = vld [vmem:[#allocation130_spill] sm:$0xff]  ;;  %v15564_v46 = vld [vmem:[#allocation196_spill] sm:$0xff] }
 0x584   :  { %10737 = vmatmul.msk.bf16.gmra.mxu3 %vm2617_vm8, %v10964_v4  ;;  %v10965_v4 = vld [vmem:[#allocation2 + $0x6c] sm:$0xff] }
 0x586   :  { %10851 = vmatmul.msk.bf16.gmra.mxu1 %vm2617_vm8, %v13649_v31  ;;  %v15559_v31 = vld [vmem:[#allocation126_spill] sm:$0xff] }
 0x587   :  { %v3994_v7 = vpop.f32.mrf.mxu3  ;;  %v3311_v21 = vadd.f32 %v15560_v16, %v15559_v31 }
 0x588   :  { %v14320_v48 = vadd.f32 %v3994_v7, %v3306_v63  ;;  %v14335_v63 = vpop.f32.mrf.mxu2  ;;  %v14337_v7 = vpop.f32.mrf.mxu1 }
 0x589   :  { %15561 = vst [vmem:[#allocation177_spill] sm:$0xff] %v14335_v63  ;;  %v15570_v63 = vld [vmem:[#allocation203_spill] sm:$0xff] }
 0x58a   :  { %15554 = vst [vmem:[#allocation105_spill] sm:$0xff] %v14320_v48 }
 0x58f   :  { %v3996_v0 = vpop.f32.mrf.mxu3 }
 0x590   :  { %v14328_v43 = vadd.f32 %v3996_v0, %v3308_v18  ;;  %v3313_v0 = vadd.f32 %v15564_v46, %v15563_v59  ;;  %v15565_v18 = vld [vmem:[#allocation27_spill] sm:$0xff]  ;;  %v14347_v54 = vpop.f32.mrf.mxu2  ;;  %v14351_v16 = vpop.f32.mrf.mxu1  ;;  %v15573_v46 = vld [vmem:[#allocation65_spill] sm:$0xff] }
 0x591   :  { %15568 = vst [vmem:[#allocation181_spill] sm:$0xff] %v14347_v54 }
 0x592   :  { %15558 = vst [vmem:[#allocation109_spill] sm:$0xff] %v14328_v43  ;;  %v4562_v43 = vadd.f32 %v15565_v18, %v13277_v24  ;;  %v15572_v24 = vld [vmem:[#allocation29_spill] sm:$0xff] }
 0x594   :  { %10738 = vmatmul.msk.bf16.gmra.mxu3 %vm2617_vm8, %v10965_v4 }
 0x596   :  { %10852 = vmatmul.msk.bf16.gmra.mxu1 %vm2617_vm8, %v13659_v41  ;;  %v3158_v41 = vadd.f32 %v15567_v23, %v15566_v20 }
 0x597   :  { %v3999_v48 = vpop.f32.mrf.mxu3 }
 0x598   :  { %v14339_v27 = vadd.f32 %v3999_v48, %v3311_v21  ;;  %v4005_v9 = vadd.f32 %v15570_v63, %v3158_v41  ;;  %v10966_v48 = vld [vmem:[#allocation2 + $0x78] sm:$0xff]  ;;  %v15571_v21 = vld [vmem:[#allocation67_spill] sm:$0xff]  ;;  %v14363_v54 = vpop.f32.mrf.mxu1 }
 0x599   :  { %v15576_v41 = vld [vmem:[#allocation31_spill] sm:$0xff] }
 0x59a   :  { %15562 = vst [vmem:[#allocation114_spill] sm:$0xff] %v14339_v27  ;;  %v5856_v27 = vadd.f32 %v15571_v21, %v4562_v43  ;;  %v4563_v59 = vadd.f32 %v15572_v24, %v4005_v9  ;;  %v15575_v43 = vld [vmem:[#allocation207_spill] sm:$0xff]  ;;  %v15577_v21 = vld [vmem:[#allocation68_spill] sm:$0xff] }
 0x59c   :  { %v6638_v23 = vadd.f32 %v15573_v46, %v5856_v27  ;;  %v14373_v27 = vld [vmem:[%s15111_s4] ss:$0 sm:$0xff]  ;;  %v10967_v46 = vld [vmem:[#allocation2 + $0x84] sm:$0xff] }
 0x59f   :  { %v4001_v4 = vpop.f32.mrf.mxu3 }
 0x5a0   :  { %v14349_v31 = vadd.f32 %v4001_v4, %v3313_v0  ;;  %v14360_v0 = vpop.f32.mrf.mxu2  ;;  %v15574_v4 = vld [vmem:[#allocation71_spill] sm:$0xff] }
 0x5a2   :  { %15569 = vst [vmem:[#allocation118_spill] sm:$0xff] %v14349_v31  ;;  %v5857_v31 = vadd.f32 %v15574_v4, %v4563_v59  ;;  %v15580_v4 = vld [vmem:[#allocation210_spill] sm:$0xff] }
 0x5a4   :  { %10739 = vmatmul.msk.bf16.gmra.mxu3 %vm2617_vm8, %v10966_v48  ;;  %v4564_v48 = vadd.f32 %v15576_v41, %v15575_v43  ;;  %v6639_v56 = vadd.f32 %v15577_v21, %v5857_v31  ;;  %v15582_v43 = vld [vmem:[#allocation72_spill] sm:$0xff] }
 0x5a6   :  { %10853 = vmatmul.msk.bf16.gmra.mxu1 %vm2617_vm8, %v13692_v3 }
 0x5a7   :  { %v7037_v20 = vpop.f32.mrf.mxu3 }
 0x5a8   :  { %v7197_v18 = vadd.f32 %v7037_v20, %v6638_v23  ;;  %v15578_v23 = vld [vmem:[#allocation75_spill] sm:$0xff] }
 0x5a9   :  { %v5858_v20 = vadd.f32 %v15578_v23, %v4564_v48 }
 0x5aa   :  { %v8491_v63 = vadd.f32 %v13607_v49, %v7197_v18  ;;  %v14377_v49 = vpop.f32.mrf.mxu2 }
 0x5ab   :  { %15579 = vst [vmem:[#allocation185_spill] sm:$0xff] %v14377_v49  ;;  %v6640_v41 = vadd.f32 %v15582_v43, %v5858_v20 }
 0x5ac   :  { %v9273_v9 = vadd.f32 %v13926_v60, %v8491_v63  ;;  %v14382_v60 = vpop.f32.mrf.mxu1 }
 0x5ae   :  { %v9341_v18 = vadd.f32 %v14373_v27, %v9273_v9 }
 0x5af   :  { %v7039_v3 = vpop.f32.mrf.mxu3 }
 0x5b0   :  { %v7198_v24 = vadd.f32 %v7039_v3, %v6639_v56  ;;  %v15581_v56 = vld [vmem:[#allocation33_spill] sm:$0xff]  ;;  %v9405_v21 = vmax.f32 %v9341_v18, 0.0 }
 0x5b1   :  { %v4565_v63 = vadd.f32 %v15581_v56, %v15580_v4  ;;  %v15585_v4 = vld [vmem:[#allocation76_spill] sm:$0xff] }
 0x5b2   :  { %v8492_v59 = vadd.f32 %v13625_v61, %v7198_v24  ;;  %v14395_v49 = vpop.f32.mrf.mxu2 }
 0x5b4   :  { %v9274_v31 = vadd.f32 %v13952_v28, %v8492_v59  ;;  %10740 = vmatmul.msk.bf16.gmra.mxu3 %vm2617_vm8, %v10967_v46  ;;  %v15583_v28 = vld [vmem:[#allocation79_spill] sm:$0xff]  ;;  %v14398_v56 = vpop.f32.mrf.mxu1 }
 0x5b5   :  { %v5859_v59 = vadd.f32 %v15583_v28, %v4565_v63  ;;  %v10968_v63 = vld [vmem:[#allocation2 + $0x90] sm:$0xff] }
 0x5b6   :  { %10854 = vmatmul.msk.bf16.gmra.mxu1 %vm2617_vm8, %v13736_v17  ;;  %v9342_v61 = vadd.f32 %v14373_v27, %v9274_v31  ;;  %v15584_v17 = vld [vmem:[#allocation35_spill] sm:$0xff] }
 0x5b7   :  { %v7042_v48 = vpop.f32.mrf.mxu3  ;;  %v4566_v23 = vadd.f32 %v15584_v17, %v13407_v50  ;;  %v6641_v31 = vadd.f32 %v15585_v4, %v5859_v59  ;;  %v15587_v50 = vld [vmem:[#allocation37_spill] sm:$0xff]  ;;  %v15589_v4 = vld [vmem:[#allocation87_spill] sm:$0xff] }
 0x5b8   :  { %v9406_v3 = vmax.f32 %v9342_v61, 0.0  ;;  %v7199_v9 = vadd.f32 %v7042_v48, %v6640_v41  ;;  %v15586_v41 = vld [vmem:[#allocation83_spill] sm:$0xff] }
 0x5ba   :  { %v9469_v24 = vpack.c.bf16 %v9406_v3, %v9405_v21  ;;  %v8493_v46 = vadd.f32 %v13643_v52, %v7199_v9  ;;  %v5860_v52 = vadd.f32 %v15586_v41, %v4566_v23  ;;  %v4567_v3 = vadd.f32 %v15587_v50, %v13438_v1  ;;  %v15588_v9 = vld [vmem:[#allocation80_spill] sm:$0xff]  ;;  %v14412_v28 = vpop.f32.mrf.mxu2  ;;  %v15590_v1 = vld [vmem:[#allocation39_spill] sm:$0xff] }
 0x5bb   :  { %v15592_v50 = vld [vmem:[#allocation91_spill] sm:$0xff] }
 0x5bc   :  { %10861 = vmatmul.msk.bf16.vlgmr.msra.gmra.mxu2 %vm2617_vm8, %v9469_v24  ;;  %v9275_v18 = vadd.f32 %v13971_v10, %v8493_v46  ;;  %v6642_v24 = vadd.f32 %v15588_v9, %v5860_v52  ;;  %v14414_v23 = vpop.f32.mrf.mxu1 }
 0x5be   :  { %v9343_v48 = vadd.f32 %v14373_v27, %v9275_v18  ;;  %v15591_v18 = vld [vmem:[#allocation84_spill] sm:$0xff] }
 0x5bf   :  { %v7044_v20 = vpop.f32.mrf.mxu3 }
 0x5c0   :  { %v7200_v61 = vadd.f32 %v7044_v20, %v6641_v31  ;;  %v9407_v59 = vmax.f32 %v9343_v48, 0.0  ;;  %v5861_v31 = vadd.f32 %v15589_v4, %v4567_v3  ;;  %v4568_v20 = vadd.f32 %v15590_v1, %v13460_v11  ;;  %v15593_v11 = vld [vmem:[#allocation223_spill] sm:$0xff] }
 0x5c2   :  { %v8494_v43 = vadd.f32 %v13664_v38, %v7200_v61  ;;  %v6643_v61 = vadd.f32 %v15591_v18, %v5861_v31  ;;  %v14423_v52 = vpop.f32.mrf.mxu2  ;;  %v5862_v3 = vadd.f32 %v15592_v50, %v4568_v20  ;;  %v15597_v20 = vld [vmem:[#allocation252_spill] sm:$0xff]  ;;  %v15601_v50 = vld [vmem:[#allocation281_spill] sm:$0xff] }
 0x5c4   :  { %v9276_v21 = vadd.f32 %v13987_v57, %v8494_v43  ;;  %10741 = vmatmul.msk.bf16.gmra.mxu3 %vm2617_vm8, %v10968_v63 }
 0x5c6   :  { %10855 = vmatmul.msk.bf16.gmra.mxu1 %vm2617_vm8, %v13758_v34  ;;  %v9344_v10 = vadd.f32 %v14373_v27, %v9276_v21  ;;  %v10969_v21 = vld [vmem:[#allocation2 + $0x9c] sm:$0xff] }
 0x5c7   :  { %v7047_v38 = vpop.f32.mrf.mxu3 }
 0x5c8   :  { %v9408_v46 = vmax.f32 %v9344_v10, 0.0  ;;  %v7201_v17 = vadd.f32 %v7047_v38, %v6642_v24  ;;  %v14427_v10 = vpop.f32.mrf.mxu1 }
 0x5ca   :  { %v9470_v57 = vpack.c.bf16 %v9408_v46, %v9407_v59  ;;  %v8495_v34 = vadd.f32 %v13679_v2, %v7201_v17 }
 0x5cc   :  { %10862 = vmatmul.msk.bf16.gmra.mxu2 %vm2617_vm8, %v9470_v57  ;;  %v9277_v63 = vadd.f32 %v14004_v30, %v8495_v34  ;;  %v15594_v30 = vld [vmem:[#allocation41_spill] sm:$0xff]  ;;  %v15596_v34 = vld [vmem:[#allocation95_spill] sm:$0xff] }
 0x5cd   :  { %v4569_v24 = vadd.f32 %v15594_v30, %v15593_v11  ;;  %v10970_v30 = vld [vmem:[#allocation2 + $0xa8] sm:$0xff] }
 0x5ce   :  { %v9345_v2 = vadd.f32 %v14373_v27, %v9277_v63 }
 0x5cf   :  { %v7049_v43 = vpop.f32.mrf.mxu3  ;;  %v5863_v1 = vadd.f32 %v15596_v34, %v4569_v24  ;;  %v15603_v24 = vld [vmem:[#allocation99_spill] sm:$0xff] }
 0x5d0   :  { %v7202_v41 = vadd.f32 %v7049_v43, %v6643_v61  ;;  %v9409_v17 = vmax.f32 %v9345_v2, 0.0  ;;  %v15598_v61 = vld [vmem:[#allocation226_spill] sm:$0xff]  ;;  %v15599_v43 = vld [vmem:[#allocation43_spill] sm:$0xff] }
 0x5d1   :  { %v4570_v63 = vadd.f32 %v15599_v43, %v15598_v61 }
 0x5d2   :  { %v8496_v48 = vadd.f32 %v13697_v35, %v7202_v41  ;;  %v15595_v35 = vld [vmem:[#allocation88_spill] sm:$0xff] }
 0x5d3   :  { %v6644_v59 = vadd.f32 %v15595_v35, %v5862_v3  ;;  %v15600_v41 = vld [vmem:[#allocation92_spill] sm:$0xff] }
 0x5d4   :  { %v9278_v9 = vadd.f32 %v14018_v22, %v8496_v48  ;;  %10742 = vmatmul.msk.bf16.gmra.mxu3 %vm2617_vm8, %v10969_v21  ;;  %v14439_v22 = vpop.f32.mrf.mxu2  ;;  %v6645_v48 = vadd.f32 %v15600_v41, %v5863_v1 }
 0x5d6   :  { %10856 = vmatmul.msk.bf16.gmra.mxu1 %vm2617_vm8, %v13799_v37  ;;  %v9346_v38 = vadd.f32 %v14373_v27, %v9278_v9  ;;  %v14443_v37 = vpop.f32.mrf.mxu1  ;;  %v15602_v9 = vld [vmem:[#allocation254_spill] sm:$0xff] }
 0x5d7   :  { %v7052_v46 = vpop.f32.mrf.mxu3 }
 0x5d8   :  { %v9410_v57 = vmax.f32 %v9346_v38, 0.0  ;;  %v7203_v4 = vadd.f32 %v7052_v46, %v6644_v59  ;;  %v5864_v38 = vadd.f32 %v15603_v24, %v4570_v63  ;;  %v15604_v59 = vld [vmem:[#allocation282_spill] sm:$0xff] }
 0x5da   :  { %v9471_v31 = vpack.c.bf16 %v9410_v57, %v9409_v17  ;;  %v8497_v18 = vadd.f32 %v15597_v20, %v7203_v4  ;;  %v15605_v17 = vld [vmem:[#allocation265_spill] sm:$0xff]  ;;  %v15606_v57 = vld [vmem:[#allocation230_spill] sm:$0xff]  ;;  %v15609_v20 = vld [vmem:[#allocation96_spill] sm:$0xff] }
 0x5db   :  { %v15607_v4 = vld [vmem:[#allocation45_spill] sm:$0xff] }
 0x5dc   :  { %10863 = vmatmul.msk.bf16.gmra.mxu2 %vm2617_vm8, %v9471_v31  ;;  %v9279_v3 = vadd.f32 %v15601_v50, %v8497_v18  ;;  %v4571_v31 = vadd.f32 %v15607_v4, %v15606_v57  ;;  %v14458_v34 = vpop.f32.mrf.mxu2  ;;  %v6646_v18 = vadd.f32 %v15609_v20, %v5864_v38  ;;  %v15610_v50 = vld [vmem:[#allocation103_spill] sm:$0xff]  ;;  %v15615_v38 = vld [vmem:[#allocation284_spill] sm:$0xff] }
 0x5dd   :  { %15608 = vst [vmem:[#allocation123_spill] sm:$0xff] %v14458_v34  ;;  %v15642_v34 = vld [vmem:[#allocation117_spill] sm:$0xff] }
 0x5de   :  { %v9347_v35 = vadd.f32 %v14373_v27, %v9279_v3  ;;  %v14462_v61 = vpop.f32.mrf.mxu1  ;;  %v5865_v3 = vadd.f32 %v15610_v50, %v4571_v31  ;;  %v10971_v31 = vld [vmem:[#allocation2 + $0xb4] sm:$0xff] }
 0x5df   :  { %v7054_v21 = vpop.f32.mrf.mxu3  ;;  %v15620_v50 = vld [vmem:[#allocation238_spill] sm:$0xff] }
 0x5e0   :  { %v7204_v2 = vadd.f32 %v7054_v21, %v6645_v48  ;;  %v9411_v63 = vmax.f32 %v9347_v35, 0.0 }
 0x5e2   :  { %v8498_v11 = vadd.f32 %v15602_v9, %v7204_v2  ;;  %v15611_v2 = vld [vmem:[#allocation257_spill] sm:$0xff] }
 0x5e4   :  { %v9280_v46 = vadd.f32 %v15604_v59, %v8498_v11  ;;  %10743 = vmatmul.msk.bf16.gmra.mxu3 %vm2617_vm8, %v10970_v30  ;;  %v15612_v11 = vld [vmem:[#allocation234_spill] sm:$0xff]  ;;  %v15613_v30 = vld [vmem:[#allocation47_spill] sm:$0xff]  ;;  %v15614_v59 = vld [vmem:[#allocation100_spill] sm:$0xff]  ;;  %v14471_v20 = vpop.f32.mrf.mxu2 }
 0x5e5   :  { %v4572_v24 = vadd.f32 %v15613_v30, %v15612_v11  ;;  %15616 = vst [vmem:[#allocation188_spill] sm:$0xff] %v14471_v20  ;;  %v15622_v11 = vld [vmem:[#allocation104_spill] sm:$0xff] }
 0x5e6   :  { %10857 = vmatmul.msk.bf16.gmra.mxu1 %vm2617_vm8, %v15605_v17  ;;  %v9348_v1 = vadd.f32 %v14373_v27, %v9280_v46  ;;  %v6647_v46 = vadd.f32 %v15614_v59, %v5865_v3  ;;  %v14473_v35 = vpop.f32.mrf.mxu1  ;;  %v15621_v3 = vld [vmem:[#allocation49_spill] sm:$0xff] }
 0x5e7   :  { %v7057_v43 = vpop.f32.mrf.mxu3 }
 0x5e8   :  { %v9412_v41 = vmax.f32 %v9348_v1, 0.0  ;;  %v7205_v48 = vadd.f32 %v7057_v43, %v6646_v18  ;;  %v15617_v1 = vld [vmem:[#allocation259_spill] sm:$0xff] }
 0x5e9   :  { %v15618_v43 = vld [vmem:[#allocation107_spill] sm:$0xff] }
 0x5ea   :  { %v9472_v21 = vpack.c.bf16 %v9412_v41, %v9411_v63  ;;  %v8499_v9 = vadd.f32 %v15611_v2, %v7205_v48  ;;  %v5866_v63 = vadd.f32 %v15618_v43, %v4572_v24  ;;  %v4573_v2 = vadd.f32 %v15621_v3, %v15620_v50  ;;  %v15626_v43 = vld [vmem:[#allocation242_spill] sm:$0xff]  ;;  %v15628_v50 = vld [vmem:[#allocation108_spill] sm:$0xff] }
 0x5ec   :  { %10864 = vmatmul.msk.bf16.gmra.mxu2 %vm2617_vm8, %v9472_v21  ;;  %v9281_v57 = vadd.f32 %v15615_v38, %v8499_v9  ;;  %v15619_v21 = vld [vmem:[#allocation270_spill] sm:$0xff]  ;;  %v6648_v30 = vadd.f32 %v15622_v11, %v5866_v63 }
 0x5ee   :  { %v9349_v41 = vadd.f32 %v14373_v27, %v9281_v57  ;;  %v15623_v57 = vld [vmem:[#allocation111_spill] sm:$0xff] }
 0x5ef   :  { %v7059_v17 = vpop.f32.mrf.mxu3 }
 0x5f0   :  { %v7206_v4 = vadd.f32 %v7059_v17, %v6647_v46  ;;  %v9413_v46 = vmax.f32 %v9349_v41, 0.0  ;;  %v15629_v41 = vld [vmem:[#allocation160_spill] sm:$0xff] }
 0x5f2   :  { %v8500_v18 = vadd.f32 %v15617_v1, %v7206_v4  ;;  %v5867_v4 = vadd.f32 %v15623_v57, %v4573_v2  ;;  %v14489_v1 = vpop.f32.mrf.mxu1  ;;  %v10972_v2 = vld [vmem:[#allocation2 + $0xc0] sm:$0xff] }
 0x5f4   :  { %v9282_v48 = vadd.f32 %v14078_v47, %v8500_v18  ;;  %10744 = vmatmul.msk.bf16.gmra.mxu3 %vm2617_vm8, %v10971_v31  ;;  %v14487_v47 = vpop.f32.mrf.mxu2  ;;  %v15625_v18 = vld [vmem:[#allocation261_spill] sm:$0xff]  ;;  %v6649_v63 = vadd.f32 %v15628_v50, %v5867_v4  ;;  %v15634_v4 = vld [vmem:[#allocation34_spill] sm:$0xff] }
 0x5f5   :  { %15624 = vst [vmem:[#allocation126_spill] sm:$0xff] %v14487_v47  ;;  %v15632_v47 = vld [vmem:[#allocation287_spill] sm:$0xff] }
 0x5f6   :  { %10858 = vmatmul.msk.bf16.gmra.mxu1 %vm2617_vm8, %v15619_v21  ;;  %v9350_v9 = vadd.f32 %v14373_v27, %v9282_v48  ;;  %v15627_v21 = vld [vmem:[#allocation51_spill] sm:$0xff] }
 0x5f7   :  { %v7062_v59 = vpop.f32.mrf.mxu3  ;;  %v4574_v48 = vadd.f32 %v15627_v21, %v15626_v43  ;;  %v15636_v43 = vld [vmem:[#allocation53_spill] sm:$0xff] }
 0x5f8   :  { %v9414_v17 = vmax.f32 %v9350_v9, 0.0  ;;  %v7207_v24 = vadd.f32 %v7062_v59, %v6648_v30  ;;  %v15630_v30 = vld [vmem:[#allocation263_spill] sm:$0xff] }
 0x5fa   :  { %v9473_v38 = vpack.c.bf16 %v9414_v17, %v9413_v46  ;;  %v8501_v31 = vadd.f32 %v15625_v18, %v7207_v24  ;;  %v15631_v46 = vld [vmem:[#allocation116_spill] sm:$0xff]  ;;  %v14504_v18 = vpop.f32.mrf.mxu1 }
 0x5fb   :  { %v5868_v17 = vadd.f32 %v15631_v46, %v4574_v48 }
 0x5fc   :  { %10865 = vmatmul.msk.bf16.gmra.mxu2 %vm2617_vm8, %v9473_v38  ;;  %v9283_v9 = vadd.f32 %v15629_v41, %v8501_v31  ;;  %v14502_v38 = vpop.f32.mrf.mxu2  ;;  %v15635_v31 = vld [vmem:[#allocation244_spill] sm:$0xff] }
 0x5fd   :  { %15633 = vst [vmem:[#allocation192_spill] sm:$0xff] %v14502_v38  ;;  %v4575_v21 = vadd.f32 %v15636_v43, %v15635_v31  ;;  %v15640_v38 = vld [vmem:[#allocation246_spill] sm:$0xff] }
 0x5fe   :  { %v9351_v57 = vadd.f32 %v14373_v27, %v9283_v9 }
 0x5ff   :  { %v7064_v3 = vpop.f32.mrf.mxu3 }
 0x600   :  { %v7208_v11 = vadd.f32 %v7064_v3, %v6649_v63  ;;  %v15637_v63 = vld [vmem:[#allocation113_spill] sm:$0xff]  ;;  %v9415_v41 = vmax.f32 %v9351_v57, 0.0 }
 0x601   :  { %v6650_v48 = vadd.f32 %v15637_v63, %v5868_v17  ;;  %v15643_v63 = vld [vmem:[#allocation269_spill] sm:$0xff] }
 0x602   :  { %v8502_v59 = vadd.f32 %v15630_v30, %v7208_v11  ;;  %v15638_v30 = vld [vmem:[#allocation120_spill] sm:$0xff] }
 0x604   :  { %v9284_v24 = vadd.f32 %v15632_v47, %v8502_v59  ;;  %10745 = vmatmul.msk.bf16.gmra.mxu3 %vm2617_vm8, %v10972_v2  ;;  %v5869_v59 = vadd.f32 %v15638_v30, %v4575_v21  ;;  %v15639_v2 = vld [vmem:[#allocation266_spill] sm:$0xff]  ;;  %v14518_v43 = vpop.f32.mrf.mxu2 }
 0x605   :  { %v15647_v30 = vld [vmem:[#allocation122_spill] sm:$0xff] }
 0x606   :  { %10859 = vmatmul.msk.bf16.gmra.mxu1 %vm2617_vm8, %v15634_v4  ;;  %v9352_v50 = vadd.f32 %v14373_v27, %v9284_v24  ;;  %v15641_v4 = vld [vmem:[#allocation55_spill] sm:$0xff]  ;;  %v6651_v31 = vadd.f32 %v15642_v34, %v5869_v59 }
 0x607   :  { %v7067_v3 = vpop.f32.mrf.mxu3  ;;  %v4576_v20 = vadd.f32 %v15641_v4, %v15640_v38  ;;  %v15645_v38 = vld [vmem:[#allocation248_spill] sm:$0xff] }
 0x608   :  { %v9416_v9 = vmax.f32 %v9352_v50, 0.0  ;;  %v7209_v47 = vadd.f32 %v7067_v3, %v6650_v48  ;;  %v10973_v50 = vld [vmem:[#allocation2 + $0xcc] sm:$0xff] }
 0x609   :  { %v15644_v3 = vld [vmem:[#allocation125_spill] sm:$0xff] }
 0x60a   :  { %v9474_v11 = vpack.c.bf16 %v9416_v9, %v9415_v41  ;;  %v8503_v46 = vadd.f32 %v15639_v2, %v7209_v47  ;;  %v5870_v21 = vadd.f32 %v15644_v3, %v4576_v20  ;;  %v15646_v47 = vld [vmem:[#allocation57_spill] sm:$0xff]  ;;  %v15652_v3 = vld [vmem:[#allocation127_spill] sm:$0xff] }
 0x60b   :  { %v4577_v34 = vadd.f32 %v15646_v47, %v15645_v38  ;;  %v15653_v47 = vld [vmem:[#allocation274_spill] sm:$0xff] }
 0x60c   :  { %10866 = vmatmul.msk.bf16.gmra.mxu2 %vm2617_vm8, %v9474_v11  ;;  %v9285_v17 = vadd.f32 %v14127_v55, %v8503_v46  ;;  %v6652_v59 = vadd.f32 %v15647_v30, %v5870_v21  ;;  %v10974_v30 = vld [vmem:[#allocation2 + $0xf0] sm:$0xff] }
 0x60e   :  { %v9353_v41 = vadd.f32 %v14373_v27, %v9285_v17 }
 0x60f   :  { %v7069_v24 = vpop.f32.mrf.mxu3 }
 0x610   :  { %v7210_v57 = vadd.f32 %v7069_v24, %v6651_v31  ;;  %v9417_v2 = vmax.f32 %v9353_v41, 0.0  ;;  %v14530_v31 = vpop.f32.mrf.mxu2  ;;  %v15648_v24 = vld [vmem:[#allocation129_spill] sm:$0xff] }
 0x611   :  { %v5871_v17 = vadd.f32 %v15648_v24, %v4577_v34 }
 0x612   :  { %v8504_v48 = vadd.f32 %v15643_v63, %v7210_v57  ;;  %v15649_v57 = vld [vmem:[#allocation272_spill] sm:$0xff]  ;;  %v15651_v63 = vld [vmem:[#allocation59_spill] sm:$0xff] }
 0x614   :  { %v9286_v9 = vadd.f32 %v14144_v51, %v8504_v48  ;;  %10746 = vmatmul.msk.bf16.gmra.mxu3 %vm2617_vm8, %v10973_v50  ;;  %v15650_v50 = vld [vmem:[#allocation14_spill] sm:$0xff] }
 0x615   :  { %v4578_v48 = vadd.f32 %v15651_v63, %v15650_v50 }
 0x616   :  { %v9354_v11 = vadd.f32 %v14373_v27, %v9286_v9  ;;  %v6653_v9 = vadd.f32 %v15652_v3, %v5871_v17 }
 0x617   :  { %v7072_v55 = vpop.f32.mrf.mxu3 }
 0x618   :  { %v9418_v46 = vmax.f32 %v9354_v11, 0.0  ;;  %v7211_v4 = vadd.f32 %v7072_v55, %v6652_v59  ;;  %v15654_v59 = vld [vmem:[#allocation133_spill] sm:$0xff] }
 0x619   :  { %v5872_v55 = vadd.f32 %v15654_v59, %v4578_v48  ;;  %v15662_v59 = vld [vmem:[#allocation138_spill] sm:$0xff] }
 0x61a   :  { %v9475_v20 = vpack.c.bf16 %v9418_v46, %v9417_v2  ;;  %v8505_v51 = vadd.f32 %v15649_v57, %v7211_v4  ;;  %v14541_v2 = vpop.f32.mrf.mxu2  ;;  %v15655_v4 = vld [vmem:[#allocation15_spill] sm:$0xff] }
 0x61c   :  { %10867 = vmatmul.msk.bf16.gmra.mxu2 %vm2617_vm8, %v9475_v20  ;;  %v9287_v21 = vadd.f32 %v14153_v62, %v8505_v51  ;;  %v15656_v20 = vld [vmem:[#allocation61_spill] sm:$0xff]  ;;  %v15657_v62 = vld [vmem:[#allocation132_spill] sm:$0xff] }
 0x61d   :  { %v4579_v24 = vadd.f32 %v15656_v20, %v15655_v4  ;;  %v6654_v57 = vadd.f32 %v15657_v62, %v5872_v55  ;;  %v15663_v20 = vld [vmem:[#allocation278_spill] sm:$0xff] }
 0x61e   :  { %v9355_v34 = vadd.f32 %v14373_v27, %v9287_v21  ;;  %v10975_v62 = vld [vmem:[#allocation2 + $0xfc] sm:$0xff] }
 0x61f   :  { %v7074_v38 = vpop.f32.mrf.mxu3 }
 0x620   :  { %v7212_v41 = vadd.f32 %v7074_v38, %v6653_v9  ;;  %v9419_v50 = vmax.f32 %v9355_v34, 0.0  ;;  %v15658_v9 = vld [vmem:[#allocation137_spill] sm:$0xff] }
 0x621   :  { %v5873_v38 = vadd.f32 %v15658_v9, %v4579_v24 }
 0x622   :  { %v8506_v11 = vadd.f32 %v15653_v47, %v7212_v41  ;;  %v15659_v41 = vld [vmem:[#allocation276_spill] sm:$0xff] }
 0x623   :  { %v15660_v47 = vld [vmem:[#allocation16_spill] sm:$0xff] }
 0x624   :  { %v9288_v46 = vadd.f32 %v14171_v5, %v8506_v11  ;;  %10747 = vmatmul.msk.bf16.gmra.mxu3 %vm2617_vm8, %v10974_v30  ;;  %v14553_v5 = vpop.f32.mrf.mxu2  ;;  %v15661_v11 = vld [vmem:[#allocation63_spill] sm:$0xff] }
 0x625   :  { %v4580_v30 = vadd.f32 %v15661_v11, %v15660_v47 }
 0x626   :  { %v9356_v17 = vadd.f32 %v14373_v27, %v9288_v46  ;;  %v6655_v46 = vadd.f32 %v15662_v59, %v5873_v38  ;;  %v15667_v38 = vld [vmem:[#allocation142_spill] sm:$0xff] }
 0x627   :  { %v7077_v51 = vpop.f32.mrf.mxu3 }
 0x628   :  { %v9420_v63 = vmax.f32 %v9356_v17, 0.0  ;;  %v7213_v3 = vadd.f32 %v7077_v51, %v6654_v57  ;;  %v15664_v57 = vld [vmem:[#allocation141_spill] sm:$0xff] }
 0x629   :  { %v5874_v24 = vadd.f32 %v15664_v57, %v4580_v30  ;;  %v15672_v57 = vld [vmem:[#allocation148_spill] sm:$0xff] }
 0x62a   :  { %v9476_v48 = vpack.c.bf16 %v9420_v63, %v9419_v50  ;;  %v8507_v21 = vadd.f32 %v15659_v41, %v7213_v3  ;;  %v15665_v63 = vld [vmem:[#allocation17_spill] sm:$0xff]  ;;  %v15666_v3 = vld [vmem:[#allocation66_spill] sm:$0xff] }
 0x62b   :  { %v6656_v41 = vadd.f32 %v15667_v38, %v5874_v24  ;;  %v15673_v38 = vld [vmem:[#allocation121_spill] sm:$0xff] }
 0x62c   :  { %10868 = vmatmul.msk.bf16.gmra.mxu2 %vm2617_vm8, %v9476_v48  ;;  %v9289_v55 = vadd.f32 %v14180_v14, %v8507_v21  ;;  %v4581_v48 = vadd.f32 %v15666_v3, %v15665_v63  ;;  %v14568_v14 = vpop.f32.mrf.mxu2  ;;  %v9774_v63 = vld [vmem:[#allocation3] sm:$0xff] }
 0x62e   :  { %v9357_v51 = vadd.f32 %v14373_v27, %v9289_v55  ;;  %v15669_v55 = vld [vmem:[#allocation279_spill] sm:$0xff] }
 0x62f   :  { %v7079_v4 = vpop.f32.mrf.mxu3 }
 0x630   :  { %v7214_v34 = vadd.f32 %v7079_v4, %v6655_v46  ;;  %v9421_v47 = vmax.f32 %v9357_v51, 0.0  ;;  %v15668_v46 = vld [vmem:[#allocation145_spill] sm:$0xff] }
 0x631   :  { %v5875_v4 = vadd.f32 %v15668_v46, %v4581_v48 }
 0x632   :  { %v8508_v17 = vadd.f32 %v15663_v20, %v7214_v34  ;;  %v14576_v34 = vld [vmem:[%s15113_s6] ss:$0 sm:$0xff]  ;;  %v15670_v20 = vld [vmem:[#allocation18_spill] sm:$0xff] }
 0x633   :  { %v6657_v24 = vadd.f32 %v15672_v57, %v5875_v4  ;;  %v15675_v4 = vld [vmem:[#allocation19_spill] sm:$0xff] }
 0x634   :  { %v9290_v50 = vadd.f32 %v14196_v53, %v8508_v17  ;;  %10748 = vmatmul.msk.bf16.gmra.mxu3 %vm2617_vm8, %v10975_v62  ;;  %v15671_v17 = vld [vmem:[#allocation70_spill] sm:$0xff] }
 0x635   :  { %v4582_v62 = vadd.f32 %v15671_v17, %v15670_v20  ;;  %v15676_v20 = vld [vmem:[#allocation74_spill] sm:$0xff] }
 0x636   :  { %v9358_v9 = vadd.f32 %v14373_v27, %v9290_v50  ;;  %v4583_v17 = vadd.f32 %v15676_v20, %v15675_v4  ;;  %v15682_v4 = vld [vmem:[#allocation159_spill] sm:$0xff] }
 0x637   :  { %v7082_v21 = vpop.f32.mrf.mxu3 }
 0x638   :  { %v9422_v11 = vmax.f32 %v9358_v9, 0.0  ;;  %v7215_v59 = vadd.f32 %v7082_v21, %v6656_v41 }
 0x63a   :  { %v9477_v30 = vpack.c.bf16 %v9422_v11, %v9421_v47  ;;  %v8509_v53 = vadd.f32 %v15669_v55, %v7215_v59  ;;  %v10976_v47 = vld [vmem:[#allocation2 + $0x108] sm:$0xff]  ;;  %v15674_v11 = vld [vmem:[#allocation150_spill] sm:$0xff] }
 0x63b   :  { %v5876_v59 = vadd.f32 %v15674_v11, %v4582_v62 }
 0x63c   :  { %10869 = vmatmul.msk.bf16.gmra.mxu2 %vm2617_vm8, %v9477_v30  ;;  %v9291_v3 = vadd.f32 %v14214_v13, %v8509_v53  ;;  %v15677_v53 = vld [vmem:[#allocation153_spill] sm:$0xff] }
 0x63d   :  { %v6658_v57 = vadd.f32 %v15677_v53, %v5876_v59  ;;  %v9776_v53 = vld [vmem:[#allocation3 + $0x10] sm:$0xff] }
 0x63e   :  { %v9359_v30 = vadd.f32 %v14373_v27, %v9291_v3 }
 0x63f   :  { %v7084_v51 = vpop.f32.mrf.mxu3  ;;  %v9614_v50 = vpop.f32.mrf.mxu2 }
 0x640   :  { %v7216_v48 = vadd.f32 %v7084_v51, %v6657_v24  ;;  %v9615_v9 = vadd.f32 %v14576_v34, %v9614_v50  ;;  %v9775_v50 = vld [vmem:[#allocation3 + $0x8] sm:$0xff]  ;;  %v9423_v62 = vmax.f32 %v9359_v30, 0.0 }
 0x642   :  { %v8510_v41 = vadd.f32 %v15673_v38, %v7216_v48  ;;  %v9838_v21 = vadd.f32 %v9774_v63, %v9615_v9  ;;  %v15678_v38 = vld [vmem:[#allocation154_spill] sm:$0xff] }
 0x644   :  { %v9292_v46 = vadd.f32 %v14232_v15, %v8510_v41  ;;  %v9902_v55 = vmax.f32 %v9838_v21, 0.0  ;;  %10749 = vmatmul.msk.bf16.gmra.mxu3 %vm2617_vm8, %v10976_v47  ;;  %v5877_v41 = vadd.f32 %v15678_v38, %v4583_v17  ;;  %v15679_v21 = vld [vmem:[#allocation280_spill] sm:$0xff] }
 0x646   :  { %v9360_v13 = vadd.f32 %v14373_v27, %v9292_v46  ;;  %9966 = vst.msk [vmem:[#allocation6] sm:$0xff] %vm388_vm0, %v9902_v55  ;;  %v15680_v46 = vld [vmem:[#allocation20_spill] sm:$0xff]  ;;  %v15681_v55 = vld [vmem:[#allocation78_spill] sm:$0xff]  ;;  %v6659_v30 = vadd.f32 %v15682_v4, %v5877_v41  ;;  %v15685_v41 = vld [vmem:[#allocation21_spill] sm:$0xff] }
 0x647   :  { %v7087_v24 = vpop.f32.mrf.mxu3  ;;  %v9616_v51 = vpop.f32.mrf.mxu2  ;;  %v4584_v59 = vadd.f32 %v15681_v55, %v15680_v46 }
 0x648   :  { %v9424_v63 = vmax.f32 %v9360_v13, 0.0  ;;  %v7217_v3 = vadd.f32 %v7087_v24, %v6658_v57  ;;  %v9617_v15 = vadd.f32 %v14576_v34, %v9616_v51  ;;  %v15683_v51 = vld [vmem:[#allocation42_spill] sm:$0xff] }
 0x64a   :  { %v9839_v48 = vadd.f32 %v9775_v50, %v9617_v15  ;;  %v9478_v9 = vpack.c.bf16 %v9424_v63, %v9423_v62  ;;  %v8511_v47 = vadd.f32 %v15679_v21, %v7217_v3  ;;  %v10977_v63 = vld [vmem:[#allocation2 + $0x114] sm:$0xff] }
 0x64b   :  { %v15684_v3 = vld [vmem:[#allocation158_spill] sm:$0xff] }
 0x64c   :  { %v9903_v11 = vmax.f32 %v9839_v48, 0.0  ;;  %10870 = vmatmul.msk.bf16.gmra.mxu2 %vm2617_vm8, %v9478_v9  ;;  %v9293_v57 = vadd.f32 %v14252_v45, %v8511_v47  ;;  %v5878_v15 = vadd.f32 %v15684_v3, %v4584_v59  ;;  %v15686_v21 = vld [vmem:[#allocation82_spill] sm:$0xff]  ;;  %v15687_v47 = vld [vmem:[#allocation164_spill] sm:$0xff] }
 0x64d   :  { %v15691_v3 = vld [vmem:[#allocation86_spill] sm:$0xff] }
 0x64e   :  { %9967 = vst.msk [vmem:[#allocation6 + $0x8] sm:$0xff] %vm388_vm0, %v9903_v11  ;;  %v9361_v48 = vadd.f32 %v14373_v27, %v9293_v57  ;;  %v4585_v11 = vadd.f32 %v15686_v21, %v15685_v41  ;;  %v6660_v46 = vadd.f32 %v15687_v47, %v5878_v15  ;;  %v9778_v21 = vld [vmem:[#allocation3 + $0x20] sm:$0xff] }
 0x64f   :  { %v7089_v20 = vpop.f32.mrf.mxu3  ;;  %v9619_v13 = vpop.f32.mrf.mxu2 }
 0x650   :  { %v7218_v24 = vadd.f32 %v7089_v20, %v6659_v30  ;;  %v9620_v17 = vadd.f32 %v14576_v34, %v9619_v13  ;;  %v9777_v30 = vld [vmem:[#allocation3 + $0x18] sm:$0xff]  ;;  %v9425_v59 = vmax.f32 %v9361_v48, 0.0 }
 0x652   :  { %v8512_v50 = vadd.f32 %v15683_v51, %v7218_v24  ;;  %v9840_v62 = vadd.f32 %v9776_v53, %v9620_v17  ;;  %v15688_v24 = vld [vmem:[#allocation163_spill] sm:$0xff]  ;;  %v15689_v51 = vld [vmem:[#allocation146_spill] sm:$0xff] }
 0x653   :  { %v5879_v17 = vadd.f32 %v15688_v24, %v4585_v11  ;;  %v15696_v24 = vld [vmem:[#allocation90_spill] sm:$0xff] }
 0x654   :  { %v9294_v9 = vadd.f32 %v14274_v12, %v8512_v50  ;;  %v9904_v38 = vmax.f32 %v9840_v62, 0.0  ;;  %10750 = vmatmul.msk.bf16.gmra.mxu3 %vm2617_vm8, %v10977_v63  ;;  %v15690_v63 = vld [vmem:[#allocation22_spill] sm:$0xff] }
 0x655   :  { %v4586_v15 = vadd.f32 %v15691_v3, %v15690_v63  ;;  %v9779_v3 = vld [vmem:[#allocation3 + $0x28] sm:$0xff] }
 0x656   :  { %v9362_v45 = vadd.f32 %v14373_v27, %v9294_v9  ;;  %9968 = vst.msk [vmem:[#allocation6 + $0x10] sm:$0xff] %vm388_vm0, %v9904_v38  ;;  %v15692_v9 = vld [vmem:[#allocation170_spill] sm:$0xff] }
 0x657   :  { %v7092_v55 = vpop.f32.mrf.mxu3  ;;  %v9621_v4 = vpop.f32.mrf.mxu2  ;;  %v6661_v48 = vadd.f32 %v15692_v9, %v5879_v17 }
 0x658   :  { %v9426_v20 = vmax.f32 %v9362_v45, 0.0  ;;  %v7219_v13 = vadd.f32 %v7092_v55, %v6660_v46  ;;  %v9622_v12 = vadd.f32 %v14576_v34, %v9621_v4  ;;  %v15693_v46 = vld [vmem:[#allocation283_spill] sm:$0xff] }
 0x65a   :  { %v9841_v53 = vadd.f32 %v9777_v30, %v9622_v12  ;;  %v9479_v57 = vpack.c.bf16 %v9426_v20, %v9425_v59  ;;  %v8513_v50 = vadd.f32 %v15689_v51, %v7219_v13  ;;  %v10978_v30 = vld [vmem:[#allocation2 + $0x120] sm:$0xff] }
 0x65b   :  { %v15694_v59 = vld [vmem:[#allocation167_spill] sm:$0xff] }
 0x65c   :  { %v9905_v62 = vmax.f32 %v9841_v53, 0.0  ;;  %10871 = vmatmul.msk.bf16.gmra.mxu2 %vm2617_vm8, %v9479_v57  ;;  %v9295_v45 = vadd.f32 %v14293_v36, %v8513_v50  ;;  %v5880_v20 = vadd.f32 %v15694_v59, %v4586_v15  ;;  %v15695_v57 = vld [vmem:[#allocation23_spill] sm:$0xff]  ;;  %v15702_v59 = vld [vmem:[#allocation180_spill] sm:$0xff] }
 0x65d   :  { %v4587_v17 = vadd.f32 %v15696_v24, %v15695_v57  ;;  %v15697_v51 = vld [vmem:[#allocation175_spill] sm:$0xff] }
 0x65e   :  { %9969 = vst.msk [vmem:[#allocation6 + $0x18] sm:$0xff] %vm388_vm0, %v9905_v62  ;;  %v9363_v13 = vadd.f32 %v14373_v27, %v9295_v45  ;;  %v6662_v50 = vadd.f32 %v15697_v51, %v5880_v20 }
 0x65f   :  { %v7094_v38 = vpop.f32.mrf.mxu3  ;;  %v9624_v41 = vpop.f32.mrf.mxu2 }
 0x660   :  { %v7220_v47 = vadd.f32 %v7094_v38, %v6661_v48  ;;  %v9625_v11 = vadd.f32 %v14576_v34, %v9624_v41  ;;  %v9427_v15 = vmax.f32 %v9363_v13, 0.0 }
 0x662   :  { %v8514_v55 = vadd.f32 %v15693_v46, %v7220_v47  ;;  %v9842_v4 = vadd.f32 %v9778_v21, %v9625_v11  ;;  %v15698_v21 = vld [vmem:[#allocation172_spill] sm:$0xff]  ;;  %v15699_v47 = vld [vmem:[#allocation50_spill] sm:$0xff] }
 0x663   :  { %v5881_v45 = vadd.f32 %v15698_v21, %v4587_v17  ;;  %v15707_v21 = vld [vmem:[#allocation184_spill] sm:$0xff] }
 0x664   :  { %v9296_v12 = vadd.f32 %v14305_v32, %v8514_v55  ;;  %v9906_v53 = vmax.f32 %v9842_v4, 0.0  ;;  %10751 = vmatmul.msk.bf16.gmra.mxu3 %vm2617_vm8, %v10978_v30  ;;  %v15700_v55 = vld [vmem:[#allocation24_spill] sm:$0xff]  ;;  %v15701_v4 = vld [vmem:[#allocation94_spill] sm:$0xff] }
 0x665   :  { %v4588_v30 = vadd.f32 %v15701_v4, %v15700_v55  ;;  %v6663_v20 = vadd.f32 %v15702_v59, %v5881_v45 }
 0x666   :  { %v9364_v36 = vadd.f32 %v14373_v27, %v9296_v12  ;;  %9970 = vst.msk [vmem:[#allocation6 + $0x20] sm:$0xff] %vm388_vm0, %v9906_v53  ;;  %v9780_v53 = vld [vmem:[#allocation3 + $0x30] sm:$0xff] }
 0x667   :  { %v7097_v62 = vpop.f32.mrf.mxu3  ;;  %v9626_v63 = vpop.f32.mrf.mxu2 }
 0x668   :  { %v9428_v9 = vmax.f32 %v9364_v36, 0.0  ;;  %v7221_v48 = vadd.f32 %v7097_v62, %v6662_v50  ;;  %v9627_v32 = vadd.f32 %v14576_v34, %v9626_v63  ;;  %v15703_v36 = vld [vmem:[#allocation285_spill] sm:$0xff]  ;;  %v15704_v63 = vld [vmem:[#allocation176_spill] sm:$0xff] }
 0x669   :  { %v10979_v62 = vld [vmem:[#allocation2 + $0x12c] sm:$0xff] }
 0x66a   :  { %v9843_v38 = vadd.f32 %v9779_v3, %v9627_v32  ;;  %v9480_v41 = vpack.c.bf16 %v9428_v9, %v9427_v15  ;;  %v8515_v11 = vadd.f32 %v15699_v47, %v7221_v48  ;;  %v5882_v3 = vadd.f32 %v15704_v63, %v4588_v30  ;;  %v15705_v32 = vld [vmem:[#allocation25_spill] sm:$0xff] }
 0x66c   :  { %v9907_v46 = vmax.f32 %v9843_v38, 0.0  ;;  %10872 = vmatmul.msk.bf16.gmra.mxu2 %vm2617_vm8, %v9480_v41  ;;  %v9297_v57 = vadd.f32 %v14313_v6, %v8515_v11  ;;  %v15706_v38 = vld [vmem:[#allocation98_spill] sm:$0xff]  ;;  %v6664_v45 = vadd.f32 %v15707_v21, %v5882_v3  ;;  %v15713_v21 = vld [vmem:[#allocation183_spill] sm:$0xff] }
 0x66d   :  { %v4589_v41 = vadd.f32 %v15706_v38, %v15705_v32 }
 0x66e   :  { %9971 = vst.msk [vmem:[#allocation6 + $0x28] sm:$0xff] %vm388_vm0, %v9907_v46  ;;  %v9365_v15 = vadd.f32 %v14373_v27, %v9297_v57  ;;  %v9781_v46 = vld [vmem:[#allocation3 + $0x38] sm:$0xff] }
 0x66f   :  { %v7099_v13 = vpop.f32.mrf.mxu3  ;;  %v9629_v12 = vpop.f32.mrf.mxu2 }
 0x670   :  { %v7222_v24 = vadd.f32 %v7099_v13, %v6663_v20  ;;  %v9630_v17 = vadd.f32 %v14576_v34, %v9629_v12  ;;  %v9429_v55 = vmax.f32 %v9365_v15, 0.0  ;;  %v15708_v13 = vld [vmem:[#allocation179_spill] sm:$0xff]  ;;  %v9782_v15 = vld [vmem:[#allocation3 + $0x40] sm:$0xff] }
 0x671   :  { %v5883_v12 = vadd.f32 %v15708_v13, %v4589_v41  ;;  %v9783_v13 = vld [vmem:[#allocation3 + $0x48] sm:$0xff] }
 0x672   :  { %v8516_v51 = vadd.f32 %v15703_v36, %v7222_v24  ;;  %v9844_v50 = vadd.f32 %v9780_v53, %v9630_v17  ;;  %v15709_v53 = vld [vmem:[#allocation286_spill] sm:$0xff] }
 0x673   :  { %v15710_v17 = vld [vmem:[#allocation26_spill] sm:$0xff] }
 0x674   :  { %v9298_v9 = vadd.f32 %v14324_v58, %v8516_v51  ;;  %v9908_v48 = vmax.f32 %v9844_v50, 0.0  ;;  %10752 = vmatmul.msk.bf16.gmra.mxu3 %vm2617_vm8, %v10979_v62  ;;  %v15711_v36 = vld [vmem:[#allocation102_spill] sm:$0xff]  ;;  %v15712_v50 = vld [vmem:[#allocation189_spill] sm:$0xff] }
 0x675   :  { %v4590_v51 = vadd.f32 %v15711_v36, %v15710_v17  ;;  %v6665_v62 = vadd.f32 %v15712_v50, %v5883_v12  ;;  %v15717_v36 = vld [vmem:[#allocation187_spill] sm:$0xff]  ;;  %v15718_v50 = vld [vmem:[#allocation60_spill] sm:$0xff] }
 0x676   :  { %v9366_v6 = vadd.f32 %v14373_v27, %v9298_v9  ;;  %9972 = vst.msk [vmem:[#allocation6 + $0x30] sm:$0xff] %vm388_vm0, %v9908_v48 }
 0x677   :  { %v7102_v47 = vpop.f32.mrf.mxu3  ;;  %v9631_v11 = vpop.f32.mrf.mxu2 }
 0x678   :  { %v9430_v4 = vmax.f32 %v9366_v6, 0.0  ;;  %v7223_v30 = vadd.f32 %v7102_v47, %v6664_v45  ;;  %v9632_v58 = vadd.f32 %v14576_v34, %v9631_v11  ;;  %v10980_v6 = vld [vmem:[#allocation2 + $0x138] sm:$0xff]  ;;  %v5884_v45 = vadd.f32 %v15713_v21, %v4590_v51 }
 0x67a   :  { %v9845_v59 = vadd.f32 %v9781_v46, %v9632_v58  ;;  %v9481_v20 = vpack.c.bf16 %v9430_v4, %v9429_v55  ;;  %v8517_v57 = vadd.f32 %v15709_v53, %v7223_v30  ;;  %v15714_v55 = vld [vmem:[#allocation28_spill] sm:$0xff]  ;;  %v15715_v4 = vld [vmem:[#allocation106_spill] sm:$0xff] }
 0x67b   :  { %v4591_v30 = vadd.f32 %v15715_v4, %v15714_v55  ;;  %v15716_v58 = vld [vmem:[#allocation194_spill] sm:$0xff]  ;;  %v10981_v4 = vld [vmem:[#allocation2 + $0x144] sm:$0xff] }
 0x67c   :  { %v9909_v24 = vmax.f32 %v9845_v59, 0.0  ;;  %10873 = vmatmul.msk.bf16.gmra.mxu2 %vm2617_vm8, %v9481_v20  ;;  %v9299_v9 = vadd.f32 %v14337_v7, %v8517_v57 }
 0x67d   :  { %v5885_v51 = vadd.f32 %v15717_v36, %v4591_v30  ;;  %v15723_v30 = vld [vmem:[#allocation191_spill] sm:$0xff] }
 0x67e   :  { %9973 = vst.msk [vmem:[#allocation6 + $0x38] sm:$0xff] %vm388_vm0, %v9909_v24  ;;  %v9367_v47 = vadd.f32 %v14373_v27, %v9299_v9 }
 0x67f   :  { %v7104_v63 = vpop.f32.mrf.mxu3  ;;  %v9634_v3 = vpop.f32.mrf.mxu2 }
 0x680   :  { %v7224_v48 = vadd.f32 %v7104_v63, %v6665_v62  ;;  %v9635_v32 = vadd.f32 %v14576_v34, %v9634_v3  ;;  %v9431_v12 = vmax.f32 %v9367_v47, 0.0  ;;  %v15719_v3 = vld [vmem:[#allocation30_spill] sm:$0xff] }
 0x682   :  { %v8518_v38 = vadd.f32 %v14118_v39, %v7224_v48  ;;  %v9846_v41 = vadd.f32 %v9782_v15, %v9635_v32  ;;  %v6666_v39 = vadd.f32 %v15716_v58, %v5884_v45  ;;  %v15720_v15 = vld [vmem:[#allocation110_spill] sm:$0xff]  ;;  %v15721_v48 = vld [vmem:[#allocation199_spill] sm:$0xff] }
 0x683   :  { %v4592_v9 = vadd.f32 %v15720_v15, %v15719_v3  ;;  %v6667_v32 = vadd.f32 %v15721_v48, %v5885_v51  ;;  %v15727_v3 = vld [vmem:[#allocation195_spill] sm:$0xff] }
 0x684   :  { %v9300_v11 = vadd.f32 %v14351_v16, %v8518_v38  ;;  %v9910_v46 = vmax.f32 %v9846_v41, 0.0  ;;  %10753 = vmatmul.msk.bf16.gmra.mxu3 %vm2617_vm8, %v10980_v6  ;;  %v9784_v6 = vld [vmem:[#allocation3 + $0x50] sm:$0xff] }
 0x686   :  { %v9368_v7 = vadd.f32 %v14373_v27, %v9300_v11  ;;  %9974 = vst.msk [vmem:[#allocation6 + $0x40] sm:$0xff] %vm388_vm0, %v9910_v46  ;;  %v15722_v11 = vld [vmem:[#allocation288_spill] sm:$0xff] }
 0x687   :  { %v7107_v59 = vpop.f32.mrf.mxu3  ;;  %v9636_v20 = vpop.f32.mrf.mxu2 }
 0x688   :  { %v9432_v53 = vmax.f32 %v9368_v7, 0.0  ;;  %v7225_v57 = vadd.f32 %v7107_v59, %v6666_v39  ;;  %v9637_v16 = vadd.f32 %v14576_v34, %v9636_v20  ;;  %v5886_v7 = vadd.f32 %v15723_v30, %v4592_v9  ;;  %v15724_v20 = vld [vmem:[#allocation32_spill] sm:$0xff]  ;;  %v15728_v9 = vld [vmem:[#allocation69_spill] sm:$0xff] }
 0x68a   :  { %v9847_v24 = vadd.f32 %v9783_v13, %v9637_v16  ;;  %v9482_v17 = vpack.c.bf16 %v9432_v53, %v9431_v12  ;;  %v8519_v62 = vadd.f32 %v15718_v50, %v7225_v57  ;;  %v15725_v13 = vld [vmem:[#allocation115_spill] sm:$0xff]  ;;  %v15726_v53 = vld [vmem:[#allocation202_spill] sm:$0xff] }
 0x68b   :  { %v4593_v12 = vadd.f32 %v15725_v13, %v15724_v20  ;;  %v6668_v57 = vadd.f32 %v15726_v53, %v5886_v7  ;;  %v15732_v7 = vld [vmem:[#allocation73_spill] sm:$0xff]  ;;  %v15733_v20 = vld [vmem:[#allocation198_spill] sm:$0xff] }
 0x68c   :  { %v9911_v63 = vmax.f32 %v9847_v24, 0.0  ;;  %10874 = vmatmul.msk.bf16.gmra.mxu2 %vm2617_vm8, %v9482_v17  ;;  %v9301_v21 = vadd.f32 %v14363_v54, %v8519_v62  ;;  %v9785_v17 = vld [vmem:[#allocation3 + $0x58] sm:$0xff] }
 0x68d   :  { %v5887_v15 = vadd.f32 %v15727_v3, %v4593_v12 }
 0x68e   :  { %9975 = vst.msk [vmem:[#allocation6 + $0x48] sm:$0xff] %vm388_vm0, %v9911_v63  ;;  %v9369_v58 = vadd.f32 %v14373_v27, %v9301_v21  ;;  %v15731_v21 = vld [vmem:[#allocation206_spill] sm:$0xff] }
 0x68f   :  { %v7109_v38 = vpop.f32.mrf.mxu3  ;;  %v9639_v41 = vpop.f32.mrf.mxu2 }
 0x690   :  { %v7226_v45 = vadd.f32 %v7109_v38, %v6667_v32  ;;  %v9640_v47 = vadd.f32 %v14576_v34, %v9639_v41  ;;  %v9433_v36 = vmax.f32 %v9369_v58, 0.0  ;;  %v15729_v38 = vld [vmem:[#allocation112_spill] sm:$0xff]  ;;  %v15730_v41 = vld [vmem:[#allocation119_spill] sm:$0xff] }
 0x692   :  { %v8520_v46 = vadd.f32 %v15722_v11, %v7226_v45  ;;  %v9848_v55 = vadd.f32 %v9784_v6, %v9640_v47  ;;  %v4594_v6 = vadd.f32 %v15730_v41, %v15729_v38  ;;  %v6669_v45 = vadd.f32 %v15731_v21, %v5887_v15  ;;  %v15737_v38 = vld [vmem:[#allocation201_spill] sm:$0xff] }
 0x694   :  { %v9302_v39 = vadd.f32 %v14382_v60, %v8520_v46  ;;  %v9912_v59 = vmax.f32 %v9848_v55, 0.0  ;;  %10754 = vmatmul.msk.bf16.gmra.mxu3 %vm2617_vm8, %v10981_v4  ;;  %v9786_v46 = vld [vmem:[#allocation3 + $0x60] sm:$0xff]  ;;  %v5888_v13 = vadd.f32 %v15733_v20, %v4594_v6  ;;  %v15738_v6 = vld [vmem:[#allocation143_spill] sm:$0xff] }
 0x696   :  { %v9370_v54 = vadd.f32 %v14373_v27, %v9302_v39  ;;  %9976 = vst.msk [vmem:[#allocation6 + $0x50] sm:$0xff] %vm388_vm0, %v9912_v59  ;;  %v10982_v59 = vld [vmem:[#allocation2 + $0x150] sm:$0xff] }
 0x697   :  { %v7112_v16 = vpop.f32.mrf.mxu3  ;;  %v9641_v24 = vpop.f32.mrf.mxu2 }
 0x698   :  { %v9434_v51 = vmax.f32 %v9370_v54, 0.0  ;;  %v7227_v50 = vadd.f32 %v7112_v16, %v6668_v57  ;;  %v9642_v60 = vadd.f32 %v14576_v34, %v9641_v24  ;;  %v15734_v57 = vld [vmem:[#allocation36_spill] sm:$0xff] }
 0x699   :  { %v15735_v16 = vld [vmem:[#allocation124_spill] sm:$0xff] }
 0x69a   :  { %v9849_v62 = vadd.f32 %v9785_v17, %v9642_v60  ;;  %v9483_v63 = vpack.c.bf16 %v9434_v51, %v9433_v36  ;;  %v8521_v48 = vadd.f32 %v15728_v9, %v7227_v50  ;;  %v4595_v24 = vadd.f32 %v15735_v16, %v15734_v57  ;;  %v15736_v17 = vld [vmem:[#allocation212_spill] sm:$0xff]  ;;  %v9787_v60 = vld [vmem:[#allocation3 + $0x68] sm:$0xff]  ;;  %v14716_v9 = vpop.f32.mrf.mxu1  ;;  %v15743_v16 = vld [vmem:[#allocation205_spill] sm:$0xff] }
 0x69b   :  { %v6670_v36 = vadd.f32 %v15736_v17, %v5888_v13  ;;  %v10983_v57 = vld [vmem:[#allocation2 + $0x15c] sm:$0xff] }
 0x69c   :  { %v9913_v32 = vmax.f32 %v9849_v62, 0.0  ;;  %10875 = vmatmul.msk.bf16.gmra.mxu2 %vm2617_vm8, %v9483_v63  ;;  %v9303_v55 = vadd.f32 %v14398_v56, %v8521_v48  ;;  %v14713_v62 = vpop.f32.mrf.mxu0  ;;  %v5889_v41 = vadd.f32 %v15737_v38, %v4595_v24 }
 0x69e   :  { %9977 = vst.msk [vmem:[#allocation6 + $0x58] sm:$0xff] %vm388_vm0, %v9913_v32  ;;  %v9371_v12 = vadd.f32 %v14373_v27, %v9303_v55  ;;  %v15741_v55 = vld [vmem:[#allocation216_spill] sm:$0xff] }
 0x69f   :  { %v7114_v47 = vpop.f32.mrf.mxu3  ;;  %v9644_v11 = vpop.f32.mrf.mxu2 }
 0x6a0   :  { %v7228_v4 = vadd.f32 %v7114_v47, %v6669_v45  ;;  %v9645_v30 = vadd.f32 %v14576_v34, %v9644_v11  ;;  %v9435_v63 = vmax.f32 %v9371_v12, 0.0  ;;  %v15739_v47 = vld [vmem:[#allocation38_spill] sm:$0xff]  ;;  %v15740_v11 = vld [vmem:[#allocation128_spill] sm:$0xff]  ;;  %v15742_v12 = vld [vmem:[#allocation147_spill] sm:$0xff] }
 0x6a2   :  { %v8522_v58 = vadd.f32 %v15732_v7, %v7228_v4  ;;  %v9850_v39 = vadd.f32 %v9786_v46, %v9645_v30  ;;  %v4596_v46 = vadd.f32 %v15740_v11, %v15739_v47  ;;  %v6671_v4 = vadd.f32 %v15741_v55, %v5889_v41  ;;  %v15747_v47 = vld [vmem:[#allocation209_spill] sm:$0xff] }
 0x6a4   :  { %v9304_v54 = vadd.f32 %v14414_v23, %v8522_v58  ;;  %v9914_v53 = vmax.f32 %v9850_v39, 0.0  ;;  %10755 = vmatmul.msk.bf16.gmra.mxu3 %vm2617_vm8, %v10982_v59  ;;  %v9788_v58 = vld [vmem:[#allocation3 + $0x70] sm:$0xff]  ;;  %v14727_v13 = vpop.f32.mrf.mxu0  ;;  %v5890_v24 = vadd.f32 %v15743_v16, %v4596_v46 }
 0x6a6   :  { %v9372_v56 = vadd.f32 %v14373_v27, %v9304_v54  ;;  %9978 = vst.msk [vmem:[#allocation6 + $0x60] sm:$0xff] %vm388_vm0, %v9914_v53 }
 0x6a7   :  { %v7117_v51 = vpop.f32.mrf.mxu3  ;;  %v9646_v50 = vpop.f32.mrf.mxu2 }
 0x6a8   :  { %v9436_v3 = vmax.f32 %v9372_v56, 0.0  ;;  %v7229_v23 = vadd.f32 %v7117_v51, %v6670_v36  ;;  %v9647_v15 = vadd.f32 %v14576_v34, %v9646_v50  ;;  %v14731_v56 = vpop.f32.mrf.mxu1  ;;  %v15745_v50 = vld [vmem:[#allocation131_spill] sm:$0xff] }
 0x6aa   :  { %v9851_v48 = vadd.f32 %v9787_v60, %v9647_v15  ;;  %v9484_v32 = vpack.c.bf16 %v9436_v3, %v9435_v63  ;;  %v8523_v21 = vadd.f32 %v15738_v6, %v7229_v23  ;;  %v15746_v3 = vld [vmem:[#allocation219_spill] sm:$0xff] }
 0x6ab   :  { %v6672_v23 = vadd.f32 %v15746_v3, %v5890_v24  ;;  %v15753_v3 = vld [vmem:[#allocation140_spill] sm:$0xff] }
 0x6ac   :  { %v9915_v45 = vmax.f32 %v9851_v48, 0.0  ;;  %10876 = vmatmul.msk.bf16.gmra.mxu2 %vm2617_vm8, %v9484_v32  ;;  %v9305_v39 = vadd.f32 %v14427_v10, %v8523_v21  ;;  %v15744_v10 = vld [vmem:[#allocation40_spill] sm:$0xff]  ;;  %v14743_v46 = vpop.f32.mrf.mxu0 }
 0x6ad   :  { %v4597_v60 = vadd.f32 %v15745_v50, %v15744_v10  ;;  %v9789_v32 = vld [vmem:[#allocation3 + $0x78] sm:$0xff]  ;;  %v14760_v10 = vld [vmem:[%s15111_s4] ss:$0 sm:$0xff] }
 0x6ae   :  { %9979 = vst.msk [vmem:[#allocation6 + $0x68] sm:$0xff] %vm388_vm0, %v9915_v45  ;;  %v9373_v17 = vadd.f32 %v14373_v27, %v9305_v39  ;;  %v15750_v39 = vld [vmem:[#allocation222_spill] sm:$0xff] }
 0x6af   :  { %v7119_v30 = vpop.f32.mrf.mxu3  ;;  %v9649_v7 = vpop.f32.mrf.mxu2  ;;  %v5891_v11 = vadd.f32 %v15747_v47, %v4597_v60 }
 0x6b0   :  { %v7230_v59 = vadd.f32 %v7119_v30, %v6671_v4  ;;  %v9650_v20 = vadd.f32 %v14576_v34, %v9649_v7  ;;  %v9437_v38 = vmax.f32 %v9373_v17, 0.0  ;;  %v15748_v4 = vld [vmem:[#allocation134_spill] sm:$0xff]  ;;  %v15749_v30 = vld [vmem:[#allocation136_spill] sm:$0xff] }
 0x6b1   :  { %v4598_v7 = vadd.f32 %v15749_v30, %v15748_v4  ;;  %v10984_v17 = vld [vmem:[#allocation2 + $0x168] sm:$0xff] }
 0x6b2   :  { %v8524_v54 = vadd.f32 %v15742_v12, %v7230_v59  ;;  %v9852_v53 = vadd.f32 %v9788_v58, %v9650_v20  ;;  %v14749_v58 = vpop.f32.mrf.mxu1  ;;  %v6673_v59 = vadd.f32 %v15750_v39, %v5891_v11  ;;  %v15756_v39 = vld [vmem:[#allocation46_spill] sm:$0xff] }
 0x6b4   :  { %v9306_v36 = vadd.f32 %v14443_v37, %v8524_v54  ;;  %v9916_v51 = vmax.f32 %v9852_v53, 0.0  ;;  %10756 = vmatmul.msk.bf16.gmra.mxu3 %vm2617_vm8, %v10983_v57  ;;  %v9790_v54 = vld [vmem:[#allocation3 + $0x80] sm:$0xff] }
 0x6b6   :  { %v9374_v63 = vadd.f32 %v14373_v27, %v9306_v36  ;;  %9980 = vst.msk [vmem:[#allocation6 + $0x70] sm:$0xff] %vm388_vm0, %v9916_v51  ;;  %v15751_v36 = vld [vmem:[#allocation213_spill] sm:$0xff] }
 0x6b7   :  { %v7122_v15 = vpop.f32.mrf.mxu3  ;;  %v9651_v48 = vpop.f32.mrf.mxu2  ;;  %v5892_v51 = vadd.f32 %v15751_v36, %v4598_v7 }
 0x6b8   :  { %v9438_v41 = vmax.f32 %v9374_v63, 0.0  ;;  %v7231_v6 = vadd.f32 %v7122_v15, %v6672_v23  ;;  %v9652_v37 = vadd.f32 %v14576_v34, %v9651_v48  ;;  %v15754_v48 = vld [vmem:[#allocation228_spill] sm:$0xff] }
 0x6ba   :  { %v9853_v21 = vadd.f32 %v9789_v32, %v9652_v37  ;;  %v9485_v45 = vpack.c.bf16 %v9438_v41, %v9437_v38  ;;  %v8525_v27 = vadd.f32 %v14226_v8, %v7231_v6  ;;  %v6674_v32 = vadd.f32 %v15754_v48, %v5892_v51  ;;  %v9791_v6 = vld [vmem:[#allocation3 + $0x88] sm:$0xff]  ;;  %v14772_v37 = vpop.f32.mrf.mxu1  ;;  %v15760_v48 = vld [vmem:[#allocation48_spill] sm:$0xff] }
 0x6bc   :  { %v9917_v55 = vmax.f32 %v9853_v21, 0.0  ;;  %10877 = vmatmul.msk.bf16.gmra.mxu2 %vm2617_vm8, %v9485_v45  ;;  %v9307_v53 = vadd.f32 %v14462_v61, %v8525_v27  ;;  %v15752_v61 = vld [vmem:[#allocation44_spill] sm:$0xff] }
 0x6bd   :  { %v4599_v23 = vadd.f32 %v15753_v3, %v15752_v61 }
 0x6be   :  { %9981 = vst.msk [vmem:[#allocation6 + $0x78] sm:$0xff] %vm388_vm0, %v9917_v55  ;;  %v9375_v50 = vadd.f32 %v14760_v10, %v9307_v53  ;;  %v15755_v55 = vld [vmem:[#allocation215_spill] sm:$0xff] }
 0x6bf   :  { %v7124_v20 = vpop.f32.mrf.mxu3  ;;  %v9654_v12 = vpop.f32.mrf.mxu2  ;;  %v5893_v4 = vadd.f32 %v15755_v55, %v4599_v23 }
 0x6c0   :  { %v7232_v57 = vadd.f32 %v7124_v20, %v6673_v59  ;;  %v9655_v8 = vadd.f32 %v14576_v34, %v9654_v12  ;;  %v15757_v59 = vld [vmem:[#allocation144_spill] sm:$0xff]  ;;  %v15758_v12 = vld [vmem:[#allocation233_spill] sm:$0xff] }
 0x6c1   :  { %v4600_v20 = vadd.f32 %v15757_v59, %v15756_v39 }
 0x6c2   :  { %v8526_v16 = vadd.f32 %v14245_v19, %v7232_v57  ;;  %v9854_v24 = vadd.f32 %v9790_v54, %v9655_v8  ;;  %v14767_v19 = vpop.f32.mrf.mxu0  ;;  %v6675_v54 = vadd.f32 %v15758_v12, %v5893_v4  ;;  %v9792_v8 = vld [vmem:[#allocation3 + $0x90] sm:$0xff]  ;;  %v14786_v36 = vpop.f32.mrf.mxu1 }
 0x6c3   :  { %v15764_v12 = vld [vmem:[#allocation155_spill] sm:$0xff] }
 0x6c4   :  { %v9308_v60 = vadd.f32 %v14473_v35, %v8526_v16  ;;  %v9918_v63 = vmax.f32 %v9854_v24, 0.0  ;;  %10757 = vmatmul.msk.bf16.gmra.mxu3 %vm2617_vm8, %v10984_v17  ;;  %v9439_v35 = vmax.f32 %v9375_v50, 0.0 }
 0x6c6   :  { %v9376_v15 = vadd.f32 %v14760_v10, %v9308_v60  ;;  %9982 = vst.msk [vmem:[#allocation6 + $0x80] sm:$0xff] %vm388_vm0, %v9918_v63  ;;  %v10985_v60 = vld [vmem:[#allocation2 + $0x174] sm:$0xff] }
 0x6c7   :  { %v7127_v38 = vpop.f32.mrf.mxu3  ;;  %v9656_v41 = vpop.f32.mrf.mxu2  ;;  %v15759_v63 = vld [vmem:[#allocation218_spill] sm:$0xff] }
 0x6c8   :  { %v9440_v21 = vmax.f32 %v9376_v15, 0.0  ;;  %v7233_v45 = vadd.f32 %v7127_v38, %v6674_v32  ;;  %v9657_v47 = vadd.f32 %v14576_v34, %v9656_v41  ;;  %v5894_v61 = vadd.f32 %v15759_v63, %v4600_v20  ;;  %v15762_v41 = vld [vmem:[#allocation237_spill] sm:$0xff] }
 0x6ca   :  { %v9855_v11 = vadd.f32 %v9791_v6, %v9657_v47  ;;  %v9486_v27 = vpack.c.bf16 %v9440_v21, %v9439_v35  ;;  %v8527_v30 = vadd.f32 %v14264_v44, %v7233_v45  ;;  %v14782_v16 = vpop.f32.mrf.mxu0  ;;  %v9793_v21 = vld [vmem:[#allocation3 + $0x98] sm:$0xff]  ;;  %v14802_v39 = vpop.f32.mrf.mxu1 }
 0x6cc   :  { %v9919_v7 = vmax.f32 %v9855_v11, 0.0  ;;  %10878 = vmatmul.msk.bf16.gmra.mxu2 %vm2617_vm8, %v9486_v27  ;;  %v9309_v24 = vadd.f32 %v14489_v1, %v8527_v30  ;;  %v15761_v1 = vld [vmem:[#allocation149_spill] sm:$0xff] }
 0x6cd   :  { %v4601_v32 = vadd.f32 %v15761_v1, %v15760_v48  ;;  %v15763_v30 = vld [vmem:[#allocation221_spill] sm:$0xff] }
 0x6ce   :  { %9983 = vst.msk [vmem:[#allocation6 + $0x88] sm:$0xff] %vm388_vm0, %v9919_v7  ;;  %v9377_v3 = vadd.f32 %v14760_v10, %v9309_v24 }
 0x6cf   :  { %v7129_v53 = vpop.f32.mrf.mxu3  ;;  %v9659_v57 = vpop.f32.mrf.mxu2  ;;  %v5895_v7 = vadd.f32 %v15763_v30, %v4601_v32 }
 0x6d0   :  { %v7234_v17 = vadd.f32 %v7129_v53, %v6675_v54  ;;  %v9660_v44 = vadd.f32 %v14576_v34, %v9659_v57  ;;  %v9441_v45 = vmax.f32 %v9377_v3, 0.0  ;;  %v15765_v54 = vld [vmem:[#allocation152_spill] sm:$0xff]  ;;  %v15766_v57 = vld [vmem:[#allocation241_spill] sm:$0xff] }
 0x6d1   :  { %v4602_v53 = vadd.f32 %v15765_v54, %v15764_v12  ;;  %v15767_v3 = vld [vmem:[#allocation225_spill] sm:$0xff]  ;;  %v15772_v54 = vld [vmem:[#allocation54_spill] sm:$0xff] }
 0x6d2   :  { %v8528_v51 = vadd.f32 %v14282_v42, %v7234_v17  ;;  %v9856_v50 = vadd.f32 %v9792_v8, %v9660_v44  ;;  %v6676_v42 = vadd.f32 %v15762_v41, %v5894_v61  ;;  %v14799_v27 = vpop.f32.mrf.mxu0  ;;  %v6677_v8 = vadd.f32 %v15766_v57, %v5895_v7  ;;  %v9794_v44 = vld [vmem:[#allocation3 + $0xa0] sm:$0xff]  ;;  %v10986_v61 = vld [vmem:[#allocation2 + $0x180] sm:$0xff] }
 0x6d3   :  { %v15771_v7 = vld [vmem:[#allocation229_spill] sm:$0xff] }
 0x6d4   :  { %v9310_v23 = vadd.f32 %v14504_v18, %v8528_v51  ;;  %v9920_v15 = vmax.f32 %v9856_v50, 0.0  ;;  %10758 = vmatmul.msk.bf16.gmra.mxu3 %vm2617_vm8, %v10985_v60 }
 0x6d6   :  { %v9378_v38 = vadd.f32 %v14760_v10, %v9310_v23  ;;  %9984 = vst.msk [vmem:[#allocation6 + $0x90] sm:$0xff] %vm388_vm0, %v9920_v15  ;;  %v5896_v23 = vadd.f32 %v15767_v3, %v4602_v53  ;;  %v15773_v53 = vld [vmem:[#allocation162_spill] sm:$0xff]  ;;  %v10987_v3 = vld [vmem:[#allocation2 + $0x18c] sm:$0xff] }
 0x6d7   :  { %v7132_v6 = vpop.f32.mrf.mxu3  ;;  %v9661_v35 = vpop.f32.mrf.mxu2  ;;  %v4604_v57 = vadd.f32 %v15773_v53, %v15772_v54  ;;  %v15779_v54 = vld [vmem:[#allocation236_spill] sm:$0xff] }
 0x6d8   :  { %v9442_v47 = vmax.f32 %v9378_v38, 0.0  ;;  %v7235_v11 = vadd.f32 %v7132_v6, %v6676_v42  ;;  %v9662_v18 = vadd.f32 %v14576_v34, %v9661_v35  ;;  %v15768_v38 = vld [vmem:[#allocation52_spill] sm:$0xff]  ;;  %v14821_v42 = vpop.f32.mrf.mxu1  ;;  %v15770_v6 = vld [vmem:[#allocation151_spill] sm:$0xff] }
 0x6d9   :  { %v6678_v35 = vadd.f32 %v15770_v6, %v5896_v23  ;;  %v15774_v23 = vld [vmem:[#allocation232_spill] sm:$0xff] }
 0x6da   :  { %v9857_v55 = vadd.f32 %v9793_v21, %v9662_v18  ;;  %v9487_v4 = vpack.c.bf16 %v9442_v47, %v9441_v45  ;;  %v8529_v59 = vadd.f32 %v14713_v62, %v7235_v11  ;;  %v14814_v15 = vpop.f32.mrf.mxu0  ;;  %v9795_v47 = vld [vmem:[#allocation3 + $0xa8] sm:$0xff] }
 0x6dc   :  { %v9921_v20 = vmax.f32 %v9857_v55, 0.0  ;;  %10879 = vmatmul.msk.bf16.gmra.mxu2 %vm2617_vm8, %v9487_v4  ;;  %v9311_v51 = vadd.f32 %v14716_v9, %v8529_v59  ;;  %v15769_v9 = vld [vmem:[#allocation157_spill] sm:$0xff] }
 0x6dd   :  { %v4603_v41 = vadd.f32 %v15769_v9, %v15768_v38  ;;  %v15775_v38 = vld [vmem:[#allocation56_spill] sm:$0xff]  ;;  %v15776_v9 = vld [vmem:[#allocation166_spill] sm:$0xff] }
 0x6de   :  { %9985 = vst.msk [vmem:[#allocation6 + $0x98] sm:$0xff] %vm388_vm0, %v9921_v20  ;;  %v9379_v48 = vadd.f32 %v14760_v10, %v9311_v51  ;;  %v9796_v51 = vld [vmem:[#allocation3 + $0xb0] sm:$0xff] }
 0x6df   :  { %v7134_v24 = vpop.f32.mrf.mxu3  ;;  %v9664_v17 = vpop.f32.mrf.mxu2  ;;  %v5897_v59 = vadd.f32 %v15771_v7, %v4603_v41  ;;  %v4605_v41 = vadd.f32 %v15776_v9, %v15775_v38 }
 0x6e0   :  { %v7236_v50 = vadd.f32 %v7134_v24, %v6677_v8  ;;  %v9665_v60 = vadd.f32 %v14576_v34, %v9664_v17  ;;  %v9443_v11 = vmax.f32 %v9379_v48, 0.0  ;;  %v5898_v48 = vadd.f32 %v15774_v23, %v4604_v57 }
 0x6e1   :  { %v6679_v24 = vadd.f32 %v14249_v29, %v5897_v59  ;;  %v7355_v59 = vld [vmem:[#allocation2 + $0x1a8] sm:$0xf]  ;;  %v5899_v53 = vadd.f32 %v15779_v54, %v4605_v41 }
 0x6e2   :  { %v8530_v62 = vadd.f32 %v14727_v13, %v7236_v50  ;;  %v9858_v63 = vadd.f32 %v9794_v44, %v9665_v60  ;;  %v14832_v8 = vpop.f32.mrf.mxu0  ;;  %v14836_v50 = vpop.f32.mrf.mxu1  ;;  %v8111_v57 = vshll.u32 %v7355_v59, 16  ;;  %v8902_v23 = vrot.slane %v7355_v59, 5 }
 0x6e4   :  { %v9312_v1 = vadd.f32 %v14731_v56, %v8530_v62  ;;  %v9922_v32 = vmax.f32 %v9858_v63, 0.0  ;;  %10759 = vmatmul.msk.bf16.gmra.mxu3 %vm2617_vm8, %v10986_v61 }
 0x6e6   :  { %v9380_v13 = vadd.f32 %v14760_v10, %v9312_v1  ;;  %9986 = vst.msk [vmem:[#allocation6 + $0xa0] sm:$0xff] %vm388_vm0, %v9922_v32 }
 0x6e7   :  { %v7137_v21 = vpop.f32.mrf.mxu3  ;;  %v9666_v45 = vpop.f32.mrf.mxu2 }
 0x6e8   :  { %v9444_v18 = vmax.f32 %v9380_v13, 0.0  ;;  %v7237_v56 = vadd.f32 %v7137_v21, %v6678_v35  ;;  %v9667_v55 = vadd.f32 %v14576_v34, %v9666_v45  ;;  %v9797_v35 = vld [vmem:[#allocation3 + $0xb8] sm:$0xff] }
 0x6ea   :  { %v9859_v4 = vadd.f32 %v9795_v47, %v9667_v55  ;;  %v9488_v30 = vpack.c.bf16 %v9444_v18, %v9443_v11  ;;  %v8531_v20 = vadd.f32 %v14743_v46, %v7237_v56  ;;  %v14850_v21 = vpop.f32.mrf.mxu0  ;;  %v167_v18 = vld [vmem:[#allocation2 + $0x1a4] sm:$0x1]  ;;  %v277_v56 = vld [vmem:[#allocation2 + $0x1ac] sm:$0x1] }
 0x6eb   :  { %v278_v7 = vsel %vm11256_vm6, 0, %v277_v56 }
 0x6ec   :  { %v9923_v12 = vmax.f32 %v9859_v4, 0.0  ;;  %10880 = vmatmul.msk.bf16.gmra.mxu2 %vm2617_vm8, %v9488_v30  ;;  %v9313_v60 = vadd.f32 %v14749_v58, %v8531_v20  ;;  %v168_v4 = vsel %vm11236_vm3, 0, %v167_v18  ;;  %279 = vst [vmem:[#allocation2 + $0x1ac] sm:$0x1] %v278_v7 }
 0x6ed   :  { %169 = vst [vmem:[#allocation2 + $0x1a4] sm:$0x1] %v168_v4 }
 0x6ee   :  { %9987 = vst.msk [vmem:[#allocation6 + $0xa8] sm:$0xff] %vm388_vm0, %v9923_v12  ;;  %v9381_v1 = vadd.f32 %v14760_v10, %v9313_v60  ;;  %v8113_v60 = vrot.slane %v8111_v57, 5 }
 0x6ef   :  { %v7139_v17 = vpop.f32.mrf.mxu3  ;;  %v9669_v44 = vpop.f32.mrf.mxu2 }
 0x6f0   :  { %v7238_v46 = vadd.f32 %v7139_v17, %v6679_v24  ;;  %v9670_v62 = vadd.f32 %v14576_v34, %v9669_v44  ;;  %v9445_v45 = vmax.f32 %v9381_v1, 0.0  ;;  %v8586_v24 = vld [vmem:[#allocation2 + $0x1a4] sm:$0xe]  ;;  %v8115_v44 = vshrl.u32 %v7355_v59, 16 }
 0x6f2   :  { %v8532_v63 = vadd.f32 %v14767_v19, %v7238_v46  ;;  %v9860_v61 = vadd.f32 %v9796_v51, %v9670_v62  ;;  %v6680_v19 = vadd.f32 %v14270_v33, %v5898_v48  ;;  %v14857_v33 = vpop.f32.mrf.mxu1  ;;  %v15780_v46 = vld [vmem:[#allocation168_spill] sm:$0xff]  ;;  %v15781_v62 = vld [vmem:[#allocation171_spill] sm:$0xff]  ;;  %v6681_v48 = vadd.f32 %v14289_v40, %v5899_v53  ;;  %v15784_v53 = vld [vmem:[#allocation174_spill] sm:$0xff] }
 0x6f4   :  { %v9314_v29 = vadd.f32 %v14772_v37, %v8532_v63  ;;  %v9924_v32 = vmax.f32 %v9860_v61, 0.0  ;;  %10760 = vmatmul.msk.bf16.gmra.mxu3 %vm2617_vm8, %v10987_v3  ;;  %v4606_v63 = vadd.f32 %v15781_v62, %v15780_v46  ;;  %v8117_v61 = vrot.slane %v8115_v44, 4 }
 0x6f5   :  { %v10827_v3 = vrot.slane %v8586_v24, 9 }
 0x6f6   :  { %v9382_v58 = vadd.f32 %v14760_v10, %v9314_v29  ;;  %9988 = vst.msk [vmem:[#allocation6 + $0xb0] sm:$0xff] %vm388_vm0, %v9924_v32  ;;  %v9798_v32 = vld [vmem:[#allocation3 + $0xc0] sm:$0xff]  ;;  %v8118_v38 = vor.u32 %v8117_v61, %v8113_v60 }
 0x6f7   :  { %v7142_v13 = vpop.f32.mrf.mxu3  ;;  %v9671_v6 = vpop.f32.mrf.mxu2 }
 0x6f8   :  { %v9446_v47 = vmax.f32 %v9382_v58, 0.0  ;;  %v7239_v37 = vadd.f32 %v7142_v13, %v6680_v19  ;;  %v9672_v11 = vadd.f32 %v14576_v34, %v9671_v6  ;;  %v15782_v58 = vld [vmem:[#allocation240_spill] sm:$0xff]  ;;  %v7354_v13 = vld [vmem:[#allocation2 + $0x1a4] sm:$0xf]  ;;  %v8903_v6 = vsel %vm11316_vm15, %v10827_v3, %v8902_v23 }
 0x6f9   :  { %v5900_v19 = vadd.f32 %v15782_v58, %v4606_v63  ;;  %v8105_v18 = vshll.u32 %v7354_v13, 16  ;;  %v8119_v55 = vrot.slane %v8118_v38, 4  ;;  %v8971_v44 = vunpack.c.l.b16 %v8903_v6 }
 0x6fa   :  { %v9861_v20 = vadd.f32 %v9797_v35, %v9672_v11  ;;  %v9489_v12 = vpack.c.bf16 %v9446_v47, %v9445_v45  ;;  %v8533_v17 = vadd.f32 %v14782_v16, %v7239_v37  ;;  %v8904_v35 = vrot.slane %v8902_v23, 4  ;;  %v14871_v45 = vpop.f32.mrf.mxu0  ;;  %v7356_v37 = vld [vmem:[#allocation2 + $0x1ac] sm:$0x1]  ;;  %v14875_v7 = vpop.f32.mrf.mxu1  ;;  %v9799_v23 = vld [vmem:[#allocation3 + $0xc8] sm:$0xff] }
 0x6fb   :  { %v8102_v11 = vshrl.u32 %v7354_v13, 16  ;;  %v8121_v4 = vshll.u32 %v7356_v37, 16  ;;  %v8905_v30 = vrot.slane %v7356_v37, 5  ;;  %v8107_v54 = vrot.slane %v8105_v18, 5  ;;  %v15786_v13 = vld [vmem:[#allocation243_spill] sm:$0xff]  ;;  %v15788_v37 = vld [vmem:[#allocation178_spill] sm:$0xff] }
 0x6fc   :  { %v9925_v51 = vmax.f32 %v9861_v20, 0.0  ;;  %10881 = vmatmul.msk.bf16.gmra.mxu2 %vm2617_vm8, %v9489_v12  ;;  %v9315_v1 = vadd.f32 %v14786_v36, %v8533_v17  ;;  %v10988_v36 = vld [vmem:[#allocation2 + $0x198] sm:$0xff]  ;;  %v6682_v46 = vadd.f32 %v14301_v26, %v5900_v19 }
 0x6fd   :  { %v8104_v12 = vrot.slane %v8102_v11, 4  ;;  %v8123_v24 = vrot.slane %v8121_v4, 5  ;;  %v8906_v17 = vsel %vm11316_vm15, %v8904_v35, %v8905_v30  ;;  %v9800_v30 = vld [vmem:[#allocation3 + $0xd0] sm:$0xff] }
 0x6fe   :  { %9989 = vst.msk [vmem:[#allocation6 + $0xb8] sm:$0xff] %vm388_vm0, %v9925_v51  ;;  %v9383_v56 = vadd.f32 %v14760_v10, %v9315_v1  ;;  %v8972_v62 = vunpack.c.l.b16 %v8906_v17 }
 0x6ff   :  { %v7144_v29 = vpop.f32.mrf.mxu3  ;;  %v9674_v16 = vpop.f32.mrf.mxu2  ;;  %v8124_v1 = vsel %vm11282_vm11, %v8119_v55, %v8123_v24 }
 0x700   :  { %v7240_v9 = vadd.f32 %v7144_v29, %v6681_v48  ;;  %v9675_v41 = vadd.f32 %v14576_v34, %v9674_v16  ;;  %v9447_v63 = vmax.f32 %v9383_v56, 0.0  ;;  %v8190_v38 = vunpack.c.l.b16 %v8124_v1  ;;  %v15789_v56 = vld [vmem:[#allocation169_spill] sm:$0xff]  ;;  %v9801_v48 = vld [vmem:[#allocation3 + $0xd8] sm:$0xff] }
 0x702   :  { %v8534_v40 = vadd.f32 %v14799_v27, %v7240_v9  ;;  %v9862_v47 = vadd.f32 %v9798_v32, %v9675_v41  ;;  %v15783_v27 = vld [vmem:[#allocation58_spill] sm:$0xff]  ;;  %v9004_v9 = vpack.c.b16 %v8972_v62, %v8971_v44  ;;  %v14893_v35 = vpop.f32.mrf.mxu0  ;;  %v14899_v18 = vpop.f32.mrf.mxu1 }
 0x703   :  { %v4607_v57 = vadd.f32 %v15784_v53, %v15783_v27 }
 0x704   :  { %v9316_v59 = vadd.f32 %v14802_v39, %v8534_v40  ;;  %v9926_v20 = vmax.f32 %v9862_v47, 0.0  ;;  %10761 = vmatmul.msk.bf16.gmra.mxu3 %vm2617_vm8, %v10988_v36  ;;  %v8108_v39 = vor.u32 %v8107_v54, %v8104_v12  ;;  %10860 = vmatmul.msk.bf16.gmra.mxu1 %vm2617_vm8, %v9004_v9  ;;  %v15787_v36 = vld [vmem:[#allocation62_spill] sm:$0xff]  ;;  %v10989_v54 = vld [vmem:[#allocation2 + $0x1a4] sm:$0xff] }
 0x705   :  { %v5901_v26 = vadd.f32 %v15786_v13, %v4607_v57  ;;  %v4608_v11 = vadd.f32 %v15788_v37, %v15787_v36  ;;  %v15790_v57 = vld [vmem:[#allocation245_spill] sm:$0xff]  ;;  %v15794_v9 = vld [vmem:[#allocation247_spill] sm:$0xff] }
 0x706   :  { %v9384_v51 = vadd.f32 %v14760_v10, %v9316_v59  ;;  %9990 = vst.msk [vmem:[#allocation6 + $0xc0] sm:$0xff] %vm388_vm0, %v9926_v20  ;;  %v8109_v32 = vrot.slane %v8108_v39, 4  ;;  %v14908_v20 = vld [vmem:[%s15113_s6] ss:$0 sm:$0xff]  ;;  %v9802_v37 = vld [vmem:[#allocation3 + $0xe0] sm:$0xff] }
 0x707   :  { %v7147_v61 = vpop.f32.mrf.mxu3  ;;  %v9676_v3 = vpop.f32.mrf.mxu2  ;;  %v5902_v24 = vadd.f32 %v15790_v57, %v4608_v11  ;;  %v15800_v57 = vld [vmem:[#allocation190_spill] sm:$0xff] }
 0x708   :  { %v9448_v29 = vmax.f32 %v9384_v51, 0.0  ;;  %v7241_v16 = vadd.f32 %v7147_v61, %v6682_v46  ;;  %v9677_v25 = vadd.f32 %v14576_v34, %v9676_v3  ;;  %v8114_v19 = vsel %vm11282_vm11, %v8109_v32, %v8113_v60  ;;  %v15792_v46 = vld [vmem:[#allocation182_spill] sm:$0xff] }
 0x709   :  { %v8189_v6 = vunpack.c.l.b16 %v8114_v19  ;;  %v6683_v60 = vadd.f32 %v15789_v56, %v5901_v26  ;;  %v15795_v26 = vld [vmem:[#allocation135_spill] sm:$0xff]  ;;  %v15796_v19 = vld [vmem:[#allocation186_spill] sm:$0xff] }
 0x70a   :  { %v9863_v41 = vadd.f32 %v9799_v23, %v9677_v25  ;;  %v9490_v58 = vpack.c.bf16 %v9448_v29, %v9447_v63  ;;  %v8535_v40 = vadd.f32 %v14814_v15, %v7241_v16  ;;  %v14918_v62 = vpop.f32.mrf.mxu0  ;;  %v9235_v1 = vpop.f32.mrf.mxu1 }
 0x70b   :  { %v8222_v34 = vpack.c.b16 %v8190_v38, %v8189_v6  ;;  %v4610_v6 = vadd.f32 %v15796_v19, %v15795_v26 }
 0x70c   :  { %v9927_v47 = vmax.f32 %v9863_v41, 0.0  ;;  %10882 = vmatmul.msk.bf16.gmra.mxu2 %vm2617_vm8, %v9490_v58  ;;  %v9317_v15 = vadd.f32 %v14821_v42, %v8535_v40  ;;  %v15791_v42 = vld [vmem:[#allocation64_spill] sm:$0xff]  ;;  %v15797_v40 = vld [vmem:[#allocation177_spill] sm:$0xff] }
 0x70d   :  { %10795 = vmatmul.msk.bf16.gmra.mxu0 %vm2617_vm8, %v8222_v34  ;;  %v4609_v39 = vadd.f32 %v15792_v46, %v15791_v42 }
 0x70e   :  { %9991 = vst.msk [vmem:[#allocation6 + $0xc8] sm:$0xff] %vm388_vm0, %v9927_v47  ;;  %v9385_v17 = vadd.f32 %v14760_v10, %v9317_v15  ;;  %v15798_v15 = vld [vmem:[#allocation249_spill] sm:$0xff] }
 0x70f   :  { %v7149_v55 = vpop.f32.mrf.mxu3  ;;  %v9679_v4 = vpop.f32.mrf.mxu2  ;;  %v5903_v41 = vadd.f32 %v15794_v9, %v4609_v39 }
 0x710   :  { %v7242_v59 = vadd.f32 %v7149_v55, %v6683_v60  ;;  %v9680_v12 = vadd.f32 %v14908_v20, %v9679_v4  ;;  %v9449_v29 = vmax.f32 %v9385_v17, 0.0  ;;  %v15801_v17 = vld [vmem:[#allocation181_spill] sm:$0xff] }
 0x711   :  { %v6685_v47 = vadd.f32 %v15797_v40, %v5903_v41 }
 0x712   :  { %v8536_v27 = vadd.f32 %v14832_v8, %v7242_v59  ;;  %v9864_v53 = vadd.f32 %v9800_v30, %v9680_v12  ;;  %v15793_v8 = vld [vmem:[#allocation173_spill] sm:$0xff]  ;;  %v8456_v11 = vpop.f32.mrf.mxu0  ;;  %v5904_v59 = vadd.f32 %v15798_v15, %v4610_v6 }
 0x713   :  { %v6684_v61 = vadd.f32 %v15793_v8, %v5902_v24 }
 0x714   :  { %v9318_v44 = vadd.f32 %v14836_v50, %v8536_v27  ;;  %v9928_v51 = vmax.f32 %v9864_v53, 0.0  ;;  %10762 = vmatmul.msk.bf16.gmra.mxu3 %vm2617_vm8, %v10989_v54  ;;  %v15799_v53 = vld [vmem:[#allocation139_spill] sm:$0xff] }
 0x715   :  { %v4611_v24 = vadd.f32 %v15800_v57, %v15799_v53 }
 0x716   :  { %v9386_v63 = vadd.f32 %v14760_v10, %v9318_v44  ;;  %9992 = vst.msk [vmem:[#allocation6 + $0xd0] sm:$0xff] %vm388_vm0, %v9928_v51  ;;  %v6686_v44 = vadd.f32 %v15801_v17, %v5904_v59  ;;  %v15809_v17 = vld [vmem:[#allocation253_spill] sm:$0xff] }
 0x717   :  { %v7152_v3 = vpop.f32.mrf.mxu3  ;;  %v9681_v23 = vpop.f32.mrf.mxu2 }
 0x718   :  { %v9450_v50 = vmax.f32 %v9386_v63, 0.0  ;;  %v7243_v16 = vadd.f32 %v7152_v3, %v6684_v61  ;;  %v9682_v25 = vadd.f32 %v14908_v20, %v9681_v23  ;;  %v15802_v23 = vld [vmem:[#allocation250_spill] sm:$0xff] }
 0x71a   :  { %v9865_v32 = vadd.f32 %v9801_v48, %v9682_v25  ;;  %v9491_v38 = vpack.c.bf16 %v9450_v50, %v9449_v29  ;;  %v8537_v58 = vadd.f32 %v14850_v21, %v7243_v16  ;;  %v14933_v21 = vpop.f32.mrf.mxu1  ;;  %v8458_v61 = vpop.f32.mrf.mxu0  ;;  %v5905_v48 = vadd.f32 %v15802_v23, %v4611_v24  ;;  %v15803_v25 = vld [vmem:[#allocation77_spill] sm:$0xff] }
 0x71b   :  { %v9806_v23 = vld [vmem:[#allocation3 + $0x100] sm:$0xff] }
 0x71c   :  { %v9929_v13 = vmax.f32 %v9865_v32, 0.0  ;;  %10883 = vmatmul.msk.bf16.gmra.mxu2 %vm2617_vm8, %v9491_v38  ;;  %v9319_v56 = vadd.f32 %v14857_v33, %v8537_v58  ;;  %v15804_v32 = vld [vmem:[#allocation193_spill] sm:$0xff]  ;;  %v6687_v9 = vadd.f32 %v14360_v0, %v5905_v48 }
 0x71d   :  { %v4612_v38 = vadd.f32 %v15804_v32, %v15803_v25  ;;  %v15807_v0 = vld [vmem:[#allocation197_spill] sm:$0xff] }
 0x71e   :  { %9993 = vst.msk [vmem:[#allocation6 + $0xd8] sm:$0xff] %vm388_vm0, %v9929_v13  ;;  %v9387_v12 = vadd.f32 %v14760_v10, %v9319_v56  ;;  %v9804_v13 = vld [vmem:[#allocation3 + $0xf0] sm:$0xff] }
 0x71f   :  { %v7154_v34 = vpop.f32.mrf.mxu3  ;;  %v9684_v36 = vpop.f32.mrf.mxu2 }
 0x720   :  { %v7244_v60 = vadd.f32 %v7154_v34, %v6685_v47  ;;  %v9685_v55 = vadd.f32 %v14908_v20, %v9684_v36  ;;  %v9451_v46 = vmax.f32 %v9387_v12, 0.0  ;;  %v15805_v47 = vld [vmem:[#allocation251_spill] sm:$0xff] }
 0x721   :  { %v5906_v34 = vadd.f32 %v15805_v47, %v4612_v38  ;;  %v15812_v38 = vld [vmem:[#allocation255_spill] sm:$0xff]  ;;  %v9807_v47 = vld [vmem:[#allocation3 + $0x108] sm:$0xff] }
 0x722   :  { %v8538_v4 = vadd.f32 %v14871_v45, %v7244_v60  ;;  %v9866_v30 = vadd.f32 %v9802_v37, %v9685_v55  ;;  %v9803_v45 = vld [vmem:[#allocation3 + $0xe8] sm:$0xff]  ;;  %v9240_v29 = vpop.f32.mrf.mxu1  ;;  %v8461_v36 = vpop.f32.mrf.mxu0  ;;  %v15806_v55 = vld [vmem:[#allocation81_spill] sm:$0xff] }
 0x724   :  { %v9320_v54 = vadd.f32 %v14875_v7, %v8538_v4  ;;  %v9930_v27 = vmax.f32 %v9866_v30, 0.0  ;;  %v4613_v4 = vadd.f32 %v15807_v0, %v15806_v55 }
 0x726   :  { %v9388_v33 = vadd.f32 %v14760_v10, %v9320_v54  ;;  %9994 = vst.msk [vmem:[#allocation6 + $0xe0] sm:$0xff] %vm388_vm0, %v9930_v27  ;;  %v9805_v54 = vld [vmem:[#allocation3 + $0xf8] sm:$0xff] }
 0x727   :  { %v7157_v51 = vpop.f32.mrf.mxu3  ;;  %v9686_v42 = vpop.f32.mrf.mxu2 }
 0x728   :  { %v9452_v39 = vmax.f32 %v9388_v33, 0.0  ;;  %v7245_v63 = vadd.f32 %v7157_v51, %v6686_v44  ;;  %v9687_v8 = vadd.f32 %v14908_v20, %v9686_v42  ;;  %v5907_v44 = vadd.f32 %v15809_v17, %v4613_v4  ;;  %v15815_v4 = vld [vmem:[#allocation256_spill] sm:$0xff] }
 0x72a   :  { %v9867_v7 = vadd.f32 %v9803_v45, %v9687_v8  ;;  %v9492_v3 = vpack.c.bf16 %v9452_v39, %v9451_v46  ;;  %v8539_v50 = vadd.f32 %v14893_v35, %v7245_v63  ;;  %v9243_v30 = vpop.f32.mrf.mxu1  ;;  %v15810_v45 = vld [vmem:[#allocation85_spill] sm:$0xff]  ;;  %v15811_v46 = vld [vmem:[#allocation200_spill] sm:$0xff]  ;;  %v8463_v63 = vpop.f32.mrf.mxu0  ;;  %v6689_v8 = vadd.f32 %v14395_v49, %v5907_v44 }
 0x72b   :  { %v4614_v39 = vadd.f32 %v15811_v46, %v15810_v45 }
 0x72c   :  { %v9931_v16 = vmax.f32 %v9867_v7, 0.0  ;;  %10884 = vmatmul.msk.bf16.gmra.mxu2 %vm2617_vm8, %v9492_v3  ;;  %v9321_v26 = vadd.f32 %v14899_v18, %v8539_v50  ;;  %v15808_v18 = vld [vmem:[#allocation185_spill] sm:$0xff] }
 0x72d   :  { %v6688_v59 = vadd.f32 %v15808_v18, %v5906_v34 }
 0x72e   :  { %9995 = vst.msk [vmem:[#allocation6 + $0xe8] sm:$0xff] %vm388_vm0, %v9931_v16  ;;  %v9389_v37 = vadd.f32 %v14760_v10, %v9321_v26  ;;  %v15813_v26 = vld [vmem:[#allocation89_spill] sm:$0xff] }
 0x72f   :  { %v7159_v41 = vpop.f32.mrf.mxu3  ;;  %v9689_v58 = vpop.f32.mrf.mxu2 }
 0x730   :  { %v7246_v19 = vadd.f32 %v7159_v41, %v6687_v9  ;;  %v9690_v6 = vadd.f32 %v14908_v20, %v9689_v58  ;;  %v9453_v27 = vmax.f32 %v9389_v37, 0.0  ;;  %v5908_v9 = vadd.f32 %v15812_v38, %v4614_v39 }
 0x732   :  { %v8540_v35 = vadd.f32 %v14918_v62, %v7246_v19  ;;  %v9868_v40 = vadd.f32 %v9804_v13, %v9690_v6  ;;  %v9245_v48 = vpop.f32.mrf.mxu1  ;;  %v15814_v19 = vld [vmem:[#allocation204_spill] sm:$0xff] }
 0x733   :  { %v4615_v49 = vadd.f32 %v15814_v19, %v15813_v26 }
 0x734   :  { %v9322_v56 = vadd.f32 %v9235_v1, %v8540_v35  ;;  %v9932_v60 = vmax.f32 %v9868_v40, 0.0 }
 0x736   :  { %v9390_v15 = vadd.f32 %v14760_v10, %v9322_v56  ;;  %9996 = vst.msk [vmem:[#allocation6 + $0xf0] sm:$0xff] %vm388_vm0, %v9932_v60 }
 0x737   :  { %v7162_v12 = vpop.f32.mrf.mxu3  ;;  %v9691_v62 = vpop.f32.mrf.mxu2 }
 0x738   :  { %v9454_v53 = vmax.f32 %v9390_v15, 0.0  ;;  %v7247_v57 = vadd.f32 %v7162_v12, %v6688_v59  ;;  %v9692_v24 = vadd.f32 %v14908_v20, %v9691_v62  ;;  %v5909_v15 = vadd.f32 %v15815_v4, %v4615_v49  ;;  %v15816_v12 = vld [vmem:[#allocation156_spill] sm:$0xff]  ;;  %v15822_v49 = vld [vmem:[#allocation161_spill] sm:$0xff]  ;;  %v15825_v4 = vld [vmem:[#allocation262_spill] sm:$0xff] }
 0x73a   :  { %v9869_v1 = vadd.f32 %v9805_v54, %v9692_v24  ;;  %v9493_v33 = vpack.c.bf16 %v9454_v53, %v9453_v27  ;;  %v8541_v51 = vadd.f32 %v8456_v11, %v7247_v57  ;;  %v6691_v54 = vadd.f32 %v14423_v52, %v5909_v15  ;;  %v9808_v57 = vld [vmem:[#allocation3 + $0x110] sm:$0xff] }
 0x73c   :  { %v9933_v42 = vmax.f32 %v9869_v1, 0.0  ;;  %10885 = vmatmul.msk.bf16.gmra.mxu2 %vm2617_vm8, %v9493_v33  ;;  %v9323_v50 = vadd.f32 %v14933_v21, %v8541_v51  ;;  %v6690_v21 = vadd.f32 %v14412_v28, %v5908_v9  ;;  %v15817_v28 = vld [vmem:[#allocation208_spill] sm:$0xff]  ;;  %v15818_v51 = vld [vmem:[#allocation258_spill] sm:$0xff] }
 0x73d   :  { %v4616_v62 = vadd.f32 %v15817_v28, %v15816_v12  ;;  %v15826_v28 = vld [vmem:[#allocation97_spill] sm:$0xff] }
 0x73e   :  { %9997 = vst.msk [vmem:[#allocation6 + $0xf8] sm:$0xff] %vm388_vm0, %v9933_v42  ;;  %v9391_v41 = vadd.f32 %v14760_v10, %v9323_v50 }
 0x73f   :  { %v7164_v7 = vpop.f32.mrf.mxu3  ;;  %v9694_v3 = vpop.f32.mrf.mxu2  ;;  %v5910_v42 = vadd.f32 %v15818_v51, %v4616_v62  ;;  %v15827_v62 = vld [vmem:[#allocation217_spill] sm:$0xff] }
 0x740   :  { %v7248_v16 = vadd.f32 %v7164_v7, %v6689_v8  ;;  %v9695_v11 = vadd.f32 %v14908_v20, %v9694_v3  ;;  %v9455_v34 = vmax.f32 %v9391_v41, 0.0  ;;  %v15819_v7 = vld [vmem:[#allocation93_spill] sm:$0xff]  ;;  %v15820_v3 = vld [vmem:[#allocation211_spill] sm:$0xff]  ;;  %v15821_v41 = vld [vmem:[#allocation260_spill] sm:$0xff] }
 0x741   :  { %v4617_v52 = vadd.f32 %v15820_v3, %v15819_v7 }
 0x742   :  { %v8542_v25 = vadd.f32 %v8458_v61, %v7248_v16  ;;  %v9870_v32 = vadd.f32 %v9806_v23, %v9695_v11  ;;  %v8466_v61 = vpop.f32.mrf.mxu0 }
 0x744   :  { %v9324_v58 = vadd.f32 %v9240_v29, %v8542_v25  ;;  %v9934_v13 = vmax.f32 %v9870_v32, 0.0  ;;  %v9248_v29 = vpop.f32.mrf.mxu1 }
 0x746   :  { %v9392_v6 = vadd.f32 %v14760_v10, %v9324_v58  ;;  %9998 = vst.msk [vmem:[#allocation6 + $0x100] sm:$0xff] %vm388_vm0, %v9934_v13  ;;  %v5911_v58 = vadd.f32 %v15821_v41, %v4617_v52  ;;  %v15830_v52 = vld [vmem:[#allocation165_spill] sm:$0xff] }
 0x747   :  { %v7167_v35 = vpop.f32.mrf.mxu3  ;;  %v9696_v40 = vpop.f32.mrf.mxu2 }
 0x748   :  { %v9456_v37 = vmax.f32 %v9392_v6, 0.0  ;;  %v7249_v56 = vadd.f32 %v7167_v35, %v6690_v21  ;;  %v9697_v60 = vadd.f32 %v14908_v20, %v9696_v40  ;;  %v15823_v6 = vld [vmem:[#allocation214_spill] sm:$0xff]  ;;  %v15824_v35 = vld [vmem:[#allocation123_spill] sm:$0xff] }
 0x749   :  { %v6693_v40 = vadd.f32 %v15824_v35, %v5911_v58  ;;  %v15834_v35 = vld [vmem:[#allocation101_spill] sm:$0xff] }
 0x74a   :  { %v9871_v55 = vadd.f32 %v9807_v47, %v9697_v60  ;;  %v9494_v0 = vpack.c.bf16 %v9456_v37, %v9455_v34  ;;  %v8543_v18 = vadd.f32 %v8461_v36, %v7249_v56  ;;  %v8468_v17 = vpop.f32.mrf.mxu0  ;;  %v9810_v37 = vld [vmem:[#allocation3 + $0x120] sm:$0xff] }
 0x74c   :  { %v9935_v59 = vmax.f32 %v9871_v55, 0.0  ;;  %10886 = vmatmul.msk.bf16.gmra.mxu2 %vm2617_vm8, %v9494_v0  ;;  %v9325_v24 = vadd.f32 %v9243_v30, %v8543_v18  ;;  %v9250_v45 = vpop.f32.mrf.mxu1  ;;  %v6692_v30 = vadd.f32 %v14439_v22, %v5910_v42  ;;  %v4618_v22 = vadd.f32 %v15823_v6, %v15822_v49 }
 0x74e   :  { %9999 = vst.msk [vmem:[#allocation6 + $0x108] sm:$0xff] %vm388_vm0, %v9935_v59  ;;  %v9393_v46 = vadd.f32 %v14760_v10, %v9325_v24  ;;  %v5912_v15 = vadd.f32 %v15825_v4, %v4618_v22 }
 0x74f   :  { %v7169_v27 = vpop.f32.mrf.mxu3  ;;  %v9699_v53 = vpop.f32.mrf.mxu2 }
 0x750   :  { %v7250_v1 = vadd.f32 %v7169_v27, %v6691_v54  ;;  %v9700_v33 = vadd.f32 %v14908_v20, %v9699_v53  ;;  %v9457_v11 = vmax.f32 %v9393_v46, 0.0  ;;  %v4619_v54 = vadd.f32 %v15827_v62, %v15826_v28  ;;  %v15837_v28 = vld [vmem:[#allocation268_spill] sm:$0xff] }
 0x752   :  { %v8544_v44 = vadd.f32 %v8463_v63, %v7250_v1  ;;  %v9872_v36 = vadd.f32 %v9808_v57, %v9700_v33  ;;  %v9809_v63 = vld [vmem:[#allocation3 + $0x118] sm:$0xff]  ;;  %v8471_v13 = vpop.f32.mrf.mxu0  ;;  %v9811_v33 = vld [vmem:[#allocation3 + $0x128] sm:$0xff] }
 0x754   :  { %v9326_v39 = vadd.f32 %v9245_v48, %v8544_v44  ;;  %v9936_v8 = vmax.f32 %v9872_v36, 0.0  ;;  %v9253_v21 = vpop.f32.mrf.mxu1 }
 0x756   :  { %v9394_v23 = vadd.f32 %v14760_v10, %v9326_v39  ;;  %10000 = vst.msk [vmem:[#allocation6 + $0x110] sm:$0xff] %vm388_vm0, %v9936_v8  ;;  %v15829_v39 = vld [vmem:[#allocation264_spill] sm:$0xff] }
 0x757   :  { %v7172_v50 = vpop.f32.mrf.mxu3  ;;  %v9701_v16 = vpop.f32.mrf.mxu2  ;;  %v5913_v8 = vadd.f32 %v15829_v39, %v4619_v54  ;;  %v15840_v39 = vld [vmem:[#allocation271_spill] sm:$0xff] }
 0x758   :  { %v9458_v25 = vmax.f32 %v9394_v23, 0.0  ;;  %v7251_v32 = vadd.f32 %v7172_v50, %v6692_v30  ;;  %v9702_v38 = vadd.f32 %v14908_v20, %v9701_v16  ;;  %v15831_v23 = vld [vmem:[#allocation220_spill] sm:$0xff]  ;;  %v15832_v50 = vld [vmem:[#allocation126_spill] sm:$0xff] }
 0x759   :  { %v4620_v30 = vadd.f32 %v15831_v23, %v15830_v52  ;;  %v6695_v16 = vadd.f32 %v15832_v50, %v5913_v8  ;;  %v15842_v50 = vld [vmem:[#allocation231_spill] sm:$0xff] }
 0x75a   :  { %v9873_v9 = vadd.f32 %v9809_v63, %v9702_v38  ;;  %v9495_v48 = vpack.c.bf16 %v9458_v25, %v9457_v11  ;;  %v8545_v26 = vadd.f32 %v8466_v61, %v7251_v32  ;;  %v8473_v27 = vpop.f32.mrf.mxu0  ;;  %v9812_v25 = vld [vmem:[#allocation3 + $0x130] sm:$0xff] }
 0x75c   :  { %v9937_v19 = vmax.f32 %v9873_v9, 0.0  ;;  %10887 = vmatmul.msk.bf16.gmra.mxu2 %vm2617_vm8, %v9495_v48  ;;  %v9327_v56 = vadd.f32 %v9248_v29, %v8545_v26  ;;  %v15828_v29 = vld [vmem:[#allocation188_spill] sm:$0xff]  ;;  %v15833_v26 = vld [vmem:[#allocation267_spill] sm:$0xff] }
 0x75d   :  { %v6694_v57 = vadd.f32 %v15828_v29, %v5912_v15  ;;  %v15838_v29 = vld [vmem:[#allocation105_spill] sm:$0xff] }
 0x75e   :  { %10001 = vst.msk [vmem:[#allocation6 + $0x118] sm:$0xff] %vm388_vm0, %v9937_v19  ;;  %v9395_v18 = vadd.f32 %v14760_v10, %v9327_v56  ;;  %v5914_v19 = vadd.f32 %v15833_v26, %v4620_v30  ;;  %v15841_v30 = vld [vmem:[#allocation109_spill] sm:$0xff] }
 0x75f   :  { %v7174_v47 = vpop.f32.mrf.mxu3  ;;  %v9704_v34 = vpop.f32.mrf.mxu2 }
 0x760   :  { %v7252_v60 = vadd.f32 %v7174_v47, %v6693_v40  ;;  %v9705_v55 = vadd.f32 %v14908_v20, %v9704_v34  ;;  %v9459_v44 = vmax.f32 %v9395_v18, 0.0  ;;  %v15835_v40 = vld [vmem:[#allocation224_spill] sm:$0xff] }
 0x761   :  { %v4621_v47 = vadd.f32 %v15835_v40, %v15834_v35  ;;  %v15844_v35 = vld [vmem:[#allocation114_spill] sm:$0xff]  ;;  %v15845_v40 = vld [vmem:[#allocation235_spill] sm:$0xff] }
 0x762   :  { %v8546_v0 = vadd.f32 %v8468_v17, %v7252_v60  ;;  %v9874_v61 = vadd.f32 %v9810_v37, %v9705_v55  ;;  %v9255_v17 = vpop.f32.mrf.mxu1  ;;  %v8476_v32 = vpop.f32.mrf.mxu0  ;;  %v9813_v55 = vld [vmem:[#allocation3 + $0x138] sm:$0xff] }
 0x763   :  { %v5915_v62 = vadd.f32 %v15837_v28, %v4621_v47  ;;  %v4624_v47 = vadd.f32 %v15845_v40, %v15844_v35  ;;  %v9820_v40 = vld [vmem:[#allocation3 + $0x170] sm:$0xff] }
 0x764   :  { %v9328_v59 = vadd.f32 %v9250_v45, %v8546_v0  ;;  %v9938_v12 = vmax.f32 %v9874_v61, 0.0 }
 0x766   :  { %v9396_v53 = vadd.f32 %v14760_v10, %v9328_v59  ;;  %10002 = vst.msk [vmem:[#allocation6 + $0x120] sm:$0xff] %vm388_vm0, %v9938_v12 }
 0x767   :  { %v7177_v24 = vpop.f32.mrf.mxu3  ;;  %v9706_v1 = vpop.f32.mrf.mxu2 }
 0x768   :  { %v9460_v36 = vmax.f32 %v9396_v53, 0.0  ;;  %v7253_v51 = vadd.f32 %v7177_v24, %v6694_v57  ;;  %v9707_v42 = vadd.f32 %v14908_v20, %v9706_v1  ;;  %v15839_v57 = vld [vmem:[#allocation227_spill] sm:$0xff]  ;;  %v6697_v1 = vadd.f32 %v14518_v43, %v5915_v62 }
 0x769   :  { %v4622_v24 = vadd.f32 %v15839_v57, %v15838_v29 }
 0x76a   :  { %v9875_v45 = vadd.f32 %v9811_v33, %v9707_v42  ;;  %v9496_v46 = vpack.c.bf16 %v9460_v36, %v9459_v44  ;;  %v8547_v7 = vadd.f32 %v8471_v13, %v7253_v51  ;;  %v9258_v41 = vpop.f32.mrf.mxu1  ;;  %v8478_v18 = vpop.f32.mrf.mxu0  ;;  %v9814_v44 = vld [vmem:[#allocation3 + $0x140] sm:$0xff] }
 0x76b   :  { %v5916_v8 = vadd.f32 %v15840_v39, %v4622_v24  ;;  %v15849_v39 = vld [vmem:[#allocation277_spill] sm:$0xff] }
 0x76c   :  { %v9939_v3 = vmax.f32 %v9875_v45, 0.0  ;;  %10888 = vmatmul.msk.bf16.gmra.mxu2 %vm2617_vm8, %v9496_v46  ;;  %v9329_v38 = vadd.f32 %v9253_v21, %v8547_v7  ;;  %v15836_v21 = vld [vmem:[#allocation192_spill] sm:$0xff] }
 0x76d   :  { %v6696_v37 = vadd.f32 %v15836_v21, %v5914_v19  ;;  %v15843_v19 = vld [vmem:[#allocation273_spill] sm:$0xff] }
 0x76e   :  { %10003 = vst.msk [vmem:[#allocation6 + $0x128] sm:$0xff] %vm388_vm0, %v9939_v3  ;;  %v9397_v49 = vadd.f32 %v14760_v10, %v9329_v38  ;;  %v9815_v38 = vld [vmem:[#allocation3 + $0x148] sm:$0xff] }
 0x76f   :  { %v7179_v63 = vpop.f32.mrf.mxu3  ;;  %v9709_v11 = vpop.f32.mrf.mxu2 }
 0x770   :  { %v7254_v9 = vadd.f32 %v7179_v63, %v6695_v16  ;;  %v9710_v48 = vadd.f32 %v14908_v20, %v9709_v11  ;;  %v9461_v0 = vmax.f32 %v9397_v49, 0.0  ;;  %v4623_v16 = vadd.f32 %v15842_v50, %v15841_v30  ;;  %v9818_v30 = vld [vmem:[#allocation3 + $0x160] sm:$0xff] }
 0x771   :  { %v6698_v11 = vadd.f32 %v14530_v31, %v5916_v8 }
 0x772   :  { %v8548_v58 = vadd.f32 %v8473_v27, %v7254_v9  ;;  %v9876_v13 = vadd.f32 %v9812_v25, %v9710_v48  ;;  %v9260_v54 = vpop.f32.mrf.mxu1  ;;  %v8481_v7 = vpop.f32.mrf.mxu0  ;;  %v5917_v49 = vadd.f32 %v15843_v19, %v4623_v16 }
 0x774   :  { %v9330_v6 = vadd.f32 %v9255_v17, %v8548_v58  ;;  %v9940_v22 = vmax.f32 %v9876_v13, 0.0 }
 0x776   :  { %v9398_v34 = vadd.f32 %v14760_v10, %v9330_v6  ;;  %10004 = vst.msk [vmem:[#allocation6 + $0x130] sm:$0xff] %vm388_vm0, %v9940_v22 }
 0x777   :  { %v7182_v56 = vpop.f32.mrf.mxu3  ;;  %v9711_v60 = vpop.f32.mrf.mxu2 }
 0x778   :  { %v9462_v61 = vmax.f32 %v9398_v34, 0.0  ;;  %v7255_v4 = vadd.f32 %v7182_v56, %v6696_v37  ;;  %v9712_v15 = vadd.f32 %v14908_v20, %v9711_v60  ;;  %v6699_v34 = vadd.f32 %v14541_v2, %v5917_v49  ;;  %v9816_v56 = vld [vmem:[#allocation3 + $0x150] sm:$0xff] }
 0x779   :  { %v11121_v2 = vld [vmem:[%s15111_s4] ss:$0 sm:$0xff]  ;;  %s11178_s4 = smov [#allocation6]  }
 0x77a   :  { %v9877_v59 = vadd.f32 %v9813_v55, %v9712_v15  ;;  %v9497_v12 = vpack.c.bf16 %v9462_v61, %v9461_v0  ;;  %v8549_v27 = vadd.f32 %v8476_v32, %v7255_v4  ;;  %v9263_v43 = vpop.f32.mrf.mxu1  ;;  %v8483_v31 = vpop.f32.mrf.mxu0  ;;  %s10034_s21 = sshll.u32 %s11178_s4, 4  ;;  %s10035_s21 = int_to_ptr.vmem [resolvable:$true] %s10034_s21 }
 0x77c   :  { %v9941_v53 = vmax.f32 %v9877_v59, 0.0  ;;  %10889 = vmatmul.msk.bf16.gmra.mxu2 %vm2617_vm8, %v9497_v12  ;;  %v9331_v36 = vadd.f32 %v9258_v41, %v8549_v27  ;;  %v15848_v27 = vld [vmem:[#allocation239_spill] sm:$0xff] }
 0x77e   :  { %10005 = vst.msk [vmem:[#allocation6 + $0x138] sm:$0xff] %vm388_vm0, %v9941_v53  ;;  %v9399_v3 = vadd.f32 %v14760_v10, %v9331_v36 }
 0x77f   :  { %v7184_v33 = vpop.f32.mrf.mxu3  ;;  %v9714_v17 = vpop.f32.mrf.mxu2 }
 0x780   :  { %v7256_v51 = vadd.f32 %v7184_v33, %v6697_v1  ;;  %v9715_v42 = vadd.f32 %v14908_v20, %v9714_v17  ;;  %v9463_v9 = vmax.f32 %v9399_v3, 0.0  ;;  %v9817_v17 = vld [vmem:[#allocation3 + $0x158] sm:$0xff] }
 0x782   :  { %v8550_v45 = vadd.f32 %v8478_v18, %v7256_v51  ;;  %v9878_v46 = vadd.f32 %v9814_v44, %v9715_v42  ;;  %v9265_v61 = vpop.f32.mrf.mxu1  ;;  %v15846_v18 = vld [vmem:[#allocation275_spill] sm:$0xff] }
 0x783   :  { %v5918_v59 = vadd.f32 %v15846_v18, %v4624_v47 }
 0x784   :  { %v9332_v52 = vadd.f32 %v9260_v54, %v8550_v45  ;;  %v9942_v23 = vmax.f32 %v9878_v46, 0.0  ;;  %v15847_v54 = vld [vmem:[#allocation118_spill] sm:$0xff] }
 0x785   :  { %v4625_v53 = vadd.f32 %v15848_v27, %v15847_v54  ;;  %v6700_v24 = vadd.f32 %v14553_v5, %v5918_v59 }
 0x786   :  { %v9400_v63 = vadd.f32 %v14760_v10, %v9332_v52  ;;  %10006 = vst.msk [vmem:[#allocation6 + $0x140] sm:$0xff] %vm388_vm0, %v9942_v23 }
 0x787   :  { %v7187_v25 = vpop.f32.mrf.mxu3  ;;  %v9716_v32 = vpop.f32.mrf.mxu2  ;;  %v5919_v8 = vadd.f32 %v15849_v39, %v4625_v53  ;;  %v9824_v53 = vld [vmem:[#allocation3 + $0x190] sm:$0xff]  ;;  %v9827_v39 = vld [vmem:[#allocation3 + $0x1a8] sm:$0xff] }
 0x788   :  { %v9464_v48 = vmax.f32 %v9400_v63, 0.0  ;;  %v7257_v41 = vadd.f32 %v7187_v25, %v6698_v11  ;;  %v9717_v58 = vadd.f32 %v14908_v20, %v9716_v32 }
 0x789   :  { %v6701_v5 = vadd.f32 %v14568_v14, %v5919_v8 }
 0x78a   :  { %v9879_v13 = vadd.f32 %v9815_v38, %v9717_v58  ;;  %v9498_v26 = vpack.c.bf16 %v9464_v48, %v9463_v9  ;;  %v8551_v6 = vadd.f32 %v8481_v7, %v7257_v41  ;;  %v8486_v57 = vpop.f32.mrf.mxu0  ;;  %v9268_v42 = vpop.f32.mrf.mxu1 }
 0x78c   :  { %v9943_v22 = vmax.f32 %v9879_v13, 0.0  ;;  %10890 = vmatmul.msk.bf16.gmra.mxu2 %vm2617_vm8, %v9498_v26  ;;  %v9333_v60 = vadd.f32 %v9263_v43, %v8551_v6  ;;  %v9819_v13 = vld [vmem:[#allocation3 + $0x168] sm:$0xff] }
 0x78e   :  { %10007 = vst.msk [vmem:[#allocation6 + $0x148] sm:$0xff] %vm388_vm0, %v9943_v22  ;;  %v9401_v12 = vadd.f32 %v14760_v10, %v9333_v60 }
 0x78f   :  { %v7189_v21 = vpop.f32.mrf.mxu3  ;;  %v9719_v37 = vpop.f32.mrf.mxu2 }
 0x790   :  { %v7258_v55 = vadd.f32 %v7189_v21, %v6699_v34  ;;  %v9720_v0 = vadd.f32 %v14908_v20, %v9719_v37  ;;  %v9465_v44 = vmax.f32 %v9401_v12, 0.0  ;;  %v9821_v37 = vld [vmem:[#allocation3 + $0x178] sm:$0xff]  ;;  %v9823_v12 = vld [vmem:[#allocation3 + $0x188] sm:$0xff] }
 0x792   :  { %v8552_v4 = vadd.f32 %v8483_v31, %v7258_v55  ;;  %v9880_v15 = vadd.f32 %v9816_v56, %v9720_v0  ;;  %v8488_v63 = vpop.f32.mrf.mxu0  ;;  %v9270_v32 = vpop.f32.mrf.mxu1 }
 0x794   :  { %v9334_v28 = vadd.f32 %v9265_v61, %v8552_v4  ;;  %v9944_v62 = vmax.f32 %v9880_v15, 0.0  ;;  %v9822_v61 = vld [vmem:[#allocation3 + $0x180] sm:$0xff] }
 0x796   :  { %v9402_v29 = vadd.f32 %v11121_v2, %v9334_v28  ;;  %10008 = vst.msk [vmem:[#allocation6 + $0x150] sm:$0xff] %vm388_vm0, %v9944_v62 }
 0x797   :  { %v7192_v1 = vpop.f32.mrf.mxu3  ;;  %v9721_v33 = vpop.f32.mrf.mxu2 }
 0x798   :  { %v9466_v10 = vmax.f32 %v9402_v29, 0.0  ;;  %v7259_v36 = vadd.f32 %v7192_v1, %v6700_v24  ;;  %v9722_v51 = vadd.f32 %v14908_v20, %v9721_v33  ;;  %v9825_v1 = vld [vmem:[#allocation3 + $0x198] sm:$0xff] }
 0x79a   :  { %v9881_v45 = vadd.f32 %v9817_v17, %v9722_v51  ;;  %v9499_v46 = vpack.c.bf16 %v9466_v10, %v9465_v44  ;;  %v8553_v7 = vadd.f32 %v8486_v57, %v7259_v36  ;;  %v9826_v36 = vld [vmem:[#allocation3 + $0x1a0] sm:$0xff] }
 0x79c   :  { %v9945_v3 = vmax.f32 %v9881_v45, 0.0  ;;  %10891 = vmatmul.msk.bf16.gmra.mxu2 %vm2617_vm8, %v9499_v46  ;;  %v9335_v50 = vadd.f32 %v9268_v42, %v8553_v7 }
 0x79e   :  { %10009 = vst.msk [vmem:[#allocation6 + $0x158] sm:$0xff] %vm388_vm0, %v9945_v3  ;;  %v9403_v38 = vadd.f32 %v11121_v2, %v9335_v50 }
 0x79f   :  { %v7194_v52 = vpop.f32.mrf.mxu3  ;;  %v9724_v23 = vpop.f32.mrf.mxu2 }
 0x7a0   :  { %v7260_v16 = vadd.f32 %v7194_v52, %v6701_v5  ;;  %v9725_v43 = vadd.f32 %v14908_v20, %v9724_v23  ;;  %v9467_v14 = vmax.f32 %v9403_v38, 0.0  ;;  %v9828_v52 = vld [vmem:[#allocation3 + $0x1b0] sm:$0xff]  ;;  %v9830_v38 = vld [vmem:[#allocation3 + $0x1c0] sm:$0xff] }
 0x7a2   :  { %v8554_v11 = vadd.f32 %v8488_v63, %v7260_v16  ;;  %v9882_v25 = vadd.f32 %v9818_v30, %v9725_v43  ;;  %v9829_v43 = vld [vmem:[#allocation3 + $0x1b8] sm:$0xff] }
 0x7a4   :  { %v9336_v9 = vadd.f32 %v9270_v32, %v8554_v11  ;;  %v9946_v48 = vmax.f32 %v9882_v25, 0.0 }
 0x7a6   :  { %v9404_v41 = vadd.f32 %v11121_v2, %v9336_v9  ;;  %10010 = vst.msk [vmem:[#allocation6 + $0x160] sm:$0xff] %vm388_vm0, %v9946_v48 }
 0x7a7   :  { %v9726_v58 = vpop.f32.mrf.mxu2 }
 0x7a8   :  { %v9468_v26 = vmax.f32 %v9404_v41, 0.0  ;;  %v9727_v19 = vadd.f32 %v14908_v20, %v9726_v58 }
 0x7aa   :  { %v9883_v49 = vadd.f32 %v9819_v13, %v9727_v19  ;;  %v9500_v6 = vpack.c.bf16 %v9468_v26, %v9467_v14  ;;  %v9831_v13 = vld [vmem:[#allocation3 + $0x1c8] sm:$0xff] }
 0x7ac   :  { %v9947_v22 = vmax.f32 %v9883_v49, 0.0  ;;  %10892 = vmatmul.msk.bf16.gmra.mxu2 %vm2617_vm8, %v9500_v6  ;;  %v9832_v6 = vld [vmem:[#allocation3 + $0x1d0] sm:$0xff] }
 0x7ae   :  { %10011 = vst.msk [vmem:[#allocation6 + $0x168] sm:$0xff] %vm388_vm0, %v9947_v22 }
 0x7af   :  { %v9729_v35 = vpop.f32.mrf.mxu2 }
 0x7b0   :  { %v9730_v47 = vadd.f32 %v14908_v20, %v9729_v35 }
 0x7b2   :  { %v9884_v31 = vadd.f32 %v9820_v40, %v9730_v47 }
 0x7b4   :  { %v9948_v34 = vmax.f32 %v9884_v31, 0.0  ;;  %v9833_v31 = vld [vmem:[#allocation3 + $0x1d8] sm:$0xff] }
 0x7b6   :  { %10012 = vst.msk [vmem:[#allocation6 + $0x170] sm:$0xff] %vm388_vm0, %v9948_v34 }
 0x7b7   :  { %v9731_v21 = vpop.f32.mrf.mxu2 }
 0x7b8   :  { %v9732_v56 = vadd.f32 %v14908_v20, %v9731_v21 }
 0x7ba   :  { %v9885_v60 = vadd.f32 %v9821_v37, %v9732_v56 }
 0x7bc   :  { %v9949_v55 = vmax.f32 %v9885_v60, 0.0  ;;  %v9834_v60 = vld [vmem:[#allocation3 + $0x1e0] sm:$0xff] }
 0x7be   :  { %10013 = vst.msk [vmem:[#allocation6 + $0x178] sm:$0xff] %vm388_vm0, %v9949_v55 }
 0x7bf   :  { %v9734_v0 = vpop.f32.mrf.mxu2 }
 0x7c0   :  { %v9735_v4 = vadd.f32 %v14908_v20, %v9734_v0 }
 0x7c2   :  { %v9886_v15 = vadd.f32 %v9822_v61, %v9735_v4 }
 0x7c4   :  { %v9950_v18 = vmax.f32 %v9886_v15, 0.0  ;;  %v9835_v15 = vld [vmem:[#allocation3 + $0x1e8] sm:$0xff] }
 0x7c6   :  { %10014 = vst.msk [vmem:[#allocation6 + $0x180] sm:$0xff] %vm388_vm0, %v9950_v18 }
 0x7c7   :  { %v9736_v59 = vpop.f32.mrf.mxu2 }
 0x7c8   :  { %v9737_v28 = vadd.f32 %v14908_v20, %v9736_v59 }
 0x7ca   :  { %v9887_v62 = vadd.f32 %v9823_v12, %v9737_v28 }
 0x7cc   :  { %v9951_v54 = vmax.f32 %v9887_v62, 0.0  ;;  %v9836_v62 = vld [vmem:[#allocation3 + $0x1f0] sm:$0xff] }
 0x7ce   :  { %10015 = vst.msk [vmem:[#allocation6 + $0x188] sm:$0xff] %vm388_vm0, %v9951_v54 }
 0x7cf   :  { %v9739_v27 = vpop.f32.mrf.mxu2 }
 0x7d0   :  { %v9740_v2 = vadd.f32 %v14908_v20, %v9739_v27 }
 0x7d2   :  { %v9888_v29 = vadd.f32 %v9824_v53, %v9740_v2 }
 0x7d4   :  { %v9952_v57 = vmax.f32 %v9888_v29, 0.0  ;;  %v9837_v29 = vld [vmem:[#allocation3 + $0x1f8] sm:$0xff] }
 0x7d6   :  { %10016 = vst.msk [vmem:[#allocation6 + $0x190] sm:$0xff] %vm388_vm0, %v9952_v57 }
 0x7d7   :  { %v9741_v24 = vpop.f32.mrf.mxu2 }
 0x7d8   :  { %v9742_v33 = vadd.f32 %v14908_v20, %v9741_v24 }
 0x7da   :  { %v9889_v17 = vadd.f32 %v9825_v1, %v9742_v33 }
 0x7dc   :  { %v9953_v44 = vmax.f32 %v9889_v17, 0.0 }
 0x7de   :  { %10017 = vst.msk [vmem:[#allocation6 + $0x198] sm:$0xff] %vm388_vm0, %v9953_v44 }
 0x7df   :  { %v9744_v10 = vpop.f32.mrf.mxu2 }
 0x7e0   :  { %v9745_v51 = vadd.f32 %v14908_v20, %v9744_v10 }
 0x7e2   :  { %v9890_v42 = vadd.f32 %v9826_v36, %v9745_v51 }
 0x7e4   :  { %v9954_v45 = vmax.f32 %v9890_v42, 0.0 }
 0x7e6   :  { %10018 = vst.msk [vmem:[#allocation6 + $0x1a0] sm:$0xff] %vm388_vm0, %v9954_v45 }
 0x7e7   :  { %v9746_v46 = vpop.f32.mrf.mxu2 }
 0x7e8   :  { %v9747_v8 = vadd.f32 %v14908_v20, %v9746_v46 }
 0x7ea   :  { %v9891_v7 = vadd.f32 %v9827_v39, %v9747_v8 }
 0x7ec   :  { %v9955_v3 = vmax.f32 %v9891_v7, 0.0 }
 0x7ee   :  { %10019 = vst.msk [vmem:[#allocation6 + $0x1a8] sm:$0xff] %vm388_vm0, %v9955_v3 }
 0x7ef   :  { %v9749_v5 = vpop.f32.mrf.mxu2 }
 0x7f0   :  { %v9750_v23 = vadd.f32 %v14908_v20, %v9749_v5 }
 0x7f2   :  { %v9892_v30 = vadd.f32 %v9828_v52, %v9750_v23 }
 0x7f4   :  { %v9956_v50 = vmax.f32 %v9892_v30, 0.0 }
 0x7f6   :  { %10020 = vst.msk [vmem:[#allocation6 + $0x1b0] sm:$0xff] %vm388_vm0, %v9956_v50 }
 0x7f7   :  { %v9751_v16 = vpop.f32.mrf.mxu2 }
 0x7f8   :  { %v9752_v63 = vadd.f32 %v14908_v20, %v9751_v16 }
 0x7fa   :  { %v9893_v11 = vadd.f32 %v9829_v43, %v9752_v63 }
 0x7fc   :  { %v9957_v25 = vmax.f32 %v9893_v11, 0.0 }
 0x7fe   :  { %10021 = vst.msk [vmem:[#allocation6 + $0x1b8] sm:$0xff] %vm388_vm0, %v9957_v25 }
 0x7ff   :  { %v9754_v32 = vpop.f32.mrf.mxu2 }
 0x800   :  { %v9755_v9 = vadd.f32 %v14908_v20, %v9754_v32 }
 0x802   :  { %v9894_v48 = vadd.f32 %v9830_v38, %v9755_v9 }
 0x804   :  { %v9958_v41 = vmax.f32 %v9894_v48, 0.0 }
 0x806   :  { %10022 = vst.msk [vmem:[#allocation6 + $0x1c0] sm:$0xff] %vm388_vm0, %v9958_v41 }
 0x807   :  { %v9756_v58 = vpop.f32.mrf.mxu2 }
 0x808   :  { %v9757_v14 = vadd.f32 %v14908_v20, %v9756_v58 }
 0x80a   :  { %v9895_v26 = vadd.f32 %v9831_v13, %v9757_v14 }
 0x80c   :  { %v9959_v19 = vmax.f32 %v9895_v26, 0.0 }
 0x80e   :  { %10023 = vst.msk [vmem:[#allocation6 + $0x1c8] sm:$0xff] %vm388_vm0, %v9959_v19 }
 0x80f   :  { %v9759_v49 = vpop.f32.mrf.mxu2 }
 0x810   :  { %v9760_v22 = vadd.f32 %v14908_v20, %v9759_v49 }
 0x812   :  { %v9896_v35 = vadd.f32 %v9832_v6, %v9760_v22 }
 0x814   :  { %v9960_v40 = vmax.f32 %v9896_v35, 0.0 }
 0x816   :  { %10024 = vst.msk [vmem:[#allocation6 + $0x1d0] sm:$0xff] %vm388_vm0, %v9960_v40 }
 0x817   :  { %v9761_v47 = vpop.f32.mrf.mxu2 }
 0x818   :  { %v9762_v34 = vadd.f32 %v14908_v20, %v9761_v47 }
 0x81a   :  { %v9897_v21 = vadd.f32 %v9833_v31, %v9762_v34 }
 0x81c   :  { %v9961_v37 = vmax.f32 %v9897_v21, 0.0 }
 0x81e   :  { %10025 = vst.msk [vmem:[#allocation6 + $0x1d8] sm:$0xff] %vm388_vm0, %v9961_v37 }
 0x81f   :  { %v9764_v56 = vpop.f32.mrf.mxu2 }
 0x820   :  { %v9765_v55 = vadd.f32 %v14908_v20, %v9764_v56 }
 0x822   :  { %v9898_v0 = vadd.f32 %v9834_v60, %v9765_v55 }
 0x824   :  { %v9962_v61 = vmax.f32 %v9898_v0, 0.0 }
 0x826   :  { %10026 = vst.msk [vmem:[#allocation6 + $0x1e0] sm:$0xff] %vm388_vm0, %v9962_v61 }
 0x827   :  { %v9766_v4 = vpop.f32.mrf.mxu2 }
 0x828   :  { %v9767_v18 = vadd.f32 %v14908_v20, %v9766_v4 }
 0x82a   :  { %v9899_v59 = vadd.f32 %v9835_v15, %v9767_v18 }
 0x82c   :  { %v9963_v12 = vmax.f32 %v9899_v59, 0.0 }
 0x82e   :  { %10027 = vst.msk [vmem:[#allocation6 + $0x1e8] sm:$0xff] %vm388_vm0, %v9963_v12 }
 0x82f   :  { %v9769_v28 = vpop.f32.mrf.mxu2 }
 0x830   :  { %v9770_v54 = vadd.f32 %v14908_v20, %v9769_v28 }
 0x832   :  { %v9900_v27 = vadd.f32 %v9836_v62, %v9770_v54 }
 0x834   :  { %v9964_v53 = vmax.f32 %v9900_v27, 0.0 }
 0x836   :  { %10028 = vst.msk [vmem:[#allocation6 + $0x1f0] sm:$0xff] %vm388_vm0, %v9964_v53 }
 0x837   :  { %v9771_v2 = vpop.f32.mrf.mxu2 }
 0x838   :  { %v9772_v57 = vadd.f32 %v14908_v20, %v9771_v2 }
 0x83a   :  { %v9901_v24 = vadd.f32 %v9837_v29, %v9772_v57 }
 0x83c   :  { %v9965_v1 = vmax.f32 %v9901_v24, 0.0 }
 0x83e   :  { %10029 = vst.msk [vmem:[#allocation6 + $0x1f8] sm:$0xff] %vm388_vm0, %v9965_v1 }
 0x83f   :  { %10042 = dma.vmem_to_hbm [thread:$0]  %s10035_s21, 8192, %s10037_s24, [#allocation5], %s11175_s29, %s11175_s29, %s11176_s30  }
 0x840   :  { %11172 = dma.done.wait [#allocation5], 8192  }
 0x841   :  { %11173 = vsyncadd [#allocation5], 4294959104 }
 0x842   :  { %10047 = vsyncpa [#allocation4], 1 }
 0x843   :  { %10048 = vsyncpa [#allocation5], 1 }

</bundles_post_ra>
